<compile_context>
chip_gen: v7x
topology: tpu7x:2x2x1
jax: 0.10.0
libtpu: 0.0.40
codegen_flags: <defaults>
</compile_context>

<pallas_src>
import functools

import jax
import jax.numpy as jnp
from jax.experimental import pallas as pl
from jax.experimental.pallas import tpu as pltpu

F32 = jnp.float32
BF16 = jnp.bfloat16
_VMEM_LIMIT = 32 * 1024 * 1024


# ----------------------------- in-kernel helpers ---------------------------- #

def _ln(x, g, b, eps=1e-5):
    """LayerNorm over last dim in f32 (matches torch LayerNorm, eps=1e-5)."""
    mu = jnp.mean(x, axis=-1, keepdims=True)
    xc = x - mu
    var = jnp.mean(xc * xc, axis=-1, keepdims=True)
    return xc * jax.lax.rsqrt(var + eps) * g + b


def _to_lane_major(x, rows_per_group):
    """(G*rows, C) -> (G, rows*C) via leading reshape + lane concat.

    Makes the output store lane-dense (last dim a multiple of 128) without a
    tiled-dim reshape; wrapper-side reshape back to (..., rows, C) is free.
    """
    rows_c = x.shape
    grp = rows_c[0] // rows_per_group
    x3 = x.reshape(grp, rows_per_group, rows_c[1])
    return jnp.concatenate([x3[:, j, :] for j in range(rows_per_group)], axis=-1)


def _mha(q_in, kv_in, w_in, b_in, w_out, b_out, grp, t_len, nhead, self_attn):
    """Multi-head attention (PyTorch MHA semantics, dropout=0).

    q_in / kv_in : (grp*t_len, C) f32 (same array when self_attn=True)
    w_in  : (C, 3C) bf16 packed [Wq|Wk|Wv],  b_in : (1, 3C) f32
    w_out : (C, C) bf16,                     b_out: (1, C) f32
    Heads are batched together with the group axis -> 3-D einsums only.
    """
    C = w_out.shape[-1]
    hd = C // nhead
    scale = 1.0 / float(hd) ** 0.5

    if self_attn:
        qkv = jnp.dot(q_in.astype(BF16), w_in,
                      preferred_element_type=jnp.float32) + b_in
        q, k, v = qkv[:, :C], qkv[:, C:2 * C], qkv[:, 2 * C:]
    else:
        q = jnp.dot(q_in.astype(BF16), w_in[:, :C],
                    preferred_element_type=jnp.float32) + b_in[:, :C]
        kv = jnp.dot(kv_in.astype(BF16), w_in[:, C:],
                     preferred_element_type=jnp.float32) + b_in[:, C:]
        k, v = kv[:, :C], kv[:, C:]
    q = q * scale

    def split_heads(x):
        x3 = x.reshape(grp, t_len, C)                       # leading split (clean)
        return jnp.concatenate(
            [x3[:, :, h * hd:(h + 1) * hd] for h in range(nhead)], axis=0)

    q3 = split_heads(q).astype(BF16)                        # (nhead*grp, t, hd)
    k3 = split_heads(k).astype(BF16)
    v3 = split_heads(v).astype(BF16)

    s = jnp.einsum('bqd,bkd->bqk', q3, k3, preferred_element_type=jnp.float32)
    s = s - jnp.max(s, axis=-1, keepdims=True)
    p = jnp.exp(s)
    p = p / jnp.sum(p, axis=-1, keepdims=True)              # exact softmax
    o3 = jnp.einsum('bqk,bkd->bqd', p.astype(BF16), v3,
                    preferred_element_type=jnp.float32)

    # merge heads back: (nhead*grp, t, hd) -> (grp*t, C)
    o = jnp.concatenate([o3[h * grp:(h + 1) * grp] for h in range(nhead)],
                        axis=-1).reshape(grp * t_len, C)
    return jnp.dot(o.astype(BF16), w_out,
                   preferred_element_type=jnp.float32) + b_out


# ------------------------------- fused kernels ------------------------------ #

# TODO(synk): DualAttentionModule source is not provided in the reference code;
# implemented as dual cross-attention (audio<-visual, visual<-audio) over time
# with residual + LayerNorm per branch, then channel concat to 2*H.
def _datt_kernel(ea_ref, ev_ref, wproj_ref, win_ref, wout_ref,
                 vh_ref, v3h_ref, o_ref, *, nhead):
    """Input MLPs + dual cross-attention, coarse over G sequences per step.

    vh_ref rows: [b_a, b_v, bo_a, bo_v, lng_a, lnb_a, lng_v, lnb_v]  (8, H)
    v3h_ref rows: [b_in_a, b_in_v]                                   (2, 3H)
    """
    G, T, in_dim = ea_ref.shape
    ea = ea_ref[...].reshape(G * T, in_dim)                 # bf16
    ev = ev_ref[...].reshape(G * T, in_dim)
    a = jnp.maximum(jnp.dot(ea, wproj_ref[0],
                            preferred_element_type=jnp.float32) + vh_ref[0:1], 0.0)
    v = jnp.maximum(jnp.dot(ev, wproj_ref[1],
                            preferred_element_type=jnp.float32) + vh_ref[1:2], 0.0)

    a_att = _mha(a, v, win_ref[0], v3h_ref[0:1], wout_ref[0], vh_ref[2:3],
                 G, T, nhead, self_attn=False)
    v_att = _mha(v, a, win_ref[1], v3h_ref[1:2], wout_ref[1], vh_ref[3:4],
                 G, T, nhead, self_attn=False)
    a2 = _ln(a + a_att, vh_ref[4:5], vh_ref[5:6])
    v2 = _ln(v + v_att, vh_ref[6:7], vh_ref[7:8])
    u = jnp.concatenate([a2, v2], axis=-1)                  # (G*T, 2H)
    o_ref[...] = _to_lane_major(u, T).astype(o_ref.dtype)   # (G, T*2H) lane-dense


def _block_kernel(u_ref, cw_ref, wsim_ref, wqkv_ref, wlim_ref,
                  vsim_ref, vlim_ref, bqkv_ref, o_ref, pad_ref,
                  *, nhead, ks, kt):
    """Fused SIM + LIM for one LSCM block (coarse over GB batches per step).

    vsim rows: [conv_b, ln1g, ln1b, b1, b2, ln2g, ln2b]
    vlim rows: [b_out, ln1g, ln1b, b1, b2, ln2g, ln2b]
    """
    GB, S, T, C = u_ref.shape
    ps, pt = (ks - 1) // 2, (kt - 1) // 2
    R = GB * S * T
    u = u_ref[...].astype(jnp.float32)                      # (GB, S, T, C)
    u2 = u.reshape(R, C)

    # ---- SIM: 'same' conv via in-kernel im2col on a zero-padded VMEM scratch
    pad_ref[...] = jnp.zeros_like(pad_ref)
    pad_ref[:, ps:ps + S, pt:pt + T, :] = u.astype(pad_ref.dtype)
    cols = [pad_ref[:, ds:ds + S, dt:dt + T, :]
            for ds in range(ks) for dt in range(kt)]
    patches = jnp.concatenate(cols, axis=-1).reshape(R, ks * kt * C)
    conv = jnp.dot(patches, cw_ref[...],
                   preferred_element_type=jnp.float32) + vsim_ref[0:1]
    h = _ln(conv, vsim_ref[1:2], vsim_ref[2:3])
    m = jnp.maximum(jnp.dot(h.astype(BF16), wsim_ref[0],
                            preferred_element_type=jnp.float32) + vsim_ref[3:4], 0.0)
    m = jnp.dot(m.astype(BF16), wsim_ref[1],
                preferred_element_type=jnp.float32) + vsim_ref[4:5]
    x = _ln(m + u2, vsim_ref[5:6], vsim_ref[6:7])           # SIM out (R, C)

    # ---- LIM: self-attention over T, batch = GB*S sequences
    att = _mha(x, x, wqkv_ref[...], bqkv_ref[...], wlim_ref[0], vlim_ref[0:1],
               GB * S, T, nhead, self_attn=True)
    hl = _ln(att + x, vlim_ref[1:2], vlim_ref[2:3])
    m2 = jnp.maximum(jnp.dot(hl.astype(BF16), wlim_ref[1],
                             preferred_element_type=jnp.float32) + vlim_ref[3:4], 0.0)
    m2 = jnp.dot(m2.astype(BF16), wlim_ref[2],
                 preferred_element_type=jnp.float32) + vlim_ref[4:5]
    out = _ln(m2 + hl, vlim_ref[5:6], vlim_ref[6:7])
    o_ref[...] = _to_lane_major(out, S * T).astype(o_ref.dtype)  # (GB, S*T*C)


# ------------------------------ module wrappers ------------------------------ #

def _cparams():
    return pltpu.CompilerParams(dimension_semantics=("parallel",),
                                vmem_limit_bytes=_VMEM_LIMIT)


def _pick_group(n, rows_per, target_rows=256):
    """Smallest divisor g of n with g*rows_per >= target_rows, else n."""
    for cand in range(1, n + 1):
        if n % cand == 0 and cand * rows_per >= target_rows:
            return cand
    return n


def datt_forward(e_a, e_v, params, nhead):
    """Input projections + DualAttentionModule.  Returns u: (B, S, T, 2H)."""
    B, S, T, in_dim = e_a.shape
    H = params['mlp_a_w'].shape[1]
    BS = B * S
    G = _pick_group(BS, T)
    n_g = BS // G
    p = params['datt']

    wproj = jnp.stack([params['mlp_a_w'], params['mlp_v_w']], axis=0).astype(BF16)
    win = p['w_in'].astype(BF16)
    wout = p['w_out'].astype(BF16)
    vecH = jnp.concatenate([params['mlp_a_b'], params['mlp_v_b'],
                            p['b_out'][0], p['b_out'][1],
                            p['ln_g'][0], p['ln_b'][0],
                            p['ln_g'][1], p['ln_b'][1]], axis=0)        # (8, H)
    vec3H = jnp.concatenate([p['b_in'][0], p['b_in'][1]], axis=0)       # (2, 3H)

    out = pl.pallas_call(
        functools.partial(_datt_kernel, nhead=nhead),
        out_shape=jax.ShapeDtypeStruct((BS, T * 2 * H), e_a.dtype),
        grid=(n_g,),
        in_specs=[
            pl.BlockSpec((G, T, in_dim), lambda i: (i, 0, 0)),
            pl.BlockSpec((G, T, in_dim), lambda i: (i, 0, 0)),
            pl.BlockSpec((2, in_dim, H), lambda i: (0, 0, 0)),
            pl.BlockSpec((2, H, 3 * H), lambda i: (0, 0, 0)),
            pl.BlockSpec((2, H, H), lambda i: (0, 0, 0)),
            pl.BlockSpec((8, H), lambda i: (0, 0)),
            pl.BlockSpec((2, 3 * H), lambda i: (0, 0)),
        ],
        out_specs=pl.BlockSpec((G, T * 2 * H), lambda i: (i, 0)),
        compiler_params=_cparams(),
    )(e_a.reshape(BS, T, in_dim).astype(BF16),
      e_v.reshape(BS, T, in_dim).astype(BF16),
      wproj, win, wout, vecH, vec3H)
    return out.reshape(B, S, T, 2 * H)


def block_forward(u4, blk, nhead):
    """One fused SIM+LIM LSCM block.  u4: (B, S, T, C) -> (B, S*T*C)."""
    B, S, T, C = u4.shape
    GB = _pick_group(B, S * T)
    n_g = B // GB
    sim, lim = blk['sim'], blk['lim']
    KS, KT = sim['conv_w'].shape[0], sim['conv_w'].shape[1]

    # conv_w layout (KS, KT, C_in, C_out); PyTorch Conv2d weights would need
    # permute(2, 3, 1, 0) before this reshape.
    cw = sim['conv_w'].reshape(KS * KT * C, C).astype(BF16)
    wsim = jnp.stack([sim['w1'], sim['w2']], axis=0).astype(BF16)
    vsim = jnp.concatenate([sim['conv_b'], sim['ln1_g'], sim['ln1_b'],
                            sim['b1'], sim['b2'],
                            sim['ln2_g'], sim['ln2_b']], axis=0)        # (7, C)
    wqkv = lim['w_qkv'].astype(BF16)
    wlim = jnp.stack([lim['w_out'], lim['w1'], lim['w2']], axis=0).astype(BF16)
    vlim = jnp.concatenate([lim['b_out'], lim['ln1_g'], lim['ln1_b'],
                            lim['b1'], lim['b2'],
                            lim['ln2_g'], lim['ln2_b']], axis=0)        # (7, C)
    bqkv = lim['b_qkv']                                                 # (1, 3C)

    return pl.pallas_call(
        functools.partial(_block_kernel, nhead=nhead, ks=KS, kt=KT),
        out_shape=jax.ShapeDtypeStruct((B, S * T * C), u4.dtype),
        grid=(n_g,),
        in_specs=[
            pl.BlockSpec((GB, S, T, C), lambda i: (i, 0, 0, 0)),
            pl.BlockSpec((KS * KT * C, C), lambda i: (0, 0)),
            pl.BlockSpec((2, C, C), lambda i: (0, 0, 0)),
            pl.BlockSpec((C, 3 * C), lambda i: (0, 0)),
            pl.BlockSpec((3, C, C), lambda i: (0, 0, 0)),
            pl.BlockSpec((7, C), lambda i: (0, 0)),
            pl.BlockSpec((7, C), lambda i: (0, 0)),
            pl.BlockSpec((1, 3 * C), lambda i: (0, 0)),
        ],
        out_specs=pl.BlockSpec((GB, S * T * C), lambda i: (i, 0)),
        scratch_shapes=[pltpu.VMEM((GB, S + KS - 1, T + KT - 1, C), BF16)],
        compiler_params=_cparams(),
    )(u4, cw, wsim, wqkv, wlim, vsim, vlim, bqkv)


def loconet_forward(e_a, e_v, params, nhead):
    B, S, T, _ = e_a.shape
    u = datt_forward(e_a, e_v, params, nhead)                # (B, S, T, 2H)
    C = u.shape[-1]
    for blk in params['blocks']:
        u = block_forward(u, blk, nhead).reshape(B, S, T, C)  # free reshape
    return u.reshape(B, S * T * C)


# --------------------------------- parameters -------------------------------- #

def init_params(key, in_dim, hidden_dim, nhead, num_blocks):
    keys = iter(jax.random.split(key, 512))

    def w(shape, scale=0.05):
        return scale * jax.random.normal(next(keys), shape, F32)

    def zeros(shape):
        return jnp.zeros(shape, F32)

    def ones(shape):
        return jnp.ones(shape, F32)

    H = hidden_dim
    d2 = hidden_dim * 2
    blocks = []
    for _ in range(num_blocks):
        blocks.append(dict(
            sim=dict(conv_w=w((3, 7, d2, d2)), conv_b=zeros((1, d2)),
                     ln1_g=ones((1, d2)), ln1_b=zeros((1, d2)),
                     w1=w((d2, d2)), b1=zeros((1, d2)),
                     w2=w((d2, d2)), b2=zeros((1, d2)),
                     ln2_g=ones((1, d2)), ln2_b=zeros((1, d2))),
            lim=dict(w_qkv=w((d2, 3 * d2)), b_qkv=zeros((1, 3 * d2)),
                     w_out=w((d2, d2)), b_out=zeros((1, d2)),
                     ln1_g=ones((1, d2)), ln1_b=zeros((1, d2)),
                     w1=w((d2, d2)), b1=zeros((1, d2)),
                     w2=w((d2, d2)), b2=zeros((1, d2)),
                     ln2_g=ones((1, d2)), ln2_b=zeros((1, d2)))))
    datt = dict(
        # index 0 = audio<-visual attention, index 1 = visual<-audio attention
        w_in=w((2, H, 3 * H)), b_in=zeros((2, 1, 3 * H)),
        w_out=w((2, H, H)), b_out=zeros((2, 1, H)),
        ln_g=ones((2, 1, H)), ln_b=zeros((2, 1, H)))
    return dict(
        mlp_a_w=w((in_dim, H)), mlp_a_b=zeros((1, H)),
        mlp_v_w=w((in_dim, H)), mlp_v_b=zeros((1, H)),
        datt=datt, blocks=blocks)


# ------------------------------------ main ------------------------------------ #

if __name__ == "__main__":
    key = jax.random.PRNGKey(0)
    B, S, T = 2, 2, 8                         # batch, speakers, time
    in_dim, hidden_dim, nhead, num_blocks = 64, 32, 4, 2

    k1, k2, k3 = jax.random.split(key, 3)
    e_a = jax.random.normal(k1, (B, S, T, in_dim), F32)
    e_v = jax.random.normal(k2, (B, S, T, in_dim), F32)
    params = init_params(k3, in_dim, hidden_dim, nhead, num_blocks)

    fwd = jax.jit(loconet_forward, static_argnums=(3,))
    out = jax.block_until_ready(fwd(e_a, e_v, params, nhead))
    assert out.shape == (B, S * T * hidden_dim * 2), out.shape
    assert bool(jnp.all(jnp.isfinite(out)))
    print("KERNEL_OK")
</pallas_src>

<mosaic_0001>
module attributes {stable_mosaic.version = 11 : i64} {
  func.func @_datt_kernel(%arg0: i32, %arg1: memref<4x8x64xbf16, #tpu.memory_space<vmem>>, %arg2: memref<4x8x64xbf16, #tpu.memory_space<vmem>>, %arg3: memref<2x64x32xbf16, #tpu.memory_space<vmem>>, %arg4: memref<2x32x96xbf16, #tpu.memory_space<vmem>>, %arg5: memref<2x32x32xbf16, #tpu.memory_space<vmem>>, %arg6: memref<8x32xf32, #tpu.memory_space<vmem>>, %arg7: memref<2x96xf32, #tpu.memory_space<vmem>>, %arg8: memref<4x512xf32, #tpu.memory_space<vmem>>) attributes {dimension_semantics = [#tpu.dimension_semantics<parallel>], iteration_bounds = array<i64: 1>, scalar_prefetch = 0 : i64, scratch_operands = 0 : i64, tpu.core_type = #tpu.core_type<tc>, window_params = [{transform_indices = @transform_0, window_bounds = array<i64: 4, 8, 64>}, {transform_indices = @transform_1, window_bounds = array<i64: 4, 8, 64>}, {pipeline_mode = #tpu.pipeline_mode<synchronous>, transform_indices = @transform_2, window_bounds = array<i64: 2, 64, 32>}, {pipeline_mode = #tpu.pipeline_mode<synchronous>, transform_indices = @transform_3, window_bounds = array<i64: 2, 32, 96>}, {pipeline_mode = #tpu.pipeline_mode<synchronous>, transform_indices = @transform_4, window_bounds = array<i64: 2, 32, 32>}, {pipeline_mode = #tpu.pipeline_mode<synchronous>, transform_indices = @transform_5, window_bounds = array<i64: 8, 32>}, {pipeline_mode = #tpu.pipeline_mode<synchronous>, transform_indices = @transform_6, window_bounds = array<i64: 2, 96>}, {transform_indices = @transform_7, window_bounds = array<i64: 4, 512>}]} {
    %c0 = arith.constant 0 : index
    %c0_0 = arith.constant 0 : index
    %c0_1 = arith.constant 0 : index
    %0 = vector.load %arg1[%c0, %c0_0, %c0_1] : memref<4x8x64xbf16, #tpu.memory_space<vmem>>, vector<4x8x64xbf16>
    %1 = vector.shape_cast %0 : vector<4x8x64xbf16> to vector<32x64xbf16>
    %c0_2 = arith.constant 0 : index
    %c0_3 = arith.constant 0 : index
    %c0_4 = arith.constant 0 : index
    %2 = vector.load %arg2[%c0_2, %c0_3, %c0_4] : memref<4x8x64xbf16, #tpu.memory_space<vmem>>, vector<4x8x64xbf16>
    %3 = vector.shape_cast %2 : vector<4x8x64xbf16> to vector<32x64xbf16>
    %c0_5 = arith.constant 0 : index
    %c0_6 = arith.constant 0 : index
    %c0_7 = arith.constant 0 : index
    %4 = vector.load %arg3[%c0_5, %c0_6, %c0_7] : memref<2x64x32xbf16, #tpu.memory_space<vmem>>, vector<1x64x32xbf16>
    %5 = vector.shape_cast %4 : vector<1x64x32xbf16> to vector<64x32xbf16>
    %cst = arith.constant dense<0.000000e+00> : vector<32x32xf32>
    %6 = tpu.matmul %1, %5, %cst {dimension_numbers = #tpu.dot_dimension_numbers<[1], [0], [0], [1], [0, 0, 1, 1], [], []>} : vector<32x64xbf16>, vector<64x32xbf16>, vector<32x32xf32> -> vector<32x32xf32>
    %c0_8 = arith.constant 0 : index
    %c0_9 = arith.constant 0 : index
    %7 = vector.load %arg6[%c0_8, %c0_9] : memref<8x32xf32, #tpu.memory_space<vmem>>, vector<1x32xf32>
    %8 = vector.broadcast %7 : vector<1x32xf32> to vector<32x32xf32>
    %9 = arith.addf %6, %8 : vector<32x32xf32>
    %cst_10 = arith.constant 0.000000e+00 : f32
    %10 = vector.broadcast %cst_10 : f32 to vector<32x32xf32>
    %11 = arith.maximumf %9, %10 : vector<32x32xf32>
    %c1 = arith.constant 1 : index
    %c0_11 = arith.constant 0 : index
    %c0_12 = arith.constant 0 : index
    %12 = vector.load %arg3[%c1, %c0_11, %c0_12] : memref<2x64x32xbf16, #tpu.memory_space<vmem>>, vector<1x64x32xbf16>
    %13 = vector.shape_cast %12 : vector<1x64x32xbf16> to vector<64x32xbf16>
    %cst_13 = arith.constant dense<0.000000e+00> : vector<32x32xf32>
    %14 = tpu.matmul %3, %13, %cst_13 {dimension_numbers = #tpu.dot_dimension_numbers<[1], [0], [0], [1], [0, 0, 1, 1], [], []>} : vector<32x64xbf16>, vector<64x32xbf16>, vector<32x32xf32> -> vector<32x32xf32>
    %c1_14 = arith.constant 1 : index
    %c0_15 = arith.constant 0 : index
    %15 = vector.load %arg6[%c1_14, %c0_15] : memref<8x32xf32, #tpu.memory_space<vmem>>, vector<1x32xf32>
    %16 = vector.broadcast %15 : vector<1x32xf32> to vector<32x32xf32>
    %17 = arith.addf %14, %16 : vector<32x32xf32>
    %cst_16 = arith.constant 0.000000e+00 : f32
    %18 = vector.broadcast %cst_16 : f32 to vector<32x32xf32>
    %19 = arith.maximumf %17, %18 : vector<32x32xf32>
    %c0_17 = arith.constant 0 : index
    %c0_18 = arith.constant 0 : index
    %c0_19 = arith.constant 0 : index
    %20 = vector.load %arg4[%c0_17, %c0_18, %c0_19] : memref<2x32x96xbf16, #tpu.memory_space<vmem>>, vector<1x32x96xbf16>
    %21 = vector.shape_cast %20 : vector<1x32x96xbf16> to vector<32x96xbf16>
    %c0_20 = arith.constant 0 : index
    %c0_21 = arith.constant 0 : index
    %22 = vector.load %arg7[%c0_20, %c0_21] : memref<2x96xf32, #tpu.memory_space<vmem>>, vector<1x96xf32>
    %c0_22 = arith.constant 0 : index
    %c0_23 = arith.constant 0 : index
    %c0_24 = arith.constant 0 : index
    %23 = vector.load %arg5[%c0_22, %c0_23, %c0_24] : memref<2x32x32xbf16, #tpu.memory_space<vmem>>, vector<1x32x32xbf16>
    %24 = vector.shape_cast %23 : vector<1x32x32xbf16> to vector<32x32xbf16>
    %c2 = arith.constant 2 : index
    %c0_25 = arith.constant 0 : index
    %25 = vector.load %arg6[%c2, %c0_25] : memref<8x32xf32, #tpu.memory_space<vmem>>, vector<1x32xf32>
    %26 = arith.truncf %11 : vector<32x32xf32> to vector<32x32xbf16>
    %27 = vector.extract_strided_slice %21 {offsets = [0, 0], sizes = [32, 32], strides = [1, 1]} : vector<32x96xbf16> to vector<32x32xbf16>
    %cst_26 = arith.constant dense<0.000000e+00> : vector<32x32xf32>
    %28 = tpu.matmul %26, %27, %cst_26 {dimension_numbers = #tpu.dot_dimension_numbers<[1], [0], [0], [1], [0, 0, 1, 1], [], []>} : vector<32x32xbf16>, vector<32x32xbf16>, vector<32x32xf32> -> vector<32x32xf32>
    %29 = vector.extract_strided_slice %22 {offsets = [0, 0], sizes = [1, 32], strides = [1, 1]} : vector<1x96xf32> to vector<1x32xf32>
    %30 = vector.broadcast %29 : vector<1x32xf32> to vector<32x32xf32>
    %31 = arith.addf %28, %30 : vector<32x32xf32>
    %32 = arith.truncf %19 : vector<32x32xf32> to vector<32x32xbf16>
    %33 = vector.extract_strided_slice %21 {offsets = [0, 32], sizes = [32, 64], strides = [1, 1]} : vector<32x96xbf16> to vector<32x64xbf16>
    %cst_27 = arith.constant dense<0.000000e+00> : vector<32x64xf32>
    %34 = tpu.matmul %32, %33, %cst_27 {dimension_numbers = #tpu.dot_dimension_numbers<[1], [0], [0], [1], [0, 0, 1, 1], [], []>} : vector<32x32xbf16>, vector<32x64xbf16>, vector<32x64xf32> -> vector<32x64xf32>
    %35 = vector.extract_strided_slice %22 {offsets = [0, 32], sizes = [1, 64], strides = [1, 1]} : vector<1x96xf32> to vector<1x64xf32>
    %36 = vector.broadcast %35 : vector<1x64xf32> to vector<32x64xf32>
    %37 = arith.addf %34, %36 : vector<32x64xf32>
    %38 = vector.extract_strided_slice %37 {offsets = [0, 0], sizes = [32, 32], strides = [1, 1]} : vector<32x64xf32> to vector<32x32xf32>
    %39 = vector.extract_strided_slice %37 {offsets = [0, 32], sizes = [32, 32], strides = [1, 1]} : vector<32x64xf32> to vector<32x32xf32>
    %cst_28 = arith.constant 0.353553385 : f32
    %40 = vector.broadcast %cst_28 : f32 to vector<32x32xf32>
    %41 = arith.mulf %31, %40 : vector<32x32xf32>
    %42 = vector.shape_cast %41 : vector<32x32xf32> to vector<4x8x32xf32>
    %43 = vector.extract_strided_slice %42 {offsets = [0, 0, 0], sizes = [4, 8, 8], strides = [1, 1, 1]} : vector<4x8x32xf32> to vector<4x8x8xf32>
    %44 = vector.extract_strided_slice %42 {offsets = [0, 0, 8], sizes = [4, 8, 8], strides = [1, 1, 1]} : vector<4x8x32xf32> to vector<4x8x8xf32>
    %45 = vector.extract_strided_slice %42 {offsets = [0, 0, 16], sizes = [4, 8, 8], strides = [1, 1, 1]} : vector<4x8x32xf32> to vector<4x8x8xf32>
    %46 = vector.extract_strided_slice %42 {offsets = [0, 0, 24], sizes = [4, 8, 8], strides = [1, 1, 1]} : vector<4x8x32xf32> to vector<4x8x8xf32>
    %47 = tpu.concatenate %43, %44, %45, %46 in 0 : vector<4x8x8xf32>, vector<4x8x8xf32>, vector<4x8x8xf32>, vector<4x8x8xf32> -> vector<16x8x8xf32>
    %48 = arith.truncf %47 : vector<16x8x8xf32> to vector<16x8x8xbf16>
    %49 = vector.shape_cast %38 : vector<32x32xf32> to vector<4x8x32xf32>
    %50 = vector.extract_strided_slice %49 {offsets = [0, 0, 0], sizes = [4, 8, 8], strides = [1, 1, 1]} : vector<4x8x32xf32> to vector<4x8x8xf32>
    %51 = vector.extract_strided_slice %49 {offsets = [0, 0, 8], sizes = [4, 8, 8], strides = [1, 1, 1]} : vector<4x8x32xf32> to vector<4x8x8xf32>
    %52 = vector.extract_strided_slice %49 {offsets = [0, 0, 16], sizes = [4, 8, 8], strides = [1, 1, 1]} : vector<4x8x32xf32> to vector<4x8x8xf32>
    %53 = vector.extract_strided_slice %49 {offsets = [0, 0, 24], sizes = [4, 8, 8], strides = [1, 1, 1]} : vector<4x8x32xf32> to vector<4x8x8xf32>
    %54 = tpu.concatenate %50, %51, %52, %53 in 0 : vector<4x8x8xf32>, vector<4x8x8xf32>, vector<4x8x8xf32>, vector<4x8x8xf32> -> vector<16x8x8xf32>
    %55 = arith.truncf %54 : vector<16x8x8xf32> to vector<16x8x8xbf16>
    %56 = vector.shape_cast %39 : vector<32x32xf32> to vector<4x8x32xf32>
    %57 = vector.extract_strided_slice %56 {offsets = [0, 0, 0], sizes = [4, 8, 8], strides = [1, 1, 1]} : vector<4x8x32xf32> to vector<4x8x8xf32>
    %58 = vector.extract_strided_slice %56 {offsets = [0, 0, 8], sizes = [4, 8, 8], strides = [1, 1, 1]} : vector<4x8x32xf32> to vector<4x8x8xf32>
    %59 = vector.extract_strided_slice %56 {offsets = [0, 0, 16], sizes = [4, 8, 8], strides = [1, 1, 1]} : vector<4x8x32xf32> to vector<4x8x8xf32>
    %60 = vector.extract_strided_slice %56 {offsets = [0, 0, 24], sizes = [4, 8, 8], strides = [1, 1, 1]} : vector<4x8x32xf32> to vector<4x8x8xf32>
    %61 = tpu.concatenate %57, %58, %59, %60 in 0 : vector<4x8x8xf32>, vector<4x8x8xf32>, vector<4x8x8xf32>, vector<4x8x8xf32> -> vector<16x8x8xf32>
    %62 = arith.truncf %61 : vector<16x8x8xf32> to vector<16x8x8xbf16>
    "tpu.trace_start"() <{level = 10 : i32, message = "bqd,bkd->bqk"}> : () -> ()
    %cst_29 = arith.constant dense<0.000000e+00> : vector<16x8x8xf32>
    %63 = tpu.matmul %48, %55, %cst_29 {dimension_numbers = #tpu.dot_dimension_numbers<[2], [2], [1], [1], [0, 0, 0, 1, 1, 1], [0], [0]>} : vector<16x8x8xbf16>, vector<16x8x8xbf16>, vector<16x8x8xf32> -> vector<16x8x8xf32>
    "tpu.trace_stop"() : () -> ()
    %cst_30 = arith.constant dense<0xFF800000> : vector<16x8xf32>
    %64 = vector.multi_reduction <maximumf>, %63, %cst_30 [2] : vector<16x8x8xf32> to vector<16x8xf32>
    %65 = vector.shape_cast %64 : vector<16x8xf32> to vector<16x8x1xf32>
    %66 = vector.broadcast %65 : vector<16x8x1xf32> to vector<16x8x8xf32>
    %67 = arith.subf %63, %66 : vector<16x8x8xf32>
    %68 = math.exp %67 : vector<16x8x8xf32>
    %cst_31 = arith.constant dense<0.000000e+00> : vector<16x8xf32>
    %69 = vector.multi_reduction <add>, %68, %cst_31 [2] : vector<16x8x8xf32> to vector<16x8xf32>
    %70 = vector.shape_cast %69 : vector<16x8xf32> to vector<16x8x1xf32>
    %71 = vector.broadcast %70 : vector<16x8x1xf32> to vector<16x8x8xf32>
    %72 = arith.divf %68, %71 : vector<16x8x8xf32>
    %73 = arith.truncf %72 : vector<16x8x8xf32> to vector<16x8x8xbf16>
    "tpu.trace_start"() <{level = 10 : i32, message = "bqk,bkd->bqd"}> : () -> ()
    %cst_32 = arith.constant dense<0.000000e+00> : vector<16x8x8xf32>
    %74 = tpu.matmul %73, %62, %cst_32 {dimension_numbers = #tpu.dot_dimension_numbers<[2], [1], [1], [2], [0, 0, 0, 1, 1, 2], [0], [0]>} : vector<16x8x8xbf16>, vector<16x8x8xbf16>, vector<16x8x8xf32> -> vector<16x8x8xf32>
    "tpu.trace_stop"() : () -> ()
    %75 = vector.extract_strided_slice %74 {offsets = [0, 0, 0], sizes = [4, 8, 8], strides = [1, 1, 1]} : vector<16x8x8xf32> to vector<4x8x8xf32>
    %76 = vector.extract_strided_slice %74 {offsets = [4, 0, 0], sizes = [4, 8, 8], strides = [1, 1, 1]} : vector<16x8x8xf32> to vector<4x8x8xf32>
    %77 = vector.extract_strided_slice %74 {offsets = [8, 0, 0], sizes = [4, 8, 8], strides = [1, 1, 1]} : vector<16x8x8xf32> to vector<4x8x8xf32>
    %78 = vector.extract_strided_slice %74 {offsets = [12, 0, 0], sizes = [4, 8, 8], strides = [1, 1, 1]} : vector<16x8x8xf32> to vector<4x8x8xf32>
    %79 = tpu.concatenate %75, %76, %77, %78 in 2 : vector<4x8x8xf32>, vector<4x8x8xf32>, vector<4x8x8xf32>, vector<4x8x8xf32> -> vector<4x8x32xf32>
    %80 = vector.shape_cast %79 : vector<4x8x32xf32> to vector<32x32xf32>
    %81 = arith.truncf %80 : vector<32x32xf32> to vector<32x32xbf16>
    %cst_33 = arith.constant dense<0.000000e+00> : vector<32x32xf32>
    %82 = tpu.matmul %81, %24, %cst_33 {dimension_numbers = #tpu.dot_dimension_numbers<[1], [0], [0], [1], [0, 0, 1, 1], [], []>} : vector<32x32xbf16>, vector<32x32xbf16>, vector<32x32xf32> -> vector<32x32xf32>
    %83 = vector.broadcast %25 : vector<1x32xf32> to vector<32x32xf32>
    %84 = arith.addf %82, %83 : vector<32x32xf32>
    %c1_34 = arith.constant 1 : index
    %c0_35 = arith.constant 0 : index
    %c0_36 = arith.constant 0 : index
    %85 = vector.load %arg4[%c1_34, %c0_35, %c0_36] : memref<2x32x96xbf16, #tpu.memory_space<vmem>>, vector<1x32x96xbf16>
    %86 = vector.shape_cast %85 : vector<1x32x96xbf16> to vector<32x96xbf16>
    %c1_37 = arith.constant 1 : index
    %c0_38 = arith.constant 0 : index
    %87 = vector.load %arg7[%c1_37, %c0_38] : memref<2x96xf32, #tpu.memory_space<vmem>>, vector<1x96xf32>
    %c1_39 = arith.constant 1 : index
    %c0_40 = arith.constant 0 : index
    %c0_41 = arith.constant 0 : index
    %88 = vector.load %arg5[%c1_39, %c0_40, %c0_41] : memref<2x32x32xbf16, #tpu.memory_space<vmem>>, vector<1x32x32xbf16>
    %89 = vector.shape_cast %88 : vector<1x32x32xbf16> to vector<32x32xbf16>
    %c3 = arith.constant 3 : index
    %c0_42 = arith.constant 0 : index
    %90 = vector.load %arg6[%c3, %c0_42] : memref<8x32xf32, #tpu.memory_space<vmem>>, vector<1x32xf32>
    %91 = arith.truncf %19 : vector<32x32xf32> to vector<32x32xbf16>
    %92 = vector.extract_strided_slice %86 {offsets = [0, 0], sizes = [32, 32], strides = [1, 1]} : vector<32x96xbf16> to vector<32x32xbf16>
    %cst_43 = arith.constant dense<0.000000e+00> : vector<32x32xf32>
    %93 = tpu.matmul %91, %92, %cst_43 {dimension_numbers = #tpu.dot_dimension_numbers<[1], [0], [0], [1], [0, 0, 1, 1], [], []>} : vector<32x32xbf16>, vector<32x32xbf16>, vector<32x32xf32> -> vector<32x32xf32>
    %94 = vector.extract_strided_slice %87 {offsets = [0, 0], sizes = [1, 32], strides = [1, 1]} : vector<1x96xf32> to vector<1x32xf32>
    %95 = vector.broadcast %94 : vector<1x32xf32> to vector<32x32xf32>
    %96 = arith.addf %93, %95 : vector<32x32xf32>
    %97 = arith.truncf %11 : vector<32x32xf32> to vector<32x32xbf16>
    %98 = vector.extract_strided_slice %86 {offsets = [0, 32], sizes = [32, 64], strides = [1, 1]} : vector<32x96xbf16> to vector<32x64xbf16>
    %cst_44 = arith.constant dense<0.000000e+00> : vector<32x64xf32>
    %99 = tpu.matmul %97, %98, %cst_44 {dimension_numbers = #tpu.dot_dimension_numbers<[1], [0], [0], [1], [0, 0, 1, 1], [], []>} : vector<32x32xbf16>, vector<32x64xbf16>, vector<32x64xf32> -> vector<32x64xf32>
    %100 = vector.extract_strided_slice %87 {offsets = [0, 32], sizes = [1, 64], strides = [1, 1]} : vector<1x96xf32> to vector<1x64xf32>
    %101 = vector.broadcast %100 : vector<1x64xf32> to vector<32x64xf32>
    %102 = arith.addf %99, %101 : vector<32x64xf32>
    %103 = vector.extract_strided_slice %102 {offsets = [0, 0], sizes = [32, 32], strides = [1, 1]} : vector<32x64xf32> to vector<32x32xf32>
    %104 = vector.extract_strided_slice %102 {offsets = [0, 32], sizes = [32, 32], strides = [1, 1]} : vector<32x64xf32> to vector<32x32xf32>
    %cst_45 = arith.constant 0.353553385 : f32
    %105 = vector.broadcast %cst_45 : f32 to vector<32x32xf32>
    %106 = arith.mulf %96, %105 : vector<32x32xf32>
    %107 = vector.shape_cast %106 : vector<32x32xf32> to vector<4x8x32xf32>
    %108 = vector.extract_strided_slice %107 {offsets = [0, 0, 0], sizes = [4, 8, 8], strides = [1, 1, 1]} : vector<4x8x32xf32> to vector<4x8x8xf32>
    %109 = vector.extract_strided_slice %107 {offsets = [0, 0, 8], sizes = [4, 8, 8], strides = [1, 1, 1]} : vector<4x8x32xf32> to vector<4x8x8xf32>
    %110 = vector.extract_strided_slice %107 {offsets = [0, 0, 16], sizes = [4, 8, 8], strides = [1, 1, 1]} : vector<4x8x32xf32> to vector<4x8x8xf32>
    %111 = vector.extract_strided_slice %107 {offsets = [0, 0, 24], sizes = [4, 8, 8], strides = [1, 1, 1]} : vector<4x8x32xf32> to vector<4x8x8xf32>
    %112 = tpu.concatenate %108, %109, %110, %111 in 0 : vector<4x8x8xf32>, vector<4x8x8xf32>, vector<4x8x8xf32>, vector<4x8x8xf32> -> vector<16x8x8xf32>
    %113 = arith.truncf %112 : vector<16x8x8xf32> to vector<16x8x8xbf16>
    %114 = vector.shape_cast %103 : vector<32x32xf32> to vector<4x8x32xf32>
    %115 = vector.extract_strided_slice %114 {offsets = [0, 0, 0], sizes = [4, 8, 8], strides = [1, 1, 1]} : vector<4x8x32xf32> to vector<4x8x8xf32>
    %116 = vector.extract_strided_slice %114 {offsets = [0, 0, 8], sizes = [4, 8, 8], strides = [1, 1, 1]} : vector<4x8x32xf32> to vector<4x8x8xf32>
    %117 = vector.extract_strided_slice %114 {offsets = [0, 0, 16], sizes = [4, 8, 8], strides = [1, 1, 1]} : vector<4x8x32xf32> to vector<4x8x8xf32>
    %118 = vector.extract_strided_slice %114 {offsets = [0, 0, 24], sizes = [4, 8, 8], strides = [1, 1, 1]} : vector<4x8x32xf32> to vector<4x8x8xf32>
    %119 = tpu.concatenate %115, %116, %117, %118 in 0 : vector<4x8x8xf32>, vector<4x8x8xf32>, vector<4x8x8xf32>, vector<4x8x8xf32> -> vector<16x8x8xf32>
    %120 = arith.truncf %119 : vector<16x8x8xf32> to vector<16x8x8xbf16>
    %121 = vector.shape_cast %104 : vector<32x32xf32> to vector<4x8x32xf32>
    %122 = vector.extract_strided_slice %121 {offsets = [0, 0, 0], sizes = [4, 8, 8], strides = [1, 1, 1]} : vector<4x8x32xf32> to vector<4x8x8xf32>
    %123 = vector.extract_strided_slice %121 {offsets = [0, 0, 8], sizes = [4, 8, 8], strides = [1, 1, 1]} : vector<4x8x32xf32> to vector<4x8x8xf32>
    %124 = vector.extract_strided_slice %121 {offsets = [0, 0, 16], sizes = [4, 8, 8], strides = [1, 1, 1]} : vector<4x8x32xf32> to vector<4x8x8xf32>
    %125 = vector.extract_strided_slice %121 {offsets = [0, 0, 24], sizes = [4, 8, 8], strides = [1, 1, 1]} : vector<4x8x32xf32> to vector<4x8x8xf32>
    %126 = tpu.concatenate %122, %123, %124, %125 in 0 : vector<4x8x8xf32>, vector<4x8x8xf32>, vector<4x8x8xf32>, vector<4x8x8xf32> -> vector<16x8x8xf32>
    %127 = arith.truncf %126 : vector<16x8x8xf32> to vector<16x8x8xbf16>
    "tpu.trace_start"() <{level = 10 : i32, message = "bqd,bkd->bqk"}> : () -> ()
    %cst_46 = arith.constant dense<0.000000e+00> : vector<16x8x8xf32>
    %128 = tpu.matmul %113, %120, %cst_46 {dimension_numbers = #tpu.dot_dimension_numbers<[2], [2], [1], [1], [0, 0, 0, 1, 1, 1], [0], [0]>} : vector<16x8x8xbf16>, vector<16x8x8xbf16>, vector<16x8x8xf32> -> vector<16x8x8xf32>
    "tpu.trace_stop"() : () -> ()
    %cst_47 = arith.constant dense<0xFF800000> : vector<16x8xf32>
    %129 = vector.multi_reduction <maximumf>, %128, %cst_47 [2] : vector<16x8x8xf32> to vector<16x8xf32>
    %130 = vector.shape_cast %129 : vector<16x8xf32> to vector<16x8x1xf32>
    %131 = vector.broadcast %130 : vector<16x8x1xf32> to vector<16x8x8xf32>
    %132 = arith.subf %128, %131 : vector<16x8x8xf32>
    %133 = math.exp %132 : vector<16x8x8xf32>
    %cst_48 = arith.constant dense<0.000000e+00> : vector<16x8xf32>
    %134 = vector.multi_reduction <add>, %133, %cst_48 [2] : vector<16x8x8xf32> to vector<16x8xf32>
    %135 = vector.shape_cast %134 : vector<16x8xf32> to vector<16x8x1xf32>
    %136 = vector.broadcast %135 : vector<16x8x1xf32> to vector<16x8x8xf32>
    %137 = arith.divf %133, %136 : vector<16x8x8xf32>
    %138 = arith.truncf %137 : vector<16x8x8xf32> to vector<16x8x8xbf16>
    "tpu.trace_start"() <{level = 10 : i32, message = "bqk,bkd->bqd"}> : () -> ()
    %cst_49 = arith.constant dense<0.000000e+00> : vector<16x8x8xf32>
    %139 = tpu.matmul %138, %127, %cst_49 {dimension_numbers = #tpu.dot_dimension_numbers<[2], [1], [1], [2], [0, 0, 0, 1, 1, 2], [0], [0]>} : vector<16x8x8xbf16>, vector<16x8x8xbf16>, vector<16x8x8xf32> -> vector<16x8x8xf32>
    "tpu.trace_stop"() : () -> ()
    %140 = vector.extract_strided_slice %139 {offsets = [0, 0, 0], sizes = [4, 8, 8], strides = [1, 1, 1]} : vector<16x8x8xf32> to vector<4x8x8xf32>
    %141 = vector.extract_strided_slice %139 {offsets = [4, 0, 0], sizes = [4, 8, 8], strides = [1, 1, 1]} : vector<16x8x8xf32> to vector<4x8x8xf32>
    %142 = vector.extract_strided_slice %139 {offsets = [8, 0, 0], sizes = [4, 8, 8], strides = [1, 1, 1]} : vector<16x8x8xf32> to vector<4x8x8xf32>
    %143 = vector.extract_strided_slice %139 {offsets = [12, 0, 0], sizes = [4, 8, 8], strides = [1, 1, 1]} : vector<16x8x8xf32> to vector<4x8x8xf32>
    %144 = tpu.concatenate %140, %141, %142, %143 in 2 : vector<4x8x8xf32>, vector<4x8x8xf32>, vector<4x8x8xf32>, vector<4x8x8xf32> -> vector<4x8x32xf32>
    %145 = vector.shape_cast %144 : vector<4x8x32xf32> to vector<32x32xf32>
    %146 = arith.truncf %145 : vector<32x32xf32> to vector<32x32xbf16>
    %cst_50 = arith.constant dense<0.000000e+00> : vector<32x32xf32>
    %147 = tpu.matmul %146, %89, %cst_50 {dimension_numbers = #tpu.dot_dimension_numbers<[1], [0], [0], [1], [0, 0, 1, 1], [], []>} : vector<32x32xbf16>, vector<32x32xbf16>, vector<32x32xf32> -> vector<32x32xf32>
    %148 = vector.broadcast %90 : vector<1x32xf32> to vector<32x32xf32>
    %149 = arith.addf %147, %148 : vector<32x32xf32>
    %150 = arith.addf %11, %84 : vector<32x32xf32>
    %c4 = arith.constant 4 : index
    %c0_51 = arith.constant 0 : index
    %151 = vector.load %arg6[%c4, %c0_51] : memref<8x32xf32, #tpu.memory_space<vmem>>, vector<1x32xf32>
    %c5 = arith.constant 5 : index
    %c0_52 = arith.constant 0 : index
    %152 = vector.load %arg6[%c5, %c0_52] : memref<8x32xf32, #tpu.memory_space<vmem>>, vector<1x32xf32>
    %cst_53 = arith.constant dense<0.000000e+00> : vector<32xf32>
    %153 = vector.multi_reduction <add>, %150, %cst_53 [1] : vector<32x32xf32> to vector<32xf32>
    %154 = vector.shape_cast %153 : vector<32xf32> to vector<32x1xf32>
    %cst_54 = arith.constant 3.200000e+01 : f32
    %155 = vector.broadcast %cst_54 : f32 to vector<32x1xf32>
    %156 = arith.divf %154, %155 : vector<32x1xf32>
    %157 = vector.broadcast %156 : vector<32x1xf32> to vector<32x32xf32>
    %158 = arith.subf %150, %157 : vector<32x32xf32>
    %159 = arith.mulf %158, %158 : vector<32x32xf32>
    %cst_55 = arith.constant dense<0.000000e+00> : vector<32xf32>
    %160 = vector.multi_reduction <add>, %159, %cst_55 [1] : vector<32x32xf32> to vector<32xf32>
    %161 = vector.shape_cast %160 : vector<32xf32> to vector<32x1xf32>
    %cst_56 = arith.constant 3.200000e+01 : f32
    %162 = vector.broadcast %cst_56 : f32 to vector<32x1xf32>
    %163 = arith.divf %161, %162 : vector<32x1xf32>
    %cst_57 = arith.constant 9.99999974E-6 : f32
    %164 = vector.broadcast %cst_57 : f32 to vector<32x1xf32>
    %165 = arith.addf %163, %164 : vector<32x1xf32>
    %166 = math.rsqrt %165 : vector<32x1xf32>
    %167 = vector.broadcast %166 : vector<32x1xf32> to vector<32x32xf32>
    %168 = arith.mulf %158, %167 : vector<32x32xf32>
    %169 = vector.broadcast %151 : vector<1x32xf32> to vector<32x32xf32>
    %170 = arith.mulf %168, %169 : vector<32x32xf32>
    %171 = vector.broadcast %152 : vector<1x32xf32> to vector<32x32xf32>
    %172 = arith.addf %170, %171 : vector<32x32xf32>
    %173 = arith.addf %19, %149 : vector<32x32xf32>
    %c6 = arith.constant 6 : index
    %c0_58 = arith.constant 0 : index
    %174 = vector.load %arg6[%c6, %c0_58] : memref<8x32xf32, #tpu.memory_space<vmem>>, vector<1x32xf32>
    %c7 = arith.constant 7 : index
    %c0_59 = arith.constant 0 : index
    %175 = vector.load %arg6[%c7, %c0_59] : memref<8x32xf32, #tpu.memory_space<vmem>>, vector<1x32xf32>
    %cst_60 = arith.constant dense<0.000000e+00> : vector<32xf32>
    %176 = vector.multi_reduction <add>, %173, %cst_60 [1] : vector<32x32xf32> to vector<32xf32>
    %177 = vector.shape_cast %176 : vector<32xf32> to vector<32x1xf32>
    %cst_61 = arith.constant 3.200000e+01 : f32
    %178 = vector.broadcast %cst_61 : f32 to vector<32x1xf32>
    %179 = arith.divf %177, %178 : vector<32x1xf32>
    %180 = vector.broadcast %179 : vector<32x1xf32> to vector<32x32xf32>
    %181 = arith.subf %173, %180 : vector<32x32xf32>
    %182 = arith.mulf %181, %181 : vector<32x32xf32>
    %cst_62 = arith.constant dense<0.000000e+00> : vector<32xf32>
    %183 = vector.multi_reduction <add>, %182, %cst_62 [1] : vector<32x32xf32> to vector<32xf32>
    %184 = vector.shape_cast %183 : vector<32xf32> to vector<32x1xf32>
    %cst_63 = arith.constant 3.200000e+01 : f32
    %185 = vector.broadcast %cst_63 : f32 to vector<32x1xf32>
    %186 = arith.divf %184, %185 : vector<32x1xf32>
    %cst_64 = arith.constant 9.99999974E-6 : f32
    %187 = vector.broadcast %cst_64 : f32 to vector<32x1xf32>
    %188 = arith.addf %186, %187 : vector<32x1xf32>
    %189 = math.rsqrt %188 : vector<32x1xf32>
    %190 = vector.broadcast %189 : vector<32x1xf32> to vector<32x32xf32>
    %191 = arith.mulf %181, %190 : vector<32x32xf32>
    %192 = vector.broadcast %174 : vector<1x32xf32> to vector<32x32xf32>
    %193 = arith.mulf %191, %192 : vector<32x32xf32>
    %194 = vector.broadcast %175 : vector<1x32xf32> to vector<32x32xf32>
    %195 = arith.addf %193, %194 : vector<32x32xf32>
    %196 = tpu.concatenate %172, %195 in 1 : vector<32x32xf32>, vector<32x32xf32> -> vector<32x64xf32>
    %197 = vector.shape_cast %196 : vector<32x64xf32> to vector<4x8x64xf32>
    %198 = vector.extract_strided_slice %197 {offsets = [0, 0, 0], sizes = [4, 1, 64], strides = [1, 1, 1]} : vector<4x8x64xf32> to vector<4x1x64xf32>
    %199 = vector.shape_cast %198 : vector<4x1x64xf32> to vector<4x64xf32>
    %200 = vector.extract_strided_slice %197 {offsets = [0, 1, 0], sizes = [4, 1, 64], strides = [1, 1, 1]} : vector<4x8x64xf32> to vector<4x1x64xf32>
    %201 = vector.shape_cast %200 : vector<4x1x64xf32> to vector<4x64xf32>
    %202 = vector.extract_strided_slice %197 {offsets = [0, 2, 0], sizes = [4, 1, 64], strides = [1, 1, 1]} : vector<4x8x64xf32> to vector<4x1x64xf32>
    %203 = vector.shape_cast %202 : vector<4x1x64xf32> to vector<4x64xf32>
    %204 = vector.extract_strided_slice %197 {offsets = [0, 3, 0], sizes = [4, 1, 64], strides = [1, 1, 1]} : vector<4x8x64xf32> to vector<4x1x64xf32>
    %205 = vector.shape_cast %204 : vector<4x1x64xf32> to vector<4x64xf32>
    %206 = vector.extract_strided_slice %197 {offsets = [0, 4, 0], sizes = [4, 1, 64], strides = [1, 1, 1]} : vector<4x8x64xf32> to vector<4x1x64xf32>
    %207 = vector.shape_cast %206 : vector<4x1x64xf32> to vector<4x64xf32>
    %208 = vector.extract_strided_slice %197 {offsets = [0, 5, 0], sizes = [4, 1, 64], strides = [1, 1, 1]} : vector<4x8x64xf32> to vector<4x1x64xf32>
    %209 = vector.shape_cast %208 : vector<4x1x64xf32> to vector<4x64xf32>
    %210 = vector.extract_strided_slice %197 {offsets = [0, 6, 0], sizes = [4, 1, 64], strides = [1, 1, 1]} : vector<4x8x64xf32> to vector<4x1x64xf32>
    %211 = vector.shape_cast %210 : vector<4x1x64xf32> to vector<4x64xf32>
    %212 = vector.extract_strided_slice %197 {offsets = [0, 7, 0], sizes = [4, 1, 64], strides = [1, 1, 1]} : vector<4x8x64xf32> to vector<4x1x64xf32>
    %213 = vector.shape_cast %212 : vector<4x1x64xf32> to vector<4x64xf32>
    %214 = tpu.concatenate %199, %201, %203, %205, %207, %209, %211, %213 in 1 : vector<4x64xf32>, vector<4x64xf32>, vector<4x64xf32>, vector<4x64xf32>, vector<4x64xf32>, vector<4x64xf32>, vector<4x64xf32>, vector<4x64xf32> -> vector<4x512xf32>
    %c0_65 = arith.constant 0 : index
    %c0_66 = arith.constant 0 : index
    %215 = vector.load %arg8[%c0_65, %c0_66] : memref<4x512xf32, #tpu.memory_space<vmem>>, vector<4x512xf32>
    tpu.vector_store %arg8[%c0_65, %c0_66], %214 {strides = array<i32>} : memref<4x512xf32, #tpu.memory_space<vmem>>, vector<4x512xf32>,
    return
  }
  func.func @transform_0(%arg0: i32) -> (i32, i32, i32) {
    %c0_i32 = arith.constant 0 : i32
    %c0_i32_0 = arith.constant 0 : i32
    %c0_i32_1 = arith.constant 0 : i32
    return %arg0, %c0_i32, %c0_i32_0 : i32, i32, i32
  }
  func.func @transform_1(%arg0: i32) -> (i32, i32, i32) {
    %c0_i32 = arith.constant 0 : i32
    %c0_i32_0 = arith.constant 0 : i32
    %c0_i32_1 = arith.constant 0 : i32
    return %arg0, %c0_i32, %c0_i32_0 : i32, i32, i32
  }
  func.func @transform_2(%arg0: i32) -> (i32, i32, i32) {
    %c0_i32 = arith.constant 0 : i32
    %c0_i32_0 = arith.constant 0 : i32
    %c0_i32_1 = arith.constant 0 : i32
    %c0_i32_2 = arith.constant 0 : i32
    return %c0_i32, %c0_i32_0, %c0_i32_1 : i32, i32, i32
  }
  func.func @transform_3(%arg0: i32) -> (i32, i32, i32) {
    %c0_i32 = arith.constant 0 : i32
    %c0_i32_0 = arith.constant 0 : i32
    %c0_i32_1 = arith.constant 0 : i32
    %c0_i32_2 = arith.constant 0 : i32
    return %c0_i32, %c0_i32_0, %c0_i32_1 : i32, i32, i32
  }
  func.func @transform_4(%arg0: i32) -> (i32, i32, i32) {
    %c0_i32 = arith.constant 0 : i32
    %c0_i32_0 = arith.constant 0 : i32
    %c0_i32_1 = arith.constant 0 : i32
    %c0_i32_2 = arith.constant 0 : i32
    return %c0_i32, %c0_i32_0, %c0_i32_1 : i32, i32, i32
  }
  func.func @transform_5(%arg0: i32) -> (i32, i32) {
    %c0_i32 = arith.constant 0 : i32
    %c0_i32_0 = arith.constant 0 : i32
    %c0_i32_1 = arith.constant 0 : i32
    return %c0_i32, %c0_i32_0 : i32, i32
  }
  func.func @transform_6(%arg0: i32) -> (i32, i32) {
    %c0_i32 = arith.constant 0 : i32
    %c0_i32_0 = arith.constant 0 : i32
    %c0_i32_1 = arith.constant 0 : i32
    return %c0_i32, %c0_i32_0 : i32, i32
  }
  func.func @transform_7(%arg0: i32) -> (i32, i32) {
    %c0_i32 = arith.constant 0 : i32
    %c0_i32_0 = arith.constant 0 : i32
    return %arg0, %c0_i32 : i32, i32
  }
}

module attributes {stable_mosaic.version = 11 : i64} {
  func.func @_block_kernel(%arg0: i32, %arg1: memref<2x2x8x64xf32, #tpu.memory_space<vmem>>, %arg2: memref<1344x64xbf16, #tpu.memory_space<vmem>>, %arg3: memref<2x64x64xbf16, #tpu.memory_space<vmem>>, %arg4: memref<64x192xbf16, #tpu.memory_space<vmem>>, %arg5: memref<3x64x64xbf16, #tpu.memory_space<vmem>>, %arg6: memref<7x64xf32, #tpu.memory_space<vmem>>, %arg7: memref<7x64xf32, #tpu.memory_space<vmem>>, %arg8: memref<1x192xf32, #tpu.memory_space<vmem>>, %arg9: memref<2x1024xf32, #tpu.memory_space<vmem>>, %arg10: memref<2x4x14x64xbf16, #tpu.memory_space<vmem>>) attributes {dimension_semantics = [#tpu.dimension_semantics<parallel>], iteration_bounds = array<i64: 1>, scalar_prefetch = 0 : i64, scratch_operands = 1 : i64, tpu.core_type = #tpu.core_type<tc>, window_params = [{transform_indices = @transform_0, window_bounds = array<i64: 2, 2, 8, 64>}, {pipeline_mode = #tpu.pipeline_mode<synchronous>, transform_indices = @transform_1, window_bounds = array<i64: 1344, 64>}, {pipeline_mode = #tpu.pipeline_mode<synchronous>, transform_indices = @transform_2, window_bounds = array<i64: 2, 64, 64>}, {pipeline_mode = #tpu.pipeline_mode<synchronous>, transform_indices = @transform_3, window_bounds = array<i64: 64, 192>}, {pipeline_mode = #tpu.pipeline_mode<synchronous>, transform_indices = @transform_4, window_bounds = array<i64: 3, 64, 64>}, {pipeline_mode = #tpu.pipeline_mode<synchronous>, transform_indices = @transform_5, window_bounds = array<i64: 7, 64>}, {pipeline_mode = #tpu.pipeline_mode<synchronous>, transform_indices = @transform_6, window_bounds = array<i64: 7, 64>}, {pipeline_mode = #tpu.pipeline_mode<synchronous>, transform_indices = @transform_7, window_bounds = array<i64: 1, 192>}, {transform_indices = @transform_8, window_bounds = array<i64: 2, 1024>}]} {
    %c0 = arith.constant 0 : index
    %c0_0 = arith.constant 0 : index
    %c0_1 = arith.constant 0 : index
    %c0_2 = arith.constant 0 : index
    %0 = vector.load %arg1[%c0, %c0_0, %c0_1, %c0_2] : memref<2x2x8x64xf32, #tpu.memory_space<vmem>>, vector<2x2x8x64xf32>
    %1 = vector.shape_cast %0 : vector<2x2x8x64xf32> to vector<32x64xf32>
    %cst = arith.constant 0.000000e+00 : bf16
    %2 = vector.broadcast %cst : bf16 to vector<2x4x14x64xbf16>
    %c0_3 = arith.constant 0 : index
    %c0_4 = arith.constant 0 : index
    %c0_5 = arith.constant 0 : index
    %c0_6 = arith.constant 0 : index
    %3 = vector.load %arg10[%c0_3, %c0_4, %c0_5, %c0_6] : memref<2x4x14x64xbf16, #tpu.memory_space<vmem>>, vector<2x4x14x64xbf16>
    tpu.vector_store %arg10[%c0_3, %c0_4, %c0_5, %c0_6], %2 {strides = array<i32>} : memref<2x4x14x64xbf16, #tpu.memory_space<vmem>>, vector<2x4x14x64xbf16>,
    %4 = arith.truncf %0 : vector<2x2x8x64xf32> to vector<2x2x8x64xbf16>
    %c0_7 = arith.constant 0 : index
    %c1 = arith.constant 1 : index
    %c3 = arith.constant 3 : index
    %c0_8 = arith.constant 0 : index
    %5 = vector.load %arg10[%c0_7, %c1, %c3, %c0_8] : memref<2x4x14x64xbf16, #tpu.memory_space<vmem>>, vector<2x2x8x64xbf16>
    tpu.vector_store %arg10[%c0_7, %c1, %c3, %c0_8], %4 {strides = array<i32>} : memref<2x4x14x64xbf16, #tpu.memory_space<vmem>>, vector<2x2x8x64xbf16>,
    %c0_9 = arith.constant 0 : index
    %c0_10 = arith.constant 0 : index
    %c0_11 = arith.constant 0 : index
    %c0_12 = arith.constant 0 : index
    %6 = vector.load %arg10[%c0_9, %c0_10, %c0_11, %c0_12] : memref<2x4x14x64xbf16, #tpu.memory_space<vmem>>, vector<2x2x8x64xbf16>
    %c0_13 = arith.constant 0 : index
    %c0_14 = arith.constant 0 : index
    %c1_15 = arith.constant 1 : index
    %c0_16 = arith.constant 0 : index
    %7 = vector.load %arg10[%c0_13, %c0_14, %c1_15, %c0_16] : memref<2x4x14x64xbf16, #tpu.memory_space<vmem>>, vector<2x2x8x64xbf16>
    %c0_17 = arith.constant 0 : index
    %c0_18 = arith.constant 0 : index
    %c2 = arith.constant 2 : index
    %c0_19 = arith.constant 0 : index
    %8 = vector.load %arg10[%c0_17, %c0_18, %c2, %c0_19] : memref<2x4x14x64xbf16, #tpu.memory_space<vmem>>, vector<2x2x8x64xbf16>
    %c0_20 = arith.constant 0 : index
    %c0_21 = arith.constant 0 : index
    %c3_22 = arith.constant 3 : index
    %c0_23 = arith.constant 0 : index
    %9 = vector.load %arg10[%c0_20, %c0_21, %c3_22, %c0_23] : memref<2x4x14x64xbf16, #tpu.memory_space<vmem>>, vector<2x2x8x64xbf16>
    %c0_24 = arith.constant 0 : index
    %c0_25 = arith.constant 0 : index
    %c4 = arith.constant 4 : index
    %c0_26 = arith.constant 0 : index
    %10 = vector.load %arg10[%c0_24, %c0_25, %c4, %c0_26] : memref<2x4x14x64xbf16, #tpu.memory_space<vmem>>, vector<2x2x8x64xbf16>
    %c0_27 = arith.constant 0 : index
    %c0_28 = arith.constant 0 : index
    %c5 = arith.constant 5 : index
    %c0_29 = arith.constant 0 : index
    %11 = vector.load %arg10[%c0_27, %c0_28, %c5, %c0_29] : memref<2x4x14x64xbf16, #tpu.memory_space<vmem>>, vector<2x2x8x64xbf16>
    %c0_30 = arith.constant 0 : index
    %c0_31 = arith.constant 0 : index
    %c6 = arith.constant 6 : index
    %c0_32 = arith.constant 0 : index
    %12 = vector.load %arg10[%c0_30, %c0_31, %c6, %c0_32] : memref<2x4x14x64xbf16, #tpu.memory_space<vmem>>, vector<2x2x8x64xbf16>
    %c0_33 = arith.constant 0 : index
    %c1_34 = arith.constant 1 : index
    %c0_35 = arith.constant 0 : index
    %c0_36 = arith.constant 0 : index
    %13 = vector.load %arg10[%c0_33, %c1_34, %c0_35, %c0_36] : memref<2x4x14x64xbf16, #tpu.memory_space<vmem>>, vector<2x2x8x64xbf16>
    %c0_37 = arith.constant 0 : index
    %c1_38 = arith.constant 1 : index
    %c1_39 = arith.constant 1 : index
    %c0_40 = arith.constant 0 : index
    %14 = vector.load %arg10[%c0_37, %c1_38, %c1_39, %c0_40] : memref<2x4x14x64xbf16, #tpu.memory_space<vmem>>, vector<2x2x8x64xbf16>
    %c0_41 = arith.constant 0 : index
    %c1_42 = arith.constant 1 : index
    %c2_43 = arith.constant 2 : index
    %c0_44 = arith.constant 0 : index
    %15 = vector.load %arg10[%c0_41, %c1_42, %c2_43, %c0_44] : memref<2x4x14x64xbf16, #tpu.memory_space<vmem>>, vector<2x2x8x64xbf16>
    %c0_45 = arith.constant 0 : index
    %c1_46 = arith.constant 1 : index
    %c3_47 = arith.constant 3 : index
    %c0_48 = arith.constant 0 : index
    %16 = vector.load %arg10[%c0_45, %c1_46, %c3_47, %c0_48] : memref<2x4x14x64xbf16, #tpu.memory_space<vmem>>, vector<2x2x8x64xbf16>
    %c0_49 = arith.constant 0 : index
    %c1_50 = arith.constant 1 : index
    %c4_51 = arith.constant 4 : index
    %c0_52 = arith.constant 0 : index
    %17 = vector.load %arg10[%c0_49, %c1_50, %c4_51, %c0_52] : memref<2x4x14x64xbf16, #tpu.memory_space<vmem>>, vector<2x2x8x64xbf16>
    %c0_53 = arith.constant 0 : index
    %c1_54 = arith.constant 1 : index
    %c5_55 = arith.constant 5 : index
    %c0_56 = arith.constant 0 : index
    %18 = vector.load %arg10[%c0_53, %c1_54, %c5_55, %c0_56] : memref<2x4x14x64xbf16, #tpu.memory_space<vmem>>, vector<2x2x8x64xbf16>
    %c0_57 = arith.constant 0 : index
    %c1_58 = arith.constant 1 : index
    %c6_59 = arith.constant 6 : index
    %c0_60 = arith.constant 0 : index
    %19 = vector.load %arg10[%c0_57, %c1_58, %c6_59, %c0_60] : memref<2x4x14x64xbf16, #tpu.memory_space<vmem>>, vector<2x2x8x64xbf16>
    %c0_61 = arith.constant 0 : index
    %c2_62 = arith.constant 2 : index
    %c0_63 = arith.constant 0 : index
    %c0_64 = arith.constant 0 : index
    %20 = vector.load %arg10[%c0_61, %c2_62, %c0_63, %c0_64] : memref<2x4x14x64xbf16, #tpu.memory_space<vmem>>, vector<2x2x8x64xbf16>
    %c0_65 = arith.constant 0 : index
    %c2_66 = arith.constant 2 : index
    %c1_67 = arith.constant 1 : index
    %c0_68 = arith.constant 0 : index
    %21 = vector.load %arg10[%c0_65, %c2_66, %c1_67, %c0_68] : memref<2x4x14x64xbf16, #tpu.memory_space<vmem>>, vector<2x2x8x64xbf16>
    %c0_69 = arith.constant 0 : index
    %c2_70 = arith.constant 2 : index
    %c2_71 = arith.constant 2 : index
    %c0_72 = arith.constant 0 : index
    %22 = vector.load %arg10[%c0_69, %c2_70, %c2_71, %c0_72] : memref<2x4x14x64xbf16, #tpu.memory_space<vmem>>, vector<2x2x8x64xbf16>
    %c0_73 = arith.constant 0 : index
    %c2_74 = arith.constant 2 : index
    %c3_75 = arith.constant 3 : index
    %c0_76 = arith.constant 0 : index
    %23 = vector.load %arg10[%c0_73, %c2_74, %c3_75, %c0_76] : memref<2x4x14x64xbf16, #tpu.memory_space<vmem>>, vector<2x2x8x64xbf16>
    %c0_77 = arith.constant 0 : index
    %c2_78 = arith.constant 2 : index
    %c4_79 = arith.constant 4 : index
    %c0_80 = arith.constant 0 : index
    %24 = vector.load %arg10[%c0_77, %c2_78, %c4_79, %c0_80] : memref<2x4x14x64xbf16, #tpu.memory_space<vmem>>, vector<2x2x8x64xbf16>
    %c0_81 = arith.constant 0 : index
    %c2_82 = arith.constant 2 : index
    %c5_83 = arith.constant 5 : index
    %c0_84 = arith.constant 0 : index
    %25 = vector.load %arg10[%c0_81, %c2_82, %c5_83, %c0_84] : memref<2x4x14x64xbf16, #tpu.memory_space<vmem>>, vector<2x2x8x64xbf16>
    %c0_85 = arith.constant 0 : index
    %c2_86 = arith.constant 2 : index
    %c6_87 = arith.constant 6 : index
    %c0_88 = arith.constant 0 : index
    %26 = vector.load %arg10[%c0_85, %c2_86, %c6_87, %c0_88] : memref<2x4x14x64xbf16, #tpu.memory_space<vmem>>, vector<2x2x8x64xbf16>
    %27 = tpu.concatenate %6, %7, %8, %9, %10, %11, %12, %13, %14, %15, %16, %17, %18, %19, %20, %21 in 3 : vector<2x2x8x64xbf16>, vector<2x2x8x64xbf16>, vector<2x2x8x64xbf16>, vector<2x2x8x64xbf16>, vector<2x2x8x64xbf16>, vector<2x2x8x64xbf16>, vector<2x2x8x64xbf16>, vector<2x2x8x64xbf16>, vector<2x2x8x64xbf16>, vector<2x2x8x64xbf16>, vector<2x2x8x64xbf16>, vector<2x2x8x64xbf16>, vector<2x2x8x64xbf16>, vector<2x2x8x64xbf16>, vector<2x2x8x64xbf16>, vector<2x2x8x64xbf16> -> vector<2x2x8x1024xbf16>
    %28 = tpu.concatenate %22, %23, %24, %25, %26 in 3 : vector<2x2x8x64xbf16>, vector<2x2x8x64xbf16>, vector<2x2x8x64xbf16>, vector<2x2x8x64xbf16>, vector<2x2x8x64xbf16> -> vector<2x2x8x320xbf16>
    %29 = tpu.concatenate %27, %28 in 3 : vector<2x2x8x1024xbf16>, vector<2x2x8x320xbf16> -> vector<2x2x8x1344xbf16>
    %30 = vector.shape_cast %29 : vector<2x2x8x1344xbf16> to vector<32x1344xbf16>
    %c0_89 = arith.constant 0 : index
    %c0_90 = arith.constant 0 : index
    %31 = vector.load %arg2[%c0_89, %c0_90] : memref<1344x64xbf16, #tpu.memory_space<vmem>>, vector<1344x64xbf16>
    %cst_91 = arith.constant dense<0.000000e+00> : vector<32x64xf32>
    %32 = tpu.matmul %30, %31, %cst_91 {dimension_numbers = #tpu.dot_dimension_numbers<[1], [0], [0], [1], [0, 0, 1, 1], [], []>} : vector<32x1344xbf16>, vector<1344x64xbf16>, vector<32x64xf32> -> vector<32x64xf32>
    %c0_92 = arith.constant 0 : index
    %c0_93 = arith.constant 0 : index
    %33 = vector.load %arg6[%c0_92, %c0_93] : memref<7x64xf32, #tpu.memory_space<vmem>>, vector<1x64xf32>
    %34 = vector.broadcast %33 : vector<1x64xf32> to vector<32x64xf32>
    %35 = arith.addf %32, %34 : vector<32x64xf32>
    %c1_94 = arith.constant 1 : index
    %c0_95 = arith.constant 0 : index
    %36 = vector.load %arg6[%c1_94, %c0_95] : memref<7x64xf32, #tpu.memory_space<vmem>>, vector<1x64xf32>
    %c2_96 = arith.constant 2 : index
    %c0_97 = arith.constant 0 : index
    %37 = vector.load %arg6[%c2_96, %c0_97] : memref<7x64xf32, #tpu.memory_space<vmem>>, vector<1x64xf32>
    %cst_98 = arith.constant dense<0.000000e+00> : vector<32xf32>
    %38 = vector.multi_reduction <add>, %35, %cst_98 [1] : vector<32x64xf32> to vector<32xf32>
    %39 = vector.shape_cast %38 : vector<32xf32> to vector<32x1xf32>
    %cst_99 = arith.constant 6.400000e+01 : f32
    %40 = vector.broadcast %cst_99 : f32 to vector<32x1xf32>
    %41 = arith.divf %39, %40 : vector<32x1xf32>
    %42 = vector.broadcast %41 : vector<32x1xf32> to vector<32x64xf32>
    %43 = arith.subf %35, %42 : vector<32x64xf32>
    %44 = arith.mulf %43, %43 : vector<32x64xf32>
    %cst_100 = arith.constant dense<0.000000e+00> : vector<32xf32>
    %45 = vector.multi_reduction <add>, %44, %cst_100 [1] : vector<32x64xf32> to vector<32xf32>
    %46 = vector.shape_cast %45 : vector<32xf32> to vector<32x1xf32>
    %cst_101 = arith.constant 6.400000e+01 : f32
    %47 = vector.broadcast %cst_101 : f32 to vector<32x1xf32>
    %48 = arith.divf %46, %47 : vector<32x1xf32>
    %cst_102 = arith.constant 9.99999974E-6 : f32
    %49 = vector.broadcast %cst_102 : f32 to vector<32x1xf32>
    %50 = arith.addf %48, %49 : vector<32x1xf32>
    %51 = math.rsqrt %50 : vector<32x1xf32>
    %52 = vector.broadcast %51 : vector<32x1xf32> to vector<32x64xf32>
    %53 = arith.mulf %43, %52 : vector<32x64xf32>
    %54 = vector.broadcast %36 : vector<1x64xf32> to vector<32x64xf32>
    %55 = arith.mulf %53, %54 : vector<32x64xf32>
    %56 = vector.broadcast %37 : vector<1x64xf32> to vector<32x64xf32>
    %57 = arith.addf %55, %56 : vector<32x64xf32>
    %58 = arith.truncf %57 : vector<32x64xf32> to vector<32x64xbf16>
    %c0_103 = arith.constant 0 : index
    %c0_104 = arith.constant 0 : index
    %c0_105 = arith.constant 0 : index
    %59 = vector.load %arg3[%c0_103, %c0_104, %c0_105] : memref<2x64x64xbf16, #tpu.memory_space<vmem>>, vector<1x64x64xbf16>
    %60 = vector.shape_cast %59 : vector<1x64x64xbf16> to vector<64x64xbf16>
    %cst_106 = arith.constant dense<0.000000e+00> : vector<32x64xf32>
    %61 = tpu.matmul %58, %60, %cst_106 {dimension_numbers = #tpu.dot_dimension_numbers<[1], [0], [0], [1], [0, 0, 1, 1], [], []>} : vector<32x64xbf16>, vector<64x64xbf16>, vector<32x64xf32> -> vector<32x64xf32>
    %c3_107 = arith.constant 3 : index
    %c0_108 = arith.constant 0 : index
    %62 = vector.load %arg6[%c3_107, %c0_108] : memref<7x64xf32, #tpu.memory_space<vmem>>, vector<1x64xf32>
    %63 = vector.broadcast %62 : vector<1x64xf32> to vector<32x64xf32>
    %64 = arith.addf %61, %63 : vector<32x64xf32>
    %cst_109 = arith.constant 0.000000e+00 : f32
    %65 = vector.broadcast %cst_109 : f32 to vector<32x64xf32>
    %66 = arith.maximumf %64, %65 : vector<32x64xf32>
    %67 = arith.truncf %66 : vector<32x64xf32> to vector<32x64xbf16>
    %c1_110 = arith.constant 1 : index
    %c0_111 = arith.constant 0 : index
    %c0_112 = arith.constant 0 : index
    %68 = vector.load %arg3[%c1_110, %c0_111, %c0_112] : memref<2x64x64xbf16, #tpu.memory_space<vmem>>, vector<1x64x64xbf16>
    %69 = vector.shape_cast %68 : vector<1x64x64xbf16> to vector<64x64xbf16>
    %cst_113 = arith.constant dense<0.000000e+00> : vector<32x64xf32>
    %70 = tpu.matmul %67, %69, %cst_113 {dimension_numbers = #tpu.dot_dimension_numbers<[1], [0], [0], [1], [0, 0, 1, 1], [], []>} : vector<32x64xbf16>, vector<64x64xbf16>, vector<32x64xf32> -> vector<32x64xf32>
    %c4_114 = arith.constant 4 : index
    %c0_115 = arith.constant 0 : index
    %71 = vector.load %arg6[%c4_114, %c0_115] : memref<7x64xf32, #tpu.memory_space<vmem>>, vector<1x64xf32>
    %72 = vector.broadcast %71 : vector<1x64xf32> to vector<32x64xf32>
    %73 = arith.addf %70, %72 : vector<32x64xf32>
    %74 = arith.addf %73, %1 : vector<32x64xf32>
    %c5_116 = arith.constant 5 : index
    %c0_117 = arith.constant 0 : index
    %75 = vector.load %arg6[%c5_116, %c0_117] : memref<7x64xf32, #tpu.memory_space<vmem>>, vector<1x64xf32>
    %c6_118 = arith.constant 6 : index
    %c0_119 = arith.constant 0 : index
    %76 = vector.load %arg6[%c6_118, %c0_119] : memref<7x64xf32, #tpu.memory_space<vmem>>, vector<1x64xf32>
    %cst_120 = arith.constant dense<0.000000e+00> : vector<32xf32>
    %77 = vector.multi_reduction <add>, %74, %cst_120 [1] : vector<32x64xf32> to vector<32xf32>
    %78 = vector.shape_cast %77 : vector<32xf32> to vector<32x1xf32>
    %cst_121 = arith.constant 6.400000e+01 : f32
    %79 = vector.broadcast %cst_121 : f32 to vector<32x1xf32>
    %80 = arith.divf %78, %79 : vector<32x1xf32>
    %81 = vector.broadcast %80 : vector<32x1xf32> to vector<32x64xf32>
    %82 = arith.subf %74, %81 : vector<32x64xf32>
    %83 = arith.mulf %82, %82 : vector<32x64xf32>
    %cst_122 = arith.constant dense<0.000000e+00> : vector<32xf32>
    %84 = vector.multi_reduction <add>, %83, %cst_122 [1] : vector<32x64xf32> to vector<32xf32>
    %85 = vector.shape_cast %84 : vector<32xf32> to vector<32x1xf32>
    %cst_123 = arith.constant 6.400000e+01 : f32
    %86 = vector.broadcast %cst_123 : f32 to vector<32x1xf32>
    %87 = arith.divf %85, %86 : vector<32x1xf32>
    %cst_124 = arith.constant 9.99999974E-6 : f32
    %88 = vector.broadcast %cst_124 : f32 to vector<32x1xf32>
    %89 = arith.addf %87, %88 : vector<32x1xf32>
    %90 = math.rsqrt %89 : vector<32x1xf32>
    %91 = vector.broadcast %90 : vector<32x1xf32> to vector<32x64xf32>
    %92 = arith.mulf %82, %91 : vector<32x64xf32>
    %93 = vector.broadcast %75 : vector<1x64xf32> to vector<32x64xf32>
    %94 = arith.mulf %92, %93 : vector<32x64xf32>
    %95 = vector.broadcast %76 : vector<1x64xf32> to vector<32x64xf32>
    %96 = arith.addf %94, %95 : vector<32x64xf32>
    %c0_125 = arith.constant 0 : index
    %c0_126 = arith.constant 0 : index
    %97 = vector.load %arg4[%c0_125, %c0_126] : memref<64x192xbf16, #tpu.memory_space<vmem>>, vector<64x192xbf16>
    %c0_127 = arith.constant 0 : index
    %c0_128 = arith.constant 0 : index
    %98 = vector.load %arg8[%c0_127, %c0_128] : memref<1x192xf32, #tpu.memory_space<vmem>>, vector<1x192xf32>
    %c0_129 = arith.constant 0 : index
    %c0_130 = arith.constant 0 : index
    %c0_131 = arith.constant 0 : index
    %99 = vector.load %arg5[%c0_129, %c0_130, %c0_131] : memref<3x64x64xbf16, #tpu.memory_space<vmem>>, vector<1x64x64xbf16>
    %100 = vector.shape_cast %99 : vector<1x64x64xbf16> to vector<64x64xbf16>
    %c0_132 = arith.constant 0 : index
    %c0_133 = arith.constant 0 : index
    %101 = vector.load %arg7[%c0_132, %c0_133] : memref<7x64xf32, #tpu.memory_space<vmem>>, vector<1x64xf32>
    %102 = arith.truncf %96 : vector<32x64xf32> to vector<32x64xbf16>
    %cst_134 = arith.constant dense<0.000000e+00> : vector<32x192xf32>
    %103 = tpu.matmul %102, %97, %cst_134 {dimension_numbers = #tpu.dot_dimension_numbers<[1], [0], [0], [1], [0, 0, 1, 1], [], []>} : vector<32x64xbf16>, vector<64x192xbf16>, vector<32x192xf32> -> vector<32x192xf32>
    %104 = vector.broadcast %98 : vector<1x192xf32> to vector<32x192xf32>
    %105 = arith.addf %103, %104 : vector<32x192xf32>
    %106 = vector.extract_strided_slice %105 {offsets = [0, 0], sizes = [32, 64], strides = [1, 1]} : vector<32x192xf32> to vector<32x64xf32>
    %107 = vector.extract_strided_slice %105 {offsets = [0, 64], sizes = [32, 64], strides = [1, 1]} : vector<32x192xf32> to vector<32x64xf32>
    %108 = vector.extract_strided_slice %105 {offsets = [0, 128], sizes = [32, 64], strides = [1, 1]} : vector<32x192xf32> to vector<32x64xf32>
    %cst_135 = arith.constant 2.500000e-01 : f32
    %109 = vector.broadcast %cst_135 : f32 to vector<32x64xf32>
    %110 = arith.mulf %106, %109 : vector<32x64xf32>
    %111 = vector.shape_cast %110 : vector<32x64xf32> to vector<4x8x64xf32>
    %112 = vector.extract_strided_slice %111 {offsets = [0, 0, 0], sizes = [4, 8, 16], strides = [1, 1, 1]} : vector<4x8x64xf32> to vector<4x8x16xf32>
    %113 = vector.extract_strided_slice %111 {offsets = [0, 0, 16], sizes = [4, 8, 16], strides = [1, 1, 1]} : vector<4x8x64xf32> to vector<4x8x16xf32>
    %114 = vector.extract_strided_slice %111 {offsets = [0, 0, 32], sizes = [4, 8, 16], strides = [1, 1, 1]} : vector<4x8x64xf32> to vector<4x8x16xf32>
    %115 = vector.extract_strided_slice %111 {offsets = [0, 0, 48], sizes = [4, 8, 16], strides = [1, 1, 1]} : vector<4x8x64xf32> to vector<4x8x16xf32>
    %116 = tpu.concatenate %112, %113, %114, %115 in 0 : vector<4x8x16xf32>, vector<4x8x16xf32>, vector<4x8x16xf32>, vector<4x8x16xf32> -> vector<16x8x16xf32>
    %117 = arith.truncf %116 : vector<16x8x16xf32> to vector<16x8x16xbf16>
    %118 = vector.shape_cast %107 : vector<32x64xf32> to vector<4x8x64xf32>
    %119 = vector.extract_strided_slice %118 {offsets = [0, 0, 0], sizes = [4, 8, 16], strides = [1, 1, 1]} : vector<4x8x64xf32> to vector<4x8x16xf32>
    %120 = vector.extract_strided_slice %118 {offsets = [0, 0, 16], sizes = [4, 8, 16], strides = [1, 1, 1]} : vector<4x8x64xf32> to vector<4x8x16xf32>
    %121 = vector.extract_strided_slice %118 {offsets = [0, 0, 32], sizes = [4, 8, 16], strides = [1, 1, 1]} : vector<4x8x64xf32> to vector<4x8x16xf32>
    %122 = vector.extract_strided_slice %118 {offsets = [0, 0, 48], sizes = [4, 8, 16], strides = [1, 1, 1]} : vector<4x8x64xf32> to vector<4x8x16xf32>
    %123 = tpu.concatenate %119, %120, %121, %122 in 0 : vector<4x8x16xf32>, vector<4x8x16xf32>, vector<4x8x16xf32>, vector<4x8x16xf32> -> vector<16x8x16xf32>
    %124 = arith.truncf %123 : vector<16x8x16xf32> to vector<16x8x16xbf16>
    %125 = vector.shape_cast %108 : vector<32x64xf32> to vector<4x8x64xf32>
    %126 = vector.extract_strided_slice %125 {offsets = [0, 0, 0], sizes = [4, 8, 16], strides = [1, 1, 1]} : vector<4x8x64xf32> to vector<4x8x16xf32>
    %127 = vector.extract_strided_slice %125 {offsets = [0, 0, 16], sizes = [4, 8, 16], strides = [1, 1, 1]} : vector<4x8x64xf32> to vector<4x8x16xf32>
    %128 = vector.extract_strided_slice %125 {offsets = [0, 0, 32], sizes = [4, 8, 16], strides = [1, 1, 1]} : vector<4x8x64xf32> to vector<4x8x16xf32>
    %129 = vector.extract_strided_slice %125 {offsets = [0, 0, 48], sizes = [4, 8, 16], strides = [1, 1, 1]} : vector<4x8x64xf32> to vector<4x8x16xf32>
    %130 = tpu.concatenate %126, %127, %128, %129 in 0 : vector<4x8x16xf32>, vector<4x8x16xf32>, vector<4x8x16xf32>, vector<4x8x16xf32> -> vector<16x8x16xf32>
    %131 = arith.truncf %130 : vector<16x8x16xf32> to vector<16x8x16xbf16>
    "tpu.trace_start"() <{level = 10 : i32, message = "bqd,bkd->bqk"}> : () -> ()
    %cst_136 = arith.constant dense<0.000000e+00> : vector<16x8x8xf32>
    %132 = tpu.matmul %117, %124, %cst_136 {dimension_numbers = #tpu.dot_dimension_numbers<[2], [2], [1], [1], [0, 0, 0, 1, 1, 1], [0], [0]>} : vector<16x8x16xbf16>, vector<16x8x16xbf16>, vector<16x8x8xf32> -> vector<16x8x8xf32>
    "tpu.trace_stop"() : () -> ()
    %cst_137 = arith.constant dense<0xFF800000> : vector<16x8xf32>
    %133 = vector.multi_reduction <maximumf>, %132, %cst_137 [2] : vector<16x8x8xf32> to vector<16x8xf32>
    %134 = vector.shape_cast %133 : vector<16x8xf32> to vector<16x8x1xf32>
    %135 = vector.broadcast %134 : vector<16x8x1xf32> to vector<16x8x8xf32>
    %136 = arith.subf %132, %135 : vector<16x8x8xf32>
    %137 = math.exp %136 : vector<16x8x8xf32>
    %cst_138 = arith.constant dense<0.000000e+00> : vector<16x8xf32>
    %138 = vector.multi_reduction <add>, %137, %cst_138 [2] : vector<16x8x8xf32> to vector<16x8xf32>
    %139 = vector.shape_cast %138 : vector<16x8xf32> to vector<16x8x1xf32>
    %140 = vector.broadcast %139 : vector<16x8x1xf32> to vector<16x8x8xf32>
    %141 = arith.divf %137, %140 : vector<16x8x8xf32>
    %142 = arith.truncf %141 : vector<16x8x8xf32> to vector<16x8x8xbf16>
    "tpu.trace_start"() <{level = 10 : i32, message = "bqk,bkd->bqd"}> : () -> ()
    %cst_139 = arith.constant dense<0.000000e+00> : vector<16x8x16xf32>
    %143 = tpu.matmul %142, %131, %cst_139 {dimension_numbers = #tpu.dot_dimension_numbers<[2], [1], [1], [2], [0, 0, 0, 1, 1, 2], [0], [0]>} : vector<16x8x8xbf16>, vector<16x8x16xbf16>, vector<16x8x16xf32> -> vector<16x8x16xf32>
    "tpu.trace_stop"() : () -> ()
    %144 = vector.extract_strided_slice %143 {offsets = [0, 0, 0], sizes = [4, 8, 16], strides = [1, 1, 1]} : vector<16x8x16xf32> to vector<4x8x16xf32>
    %145 = vector.extract_strided_slice %143 {offsets = [4, 0, 0], sizes = [4, 8, 16], strides = [1, 1, 1]} : vector<16x8x16xf32> to vector<4x8x16xf32>
    %146 = vector.extract_strided_slice %143 {offsets = [8, 0, 0], sizes = [4, 8, 16], strides = [1, 1, 1]} : vector<16x8x16xf32> to vector<4x8x16xf32>
    %147 = vector.extract_strided_slice %143 {offsets = [12, 0, 0], sizes = [4, 8, 16], strides = [1, 1, 1]} : vector<16x8x16xf32> to vector<4x8x16xf32>
    %148 = tpu.concatenate %144, %145, %146, %147 in 2 : vector<4x8x16xf32>, vector<4x8x16xf32>, vector<4x8x16xf32>, vector<4x8x16xf32> -> vector<4x8x64xf32>
    %149 = vector.shape_cast %148 : vector<4x8x64xf32> to vector<32x64xf32>
    %150 = arith.truncf %149 : vector<32x64xf32> to vector<32x64xbf16>
    %cst_140 = arith.constant dense<0.000000e+00> : vector<32x64xf32>
    %151 = tpu.matmul %150, %100, %cst_140 {dimension_numbers = #tpu.dot_dimension_numbers<[1], [0], [0], [1], [0, 0, 1, 1], [], []>} : vector<32x64xbf16>, vector<64x64xbf16>, vector<32x64xf32> -> vector<32x64xf32>
    %152 = vector.broadcast %101 : vector<1x64xf32> to vector<32x64xf32>
    %153 = arith.addf %151, %152 : vector<32x64xf32>
    %154 = arith.addf %153, %96 : vector<32x64xf32>
    %c1_141 = arith.constant 1 : index
    %c0_142 = arith.constant 0 : index
    %155 = vector.load %arg7[%c1_141, %c0_142] : memref<7x64xf32, #tpu.memory_space<vmem>>, vector<1x64xf32>
    %c2_143 = arith.constant 2 : index
    %c0_144 = arith.constant 0 : index
    %156 = vector.load %arg7[%c2_143, %c0_144] : memref<7x64xf32, #tpu.memory_space<vmem>>, vector<1x64xf32>
    %cst_145 = arith.constant dense<0.000000e+00> : vector<32xf32>
    %157 = vector.multi_reduction <add>, %154, %cst_145 [1] : vector<32x64xf32> to vector<32xf32>
    %158 = vector.shape_cast %157 : vector<32xf32> to vector<32x1xf32>
    %cst_146 = arith.constant 6.400000e+01 : f32
    %159 = vector.broadcast %cst_146 : f32 to vector<32x1xf32>
    %160 = arith.divf %158, %159 : vector<32x1xf32>
    %161 = vector.broadcast %160 : vector<32x1xf32> to vector<32x64xf32>
    %162 = arith.subf %154, %161 : vector<32x64xf32>
    %163 = arith.mulf %162, %162 : vector<32x64xf32>
    %cst_147 = arith.constant dense<0.000000e+00> : vector<32xf32>
    %164 = vector.multi_reduction <add>, %163, %cst_147 [1] : vector<32x64xf32> to vector<32xf32>
    %165 = vector.shape_cast %164 : vector<32xf32> to vector<32x1xf32>
    %cst_148 = arith.constant 6.400000e+01 : f32
    %166 = vector.broadcast %cst_148 : f32 to vector<32x1xf32>
    %167 = arith.divf %165, %166 : vector<32x1xf32>
    %cst_149 = arith.constant 9.99999974E-6 : f32
    %168 = vector.broadcast %cst_149 : f32 to vector<32x1xf32>
    %169 = arith.addf %167, %168 : vector<32x1xf32>
    %170 = math.rsqrt %169 : vector<32x1xf32>
    %171 = vector.broadcast %170 : vector<32x1xf32> to vector<32x64xf32>
    %172 = arith.mulf %162, %171 : vector<32x64xf32>
    %173 = vector.broadcast %155 : vector<1x64xf32> to vector<32x64xf32>
    %174 = arith.mulf %172, %173 : vector<32x64xf32>
    %175 = vector.broadcast %156 : vector<1x64xf32> to vector<32x64xf32>
    %176 = arith.addf %174, %175 : vector<32x64xf32>
    %177 = arith.truncf %176 : vector<32x64xf32> to vector<32x64xbf16>
    %c1_150 = arith.constant 1 : index
    %c0_151 = arith.constant 0 : index
    %c0_152 = arith.constant 0 : index
    %178 = vector.load %arg5[%c1_150, %c0_151, %c0_152] : memref<3x64x64xbf16, #tpu.memory_space<vmem>>, vector<1x64x64xbf16>
    %179 = vector.shape_cast %178 : vector<1x64x64xbf16> to vector<64x64xbf16>
    %cst_153 = arith.constant dense<0.000000e+00> : vector<32x64xf32>
    %180 = tpu.matmul %177, %179, %cst_153 {dimension_numbers = #tpu.dot_dimension_numbers<[1], [0], [0], [1], [0, 0, 1, 1], [], []>} : vector<32x64xbf16>, vector<64x64xbf16>, vector<32x64xf32> -> vector<32x64xf32>
    %c3_154 = arith.constant 3 : index
    %c0_155 = arith.constant 0 : index
    %181 = vector.load %arg7[%c3_154, %c0_155] : memref<7x64xf32, #tpu.memory_space<vmem>>, vector<1x64xf32>
    %182 = vector.broadcast %181 : vector<1x64xf32> to vector<32x64xf32>
    %183 = arith.addf %180, %182 : vector<32x64xf32>
    %cst_156 = arith.constant 0.000000e+00 : f32
    %184 = vector.broadcast %cst_156 : f32 to vector<32x64xf32>
    %185 = arith.maximumf %183, %184 : vector<32x64xf32>
    %186 = arith.truncf %185 : vector<32x64xf32> to vector<32x64xbf16>
    %c2_157 = arith.constant 2 : index
    %c0_158 = arith.constant 0 : index
    %c0_159 = arith.constant 0 : index
    %187 = vector.load %arg5[%c2_157, %c0_158, %c0_159] : memref<3x64x64xbf16, #tpu.memory_space<vmem>>, vector<1x64x64xbf16>
    %188 = vector.shape_cast %187 : vector<1x64x64xbf16> to vector<64x64xbf16>
    %cst_160 = arith.constant dense<0.000000e+00> : vector<32x64xf32>
    %189 = tpu.matmul %186, %188, %cst_160 {dimension_numbers = #tpu.dot_dimension_numbers<[1], [0], [0], [1], [0, 0, 1, 1], [], []>} : vector<32x64xbf16>, vector<64x64xbf16>, vector<32x64xf32> -> vector<32x64xf32>
    %c4_161 = arith.constant 4 : index
    %c0_162 = arith.constant 0 : index
    %190 = vector.load %arg7[%c4_161, %c0_162] : memref<7x64xf32, #tpu.memory_space<vmem>>, vector<1x64xf32>
    %191 = vector.broadcast %190 : vector<1x64xf32> to vector<32x64xf32>
    %192 = arith.addf %189, %191 : vector<32x64xf32>
    %193 = arith.addf %192, %176 : vector<32x64xf32>
    %c5_163 = arith.constant 5 : index
    %c0_164 = arith.constant 0 : index
    %194 = vector.load %arg7[%c5_163, %c0_164] : memref<7x64xf32, #tpu.memory_space<vmem>>, vector<1x64xf32>
    %c6_165 = arith.constant 6 : index
    %c0_166 = arith.constant 0 : index
    %195 = vector.load %arg7[%c6_165, %c0_166] : memref<7x64xf32, #tpu.memory_space<vmem>>, vector<1x64xf32>
    %cst_167 = arith.constant dense<0.000000e+00> : vector<32xf32>
    %196 = vector.multi_reduction <add>, %193, %cst_167 [1] : vector<32x64xf32> to vector<32xf32>
    %197 = vector.shape_cast %196 : vector<32xf32> to vector<32x1xf32>
    %cst_168 = arith.constant 6.400000e+01 : f32
    %198 = vector.broadcast %cst_168 : f32 to vector<32x1xf32>
    %199 = arith.divf %197, %198 : vector<32x1xf32>
    %200 = vector.broadcast %199 : vector<32x1xf32> to vector<32x64xf32>
    %201 = arith.subf %193, %200 : vector<32x64xf32>
    %202 = arith.mulf %201, %201 : vector<32x64xf32>
    %cst_169 = arith.constant dense<0.000000e+00> : vector<32xf32>
    %203 = vector.multi_reduction <add>, %202, %cst_169 [1] : vector<32x64xf32> to vector<32xf32>
    %204 = vector.shape_cast %203 : vector<32xf32> to vector<32x1xf32>
    %cst_170 = arith.constant 6.400000e+01 : f32
    %205 = vector.broadcast %cst_170 : f32 to vector<32x1xf32>
    %206 = arith.divf %204, %205 : vector<32x1xf32>
    %cst_171 = arith.constant 9.99999974E-6 : f32
    %207 = vector.broadcast %cst_171 : f32 to vector<32x1xf32>
    %208 = arith.addf %206, %207 : vector<32x1xf32>
    %209 = math.rsqrt %208 : vector<32x1xf32>
    %210 = vector.broadcast %209 : vector<32x1xf32> to vector<32x64xf32>
    %211 = arith.mulf %201, %210 : vector<32x64xf32>
    %212 = vector.broadcast %194 : vector<1x64xf32> to vector<32x64xf32>
    %213 = arith.mulf %211, %212 : vector<32x64xf32>
    %214 = vector.broadcast %195 : vector<1x64xf32> to vector<32x64xf32>
    %215 = arith.addf %213, %214 : vector<32x64xf32>
    %216 = vector.shape_cast %215 : vector<32x64xf32> to vector<2x16x64xf32>
    %217 = vector.extract_strided_slice %216 {offsets = [0, 0, 0], sizes = [2, 1, 64], strides = [1, 1, 1]} : vector<2x16x64xf32> to vector<2x1x64xf32>
    %218 = vector.shape_cast %217 : vector<2x1x64xf32> to vector<2x64xf32>
    %219 = vector.extract_strided_slice %216 {offsets = [0, 1, 0], sizes = [2, 1, 64], strides = [1, 1, 1]} : vector<2x16x64xf32> to vector<2x1x64xf32>
    %220 = vector.shape_cast %219 : vector<2x1x64xf32> to vector<2x64xf32>
    %221 = vector.extract_strided_slice %216 {offsets = [0, 2, 0], sizes = [2, 1, 64], strides = [1, 1, 1]} : vector<2x16x64xf32> to vector<2x1x64xf32>
    %222 = vector.shape_cast %221 : vector<2x1x64xf32> to vector<2x64xf32>
    %223 = vector.extract_strided_slice %216 {offsets = [0, 3, 0], sizes = [2, 1, 64], strides = [1, 1, 1]} : vector<2x16x64xf32> to vector<2x1x64xf32>
    %224 = vector.shape_cast %223 : vector<2x1x64xf32> to vector<2x64xf32>
    %225 = vector.extract_strided_slice %216 {offsets = [0, 4, 0], sizes = [2, 1, 64], strides = [1, 1, 1]} : vector<2x16x64xf32> to vector<2x1x64xf32>
    %226 = vector.shape_cast %225 : vector<2x1x64xf32> to vector<2x64xf32>
    %227 = vector.extract_strided_slice %216 {offsets = [0, 5, 0], sizes = [2, 1, 64], strides = [1, 1, 1]} : vector<2x16x64xf32> to vector<2x1x64xf32>
    %228 = vector.shape_cast %227 : vector<2x1x64xf32> to vector<2x64xf32>
    %229 = vector.extract_strided_slice %216 {offsets = [0, 6, 0], sizes = [2, 1, 64], strides = [1, 1, 1]} : vector<2x16x64xf32> to vector<2x1x64xf32>
    %230 = vector.shape_cast %229 : vector<2x1x64xf32> to vector<2x64xf32>
    %231 = vector.extract_strided_slice %216 {offsets = [0, 7, 0], sizes = [2, 1, 64], strides = [1, 1, 1]} : vector<2x16x64xf32> to vector<2x1x64xf32>
    %232 = vector.shape_cast %231 : vector<2x1x64xf32> to vector<2x64xf32>
    %233 = vector.extract_strided_slice %216 {offsets = [0, 8, 0], sizes = [2, 1, 64], strides = [1, 1, 1]} : vector<2x16x64xf32> to vector<2x1x64xf32>
    %234 = vector.shape_cast %233 : vector<2x1x64xf32> to vector<2x64xf32>
    %235 = vector.extract_strided_slice %216 {offsets = [0, 9, 0], sizes = [2, 1, 64], strides = [1, 1, 1]} : vector<2x16x64xf32> to vector<2x1x64xf32>
    %236 = vector.shape_cast %235 : vector<2x1x64xf32> to vector<2x64xf32>
    %237 = vector.extract_strided_slice %216 {offsets = [0, 10, 0], sizes = [2, 1, 64], strides = [1, 1, 1]} : vector<2x16x64xf32> to vector<2x1x64xf32>
    %238 = vector.shape_cast %237 : vector<2x1x64xf32> to vector<2x64xf32>
    %239 = vector.extract_strided_slice %216 {offsets = [0, 11, 0], sizes = [2, 1, 64], strides = [1, 1, 1]} : vector<2x16x64xf32> to vector<2x1x64xf32>
    %240 = vector.shape_cast %239 : vector<2x1x64xf32> to vector<2x64xf32>
    %241 = vector.extract_strided_slice %216 {offsets = [0, 12, 0], sizes = [2, 1, 64], strides = [1, 1, 1]} : vector<2x16x64xf32> to vector<2x1x64xf32>
    %242 = vector.shape_cast %241 : vector<2x1x64xf32> to vector<2x64xf32>
    %243 = vector.extract_strided_slice %216 {offsets = [0, 13, 0], sizes = [2, 1, 64], strides = [1, 1, 1]} : vector<2x16x64xf32> to vector<2x1x64xf32>
    %244 = vector.shape_cast %243 : vector<2x1x64xf32> to vector<2x64xf32>
    %245 = vector.extract_strided_slice %216 {offsets = [0, 14, 0], sizes = [2, 1, 64], strides = [1, 1, 1]} : vector<2x16x64xf32> to vector<2x1x64xf32>
    %246 = vector.shape_cast %245 : vector<2x1x64xf32> to vector<2x64xf32>
    %247 = vector.extract_strided_slice %216 {offsets = [0, 15, 0], sizes = [2, 1, 64], strides = [1, 1, 1]} : vector<2x16x64xf32> to vector<2x1x64xf32>
    %248 = vector.shape_cast %247 : vector<2x1x64xf32> to vector<2x64xf32>
    %249 = tpu.concatenate %218, %220, %222, %224, %226, %228, %230, %232, %234, %236, %238, %240, %242, %244, %246, %248 in 1 : vector<2x64xf32>, vector<2x64xf32>, vector<2x64xf32>, vector<2x64xf32>, vector<2x64xf32>, vector<2x64xf32>, vector<2x64xf32>, vector<2x64xf32>, vector<2x64xf32>, vector<2x64xf32>, vector<2x64xf32>, vector<2x64xf32>, vector<2x64xf32>, vector<2x64xf32>, vector<2x64xf32>, vector<2x64xf32> -> vector<2x1024xf32>
    %c0_172 = arith.constant 0 : index
    %c0_173 = arith.constant 0 : index
    %250 = vector.load %arg9[%c0_172, %c0_173] : memref<2x1024xf32, #tpu.memory_space<vmem>>, vector<2x1024xf32>
    tpu.vector_store %arg9[%c0_172, %c0_173], %249 {strides = array<i32>} : memref<2x1024xf32, #tpu.memory_space<vmem>>, vector<2x1024xf32>,
    return
  }
  func.func @transform_0(%arg0: i32) -> (i32, i32, i32, i32) {
    %c0_i32 = arith.constant 0 : i32
    %c0_i32_0 = arith.constant 0 : i32
    %c0_i32_1 = arith.constant 0 : i32
    %c0_i32_2 = arith.constant 0 : i32
    return %arg0, %c0_i32, %c0_i32_0, %c0_i32_1 : i32, i32, i32, i32
  }
  func.func @transform_1(%arg0: i32) -> (i32, i32) {
    %c0_i32 = arith.constant 0 : i32
    %c0_i32_0 = arith.constant 0 : i32
    %c0_i32_1 = arith.constant 0 : i32
    return %c0_i32, %c0_i32_0 : i32, i32
  }
  func.func @transform_2(%arg0: i32) -> (i32, i32, i32) {
    %c0_i32 = arith.constant 0 : i32
    %c0_i32_0 = arith.constant 0 : i32
    %c0_i32_1 = arith.constant 0 : i32
    %c0_i32_2 = arith.constant 0 : i32
    return %c0_i32, %c0_i32_0, %c0_i32_1 : i32, i32, i32
  }
  func.func @transform_3(%arg0: i32) -> (i32, i32) {
    %c0_i32 = arith.constant 0 : i32
    %c0_i32_0 = arith.constant 0 : i32
    %c0_i32_1 = arith.constant 0 : i32
    return %c0_i32, %c0_i32_0 : i32, i32
  }
  func.func @transform_4(%arg0: i32) -> (i32, i32, i32) {
    %c0_i32 = arith.constant 0 : i32
    %c0_i32_0 = arith.constant 0 : i32
    %c0_i32_1 = arith.constant 0 : i32
    %c0_i32_2 = arith.constant 0 : i32
    return %c0_i32, %c0_i32_0, %c0_i32_1 : i32, i32, i32
  }
  func.func @transform_5(%arg0: i32) -> (i32, i32) {
    %c0_i32 = arith.constant 0 : i32
    %c0_i32_0 = arith.constant 0 : i32
    %c0_i32_1 = arith.constant 0 : i32
    return %c0_i32, %c0_i32_0 : i32, i32
  }
  func.func @transform_6(%arg0: i32) -> (i32, i32) {
    %c0_i32 = arith.constant 0 : i32
    %c0_i32_0 = arith.constant 0 : i32
    %c0_i32_1 = arith.constant 0 : i32
    return %c0_i32, %c0_i32_0 : i32, i32
  }
  func.func @transform_7(%arg0: i32) -> (i32, i32) {
    %c0_i32 = arith.constant 0 : i32
    %c0_i32_0 = arith.constant 0 : i32
    %c0_i32_1 = arith.constant 0 : i32
    return %c0_i32, %c0_i32_0 : i32, i32
  }
  func.func @transform_8(%arg0: i32) -> (i32, i32) {
    %c0_i32 = arith.constant 0 : i32
    %c0_i32_0 = arith.constant 0 : i32
    return %arg0, %c0_i32 : i32, i32
  }
}

module attributes {stable_mosaic.version = 11 : i64} {
  func.func @_block_kernel(%arg0: i32, %arg1: memref<2x2x8x64xf32, #tpu.memory_space<vmem>>, %arg2: memref<1344x64xbf16, #tpu.memory_space<vmem>>, %arg3: memref<2x64x64xbf16, #tpu.memory_space<vmem>>, %arg4: memref<64x192xbf16, #tpu.memory_space<vmem>>, %arg5: memref<3x64x64xbf16, #tpu.memory_space<vmem>>, %arg6: memref<7x64xf32, #tpu.memory_space<vmem>>, %arg7: memref<7x64xf32, #tpu.memory_space<vmem>>, %arg8: memref<1x192xf32, #tpu.memory_space<vmem>>, %arg9: memref<2x1024xf32, #tpu.memory_space<vmem>>, %arg10: memref<2x4x14x64xbf16, #tpu.memory_space<vmem>>) attributes {dimension_semantics = [#tpu.dimension_semantics<parallel>], iteration_bounds = array<i64: 1>, scalar_prefetch = 0 : i64, scratch_operands = 1 : i64, tpu.core_type = #tpu.core_type<tc>, window_params = [{transform_indices = @transform_0, window_bounds = array<i64: 2, 2, 8, 64>}, {pipeline_mode = #tpu.pipeline_mode<synchronous>, transform_indices = @transform_1, window_bounds = array<i64: 1344, 64>}, {pipeline_mode = #tpu.pipeline_mode<synchronous>, transform_indices = @transform_2, window_bounds = array<i64: 2, 64, 64>}, {pipeline_mode = #tpu.pipeline_mode<synchronous>, transform_indices = @transform_3, window_bounds = array<i64: 64, 192>}, {pipeline_mode = #tpu.pipeline_mode<synchronous>, transform_indices = @transform_4, window_bounds = array<i64: 3, 64, 64>}, {pipeline_mode = #tpu.pipeline_mode<synchronous>, transform_indices = @transform_5, window_bounds = array<i64: 7, 64>}, {pipeline_mode = #tpu.pipeline_mode<synchronous>, transform_indices = @transform_6, window_bounds = array<i64: 7, 64>}, {pipeline_mode = #tpu.pipeline_mode<synchronous>, transform_indices = @transform_7, window_bounds = array<i64: 1, 192>}, {transform_indices = @transform_8, window_bounds = array<i64: 2, 1024>}]} {
    %c0 = arith.constant 0 : index
    %c0_0 = arith.constant 0 : index
    %c0_1 = arith.constant 0 : index
    %c0_2 = arith.constant 0 : index
    %0 = vector.load %arg1[%c0, %c0_0, %c0_1, %c0_2] : memref<2x2x8x64xf32, #tpu.memory_space<vmem>>, vector<2x2x8x64xf32>
    %1 = vector.shape_cast %0 : vector<2x2x8x64xf32> to vector<32x64xf32>
    %cst = arith.constant 0.000000e+00 : bf16
    %2 = vector.broadcast %cst : bf16 to vector<2x4x14x64xbf16>
    %c0_3 = arith.constant 0 : index
    %c0_4 = arith.constant 0 : index
    %c0_5 = arith.constant 0 : index
    %c0_6 = arith.constant 0 : index
    %3 = vector.load %arg10[%c0_3, %c0_4, %c0_5, %c0_6] : memref<2x4x14x64xbf16, #tpu.memory_space<vmem>>, vector<2x4x14x64xbf16>
    tpu.vector_store %arg10[%c0_3, %c0_4, %c0_5, %c0_6], %2 {strides = array<i32>} : memref<2x4x14x64xbf16, #tpu.memory_space<vmem>>, vector<2x4x14x64xbf16>,
    %4 = arith.truncf %0 : vector<2x2x8x64xf32> to vector<2x2x8x64xbf16>
    %c0_7 = arith.constant 0 : index
    %c1 = arith.constant 1 : index
    %c3 = arith.constant 3 : index
    %c0_8 = arith.constant 0 : index
    %5 = vector.load %arg10[%c0_7, %c1, %c3, %c0_8] : memref<2x4x14x64xbf16, #tpu.memory_space<vmem>>, vector<2x2x8x64xbf16>
    tpu.vector_store %arg10[%c0_7, %c1, %c3, %c0_8], %4 {strides = array<i32>} : memref<2x4x14x64xbf16, #tpu.memory_space<vmem>>, vector<2x2x8x64xbf16>,
    %c0_9 = arith.constant 0 : index
    %c0_10 = arith.constant 0 : index
    %c0_11 = arith.constant 0 : index
    %c0_12 = arith.constant 0 : index
    %6 = vector.load %arg10[%c0_9, %c0_10, %c0_11, %c0_12] : memref<2x4x14x64xbf16, #tpu.memory_space<vmem>>, vector<2x2x8x64xbf16>
    %c0_13 = arith.constant 0 : index
    %c0_14 = arith.constant 0 : index
    %c1_15 = arith.constant 1 : index
    %c0_16 = arith.constant 0 : index
    %7 = vector.load %arg10[%c0_13, %c0_14, %c1_15, %c0_16] : memref<2x4x14x64xbf16, #tpu.memory_space<vmem>>, vector<2x2x8x64xbf16>
    %c0_17 = arith.constant 0 : index
    %c0_18 = arith.constant 0 : index
    %c2 = arith.constant 2 : index
    %c0_19 = arith.constant 0 : index
    %8 = vector.load %arg10[%c0_17, %c0_18, %c2, %c0_19] : memref<2x4x14x64xbf16, #tpu.memory_space<vmem>>, vector<2x2x8x64xbf16>
    %c0_20 = arith.constant 0 : index
    %c0_21 = arith.constant 0 : index
    %c3_22 = arith.constant 3 : index
    %c0_23 = arith.constant 0 : index
    %9 = vector.load %arg10[%c0_20, %c0_21, %c3_22, %c0_23] : memref<2x4x14x64xbf16, #tpu.memory_space<vmem>>, vector<2x2x8x64xbf16>
    %c0_24 = arith.constant 0 : index
    %c0_25 = arith.constant 0 : index
    %c4 = arith.constant 4 : index
    %c0_26 = arith.constant 0 : index
    %10 = vector.load %arg10[%c0_24, %c0_25, %c4, %c0_26] : memref<2x4x14x64xbf16, #tpu.memory_space<vmem>>, vector<2x2x8x64xbf16>
    %c0_27 = arith.constant 0 : index
    %c0_28 = arith.constant 0 : index
    %c5 = arith.constant 5 : index
    %c0_29 = arith.constant 0 : index
    %11 = vector.load %arg10[%c0_27, %c0_28, %c5, %c0_29] : memref<2x4x14x64xbf16, #tpu.memory_space<vmem>>, vector<2x2x8x64xbf16>
    %c0_30 = arith.constant 0 : index
    %c0_31 = arith.constant 0 : index
    %c6 = arith.constant 6 : index
    %c0_32 = arith.constant 0 : index
    %12 = vector.load %arg10[%c0_30, %c0_31, %c6, %c0_32] : memref<2x4x14x64xbf16, #tpu.memory_space<vmem>>, vector<2x2x8x64xbf16>
    %c0_33 = arith.constant 0 : index
    %c1_34 = arith.constant 1 : index
    %c0_35 = arith.constant 0 : index
    %c0_36 = arith.constant 0 : index
    %13 = vector.load %arg10[%c0_33, %c1_34, %c0_35, %c0_36] : memref<2x4x14x64xbf16, #tpu.memory_space<vmem>>, vector<2x2x8x64xbf16>
    %c0_37 = arith.constant 0 : index
    %c1_38 = arith.constant 1 : index
    %c1_39 = arith.constant 1 : index
    %c0_40 = arith.constant 0 : index
    %14 = vector.load %arg10[%c0_37, %c1_38, %c1_39, %c0_40] : memref<2x4x14x64xbf16, #tpu.memory_space<vmem>>, vector<2x2x8x64xbf16>
    %c0_41 = arith.constant 0 : index
    %c1_42 = arith.constant 1 : index
    %c2_43 = arith.constant 2 : index
    %c0_44 = arith.constant 0 : index
    %15 = vector.load %arg10[%c0_41, %c1_42, %c2_43, %c0_44] : memref<2x4x14x64xbf16, #tpu.memory_space<vmem>>, vector<2x2x8x64xbf16>
    %c0_45 = arith.constant 0 : index
    %c1_46 = arith.constant 1 : index
    %c3_47 = arith.constant 3 : index
    %c0_48 = arith.constant 0 : index
    %16 = vector.load %arg10[%c0_45, %c1_46, %c3_47, %c0_48] : memref<2x4x14x64xbf16, #tpu.memory_space<vmem>>, vector<2x2x8x64xbf16>
    %c0_49 = arith.constant 0 : index
    %c1_50 = arith.constant 1 : index
    %c4_51 = arith.constant 4 : index
    %c0_52 = arith.constant 0 : index
    %17 = vector.load %arg10[%c0_49, %c1_50, %c4_51, %c0_52] : memref<2x4x14x64xbf16, #tpu.memory_space<vmem>>, vector<2x2x8x64xbf16>
    %c0_53 = arith.constant 0 : index
    %c1_54 = arith.constant 1 : index
    %c5_55 = arith.constant 5 : index
    %c0_56 = arith.constant 0 : index
    %18 = vector.load %arg10[%c0_53, %c1_54, %c5_55, %c0_56] : memref<2x4x14x64xbf16, #tpu.memory_space<vmem>>, vector<2x2x8x64xbf16>
    %c0_57 = arith.constant 0 : index
    %c1_58 = arith.constant 1 : index
    %c6_59 = arith.constant 6 : index
    %c0_60 = arith.constant 0 : index
    %19 = vector.load %arg10[%c0_57, %c1_58, %c6_59, %c0_60] : memref<2x4x14x64xbf16, #tpu.memory_space<vmem>>, vector<2x2x8x64xbf16>
    %c0_61 = arith.constant 0 : index
    %c2_62 = arith.constant 2 : index
    %c0_63 = arith.constant 0 : index
    %c0_64 = arith.constant 0 : index
    %20 = vector.load %arg10[%c0_61, %c2_62, %c0_63, %c0_64] : memref<2x4x14x64xbf16, #tpu.memory_space<vmem>>, vector<2x2x8x64xbf16>
    %c0_65 = arith.constant 0 : index
    %c2_66 = arith.constant 2 : index
    %c1_67 = arith.constant 1 : index
    %c0_68 = arith.constant 0 : index
    %21 = vector.load %arg10[%c0_65, %c2_66, %c1_67, %c0_68] : memref<2x4x14x64xbf16, #tpu.memory_space<vmem>>, vector<2x2x8x64xbf16>
    %c0_69 = arith.constant 0 : index
    %c2_70 = arith.constant 2 : index
    %c2_71 = arith.constant 2 : index
    %c0_72 = arith.constant 0 : index
    %22 = vector.load %arg10[%c0_69, %c2_70, %c2_71, %c0_72] : memref<2x4x14x64xbf16, #tpu.memory_space<vmem>>, vector<2x2x8x64xbf16>
    %c0_73 = arith.constant 0 : index
    %c2_74 = arith.constant 2 : index
    %c3_75 = arith.constant 3 : index
    %c0_76 = arith.constant 0 : index
    %23 = vector.load %arg10[%c0_73, %c2_74, %c3_75, %c0_76] : memref<2x4x14x64xbf16, #tpu.memory_space<vmem>>, vector<2x2x8x64xbf16>
    %c0_77 = arith.constant 0 : index
    %c2_78 = arith.constant 2 : index
    %c4_79 = arith.constant 4 : index
    %c0_80 = arith.constant 0 : index
    %24 = vector.load %arg10[%c0_77, %c2_78, %c4_79, %c0_80] : memref<2x4x14x64xbf16, #tpu.memory_space<vmem>>, vector<2x2x8x64xbf16>
    %c0_81 = arith.constant 0 : index
    %c2_82 = arith.constant 2 : index
    %c5_83 = arith.constant 5 : index
    %c0_84 = arith.constant 0 : index
    %25 = vector.load %arg10[%c0_81, %c2_82, %c5_83, %c0_84] : memref<2x4x14x64xbf16, #tpu.memory_space<vmem>>, vector<2x2x8x64xbf16>
    %c0_85 = arith.constant 0 : index
    %c2_86 = arith.constant 2 : index
    %c6_87 = arith.constant 6 : index
    %c0_88 = arith.constant 0 : index
    %26 = vector.load %arg10[%c0_85, %c2_86, %c6_87, %c0_88] : memref<2x4x14x64xbf16, #tpu.memory_space<vmem>>, vector<2x2x8x64xbf16>
    %27 = tpu.concatenate %6, %7, %8, %9, %10, %11, %12, %13, %14, %15, %16, %17, %18, %19, %20, %21 in 3 : vector<2x2x8x64xbf16>, vector<2x2x8x64xbf16>, vector<2x2x8x64xbf16>, vector<2x2x8x64xbf16>, vector<2x2x8x64xbf16>, vector<2x2x8x64xbf16>, vector<2x2x8x64xbf16>, vector<2x2x8x64xbf16>, vector<2x2x8x64xbf16>, vector<2x2x8x64xbf16>, vector<2x2x8x64xbf16>, vector<2x2x8x64xbf16>, vector<2x2x8x64xbf16>, vector<2x2x8x64xbf16>, vector<2x2x8x64xbf16>, vector<2x2x8x64xbf16> -> vector<2x2x8x1024xbf16>
    %28 = tpu.concatenate %22, %23, %24, %25, %26 in 3 : vector<2x2x8x64xbf16>, vector<2x2x8x64xbf16>, vector<2x2x8x64xbf16>, vector<2x2x8x64xbf16>, vector<2x2x8x64xbf16> -> vector<2x2x8x320xbf16>
    %29 = tpu.concatenate %27, %28 in 3 : vector<2x2x8x1024xbf16>, vector<2x2x8x320xbf16> -> vector<2x2x8x1344xbf16>
    %30 = vector.shape_cast %29 : vector<2x2x8x1344xbf16> to vector<32x1344xbf16>
    %c0_89 = arith.constant 0 : index
    %c0_90 = arith.constant 0 : index
    %31 = vector.load %arg2[%c0_89, %c0_90] : memref<1344x64xbf16, #tpu.memory_space<vmem>>, vector<1344x64xbf16>
    %cst_91 = arith.constant dense<0.000000e+00> : vector<32x64xf32>
    %32 = tpu.matmul %30, %31, %cst_91 {dimension_numbers = #tpu.dot_dimension_numbers<[1], [0], [0], [1], [0, 0, 1, 1], [], []>} : vector<32x1344xbf16>, vector<1344x64xbf16>, vector<32x64xf32> -> vector<32x64xf32>
    %c0_92 = arith.constant 0 : index
    %c0_93 = arith.constant 0 : index
    %33 = vector.load %arg6[%c0_92, %c0_93] : memref<7x64xf32, #tpu.memory_space<vmem>>, vector<1x64xf32>
    %34 = vector.broadcast %33 : vector<1x64xf32> to vector<32x64xf32>
    %35 = arith.addf %32, %34 : vector<32x64xf32>
    %c1_94 = arith.constant 1 : index
    %c0_95 = arith.constant 0 : index
    %36 = vector.load %arg6[%c1_94, %c0_95] : memref<7x64xf32, #tpu.memory_space<vmem>>, vector<1x64xf32>
    %c2_96 = arith.constant 2 : index
    %c0_97 = arith.constant 0 : index
    %37 = vector.load %arg6[%c2_96, %c0_97] : memref<7x64xf32, #tpu.memory_space<vmem>>, vector<1x64xf32>
    %cst_98 = arith.constant dense<0.000000e+00> : vector<32xf32>
    %38 = vector.multi_reduction <add>, %35, %cst_98 [1] : vector<32x64xf32> to vector<32xf32>
    %39 = vector.shape_cast %38 : vector<32xf32> to vector<32x1xf32>
    %cst_99 = arith.constant 6.400000e+01 : f32
    %40 = vector.broadcast %cst_99 : f32 to vector<32x1xf32>
    %41 = arith.divf %39, %40 : vector<32x1xf32>
    %42 = vector.broadcast %41 : vector<32x1xf32> to vector<32x64xf32>
    %43 = arith.subf %35, %42 : vector<32x64xf32>
    %44 = arith.mulf %43, %43 : vector<32x64xf32>
    %cst_100 = arith.constant dense<0.000000e+00> : vector<32xf32>
    %45 = vector.multi_reduction <add>, %44, %cst_100 [1] : vector<32x64xf32> to vector<32xf32>
    %46 = vector.shape_cast %45 : vector<32xf32> to vector<32x1xf32>
    %cst_101 = arith.constant 6.400000e+01 : f32
    %47 = vector.broadcast %cst_101 : f32 to vector<32x1xf32>
    %48 = arith.divf %46, %47 : vector<32x1xf32>
    %cst_102 = arith.constant 9.99999974E-6 : f32
    %49 = vector.broadcast %cst_102 : f32 to vector<32x1xf32>
    %50 = arith.addf %48, %49 : vector<32x1xf32>
    %51 = math.rsqrt %50 : vector<32x1xf32>
    %52 = vector.broadcast %51 : vector<32x1xf32> to vector<32x64xf32>
    %53 = arith.mulf %43, %52 : vector<32x64xf32>
    %54 = vector.broadcast %36 : vector<1x64xf32> to vector<32x64xf32>
    %55 = arith.mulf %53, %54 : vector<32x64xf32>
    %56 = vector.broadcast %37 : vector<1x64xf32> to vector<32x64xf32>
    %57 = arith.addf %55, %56 : vector<32x64xf32>
    %58 = arith.truncf %57 : vector<32x64xf32> to vector<32x64xbf16>
    %c0_103 = arith.constant 0 : index
    %c0_104 = arith.constant 0 : index
    %c0_105 = arith.constant 0 : index
    %59 = vector.load %arg3[%c0_103, %c0_104, %c0_105] : memref<2x64x64xbf16, #tpu.memory_space<vmem>>, vector<1x64x64xbf16>
    %60 = vector.shape_cast %59 : vector<1x64x64xbf16> to vector<64x64xbf16>
    %cst_106 = arith.constant dense<0.000000e+00> : vector<32x64xf32>
    %61 = tpu.matmul %58, %60, %cst_106 {dimension_numbers = #tpu.dot_dimension_numbers<[1], [0], [0], [1], [0, 0, 1, 1], [], []>} : vector<32x64xbf16>, vector<64x64xbf16>, vector<32x64xf32> -> vector<32x64xf32>
    %c3_107 = arith.constant 3 : index
    %c0_108 = arith.constant 0 : index
    %62 = vector.load %arg6[%c3_107, %c0_108] : memref<7x64xf32, #tpu.memory_space<vmem>>, vector<1x64xf32>
    %63 = vector.broadcast %62 : vector<1x64xf32> to vector<32x64xf32>
    %64 = arith.addf %61, %63 : vector<32x64xf32>
    %cst_109 = arith.constant 0.000000e+00 : f32
    %65 = vector.broadcast %cst_109 : f32 to vector<32x64xf32>
    %66 = arith.maximumf %64, %65 : vector<32x64xf32>
    %67 = arith.truncf %66 : vector<32x64xf32> to vector<32x64xbf16>
    %c1_110 = arith.constant 1 : index
    %c0_111 = arith.constant 0 : index
    %c0_112 = arith.constant 0 : index
    %68 = vector.load %arg3[%c1_110, %c0_111, %c0_112] : memref<2x64x64xbf16, #tpu.memory_space<vmem>>, vector<1x64x64xbf16>
    %69 = vector.shape_cast %68 : vector<1x64x64xbf16> to vector<64x64xbf16>
    %cst_113 = arith.constant dense<0.000000e+00> : vector<32x64xf32>
    %70 = tpu.matmul %67, %69, %cst_113 {dimension_numbers = #tpu.dot_dimension_numbers<[1], [0], [0], [1], [0, 0, 1, 1], [], []>} : vector<32x64xbf16>, vector<64x64xbf16>, vector<32x64xf32> -> vector<32x64xf32>
    %c4_114 = arith.constant 4 : index
    %c0_115 = arith.constant 0 : index
    %71 = vector.load %arg6[%c4_114, %c0_115] : memref<7x64xf32, #tpu.memory_space<vmem>>, vector<1x64xf32>
    %72 = vector.broadcast %71 : vector<1x64xf32> to vector<32x64xf32>
    %73 = arith.addf %70, %72 : vector<32x64xf32>
    %74 = arith.addf %73, %1 : vector<32x64xf32>
    %c5_116 = arith.constant 5 : index
    %c0_117 = arith.constant 0 : index
    %75 = vector.load %arg6[%c5_116, %c0_117] : memref<7x64xf32, #tpu.memory_space<vmem>>, vector<1x64xf32>
    %c6_118 = arith.constant 6 : index
    %c0_119 = arith.constant 0 : index
    %76 = vector.load %arg6[%c6_118, %c0_119] : memref<7x64xf32, #tpu.memory_space<vmem>>, vector<1x64xf32>
    %cst_120 = arith.constant dense<0.000000e+00> : vector<32xf32>
    %77 = vector.multi_reduction <add>, %74, %cst_120 [1] : vector<32x64xf32> to vector<32xf32>
    %78 = vector.shape_cast %77 : vector<32xf32> to vector<32x1xf32>
    %cst_121 = arith.constant 6.400000e+01 : f32
    %79 = vector.broadcast %cst_121 : f32 to vector<32x1xf32>
    %80 = arith.divf %78, %79 : vector<32x1xf32>
    %81 = vector.broadcast %80 : vector<32x1xf32> to vector<32x64xf32>
    %82 = arith.subf %74, %81 : vector<32x64xf32>
    %83 = arith.mulf %82, %82 : vector<32x64xf32>
    %cst_122 = arith.constant dense<0.000000e+00> : vector<32xf32>
    %84 = vector.multi_reduction <add>, %83, %cst_122 [1] : vector<32x64xf32> to vector<32xf32>
    %85 = vector.shape_cast %84 : vector<32xf32> to vector<32x1xf32>
    %cst_123 = arith.constant 6.400000e+01 : f32
    %86 = vector.broadcast %cst_123 : f32 to vector<32x1xf32>
    %87 = arith.divf %85, %86 : vector<32x1xf32>
    %cst_124 = arith.constant 9.99999974E-6 : f32
    %88 = vector.broadcast %cst_124 : f32 to vector<32x1xf32>
    %89 = arith.addf %87, %88 : vector<32x1xf32>
    %90 = math.rsqrt %89 : vector<32x1xf32>
    %91 = vector.broadcast %90 : vector<32x1xf32> to vector<32x64xf32>
    %92 = arith.mulf %82, %91 : vector<32x64xf32>
    %93 = vector.broadcast %75 : vector<1x64xf32> to vector<32x64xf32>
    %94 = arith.mulf %92, %93 : vector<32x64xf32>
    %95 = vector.broadcast %76 : vector<1x64xf32> to vector<32x64xf32>
    %96 = arith.addf %94, %95 : vector<32x64xf32>
    %c0_125 = arith.constant 0 : index
    %c0_126 = arith.constant 0 : index
    %97 = vector.load %arg4[%c0_125, %c0_126] : memref<64x192xbf16, #tpu.memory_space<vmem>>, vector<64x192xbf16>
    %c0_127 = arith.constant 0 : index
    %c0_128 = arith.constant 0 : index
    %98 = vector.load %arg8[%c0_127, %c0_128] : memref<1x192xf32, #tpu.memory_space<vmem>>, vector<1x192xf32>
    %c0_129 = arith.constant 0 : index
    %c0_130 = arith.constant 0 : index
    %c0_131 = arith.constant 0 : index
    %99 = vector.load %arg5[%c0_129, %c0_130, %c0_131] : memref<3x64x64xbf16, #tpu.memory_space<vmem>>, vector<1x64x64xbf16>
    %100 = vector.shape_cast %99 : vector<1x64x64xbf16> to vector<64x64xbf16>
    %c0_132 = arith.constant 0 : index
    %c0_133 = arith.constant 0 : index
    %101 = vector.load %arg7[%c0_132, %c0_133] : memref<7x64xf32, #tpu.memory_space<vmem>>, vector<1x64xf32>
    %102 = arith.truncf %96 : vector<32x64xf32> to vector<32x64xbf16>
    %cst_134 = arith.constant dense<0.000000e+00> : vector<32x192xf32>
    %103 = tpu.matmul %102, %97, %cst_134 {dimension_numbers = #tpu.dot_dimension_numbers<[1], [0], [0], [1], [0, 0, 1, 1], [], []>} : vector<32x64xbf16>, vector<64x192xbf16>, vector<32x192xf32> -> vector<32x192xf32>
    %104 = vector.broadcast %98 : vector<1x192xf32> to vector<32x192xf32>
    %105 = arith.addf %103, %104 : vector<32x192xf32>
    %106 = vector.extract_strided_slice %105 {offsets = [0, 0], sizes = [32, 64], strides = [1, 1]} : vector<32x192xf32> to vector<32x64xf32>
    %107 = vector.extract_strided_slice %105 {offsets = [0, 64], sizes = [32, 64], strides = [1, 1]} : vector<32x192xf32> to vector<32x64xf32>
    %108 = vector.extract_strided_slice %105 {offsets = [0, 128], sizes = [32, 64], strides = [1, 1]} : vector<32x192xf32> to vector<32x64xf32>
    %cst_135 = arith.constant 2.500000e-01 : f32
    %109 = vector.broadcast %cst_135 : f32 to vector<32x64xf32>
    %110 = arith.mulf %106, %109 : vector<32x64xf32>
    %111 = vector.shape_cast %110 : vector<32x64xf32> to vector<4x8x64xf32>
    %112 = vector.extract_strided_slice %111 {offsets = [0, 0, 0], sizes = [4, 8, 16], strides = [1, 1, 1]} : vector<4x8x64xf32> to vector<4x8x16xf32>
    %113 = vector.extract_strided_slice %111 {offsets = [0, 0, 16], sizes = [4, 8, 16], strides = [1, 1, 1]} : vector<4x8x64xf32> to vector<4x8x16xf32>
    %114 = vector.extract_strided_slice %111 {offsets = [0, 0, 32], sizes = [4, 8, 16], strides = [1, 1, 1]} : vector<4x8x64xf32> to vector<4x8x16xf32>
    %115 = vector.extract_strided_slice %111 {offsets = [0, 0, 48], sizes = [4, 8, 16], strides = [1, 1, 1]} : vector<4x8x64xf32> to vector<4x8x16xf32>
    %116 = tpu.concatenate %112, %113, %114, %115 in 0 : vector<4x8x16xf32>, vector<4x8x16xf32>, vector<4x8x16xf32>, vector<4x8x16xf32> -> vector<16x8x16xf32>
    %117 = arith.truncf %116 : vector<16x8x16xf32> to vector<16x8x16xbf16>
    %118 = vector.shape_cast %107 : vector<32x64xf32> to vector<4x8x64xf32>
    %119 = vector.extract_strided_slice %118 {offsets = [0, 0, 0], sizes = [4, 8, 16], strides = [1, 1, 1]} : vector<4x8x64xf32> to vector<4x8x16xf32>
    %120 = vector.extract_strided_slice %118 {offsets = [0, 0, 16], sizes = [4, 8, 16], strides = [1, 1, 1]} : vector<4x8x64xf32> to vector<4x8x16xf32>
    %121 = vector.extract_strided_slice %118 {offsets = [0, 0, 32], sizes = [4, 8, 16], strides = [1, 1, 1]} : vector<4x8x64xf32> to vector<4x8x16xf32>
    %122 = vector.extract_strided_slice %118 {offsets = [0, 0, 48], sizes = [4, 8, 16], strides = [1, 1, 1]} : vector<4x8x64xf32> to vector<4x8x16xf32>
    %123 = tpu.concatenate %119, %120, %121, %122 in 0 : vector<4x8x16xf32>, vector<4x8x16xf32>, vector<4x8x16xf32>, vector<4x8x16xf32> -> vector<16x8x16xf32>
    %124 = arith.truncf %123 : vector<16x8x16xf32> to vector<16x8x16xbf16>
    %125 = vector.shape_cast %108 : vector<32x64xf32> to vector<4x8x64xf32>
    %126 = vector.extract_strided_slice %125 {offsets = [0, 0, 0], sizes = [4, 8, 16], strides = [1, 1, 1]} : vector<4x8x64xf32> to vector<4x8x16xf32>
    %127 = vector.extract_strided_slice %125 {offsets = [0, 0, 16], sizes = [4, 8, 16], strides = [1, 1, 1]} : vector<4x8x64xf32> to vector<4x8x16xf32>
    %128 = vector.extract_strided_slice %125 {offsets = [0, 0, 32], sizes = [4, 8, 16], strides = [1, 1, 1]} : vector<4x8x64xf32> to vector<4x8x16xf32>
    %129 = vector.extract_strided_slice %125 {offsets = [0, 0, 48], sizes = [4, 8, 16], strides = [1, 1, 1]} : vector<4x8x64xf32> to vector<4x8x16xf32>
    %130 = tpu.concatenate %126, %127, %128, %129 in 0 : vector<4x8x16xf32>, vector<4x8x16xf32>, vector<4x8x16xf32>, vector<4x8x16xf32> -> vector<16x8x16xf32>
    %131 = arith.truncf %130 : vector<16x8x16xf32> to vector<16x8x16xbf16>
    "tpu.trace_start"() <{level = 10 : i32, message = "bqd,bkd->bqk"}> : () -> ()
    %cst_136 = arith.constant dense<0.000000e+00> : vector<16x8x8xf32>
    %132 = tpu.matmul %117, %124, %cst_136 {dimension_numbers = #tpu.dot_dimension_numbers<[2], [2], [1], [1], [0, 0, 0, 1, 1, 1], [0], [0]>} : vector<16x8x16xbf16>, vector<16x8x16xbf16>, vector<16x8x8xf32> -> vector<16x8x8xf32>
    "tpu.trace_stop"() : () -> ()
    %cst_137 = arith.constant dense<0xFF800000> : vector<16x8xf32>
    %133 = vector.multi_reduction <maximumf>, %132, %cst_137 [2] : vector<16x8x8xf32> to vector<16x8xf32>
    %134 = vector.shape_cast %133 : vector<16x8xf32> to vector<16x8x1xf32>
    %135 = vector.broadcast %134 : vector<16x8x1xf32> to vector<16x8x8xf32>
    %136 = arith.subf %132, %135 : vector<16x8x8xf32>
    %137 = math.exp %136 : vector<16x8x8xf32>
    %cst_138 = arith.constant dense<0.000000e+00> : vector<16x8xf32>
    %138 = vector.multi_reduction <add>, %137, %cst_138 [2] : vector<16x8x8xf32> to vector<16x8xf32>
    %139 = vector.shape_cast %138 : vector<16x8xf32> to vector<16x8x1xf32>
    %140 = vector.broadcast %139 : vector<16x8x1xf32> to vector<16x8x8xf32>
    %141 = arith.divf %137, %140 : vector<16x8x8xf32>
    %142 = arith.truncf %141 : vector<16x8x8xf32> to vector<16x8x8xbf16>
    "tpu.trace_start"() <{level = 10 : i32, message = "bqk,bkd->bqd"}> : () -> ()
    %cst_139 = arith.constant dense<0.000000e+00> : vector<16x8x16xf32>
    %143 = tpu.matmul %142, %131, %cst_139 {dimension_numbers = #tpu.dot_dimension_numbers<[2], [1], [1], [2], [0, 0, 0, 1, 1, 2], [0], [0]>} : vector<16x8x8xbf16>, vector<16x8x16xbf16>, vector<16x8x16xf32> -> vector<16x8x16xf32>
    "tpu.trace_stop"() : () -> ()
    %144 = vector.extract_strided_slice %143 {offsets = [0, 0, 0], sizes = [4, 8, 16], strides = [1, 1, 1]} : vector<16x8x16xf32> to vector<4x8x16xf32>
    %145 = vector.extract_strided_slice %143 {offsets = [4, 0, 0], sizes = [4, 8, 16], strides = [1, 1, 1]} : vector<16x8x16xf32> to vector<4x8x16xf32>
    %146 = vector.extract_strided_slice %143 {offsets = [8, 0, 0], sizes = [4, 8, 16], strides = [1, 1, 1]} : vector<16x8x16xf32> to vector<4x8x16xf32>
    %147 = vector.extract_strided_slice %143 {offsets = [12, 0, 0], sizes = [4, 8, 16], strides = [1, 1, 1]} : vector<16x8x16xf32> to vector<4x8x16xf32>
    %148 = tpu.concatenate %144, %145, %146, %147 in 2 : vector<4x8x16xf32>, vector<4x8x16xf32>, vector<4x8x16xf32>, vector<4x8x16xf32> -> vector<4x8x64xf32>
    %149 = vector.shape_cast %148 : vector<4x8x64xf32> to vector<32x64xf32>
    %150 = arith.truncf %149 : vector<32x64xf32> to vector<32x64xbf16>
    %cst_140 = arith.constant dense<0.000000e+00> : vector<32x64xf32>
    %151 = tpu.matmul %150, %100, %cst_140 {dimension_numbers = #tpu.dot_dimension_numbers<[1], [0], [0], [1], [0, 0, 1, 1], [], []>} : vector<32x64xbf16>, vector<64x64xbf16>, vector<32x64xf32> -> vector<32x64xf32>
    %152 = vector.broadcast %101 : vector<1x64xf32> to vector<32x64xf32>
    %153 = arith.addf %151, %152 : vector<32x64xf32>
    %154 = arith.addf %153, %96 : vector<32x64xf32>
    %c1_141 = arith.constant 1 : index
    %c0_142 = arith.constant 0 : index
    %155 = vector.load %arg7[%c1_141, %c0_142] : memref<7x64xf32, #tpu.memory_space<vmem>>, vector<1x64xf32>
    %c2_143 = arith.constant 2 : index
    %c0_144 = arith.constant 0 : index
    %156 = vector.load %arg7[%c2_143, %c0_144] : memref<7x64xf32, #tpu.memory_space<vmem>>, vector<1x64xf32>
    %cst_145 = arith.constant dense<0.000000e+00> : vector<32xf32>
    %157 = vector.multi_reduction <add>, %154, %cst_145 [1] : vector<32x64xf32> to vector<32xf32>
    %158 = vector.shape_cast %157 : vector<32xf32> to vector<32x1xf32>
    %cst_146 = arith.constant 6.400000e+01 : f32
    %159 = vector.broadcast %cst_146 : f32 to vector<32x1xf32>
    %160 = arith.divf %158, %159 : vector<32x1xf32>
    %161 = vector.broadcast %160 : vector<32x1xf32> to vector<32x64xf32>
    %162 = arith.subf %154, %161 : vector<32x64xf32>
    %163 = arith.mulf %162, %162 : vector<32x64xf32>
    %cst_147 = arith.constant dense<0.000000e+00> : vector<32xf32>
    %164 = vector.multi_reduction <add>, %163, %cst_147 [1] : vector<32x64xf32> to vector<32xf32>
    %165 = vector.shape_cast %164 : vector<32xf32> to vector<32x1xf32>
    %cst_148 = arith.constant 6.400000e+01 : f32
    %166 = vector.broadcast %cst_148 : f32 to vector<32x1xf32>
    %167 = arith.divf %165, %166 : vector<32x1xf32>
    %cst_149 = arith.constant 9.99999974E-6 : f32
    %168 = vector.broadcast %cst_149 : f32 to vector<32x1xf32>
    %169 = arith.addf %167, %168 : vector<32x1xf32>
    %170 = math.rsqrt %169 : vector<32x1xf32>
    %171 = vector.broadcast %170 : vector<32x1xf32> to vector<32x64xf32>
    %172 = arith.mulf %162, %171 : vector<32x64xf32>
    %173 = vector.broadcast %155 : vector<1x64xf32> to vector<32x64xf32>
    %174 = arith.mulf %172, %173 : vector<32x64xf32>
    %175 = vector.broadcast %156 : vector<1x64xf32> to vector<32x64xf32>
    %176 = arith.addf %174, %175 : vector<32x64xf32>
    %177 = arith.truncf %176 : vector<32x64xf32> to vector<32x64xbf16>
    %c1_150 = arith.constant 1 : index
    %c0_151 = arith.constant 0 : index
    %c0_152 = arith.constant 0 : index
    %178 = vector.load %arg5[%c1_150, %c0_151, %c0_152] : memref<3x64x64xbf16, #tpu.memory_space<vmem>>, vector<1x64x64xbf16>
    %179 = vector.shape_cast %178 : vector<1x64x64xbf16> to vector<64x64xbf16>
    %cst_153 = arith.constant dense<0.000000e+00> : vector<32x64xf32>
    %180 = tpu.matmul %177, %179, %cst_153 {dimension_numbers = #tpu.dot_dimension_numbers<[1], [0], [0], [1], [0, 0, 1, 1], [], []>} : vector<32x64xbf16>, vector<64x64xbf16>, vector<32x64xf32> -> vector<32x64xf32>
    %c3_154 = arith.constant 3 : index
    %c0_155 = arith.constant 0 : index
    %181 = vector.load %arg7[%c3_154, %c0_155] : memref<7x64xf32, #tpu.memory_space<vmem>>, vector<1x64xf32>
    %182 = vector.broadcast %181 : vector<1x64xf32> to vector<32x64xf32>
    %183 = arith.addf %180, %182 : vector<32x64xf32>
    %cst_156 = arith.constant 0.000000e+00 : f32
    %184 = vector.broadcast %cst_156 : f32 to vector<32x64xf32>
    %185 = arith.maximumf %183, %184 : vector<32x64xf32>
    %186 = arith.truncf %185 : vector<32x64xf32> to vector<32x64xbf16>
    %c2_157 = arith.constant 2 : index
    %c0_158 = arith.constant 0 : index
    %c0_159 = arith.constant 0 : index
    %187 = vector.load %arg5[%c2_157, %c0_158, %c0_159] : memref<3x64x64xbf16, #tpu.memory_space<vmem>>, vector<1x64x64xbf16>
    %188 = vector.shape_cast %187 : vector<1x64x64xbf16> to vector<64x64xbf16>
    %cst_160 = arith.constant dense<0.000000e+00> : vector<32x64xf32>
    %189 = tpu.matmul %186, %188, %cst_160 {dimension_numbers = #tpu.dot_dimension_numbers<[1], [0], [0], [1], [0, 0, 1, 1], [], []>} : vector<32x64xbf16>, vector<64x64xbf16>, vector<32x64xf32> -> vector<32x64xf32>
    %c4_161 = arith.constant 4 : index
    %c0_162 = arith.constant 0 : index
    %190 = vector.load %arg7[%c4_161, %c0_162] : memref<7x64xf32, #tpu.memory_space<vmem>>, vector<1x64xf32>
    %191 = vector.broadcast %190 : vector<1x64xf32> to vector<32x64xf32>
    %192 = arith.addf %189, %191 : vector<32x64xf32>
    %193 = arith.addf %192, %176 : vector<32x64xf32>
    %c5_163 = arith.constant 5 : index
    %c0_164 = arith.constant 0 : index
    %194 = vector.load %arg7[%c5_163, %c0_164] : memref<7x64xf32, #tpu.memory_space<vmem>>, vector<1x64xf32>
    %c6_165 = arith.constant 6 : index
    %c0_166 = arith.constant 0 : index
    %195 = vector.load %arg7[%c6_165, %c0_166] : memref<7x64xf32, #tpu.memory_space<vmem>>, vector<1x64xf32>
    %cst_167 = arith.constant dense<0.000000e+00> : vector<32xf32>
    %196 = vector.multi_reduction <add>, %193, %cst_167 [1] : vector<32x64xf32> to vector<32xf32>
    %197 = vector.shape_cast %196 : vector<32xf32> to vector<32x1xf32>
    %cst_168 = arith.constant 6.400000e+01 : f32
    %198 = vector.broadcast %cst_168 : f32 to vector<32x1xf32>
    %199 = arith.divf %197, %198 : vector<32x1xf32>
    %200 = vector.broadcast %199 : vector<32x1xf32> to vector<32x64xf32>
    %201 = arith.subf %193, %200 : vector<32x64xf32>
    %202 = arith.mulf %201, %201 : vector<32x64xf32>
    %cst_169 = arith.constant dense<0.000000e+00> : vector<32xf32>
    %203 = vector.multi_reduction <add>, %202, %cst_169 [1] : vector<32x64xf32> to vector<32xf32>
    %204 = vector.shape_cast %203 : vector<32xf32> to vector<32x1xf32>
    %cst_170 = arith.constant 6.400000e+01 : f32
    %205 = vector.broadcast %cst_170 : f32 to vector<32x1xf32>
    %206 = arith.divf %204, %205 : vector<32x1xf32>
    %cst_171 = arith.constant 9.99999974E-6 : f32
    %207 = vector.broadcast %cst_171 : f32 to vector<32x1xf32>
    %208 = arith.addf %206, %207 : vector<32x1xf32>
    %209 = math.rsqrt %208 : vector<32x1xf32>
    %210 = vector.broadcast %209 : vector<32x1xf32> to vector<32x64xf32>
    %211 = arith.mulf %201, %210 : vector<32x64xf32>
    %212 = vector.broadcast %194 : vector<1x64xf32> to vector<32x64xf32>
    %213 = arith.mulf %211, %212 : vector<32x64xf32>
    %214 = vector.broadcast %195 : vector<1x64xf32> to vector<32x64xf32>
    %215 = arith.addf %213, %214 : vector<32x64xf32>
    %216 = vector.shape_cast %215 : vector<32x64xf32> to vector<2x16x64xf32>
    %217 = vector.extract_strided_slice %216 {offsets = [0, 0, 0], sizes = [2, 1, 64], strides = [1, 1, 1]} : vector<2x16x64xf32> to vector<2x1x64xf32>
    %218 = vector.shape_cast %217 : vector<2x1x64xf32> to vector<2x64xf32>
    %219 = vector.extract_strided_slice %216 {offsets = [0, 1, 0], sizes = [2, 1, 64], strides = [1, 1, 1]} : vector<2x16x64xf32> to vector<2x1x64xf32>
    %220 = vector.shape_cast %219 : vector<2x1x64xf32> to vector<2x64xf32>
    %221 = vector.extract_strided_slice %216 {offsets = [0, 2, 0], sizes = [2, 1, 64], strides = [1, 1, 1]} : vector<2x16x64xf32> to vector<2x1x64xf32>
    %222 = vector.shape_cast %221 : vector<2x1x64xf32> to vector<2x64xf32>
    %223 = vector.extract_strided_slice %216 {offsets = [0, 3, 0], sizes = [2, 1, 64], strides = [1, 1, 1]} : vector<2x16x64xf32> to vector<2x1x64xf32>
    %224 = vector.shape_cast %223 : vector<2x1x64xf32> to vector<2x64xf32>
    %225 = vector.extract_strided_slice %216 {offsets = [0, 4, 0], sizes = [2, 1, 64], strides = [1, 1, 1]} : vector<2x16x64xf32> to vector<2x1x64xf32>
    %226 = vector.shape_cast %225 : vector<2x1x64xf32> to vector<2x64xf32>
    %227 = vector.extract_strided_slice %216 {offsets = [0, 5, 0], sizes = [2, 1, 64], strides = [1, 1, 1]} : vector<2x16x64xf32> to vector<2x1x64xf32>
    %228 = vector.shape_cast %227 : vector<2x1x64xf32> to vector<2x64xf32>
    %229 = vector.extract_strided_slice %216 {offsets = [0, 6, 0], sizes = [2, 1, 64], strides = [1, 1, 1]} : vector<2x16x64xf32> to vector<2x1x64xf32>
    %230 = vector.shape_cast %229 : vector<2x1x64xf32> to vector<2x64xf32>
    %231 = vector.extract_strided_slice %216 {offsets = [0, 7, 0], sizes = [2, 1, 64], strides = [1, 1, 1]} : vector<2x16x64xf32> to vector<2x1x64xf32>
    %232 = vector.shape_cast %231 : vector<2x1x64xf32> to vector<2x64xf32>
    %233 = vector.extract_strided_slice %216 {offsets = [0, 8, 0], sizes = [2, 1, 64], strides = [1, 1, 1]} : vector<2x16x64xf32> to vector<2x1x64xf32>
    %234 = vector.shape_cast %233 : vector<2x1x64xf32> to vector<2x64xf32>
    %235 = vector.extract_strided_slice %216 {offsets = [0, 9, 0], sizes = [2, 1, 64], strides = [1, 1, 1]} : vector<2x16x64xf32> to vector<2x1x64xf32>
    %236 = vector.shape_cast %235 : vector<2x1x64xf32> to vector<2x64xf32>
    %237 = vector.extract_strided_slice %216 {offsets = [0, 10, 0], sizes = [2, 1, 64], strides = [1, 1, 1]} : vector<2x16x64xf32> to vector<2x1x64xf32>
    %238 = vector.shape_cast %237 : vector<2x1x64xf32> to vector<2x64xf32>
    %239 = vector.extract_strided_slice %216 {offsets = [0, 11, 0], sizes = [2, 1, 64], strides = [1, 1, 1]} : vector<2x16x64xf32> to vector<2x1x64xf32>
    %240 = vector.shape_cast %239 : vector<2x1x64xf32> to vector<2x64xf32>
    %241 = vector.extract_strided_slice %216 {offsets = [0, 12, 0], sizes = [2, 1, 64], strides = [1, 1, 1]} : vector<2x16x64xf32> to vector<2x1x64xf32>
    %242 = vector.shape_cast %241 : vector<2x1x64xf32> to vector<2x64xf32>
    %243 = vector.extract_strided_slice %216 {offsets = [0, 13, 0], sizes = [2, 1, 64], strides = [1, 1, 1]} : vector<2x16x64xf32> to vector<2x1x64xf32>
    %244 = vector.shape_cast %243 : vector<2x1x64xf32> to vector<2x64xf32>
    %245 = vector.extract_strided_slice %216 {offsets = [0, 14, 0], sizes = [2, 1, 64], strides = [1, 1, 1]} : vector<2x16x64xf32> to vector<2x1x64xf32>
    %246 = vector.shape_cast %245 : vector<2x1x64xf32> to vector<2x64xf32>
    %247 = vector.extract_strided_slice %216 {offsets = [0, 15, 0], sizes = [2, 1, 64], strides = [1, 1, 1]} : vector<2x16x64xf32> to vector<2x1x64xf32>
    %248 = vector.shape_cast %247 : vector<2x1x64xf32> to vector<2x64xf32>
    %249 = tpu.concatenate %218, %220, %222, %224, %226, %228, %230, %232, %234, %236, %238, %240, %242, %244, %246, %248 in 1 : vector<2x64xf32>, vector<2x64xf32>, vector<2x64xf32>, vector<2x64xf32>, vector<2x64xf32>, vector<2x64xf32>, vector<2x64xf32>, vector<2x64xf32>, vector<2x64xf32>, vector<2x64xf32>, vector<2x64xf32>, vector<2x64xf32>, vector<2x64xf32>, vector<2x64xf32>, vector<2x64xf32>, vector<2x64xf32> -> vector<2x1024xf32>
    %c0_172 = arith.constant 0 : index
    %c0_173 = arith.constant 0 : index
    %250 = vector.load %arg9[%c0_172, %c0_173] : memref<2x1024xf32, #tpu.memory_space<vmem>>, vector<2x1024xf32>
    tpu.vector_store %arg9[%c0_172, %c0_173], %249 {strides = array<i32>} : memref<2x1024xf32, #tpu.memory_space<vmem>>, vector<2x1024xf32>,
    return
  }
  func.func @transform_0(%arg0: i32) -> (i32, i32, i32, i32) {
    %c0_i32 = arith.constant 0 : i32
    %c0_i32_0 = arith.constant 0 : i32
    %c0_i32_1 = arith.constant 0 : i32
    %c0_i32_2 = arith.constant 0 : i32
    return %arg0, %c0_i32, %c0_i32_0, %c0_i32_1 : i32, i32, i32, i32
  }
  func.func @transform_1(%arg0: i32) -> (i32, i32) {
    %c0_i32 = arith.constant 0 : i32
    %c0_i32_0 = arith.constant 0 : i32
    %c0_i32_1 = arith.constant 0 : i32
    return %c0_i32, %c0_i32_0 : i32, i32
  }
  func.func @transform_2(%arg0: i32) -> (i32, i32, i32) {
    %c0_i32 = arith.constant 0 : i32
    %c0_i32_0 = arith.constant 0 : i32
    %c0_i32_1 = arith.constant 0 : i32
    %c0_i32_2 = arith.constant 0 : i32
    return %c0_i32, %c0_i32_0, %c0_i32_1 : i32, i32, i32
  }
  func.func @transform_3(%arg0: i32) -> (i32, i32) {
    %c0_i32 = arith.constant 0 : i32
    %c0_i32_0 = arith.constant 0 : i32
    %c0_i32_1 = arith.constant 0 : i32
    return %c0_i32, %c0_i32_0 : i32, i32
  }
  func.func @transform_4(%arg0: i32) -> (i32, i32, i32) {
    %c0_i32 = arith.constant 0 : i32
    %c0_i32_0 = arith.constant 0 : i32
    %c0_i32_1 = arith.constant 0 : i32
    %c0_i32_2 = arith.constant 0 : i32
    return %c0_i32, %c0_i32_0, %c0_i32_1 : i32, i32, i32
  }
  func.func @transform_5(%arg0: i32) -> (i32, i32) {
    %c0_i32 = arith.constant 0 : i32
    %c0_i32_0 = arith.constant 0 : i32
    %c0_i32_1 = arith.constant 0 : i32
    return %c0_i32, %c0_i32_0 : i32, i32
  }
  func.func @transform_6(%arg0: i32) -> (i32, i32) {
    %c0_i32 = arith.constant 0 : i32
    %c0_i32_0 = arith.constant 0 : i32
    %c0_i32_1 = arith.constant 0 : i32
    return %c0_i32, %c0_i32_0 : i32, i32
  }
  func.func @transform_7(%arg0: i32) -> (i32, i32) {
    %c0_i32 = arith.constant 0 : i32
    %c0_i32_0 = arith.constant 0 : i32
    %c0_i32_1 = arith.constant 0 : i32
    return %c0_i32, %c0_i32_0 : i32, i32
  }
  func.func @transform_8(%arg0: i32) -> (i32, i32) {
    %c0_i32 = arith.constant 0 : i32
    %c0_i32_0 = arith.constant 0 : i32
    return %arg0, %c0_i32 : i32, i32
  }
}

</mosaic_0001>

<bundles_post_ra>
// kernel: loconet_forward.3
= control target key start
LH: loop header
LB: loop body
LE: loop exit
PB: predicated region body
PF: predicated region fallthrough
CT: control target
= control target key end

     0   :  { %vm82_vm0 = vcmask 523264   ;;  %s5825_s26 = smov 96   ;;  %vm277_vm1 = vcmask 261120   ;;  %v5826_v47 = vmov 0.0   ;;  %vm5827_vm2 = vmmov 0   ;;  %s5828_s10 = smov 120   ;;  %s7076_s2 = inlined_call_operand.vmem [shape: bf16[2,64,32], index: 2, kind: input, shape index: {}]   ;;  %s7077_s0 = inlined_call_operand.vmem [shape: bf16[4,8,64], index: 0, kind: input, shape index: {}]   ;;  %s7078_s1 = inlined_call_operand.vmem [shape: bf16[4,8,64], index: 1, kind: input, shape index: {}]   ;;  %s7079_s3 = inlined_call_operand.vmem [shape: bf16[2,32,96], index: 3, kind: input, shape index: {}]   ;;  %s7080_s6 = inlined_call_operand.vmem [shape: f32[2,96], index: 6, kind: input, shape index: {}]   ;;  %s7081_s5 = inlined_call_operand.vmem [shape: f32[8,32], index: 5, kind: input, shape index: {}]   ;;  %s7082_s4 = inlined_call_operand.vmem [shape: bf16[2,32,32], index: 4, kind: input, shape index: {}]   ;;  %s7083_s7 = inlined_call_operand.vmem [shape: f32[4,512], index: 7, kind: output, shape index: {}]  }
   0x1   :  { %v5661_v0 = vld [vmem:[%s7076_s2] sm:$0xff]   ;;  %v5663_v2 = vld [vmem:[%s7076_s2 + $0x8] sm:$0xff]   ;;  %v5665_v4 = vld [vmem:[%s7076_s2 + $0x10] sm:$0xff]   ;;  %vm516_vm3 = vcmask 64512   ;;  %s5829_s11 = smov 112   ;;  %s5830_s12 = smov 104  }
   0x2   :  { %v5662_v1 = vld [vmem:[%s7076_s2 + $0x20] sm:$0xff]   ;;  %5014 = vmatprep.subr.bf16.mxu0 %v5661_v0  ;;  %v5664_v3 = vld [vmem:[%s7076_s2 + $0x28] sm:$0xff]   ;;  %v5666_v5 = vld [vmem:[%s7076_s2 + $0x30] sm:$0xff]   ;;  %vm1451_vm4 = vcmask 1043456   ;;  %s5832_s17 = smov 16   ;;  %s5833_s21 = smov 24  }
   0x3   :  { %5026 = vmatprep.subr.bf16.mxu1 %v5662_v1  ;;  %5015 = vmatpush3.bf16.msra.mxu0 %v5661_v0  ;;  %v5667_v6 = vld [vmem:[%s7076_s2 + $0x18] sm:$0xff]   ;;  %v5669_v8 = vld [vmem:[%s7077_s0] sm:$0xff]   ;;  %v5671_v10 = vld [vmem:[%s7077_s0 + $0x8] sm:$0xff]   ;;  %vm2282_vm5 = vcmask 130048   ;;  %vm2287_vm6 = vcmask 195584   ;;  %s5834_s9 = smov 32  }
   0x4   :  { %5027 = vmatpush3.bf16.msra.mxu1 %v5662_v1  ;;  %5016 = vmatprep.subr.bf16.mxu0 %v5663_v2  ;;  %v5668_v7 = vld [vmem:[%s7076_s2 + $0x38] sm:$0xff]   ;;  %v5670_v9 = vld [vmem:[%s7078_s1] sm:$0xff]   ;;  %v5674_v12 = vld [vmem:[%s7079_s3 + $0x8] sm:$0xff]   ;;  %vm4636_vm7 = vcmask 1041409   ;;  %vm4639_vm8 = vcmask 1042434   ;;  %vm4642_vm9 = vcmask 1043459  }
   0x5   :  { %5028 = vmatprep.subr.bf16.mxu1 %v5664_v3  ;;  %5022 = vmatprep.mubr.msk.bf16.mxu0 %vm82_vm0, %v5669_v8  ;;  %v5673_v11 = vld [vmem:[%s7079_s3] sm:$0xff]   ;;  %v5672_v13 = vld [vmem:[%s7078_s1 + $0x8] sm:$0xff]  }
   0x6   :  { %5034 = vmatprep.mubr.msk.bf16.mxu1 %vm82_vm0, %v5670_v9  ;;  %335 = vrot.lane.b32.xlu0 %v5673_v11, %s5825_s26  ;;  %v5927_v14 = vld [vmem:[%s7080_s6] ss:$0 sm:$0xff]  ;;  %v4741_v19 = vld [vmem:[%s7081_s5 + $0x1] ss:$0 sm:$0xff] }
   0x7   :  { %5017 = vmatpush3.bf16.msra.mxu0 %v5663_v2  ;;  %342 = vrot.lane.b32.xlu1 %v5927_v14, %s5825_s26  ;;  %v4724_v17 = vld [vmem:[%s7081_s5] ss:$0 sm:$0xff] }
   0x8   :  { %5029 = vmatpush3.bf16.msra.mxu1 %v5664_v3  ;;  %5018 = vmatprep.subr.bf16.mxu0 %v5665_v4 }
   0x9   :  { %5030 = vmatprep.subr.bf16.mxu1 %v5666_v5 }
   0xa   :  { %337 = vrot.lane.b32.xlu0 %v5674_v12, %s5825_s26 }
   0xb   :  { %5019 = vmatpush3.bf16.msra.mxu0 %v5665_v4 }
   0xc   :  { %5031 = vmatpush3.bf16.msra.mxu1 %v5666_v5  ;;  %5020 = vmatprep.subr.bf16.mxu0 %v5667_v6 }
   0xd   :  { %5032 = vmatprep.subr.bf16.mxu1 %v5668_v7 }
   0xf   :  { %5021 = vmatpush3.bf16.msra.mxu0 %v5667_v6 }
  0x10   :  { %5033 = vmatpush3.bf16.msra.mxu1 %v5668_v7  ;;  %5038 = vmatprep.subr.bf16.mxu0 %v5673_v11 }
  0x12   :  { %5023 = vmatmul.mubr.msk.bf16.vlgmr.msra.gmra.mrb[0].mxu0 %vm82_vm0, %v5671_v10 }
  0x13   :  { %5035 = vmatmul.mubr.msk.bf16.vlgmr.msra.gmra.mrb[0].mxu1 %vm82_vm0, %v5672_v13  ;;  %5039 = vmatpush3.bf16.msra.mxu0 %v5673_v11 }
  0x14   :  { %5040 = vmatprep.subr.bf16.mxu0 %v5674_v12 }
  0x17   :  { %5041 = vmatpush3.bf16.msra.mxu0 %v5674_v12 }
  0x18   :  { %5054 = vmatprep.subr.bf16.mxu0 %v5826_v47 }
  0x78   :  { %v336_v15 = vpop.permute.xlu0 %335 }
  0x79   :  { %5046 = vmatprep.subr.bf16.mxu1 %v336_v15  ;;  %v343_v48 = vpop.permute.xlu1 %342 }
  0x7a   :  { %5047 = vmatpush3.bf16.msra.mxu1 %v336_v15 }
  0x7c   :  { %v338_v16 = vpop.permute.xlu0 %337 }
  0x7d   :  { %5048 = vmatprep.subr.bf16.mxu1 %v338_v16 }
  0x7e   :  { %5049 = vmatpush3.bf16.msra.mxu1 %v338_v16 }
  0x7f   :  { %5060 = vmatprep.subr.bf16.mxu1 %v5826_v47 }
  0xe5   :  { %v5024_v18 = vpop.f32.mrb[0].mxu0 }
  0xe6   :  { %v5937_v20 = vadd.f32 %v5024_v18, %v4724_v17  ;;  %v5036_v21 = vpop.f32.mrb[0].mxu1  ;;  %v123_v22 = vpop.f32.mrb[1].mxu0 }
  0xe7   :  { %v5939_v23 = vadd.f32 %v4724_v17, %v123_v22  ;;  %v230_v24 = vpop.f32.mrb[1].mxu1  ;;  %v5025_v25 = vpop.f32.mrb[2].mxu0  ;;  %v5946_v31 = vadd.f32 %v5036_v21, %v4741_v19 }
  0xe8   :  { %v140_v26 = vmax.f32 %v5937_v20, 0.0  ;;  %v5942_v27 = vadd.f32 %v4741_v19, %v230_v24  ;;  %v5944_v28 = vadd.f32 %v5025_v25, %v4724_v17  ;;  %v5037_v29 = vpop.f32.mrb[2].mxu1  ;;  %v126_v30 = vpop.f32.mrb[3].mxu0 }
  0xe9   :  { %v138_v32 = vmax.f32 %v5939_v23, 0.0  ;;  %v5949_v33 = vadd.f32 %v5037_v29, %v4741_v19  ;;  %v5951_v34 = vadd.f32 %v4724_v17, %v126_v30  ;;  %v233_v35 = vpop.f32.mrb[3].mxu1  ;;  %v247_v43 = vmax.f32 %v5946_v31, 0.0 }
  0xea   :  { %v141_v36 = vmax.f32 %v5944_v28, 0.0  ;;  %v5954_v37 = vadd.f32 %v4741_v19, %v233_v35  ;;  %v245_v40 = vmax.f32 %v5942_v27, 0.0 }
  0xeb   :  { %v248_v38 = vmax.f32 %v5949_v33, 0.0  ;;  %v139_v39 = vmax.f32 %v5951_v34, 0.0 }
  0xec   :  { %v5963_v41 = vpack.c.bf16 %v141_v36, %v140_v26  ;;  %v246_v42 = vmax.f32 %v5954_v37, 0.0 }
  0xed   :  { %v5971_v44 = vpack.c.bf16 %v139_v39, %v138_v32  ;;  %v5983_v46 = vpack.c.bf16 %v248_v38, %v247_v43 }
  0xee   :  { %v5977_v45 = vpack.c.bf16 %v246_v42, %v245_v40 }
  0xef   :  { %5042 = vmatprep.mubr.msk.bf16.mxu0 %vm277_vm1, %v5971_v44 }
  0xf0   :  { %5050 = vmatprep.mubr.msk.bf16.mxu1 %vm277_vm1, %v5977_v45  ;;  %5043 = vmatmul.mubr.msk.bf16.vlgmr.msra.gmra.mrb[4].mxu0 %vm277_vm1, %v5963_v41 }
  0xf1   :  { %5051 = vmatmul.mubr.msk.bf16.vlgmr.msra.gmra.mrb[4].mxu1 %vm277_vm1, %v5983_v46  ;;  %5056 = vmatprep.mubr.msk.bf16.mxu0 %vm5827_vm2, %v5826_v47 }
  0xf2   :  { %5062 = vmatprep.mubr.msk.bf16.mxu1 %vm5827_vm2, %v5826_v47 }
 0x1c3   :  { %v5044_v49 = vpop.f32.mrb[4].mxu0 }
 0x1c4   :  { %v327_v50 = vadd.f32 %v5044_v49, %v5927_v14  ;;  %v5052_v51 = vpop.f32.mrb[4].mxu1  ;;  %v318_v52 = vpop.f32.mrb[5].mxu0 }
 0x1c5   :  { %v319_v53 = vadd.f32 %v5927_v14, %v318_v52  ;;  %v385_v54 = vpop.f32.mrb[5].mxu1  ;;  %v5045_v55 = vpop.f32.mrb[6].mxu0  ;;  %v394_v56 = vadd.f32 %v5052_v51, %v343_v48 }
 0x1c6   :  { %v386_v57 = vadd.f32 %v385_v54, %v343_v48  ;;  %v330_v58 = vadd.f32 %v5045_v55, %v5927_v14  ;;  %v5053_v59 = vpop.f32.mrb[6].mxu1  ;;  %v321_v60 = vpop.f32.mrb[7].mxu0  ;;  %v402_v61 = vmul.f32 0.35355338, %v327_v50 }
 0x1c7   :  { %v400_v62 = vmul.f32 0.35355338, %v319_v53  ;;  %v397_v63 = vadd.f32 %v5053_v59, %v343_v48  ;;  %v322_v0 = vadd.f32 %v5927_v14, %v321_v60  ;;  %v388_v1 = vpop.f32.mrb[7].mxu1  ;;  %v502_v13 = vpack.c.bf16 %v394_v56, %v394_v56 }
 0x1c8   :  { %v403_v2 = vmul.f32 0.35355338, %v330_v58  ;;  %v389_v3 = vadd.f32 %v388_v1, %v343_v48  ;;  %v500_v4 = vpack.c.bf16 %v386_v57, %v386_v57  ;;  %v446_v19 = vpack.c.bf16 %v402_v61, %v402_v61 }
 0x1c9   :  { %v401_v5 = vmul.f32 0.35355338, %v322_v0  ;;  %v5491_v6 = vpack.i.bf16 %v397_v63, %v394_v56  ;;  %v444_v14 = vpack.c.bf16 %v400_v62, %v400_v62  ;;  %v503_v15 = vpack.c.bf16 %v397_v63, %v397_v63 }
 0x1ca   :  { %v521_v7 = vsel %vm516_vm3, %v500_v4, 0  ;;  %v5481_v8 = vpack.i.bf16 %v389_v3, %v386_v57  ;;  %v501_v9 = vpack.c.bf16 %v389_v3, %v389_v3  ;;  %v5496_v11 = vpack.i.bf16 %v403_v2, %v402_v61 }
 0x1cb   :  { %5055 = vmatpush3.bf16.xpose.msra.mxu0 %v521_v7  ;;  %v5486_v10 = vpack.i.bf16 %v401_v5, %v400_v62  ;;  %v445_v16 = vpack.c.bf16 %v401_v5, %v401_v5  ;;  %v613_v17 = vsel %vm516_vm3, %v502_v13, 0  ;;  %v659_v18 = vsel %vm516_vm3, %v503_v15, 0 }
 0x1cc   :  { %5482 = vrot.lane.b32.xlu1 %v5481_v8, %s5828_s10  ;;  %v567_v12 = vsel %vm516_vm3, %v501_v9, 0  ;;  %5066 = vmatprep.subr.bf16.mxu0 %v5826_v47  ;;  %v447_v21 = vpack.c.bf16 %v403_v2, %v403_v2 }
 0x1cd   :  { %5061 = vmatpush3.bf16.xpose.msra.mxu1 %v567_v12  ;;  %5487 = vrot.lane.b32.xlu0 %v5486_v10, %s5828_s10 }
 0x1ce   :  { %5072 = vmatprep.subr.bf16.mxu1 %v5826_v47 }
 0x1d0   :  { %5492 = vrot.lane.b32.xlu1 %v5491_v6, %s5828_s10 }
 0x1d1   :  { %5497 = vrot.lane.b32.xlu0 %v5496_v11, %s5828_s10 }
 0x1d2   :  { %5057 = vmatmul.mubr.msk.bf16.vlgmr.msra.gmra.mrb[8].mxu0 %vm516_vm3, %v444_v14 }
 0x1d3   :  { %5067 = vmatpush3.bf16.xpose.msra.mxu0 %v613_v17  ;;  %5068 = vmatprep.mubr.msk.bf16.mxu0 %vm5827_vm2, %v5826_v47 }
 0x1d4   :  { %5502 = vrot.lane.b32.xlu1 %v5481_v8, %s5829_s11  ;;  %5063 = vmatmul.mubr.msk.bf16.vlgmr.msra.gmra.mrb[8].mxu1 %vm516_vm3, %v445_v16 }
 0x1d5   :  { %5073 = vmatpush3.bf16.xpose.msra.mxu1 %v659_v18  ;;  %5507 = vrot.lane.b32.xlu0 %v5486_v10, %s5829_s11 }
 0x1d6   :  { %5074 = vmatprep.mubr.msk.bf16.mxu1 %vm5827_vm2, %v5826_v47  ;;  %5078 = vmatprep.subr.bf16.mxu0 %v5826_v47 }
 0x1d7   :  { %5084 = vmatprep.subr.bf16.mxu1 %v5826_v47 }
 0x1d8   :  { %5512 = vrot.lane.b32.xlu1 %v5491_v6, %s5829_s11 }
 0x1d9   :  { %5517 = vrot.lane.b32.xlu0 %v5496_v11, %s5829_s11 }
 0x1da   :  { %5069 = vmatmul.mubr.msk.bf16.vlgmr.msra.gmra.mrb[12].mxu0 %vm516_vm3, %v446_v19 }
 0x1db   :  { %5080 = vmatprep.mubr.msk.bf16.mxu0 %vm5827_vm2, %v5826_v47 }
 0x1dc   :  { %5522 = vrot.lane.b32.xlu1 %v5481_v8, %s5830_s12  ;;  %5075 = vmatmul.mubr.msk.bf16.vlgmr.msra.gmra.mrb[12].mxu1 %vm516_vm3, %v447_v21 }
 0x1dd   :  { %5527 = vrot.lane.b32.xlu0 %v5486_v10, %s5830_s12  ;;  %5086 = vmatprep.mubr.msk.bf16.mxu1 %vm5827_vm2, %v5826_v47 }
 0x1e0   :  { %5532 = vrot.lane.b32.xlu1 %v5491_v6, %s5830_s12 }
 0x1e1   :  { %5537 = vrot.lane.b32.xlu0 %v5496_v11, %s5830_s12 }
 0x1e4   :  { %1594 = vrot.lane.b32.xlu1 %v503_v15, %s5825_s26 }
 0x1e5   :  { %1446 = vrot.lane.b32.xlu0 %v500_v4, %s5825_s26 }
 0x1e8   :  { %1496 = vrot.lane.b32.xlu1 %v501_v9, %s5825_s26 }
 0x1e9   :  { %1545 = vrot.lane.b32.xlu0 %v502_v13, %s5825_s26 }
 0x23e   :  { %v5483_v22 = vpop.permute.xlu1 %5482 }
 0x23f   :  { %v5485_v24 = vunpack.i.h.bf16 %v5483_v22  ;;  %v5484_v25 = vunpack.i.l.bf16 %v5483_v22  ;;  %v5488_v48 = vpop.permute.xlu0 %5487 }
 0x240   :  { %v5490_v55 = vunpack.i.h.bf16 %v5488_v48  ;;  %v5489_v56 = vunpack.i.l.bf16 %v5488_v48 }
 0x241   :  { %v505_v29 = vpack.c.bf16 %v5485_v24, %v5485_v24  ;;  %v504_v30 = vpack.c.bf16 %v5484_v25, %v5484_v25 }
 0x242   :  { %v5493_v35 = vpop.permute.xlu1 %5492  ;;  %v449_v60 = vpack.c.bf16 %v5490_v55, %v5490_v55  ;;  %v448_v61 = vpack.c.bf16 %v5489_v56, %v5489_v56 }
 0x243   :  { %v5495_v49 = vunpack.i.h.bf16 %v5493_v35  ;;  %v5494_v50 = vunpack.i.l.bf16 %v5493_v35  ;;  %v751_v51 = vsel %vm516_vm3, %v505_v29, 0  ;;  %v705_v52 = vsel %vm516_vm3, %v504_v30, 0  ;;  %v5498_v62 = vpop.permute.xlu0 %5497 }
 0x244   :  { %5085 = vmatpush3.bf16.xpose.msra.mxu1 %v751_v51  ;;  %5079 = vmatpush3.bf16.xpose.msra.mxu0 %v705_v52  ;;  %v5500_v3 = vunpack.i.h.bf16 %v5498_v62  ;;  %v5499_v4 = vunpack.i.l.bf16 %v5498_v62 }
 0x245   :  { %v507_v53 = vpack.c.bf16 %v5495_v49, %v5495_v49  ;;  %v506_v54 = vpack.c.bf16 %v5494_v50, %v5494_v50  ;;  %5096 = vmatprep.subr.bf16.mxu1 %v5826_v47  ;;  %5090 = vmatprep.subr.bf16.mxu0 %v5826_v47 }
 0x246   :  { %v5503_v57 = vpop.permute.xlu1 %5502  ;;  %v451_v6 = vpack.c.bf16 %v5500_v3, %v5500_v3  ;;  %v450_v7 = vpack.c.bf16 %v5499_v4, %v5499_v4 }
 0x247   :  { %1790 = vrot.lane.b32.xlu1 %v507_v53, %s5825_s26  ;;  %1741 = vrot.lane.b32.xlu0 %v506_v54, %s5825_s26  ;;  %v5505_v58 = vunpack.i.h.bf16 %v5503_v57  ;;  %v5504_v59 = vunpack.i.l.bf16 %v5503_v57  ;;  %v797_v63 = vsel %vm516_vm3, %v506_v54, 0  ;;  %v843_v0 = vsel %vm516_vm3, %v507_v53, 0  ;;  %v5508_v8 = vpop.permute.xlu0 %5507 }
 0x248   :  { %v5510_v13 = vunpack.i.h.bf16 %v5508_v8  ;;  %v5509_v14 = vunpack.i.l.bf16 %v5508_v8 }
 0x249   :  { %v509_v1 = vpack.c.bf16 %v5505_v58, %v5505_v58  ;;  %v508_v2 = vpack.c.bf16 %v5504_v59, %v5504_v59 }
 0x24a   :  { %v5513_v5 = vpop.permute.xlu1 %5512  ;;  %v453_v18 = vpack.c.bf16 %v5510_v13, %v5510_v13  ;;  %v452_v19 = vpack.c.bf16 %v5509_v14, %v5509_v14 }
 0x24b   :  { %1692 = vrot.lane.b32.xlu1 %v505_v29, %s5825_s26  ;;  %1643 = vrot.lane.b32.xlu0 %v504_v30, %s5825_s26  ;;  %v5515_v9 = vunpack.i.h.bf16 %v5513_v5  ;;  %v5514_v10 = vunpack.i.l.bf16 %v5513_v5  ;;  %v889_v11 = vsel %vm516_vm3, %v508_v2, 0  ;;  %v935_v12 = vsel %vm516_vm3, %v509_v1, 0  ;;  %v5518_v21 = vpop.permute.xlu0 %5517 }
 0x24c   :  { %5081 = vmatmul.mubr.msk.bf16.vlgmr.msra.gmra.mrb[16].mxu0 %vm516_vm3, %v448_v61  ;;  %5087 = vmatmul.mubr.msk.bf16.vlgmr.msra.gmra.mrb[16].mxu1 %vm516_vm3, %v449_v60  ;;  %v5520_v30 = vunpack.i.h.bf16 %v5518_v21  ;;  %v5519_v35 = vunpack.i.l.bf16 %v5518_v21 }
 0x24d   :  { %5091 = vmatpush3.bf16.xpose.msra.mxu0 %v797_v63  ;;  %5097 = vmatpush3.bf16.xpose.msra.mxu1 %v843_v0  ;;  %v6069_v15 = vpack.c.bf16 %v5515_v9, %v5515_v9  ;;  %v6071_v16 = vpack.c.bf16 %v5514_v10, %v5514_v10 }
 0x24e   :  { %5092 = vmatprep.mubr.msk.bf16.mxu0 %vm5827_vm2, %v5826_v47  ;;  %5098 = vmatprep.mubr.msk.bf16.mxu1 %vm5827_vm2, %v5826_v47  ;;  %v5523_v17 = vpop.permute.xlu1 %5522  ;;  %v455_v51 = vpack.c.bf16 %v5520_v30, %v5520_v30  ;;  %v454_v52 = vpack.c.bf16 %v5519_v35, %v5519_v35 }
 0x24f   :  { %1888 = vrot.lane.b32.xlu1 %v509_v1, %s5825_s26  ;;  %1839 = vrot.lane.b32.xlu0 %v508_v2, %s5825_s26  ;;  %v5525_v22 = vunpack.i.h.bf16 %v5523_v17  ;;  %v5524_v24 = vunpack.i.l.bf16 %v5523_v17  ;;  %v981_v25 = vsel %vm516_vm3, %v6071_v16, 0  ;;  %v1027_v29 = vsel %vm516_vm3, %v6069_v15, 0  ;;  %v5528_v53 = vpop.permute.xlu0 %5527 }
 0x250   :  { %5102 = vmatprep.subr.bf16.mxu0 %v5826_v47  ;;  %5108 = vmatprep.subr.bf16.mxu1 %v5826_v47  ;;  %v5530_v58 = vunpack.i.h.bf16 %v5528_v53  ;;  %v5529_v59 = vunpack.i.l.bf16 %v5528_v53 }
 0x251   :  { %v6085_v48 = vpack.c.bf16 %v5525_v22, %v5525_v22  ;;  %v6087_v49 = vpack.c.bf16 %v5524_v24, %v5524_v24 }
 0x252   :  { %v5533_v50 = vpop.permute.xlu1 %5532  ;;  %v457_v62 = vpack.c.bf16 %v5530_v58, %v5530_v58  ;;  %v456_v63 = vpack.c.bf16 %v5529_v59, %v5529_v59 }
 0x253   :  { %v5535_v54 = vunpack.i.h.bf16 %v5533_v50  ;;  %v5534_v55 = vunpack.i.l.bf16 %v5533_v50  ;;  %v1073_v56 = vsel %vm516_vm3, %v6087_v49, 0  ;;  %v1119_v57 = vsel %vm516_vm3, %v6085_v48, 0  ;;  %v5538_v0 = vpop.permute.xlu0 %5537 }
 0x254   :  { %5093 = vmatmul.mubr.msk.bf16.vlgmr.msra.gmra.mrb[20].mxu0 %vm516_vm3, %v450_v7  ;;  %5099 = vmatmul.mubr.msk.bf16.vlgmr.msra.gmra.mrb[20].mxu1 %vm516_vm3, %v451_v6  ;;  %v5540_v4 = vunpack.i.h.bf16 %v5538_v0  ;;  %v5539_v5 = vunpack.i.l.bf16 %v5538_v0 }
 0x255   :  { %5103 = vmatpush3.bf16.xpose.msra.mxu0 %v889_v11  ;;  %5109 = vmatpush3.bf16.xpose.msra.mxu1 %v935_v12  ;;  %v6101_v60 = vpack.c.bf16 %v5535_v54, %v5535_v54  ;;  %v6103_v61 = vpack.c.bf16 %v5534_v55, %v5534_v55 }
 0x256   :  { %5104 = vmatprep.mubr.msk.bf16.mxu0 %vm5827_vm2, %v5826_v47  ;;  %5110 = vmatprep.mubr.msk.bf16.mxu1 %vm5827_vm2, %v5826_v47  ;;  %v6105_v1 = vpop.permute.xlu1 %1594  ;;  %v459_v8 = vpack.c.bf16 %v5540_v4, %v5540_v4  ;;  %v458_v9 = vpack.c.bf16 %v5539_v5, %v5539_v5 }
 0x257   :  { %5114 = vmatprep.subr.bf16.mxu0 %v5826_v47  ;;  %5120 = vmatprep.subr.bf16.mxu1 %v5826_v47  ;;  %v1165_v2 = vsel %vm516_vm3, %v6103_v61, 0  ;;  %v1211_v3 = vsel %vm516_vm3, %v6101_v60, 0  ;;  %v1447_v6 = vpop.permute.xlu0 %1446 }
 0x258   :  { %v1453_v10 = vsel %vm1451_vm4, %v1447_v6, 0 }
 0x25a   :  { %v1497_v7 = vpop.permute.xlu1 %1496 }
 0x25b   :  { %v1502_v11 = vsel %vm1451_vm4, %v1497_v7, 0 }
 0x25c   :  { %5105 = vmatmul.mubr.msk.bf16.vlgmr.msra.gmra.mrb[24].mxu0 %vm516_vm3, %v452_v19  ;;  %5111 = vmatmul.mubr.msk.bf16.vlgmr.msra.gmra.mrb[24].mxu1 %vm516_vm3, %v453_v18 }
 0x25d   :  { %5115 = vmatpush3.bf16.xpose.msra.mxu0 %v981_v25  ;;  %5121 = vmatpush3.bf16.xpose.msra.mxu1 %v1027_v29 }
 0x25e   :  { %5116 = vmatprep.mubr.msk.bf16.mxu0 %vm5827_vm2, %v5826_v47  ;;  %5122 = vmatprep.mubr.msk.bf16.mxu1 %vm5827_vm2, %v5826_v47 }
 0x25f   :  { %5126 = vmatprep.subr.bf16.mxu0 %v5826_v47  ;;  %5132 = vmatprep.subr.bf16.mxu1 %v5826_v47 }
 0x264   :  { %5117 = vmatmul.mubr.msk.bf16.vlgmr.msra.gmra.mrb[28].mxu0 %vm516_vm3, %v454_v52  ;;  %5123 = vmatmul.mubr.msk.bf16.vlgmr.msra.gmra.mrb[28].mxu1 %vm516_vm3, %v455_v51 }
 0x265   :  { %5127 = vmatpush3.bf16.xpose.msra.mxu0 %v1073_v56  ;;  %5133 = vmatpush3.bf16.xpose.msra.mxu1 %v1119_v57 }
 0x266   :  { %5128 = vmatprep.mubr.msk.bf16.mxu0 %vm5827_vm2, %v5826_v47  ;;  %5134 = vmatprep.mubr.msk.bf16.mxu1 %vm5827_vm2, %v5826_v47 }
 0x267   :  { %5138 = vmatprep.subr.bf16.mxu0 %v5826_v47  ;;  %5144 = vmatprep.subr.bf16.mxu1 %v5826_v47 }
 0x26c   :  { %5129 = vmatmul.mubr.msk.bf16.vlgmr.msra.gmra.mrb[32].mxu0 %vm516_vm3, %v456_v63  ;;  %5135 = vmatmul.mubr.msk.bf16.vlgmr.msra.gmra.mrb[32].mxu1 %vm516_vm3, %v457_v62 }
 0x26d   :  { %5139 = vmatpush3.bf16.xpose.msra.mxu0 %v1165_v2  ;;  %5145 = vmatpush3.bf16.xpose.msra.mxu1 %v1211_v3 }
 0x26e   :  { %5140 = vmatprep.mubr.msk.bf16.mxu0 %vm5827_vm2, %v5826_v47  ;;  %5146 = vmatprep.mubr.msk.bf16.mxu1 %vm5827_vm2, %v5826_v47 }
 0x26f   :  { %5150 = vmatprep.subr.bf16.mxu0 %v5826_v47  ;;  %5156 = vmatprep.subr.bf16.mxu1 %v5826_v47 }
 0x274   :  { %5141 = vmatmul.mubr.msk.bf16.vlgmr.msra.gmra.mrb[36].mxu0 %vm516_vm3, %v458_v9  ;;  %5147 = vmatmul.mubr.msk.bf16.vlgmr.msra.gmra.mrb[36].mxu1 %vm516_vm3, %v459_v8 }
 0x275   :  { %5151 = vmatpush3.bf16.msra.mxu0 %v1453_v10  ;;  %5157 = vmatpush3.bf16.msra.mxu1 %v1502_v11 }
 0x276   :  { %5158 = vmatprep.mubr.msk.bf16.mxu1 %vm5827_vm2, %v5826_v47  ;;  %5168 = vmatprep.subr.bf16.mxu1 %v5826_v47 }
 0x277   :  { %5152 = vmatprep.mubr.msk.bf16.mxu0 %vm5827_vm2, %v5826_v47  ;;  %5162 = vmatprep.subr.bf16.mxu0 %v5826_v47 }
 0x2a5   :  { %v6129_v12 = vpop.f32.mrb[8].mxu0 }
 0x2a6   :  { %v5058_v13 = vpop.f32.mrb[9].mxu0  ;;  %v1253_v14 = vsel %vm516_vm3, %v6129_v12, -inf }
 0x2a7   :  { %v6133_v17 = vpop.f32.mrb[8].mxu1  ;;  %1254 = vmax.xlane.f32.xlu1 %v1253_v14  ;;  %v560_v18 = vpop.f32.mrb[10].mxu0 }
 0x2a8   :  { %v5059_v19 = vpop.f32.mrb[11].mxu0  ;;  %v5064_v21 = vpop.f32.mrb[9].mxu1  ;;  %v1256_v22 = vsel %vm516_vm3, %v6133_v17, -inf }
 0x2a9   :  { %v606_v24 = vpop.f32.mrb[10].mxu1  ;;  %1257 = vmax.xlane.f32.xlu0 %v1256_v22 }
 0x2aa   :  { %v5065_v25 = vpop.f32.mrb[11].mxu1 }
 0x2ad   :  { %v6137_v29 = vpop.f32.mrb[12].mxu0 }
 0x2ae   :  { %v5070_v30 = vpop.f32.mrb[13].mxu0  ;;  %v1259_v35 = vsel %vm516_vm3, %v6137_v29, -inf }
 0x2af   :  { %v6141_v50 = vpop.f32.mrb[12].mxu1  ;;  %1260 = vmax.xlane.f32.xlu0 %v1259_v35  ;;  %v652_v51 = vpop.f32.mrb[14].mxu0 }
 0x2b0   :  { %v5071_v52 = vpop.f32.mrb[15].mxu0  ;;  %v5076_v53 = vpop.f32.mrb[13].mxu1  ;;  %v1262_v54 = vsel %vm516_vm3, %v6141_v50, -inf }
 0x2b1   :  { %v698_v55 = vpop.f32.mrb[14].mxu1  ;;  %1263 = vmax.xlane.f32.xlu1 %v1262_v54 }
 0x2b2   :  { %v5077_v56 = vpop.f32.mrb[15].mxu1 }
 0x31f   :  { %v6145_v57 = vpop.f32.mrb[16].mxu0  ;;  %v6147_v58 = vpop.f32.mrb[16].mxu1 }
 0x320   :  { %v5082_v59 = vpop.f32.mrb[17].mxu0  ;;  %v5088_v62 = vpop.f32.mrb[17].mxu1  ;;  %v1268_v63 = vsel %vm516_vm3, %v6147_v58, -inf  ;;  %v1265_v0 = vsel %vm516_vm3, %v6145_v57, -inf }
 0x321   :  { %v790_v2 = vpop.f32.mrb[18].mxu1  ;;  %1269 = vmax.xlane.f32.xlu1 %v1268_v63  ;;  %1266 = vmax.xlane.f32.xlu0 %v1265_v0  ;;  %v744_v3 = vpop.f32.mrb[18].mxu0 }
 0x322   :  { %v5083_v4 = vpop.f32.mrb[19].mxu0  ;;  %v5089_v5 = vpop.f32.mrb[19].mxu1 }
 0x327   :  { %v6153_v6 = vpop.f32.mrb[20].mxu0  ;;  %v6155_v7 = vpop.f32.mrb[20].mxu1 }
 0x328   :  { %v5094_v8 = vpop.f32.mrb[21].mxu0  ;;  %v5100_v9 = vpop.f32.mrb[21].mxu1  ;;  %v1274_v10 = vsel %vm516_vm3, %v6155_v7, -inf  ;;  %v1271_v11 = vsel %vm516_vm3, %v6153_v6, -inf }
 0x329   :  { %v882_v13 = vpop.f32.mrb[22].mxu1  ;;  %1275 = vmax.xlane.f32.xlu1 %v1274_v10  ;;  %1272 = vmax.xlane.f32.xlu0 %v1271_v11  ;;  %v836_v14 = vpop.f32.mrb[22].mxu0 }
 0x32a   :  { %v5095_v18 = vpop.f32.mrb[23].mxu0  ;;  %v5101_v19 = vpop.f32.mrb[23].mxu1 }
 0x32f   :  { %v6161_v21 = vpop.f32.mrb[24].mxu0  ;;  %v6163_v22 = vpop.f32.mrb[24].mxu1 }
 0x330   :  { %v5106_v24 = vpop.f32.mrb[25].mxu0  ;;  %v5112_v25 = vpop.f32.mrb[25].mxu1  ;;  %v1280_v30 = vsel %vm516_vm3, %v6163_v22, -inf  ;;  %v1277_v35 = vsel %vm516_vm3, %v6161_v21, -inf }
 0x331   :  { %v974_v51 = vpop.f32.mrb[26].mxu1  ;;  %1281 = vmax.xlane.f32.xlu1 %v1280_v30  ;;  %1278 = vmax.xlane.f32.xlu0 %v1277_v35  ;;  %v928_v52 = vpop.f32.mrb[26].mxu0 }
 0x332   :  { %v5107_v53 = vpop.f32.mrb[27].mxu0  ;;  %v5113_v54 = vpop.f32.mrb[27].mxu1 }
 0x333   :  { %v6183_v25 = vpop.permute.xlu0 %1545 }
 0x337   :  { %v6169_v55 = vpop.f32.mrb[28].mxu0  ;;  %v6171_v56 = vpop.f32.mrb[28].mxu1 }
 0x338   :  { %v5118_v59 = vpop.f32.mrb[29].mxu0  ;;  %v5124_v62 = vpop.f32.mrb[29].mxu1  ;;  %v1286_v63 = vsel %vm516_vm3, %v6171_v56, -inf  ;;  %v1283_v0 = vsel %vm516_vm3, %v6169_v55, -inf }
 0x339   :  { %v1066_v2 = vpop.f32.mrb[30].mxu1  ;;  %1287 = vmax.xlane.f32.xlu1 %v1286_v63  ;;  %1284 = vmax.xlane.f32.xlu0 %v1283_v0  ;;  %v1020_v3 = vpop.f32.mrb[30].mxu0 }
 0x33a   :  { %v5119_v4 = vpop.f32.mrb[31].mxu0  ;;  %v5125_v5 = vpop.f32.mrb[31].mxu1 }
 0x33b   :  { %v6193_v0 = vpop.permute.xlu1 %1790  ;;  %v6195_v2 = vpop.permute.xlu0 %1741 }
 0x33f   :  { %v6177_v8 = vpop.f32.mrb[32].mxu1  ;;  %v6179_v9 = vpop.f32.mrb[32].mxu0 }
 0x340   :  { %v5130_v10 = vpop.f32.mrb[33].mxu0  ;;  %v5136_v11 = vpop.f32.mrb[33].mxu1  ;;  %v1289_v13 = vsel %vm516_vm3, %v6179_v9, -inf }
 0x341   :  { %v1158_v14 = vpop.f32.mrb[34].mxu1  ;;  %1290 = vmax.xlane.f32.xlu0 %v1289_v13  ;;  %v1112_v18 = vpop.f32.mrb[34].mxu0 }
 0x342   :  { %v5131_v19 = vpop.f32.mrb[35].mxu0  ;;  %v5137_v24 = vpop.f32.mrb[35].mxu1 }
 0x343   :  { %v6197_v3 = vpop.permute.xlu1 %1692  ;;  %v6199_v4 = vpop.permute.xlu0 %1643 }
 0x347   :  { %v6185_v30 = vpop.f32.mrb[36].mxu0  ;;  %v6187_v35 = vpop.f32.mrb[36].mxu1 }
 0x348   :  { %v5142_v51 = vpop.f32.mrb[37].mxu0  ;;  %v5148_v52 = vpop.f32.mrb[37].mxu1  ;;  %v1295_v53 = vsel %vm516_vm3, %v6185_v30, -inf }
 0x349   :  { %v1250_v54 = vpop.f32.mrb[38].mxu1  ;;  %1296 = vmax.xlane.f32.xlu0 %v1295_v53  ;;  %v1204_v59 = vpop.f32.mrb[38].mxu0 }
 0x34a   :  { %v5149_v62 = vpop.f32.mrb[39].mxu1  ;;  %1937 = vrot.lane.b32.xlu1 %v6071_v16, %s5825_s26  ;;  %v5143_v63 = vpop.f32.mrb[39].mxu0  ;;  %v1292_v59 = vsel %vm516_vm3, %v6177_v8, -inf }
 0x34b   :  { %v6201_v5 = vpop.permute.xlu1 %1888  ;;  %v6203_v10 = vpop.permute.xlu0 %1839 }
 0x34f   :  { %v1255_v11 = vpop.xlane.xlu1 %1254  ;;  %v1258_v13 = vpop.xlane.xlu0 %1257 }
 0x350   :  { %v1302_v16 = vsub.f32 %v6133_v17, %v1258_v13  ;;  %v1301_v24 = vsub.f32 %v6129_v12, %v1255_v11  ;;  %v1298_v17 = vsel %vm516_vm3, %v6187_v35, -inf }
 0x352   :  { %v1319_v18 = vmul.f32 1.442695, %v1302_v16  ;;  %v1317_v53 = vmul.f32 1.442695, %v1301_v24 }
 0x353   :  { %v1264_v14 = vpop.xlane.xlu1 %1263  ;;  %v1261_v52 = vpop.xlane.xlu0 %1260 }
 0x354   :  { %v1304_v19 = vsub.f32 %v6141_v50, %v1264_v14  ;;  %5681 = vpow2.f32 %v1319_v18  ;;  %v1303_v54 = vsub.f32 %v6137_v29, %v1261_v52 }
 0x356   :  { %v1323_v51 = vmul.f32 1.442695, %v1304_v19 }
 0x358   :  { %5683 = vpow2.f32 %v1323_v51 }
 0x359   :  { %5685 = vpow2.f32 %v1317_v53 }
 0x35e   :  { %v6215_v62 = vpop.eup %5681 }
 0x35f   :  { %1986 = vrot.lane.b32.xlu0 %v6069_v15, %s5825_s26  ;;  %v1321_v15 = vmul.f32 1.442695, %v1303_v54  ;;  %v1352_v12 = vsel %vm516_vm3, %v6215_v62, 0.0 }
 0x361   :  { %5687 = vpow2.f32 %v1321_v15 }
 0x362   :  { %v6219_v50 = vpop.eup %5683 }
 0x363   :  { %v1358_v29 = vsel %vm516_vm3, %v6219_v50, 0.0  ;;  %v6223_v63 = vpop.eup %5685 }
 0x364   :  { %v1349_v11 = vsel %vm516_vm3, %v6223_v63, 0.0 }
 0x36b   :  { %v6227_v13 = vpop.eup %5687 }
 0x36c   :  { %v1355_v16 = vsel %vm516_vm3, %v6227_v13, 0.0 }
 0x36e   :  { %1293 = vmax.xlane.f32.xlu1 %v1292_v59 }
 0x372   :  { %1299 = vmax.xlane.f32.xlu1 %v1298_v17 }
 0x376   :  { %1353 = vadd.xlane.f32.xlu1 %v1352_v12 }
 0x37a   :  { %1359 = vadd.xlane.f32.xlu1 %v1358_v29 }
 0x37e   :  { %1350 = vadd.xlane.f32.xlu0 %v1349_v11 }
 0x382   :  { %1356 = vadd.xlane.f32.xlu0 %v1355_v16 }
 0x3ae   :  { %v1270_v14 = vpop.xlane.xlu1 %1269  ;;  %v1267_v18 = vpop.xlane.xlu0 %1266 }
 0x3af   :  { %v1306_v19 = vsub.f32 %v6147_v58, %v1270_v14  ;;  %v1305_v24 = vsub.f32 %v6145_v57, %v1267_v18 }
 0x3b1   :  { %v1327_v51 = vmul.f32 1.442695, %v1306_v19  ;;  %v1325_v52 = vmul.f32 1.442695, %v1305_v24 }
 0x3b3   :  { %5689 = vpow2.f32 %v1327_v51 }
 0x3b4   :  { %5691 = vpow2.f32 %v1325_v52 }
 0x3b6   :  { %v1276_v53 = vpop.xlane.xlu1 %1275  ;;  %v1273_v54 = vpop.xlane.xlu0 %1272 }
 0x3b7   :  { %v1308_v59 = vsub.f32 %v6155_v7, %v1276_v53  ;;  %v1307_v15 = vsub.f32 %v6153_v6, %v1273_v54 }
 0x3b9   :  { %v1331_v17 = vmul.f32 1.442695, %v1308_v59  ;;  %v1329_v12 = vmul.f32 1.442695, %v1307_v15 }
 0x3bb   :  { %5693 = vpow2.f32 %v1331_v17 }
 0x3bc   :  { %5695 = vpow2.f32 %v1329_v12 }
 0x3bd   :  { %v6235_v29 = vpop.eup %5689 }
 0x3be   :  { %v6237_v11 = vpop.eup %5691  ;;  %v1282_v58 = vpop.xlane.xlu1 %1281  ;;  %v1364_v16 = vsel %vm516_vm3, %v6235_v29, 0.0 }
 0x3bf   :  { %v1279_v57 = vpop.xlane.xlu0 %1278  ;;  %v1310_v14 = vsub.f32 %v6163_v22, %v1282_v58  ;;  %1365 = vadd.xlane.f32.xlu1 %v1364_v16  ;;  %v1361_v6 = vsel %vm516_vm3, %v6237_v11, 0.0 }
 0x3c0   :  { %v1309_v18 = vsub.f32 %v6161_v21, %v1279_v57  ;;  %1362 = vadd.xlane.f32.xlu0 %v1361_v6 }
 0x3c1   :  { %v1335_v7 = vmul.f32 1.442695, %v1310_v14 }
 0x3c2   :  { %v1333_v19 = vmul.f32 1.442695, %v1309_v18 }
 0x3c3   :  { %5697 = vpow2.f32 %v1335_v7 }
 0x3c4   :  { %5699 = vpow2.f32 %v1333_v19 }
 0x3c5   :  { %v6245_v24 = vpop.eup %5693 }
 0x3c6   :  { %v6247_v51 = vpop.eup %5695  ;;  %v1288_v52 = vpop.xlane.xlu1 %1287  ;;  %v1370_v53 = vsel %vm516_vm3, %v6245_v24, 0.0 }
 0x3c7   :  { %v1312_v22 = vsub.f32 %v6171_v56, %v1288_v52  ;;  %1371 = vadd.xlane.f32.xlu1 %v1370_v53  ;;  %v1367_v21 = vsel %vm516_vm3, %v6247_v51, 0.0  ;;  %v1285_v57 = vpop.xlane.xlu0 %1284 }
 0x3c8   :  { %1368 = vadd.xlane.f32.xlu0 %v1367_v21  ;;  %v1311_v16 = vsub.f32 %v6169_v55, %v1285_v57 }
 0x3c9   :  { %v1339_v54 = vmul.f32 1.442695, %v1312_v22 }
 0x3ca   :  { %v1337_v18 = vmul.f32 1.442695, %v1311_v16  ;;  %v6272_v19 = vpop.permute.xlu1 %1937 }
 0x3cb   :  { %5701 = vpow2.f32 %v1339_v54 }
 0x3cc   :  { %5703 = vpow2.f32 %v1337_v18 }
 0x3cd   :  { %v6254_v59 = vpop.eup %5697 }
 0x3ce   :  { %v6256_v15 = vpop.eup %5699  ;;  %v1376_v17 = vsel %vm516_vm3, %v6254_v59, 0.0  ;;  %v1291_v14 = vpop.xlane.xlu0 %1290 }
 0x3cf   :  { %v1373_v12 = vsel %vm516_vm3, %v6256_v15, 0.0  ;;  %1377 = vadd.xlane.f32.xlu0 %v1376_v17  ;;  %v1313_v6 = vsub.f32 %v6179_v9, %v1291_v14 }
 0x3d0   :  { %1374 = vadd.xlane.f32.xlu1 %v1373_v12 }
 0x3d1   :  { %v1341_v52 = vmul.f32 1.442695, %v1313_v6 }
 0x3d3   :  { %5705 = vpow2.f32 %v1341_v52 }
 0x3d5   :  { %v6262_v56 = vpop.eup %5701 }
 0x3d6   :  { %v1382_v58 = vsel %vm516_vm3, %v6262_v56, 0.0  ;;  %v1297_v7 = vpop.xlane.xlu0 %1296  ;;  %v6277_v17 = vpop.eup %5703 }
 0x3d7   :  { %1383 = vadd.xlane.f32.xlu0 %v1382_v58  ;;  %v1315_v53 = vsub.f32 %v6185_v30, %v1297_v7  ;;  %v1379_v58 = vsel %vm516_vm3, %v6277_v17, 0.0 }
 0x3d9   :  { %v1345_v22 = vmul.f32 1.442695, %v1315_v53 }
 0x3da   :  { %v6283_v57 = vpop.permute.xlu0 %1986 }
 0x3db   :  { %5707 = vpow2.f32 %v1345_v22 }
 0x3dd   :  { %v6281_v30 = vpop.eup %5705 }
 0x3de   :  { %v1385_v16 = vsel %vm516_vm3, %v6281_v30, 0.0 }
 0x3e1   :  { %2035 = vrot.lane.b32.xlu1 %v6087_v49, %s5825_s26 }
 0x3e5   :  { %v6287_v14 = vpop.eup %5707 }
 0x3e6   :  { %v1391_v7 = vsel %vm516_vm3, %v6287_v14, 0.0 }
 0x3ed   :  { %2084 = vrot.lane.b32.xlu0 %v6085_v48, %s5825_s26 }
 0x3fb   :  { %v1294_v49 = vpop.xlane.xlu1 %1293 }
 0x3fc   :  { %v1314_v21 = vsub.f32 %v6177_v8, %v1294_v49 }
 0x3fe   :  { %v1343_v54 = vmul.f32 1.442695, %v1314_v21 }
 0x3ff   :  { %v1300_v48 = vpop.xlane.xlu1 %1299 }
 0x400   :  { %5709 = vpow2.f32 %v1343_v54  ;;  %v1316_v55 = vsub.f32 %v6187_v35, %v1300_v48 }
 0x402   :  { %v1347_v9 = vmul.f32 1.442695, %v1316_v55  ;;  %v1600_v55 = vsel %vm1451_vm4, %v6105_v1, 0  ;;  %v1698_v1 = vsel %vm1451_vm4, %v6197_v3, 0  ;;  %v1649_v3 = vsel %vm1451_vm4, %v6199_v4, 0 }
 0x403   :  { %v1354_v12 = vpop.xlane.xlu1 %1353 }
 0x404   :  { %5711 = vpow2.f32 %v1347_v9 }
 0x405   :  { %5713 = vrcp.f32 %v1354_v12  ;;  %1380 = vadd.xlane.f32.xlu1 %v1379_v58 }
 0x407   :  { %v1360_v8 = vpop.xlane.xlu1 %1359 }
 0x408   :  { %5715 = vrcp.f32 %v1360_v8 }
 0x409   :  { %1386 = vadd.xlane.f32.xlu1 %v1385_v16 }
 0x40a   :  { %v6289_v35 = vpop.eup %5709 }
 0x40b   :  { %v1351_v18 = vpop.xlane.xlu0 %1350  ;;  %v1388_v6 = vsel %vm516_vm3, %v6289_v35, 0.0 }
 0x40c   :  { %5717 = vrcp.f32 %v1351_v18  ;;  %1389 = vadd.xlane.f32.xlu0 %v1388_v6  ;;  %v1551_v18 = vsel %vm1451_vm4, %v6183_v25, 0 }
 0x40d   :  { %1392 = vadd.xlane.f32.xlu1 %v1391_v7 }
 0x40e   :  { %v6295_v52 = vpop.eup %5711 }
 0x40f   :  { %v5714_v53 = vpop.eup %5713  ;;  %v1357_v22 = vpop.xlane.xlu0 %1356  ;;  %v1394_v49 = vsel %vm516_vm3, %v6295_v52, 0.0 }
 0x410   :  { %5719 = vrcp.f32 %v1357_v22  ;;  %1395 = vadd.xlane.f32.xlu0 %v1394_v49  ;;  %v1400_v21 = vmul.f32 %v5714_v53, %v6215_v62 }
 0x412   :  { %v1430_v54 = vpack.c.bf16 %v1400_v21, %v1400_v21  ;;  %v5716_v48 = vpop.eup %5715 }
 0x413   :  { %v1404_v12 = vmul.f32 %v5716_v48, %v6219_v50  ;;  %v1747_v48 = vsel %vm1451_vm4, %v6195_v2, 0 }
 0x414   :  { %5159 = vmatmul.mubr.msk.bf16.vlgmr.msra.gmra.mrb[40].mxu1 %vm516_vm3, %v1430_v54  ;;  %v1796_v54 = vsel %vm1451_vm4, %v6193_v0, 0 }
 0x415   :  { %5169 = vmatpush3.bf16.msra.mxu1 %v1600_v55  ;;  %5170 = vmatprep.mubr.msk.bf16.mxu1 %vm5827_vm2, %v5826_v47  ;;  %v1432_v16 = vpack.c.bf16 %v1404_v12, %v1404_v12 }
 0x416   :  { %v5718_v9 = vpop.eup %5717  ;;  %5180 = vmatprep.subr.bf16.mxu1 %v5826_v47 }
 0x417   :  { %v1398_v58 = vmul.f32 %v5718_v9, %v6223_v63 }
 0x419   :  { %v1429_v8 = vpack.c.bf16 %v1398_v58, %v1398_v58  ;;  %v1894_v58 = vsel %vm1451_vm4, %v6201_v5, 0 }
 0x41a   :  { %v5720_v62 = vpop.eup %5719 }
 0x41b   :  { %5153 = vmatmul.mubr.msk.bf16.vlgmr.msra.gmra.mrb[40].mxu0 %vm516_vm3, %v1429_v8  ;;  %v1402_v50 = vmul.f32 %v5720_v62, %v6227_v13  ;;  %v1845_v62 = vsel %vm1451_vm4, %v6203_v10, 0 }
 0x41c   :  { %5163 = vmatpush3.bf16.msra.mxu0 %v1551_v18  ;;  %5171 = vmatmul.mubr.msk.bf16.vlgmr.msra.gmra.mrb[44].mxu1 %vm516_vm3, %v1432_v16 }
 0x41d   :  { %5181 = vmatpush3.bf16.msra.mxu1 %v1698_v1  ;;  %5164 = vmatprep.mubr.msk.bf16.mxu0 %vm5827_vm2, %v5826_v47  ;;  %v1431_v25 = vpack.c.bf16 %v1402_v50, %v1402_v50  ;;  %v1992_v1 = vsel %vm1451_vm4, %v6283_v57, 0  ;;  %v1943_v50 = vsel %vm1451_vm4, %v6272_v19, 0 }
 0x41e   :  { %2133 = vrot.lane.b32.xlu1 %v6103_v61, %s5825_s26  ;;  %5174 = vmatprep.subr.bf16.mxu0 %v5826_v47 }
 0x41f   :  { %5182 = vmatprep.mubr.msk.bf16.mxu1 %vm5827_vm2, %v5826_v47  ;;  %5192 = vmatprep.subr.bf16.mxu1 %v5826_v47 }
 0x423   :  { %5165 = vmatmul.mubr.msk.bf16.vlgmr.msra.gmra.mrb[44].mxu0 %vm516_vm3, %v1431_v25 }
 0x424   :  { %5175 = vmatpush3.bf16.msra.mxu0 %v1649_v3  ;;  %5176 = vmatprep.mubr.msk.bf16.mxu0 %vm5827_vm2, %v5826_v47 }
 0x425   :  { %5186 = vmatprep.subr.bf16.mxu0 %v5826_v47 }
 0x426   :  { %2182 = vrot.lane.b32.xlu0 %v6101_v60, %s5825_s26 }
 0x44c   :  { %v1366_v61 = vpop.xlane.xlu1 %1365 }
 0x44d   :  { %5721 = vrcp.f32 %v1366_v61  ;;  %v1363_v63 = vpop.xlane.xlu0 %1362 }
 0x44e   :  { %5723 = vrcp.f32 %v1363_v63 }
 0x454   :  { %v1372_v13 = vpop.xlane.xlu1 %1371 }
 0x455   :  { %5725 = vrcp.f32 %v1372_v13  ;;  %v1369_v6 = vpop.xlane.xlu0 %1368 }
 0x456   :  { %5727 = vrcp.f32 %v1369_v6 }
 0x457   :  { %v5722_v4 = vpop.eup %5721 }
 0x458   :  { %v5724_v7 = vpop.eup %5723  ;;  %v1408_v53 = vmul.f32 %v5722_v4, %v6235_v29 }
 0x459   :  { %v1406_v22 = vmul.f32 %v5724_v7, %v6237_v11 }
 0x45a   :  { %v1434_v49 = vpack.c.bf16 %v1408_v53, %v1408_v53 }
 0x45b   :  { %v1433_v21 = vpack.c.bf16 %v1406_v22, %v1406_v22 }
 0x45c   :  { %5183 = vmatmul.mubr.msk.bf16.vlgmr.msra.gmra.mrb[48].mxu1 %vm516_vm3, %v1434_v49  ;;  %v1378_v60 = vpop.xlane.xlu0 %1377 }
 0x45d   :  { %5193 = vmatpush3.bf16.msra.mxu1 %v1796_v54  ;;  %v1375_v55 = vpop.xlane.xlu1 %1374  ;;  %5177 = vmatmul.mubr.msk.bf16.vlgmr.msra.gmra.mrb[48].mxu0 %vm516_vm3, %v1433_v21  ;;  %5729 = vrcp.f32 %v1378_v60 }
 0x45e   :  { %5731 = vrcp.f32 %v1375_v55  ;;  %5187 = vmatpush3.bf16.msra.mxu0 %v1747_v48  ;;  %5188 = vmatprep.mubr.msk.bf16.mxu0 %vm5827_vm2, %v5826_v47 }
 0x45f   :  { %v5726_v29 = vpop.eup %5725  ;;  %5194 = vmatprep.mubr.msk.bf16.mxu1 %vm5827_vm2, %v5826_v47  ;;  %5198 = vmatprep.subr.bf16.mxu0 %v5826_v47 }
 0x460   :  { %v5728_v0 = vpop.eup %5727  ;;  %5204 = vmatprep.subr.bf16.mxu1 %v5826_v47  ;;  %v1412_v2 = vmul.f32 %v5726_v29, %v6245_v24 }
 0x461   :  { %v1410_v11 = vmul.f32 %v5728_v0, %v6247_v51  ;;  %v2036_v3 = vpop.permute.xlu1 %2035 }
 0x462   :  { %v1436_v9 = vpack.c.bf16 %v1412_v2, %v1412_v2  ;;  %v2041_v49 = vsel %vm1451_vm4, %v2036_v3, 0  ;;  %v6390_v2 = vld [vmem:[%s7079_s3 + $0x10] sm:$0xff]  }
 0x463   :  { %v1435_v12 = vpack.c.bf16 %v1410_v11, %v1410_v11 }
 0x464   :  { %5195 = vmatmul.mubr.msk.bf16.vlgmr.msra.gmra.mrb[52].mxu1 %vm516_vm3, %v1436_v9  ;;  %v1384_v8 = vpop.xlane.xlu0 %1383 }
 0x465   :  { %5189 = vmatmul.mubr.msk.bf16.vlgmr.msra.gmra.mrb[52].mxu0 %vm516_vm3, %v1435_v12  ;;  %5205 = vmatpush3.bf16.msra.mxu1 %v1894_v58  ;;  %5733 = vrcp.f32 %v1384_v8  ;;  %v6406_v8 = vld [vmem:[%s7079_s3 + $0x18] sm:$0xff]   ;;  %s5831_s3 = smov 8  }
 0x466   :  { %5199 = vmatpush3.bf16.msra.mxu0 %v1845_v62  ;;  %5200 = vmatprep.mubr.msk.bf16.mxu0 %vm5827_vm2, %v5826_v47 }
 0x467   :  { %v5730_v24 = vpop.eup %5729  ;;  %5206 = vmatprep.mubr.msk.bf16.mxu1 %vm5827_vm2, %v5826_v47  ;;  %5210 = vmatprep.subr.bf16.mxu0 %v5826_v47 }
 0x468   :  { %v5732_v5 = vpop.eup %5731  ;;  %5216 = vmatprep.subr.bf16.mxu1 %v5826_v47  ;;  %v1416_v51 = vmul.f32 %v5730_v24, %v6254_v59  ;;  %v2085_v57 = vpop.permute.xlu0 %2084 }
 0x469   :  { %v1414_v10 = vmul.f32 %v5732_v5, %v6256_v15  ;;  %v2090_v19 = vsel %vm1451_vm4, %v2085_v57, 0 }
 0x46a   :  { %v1438_v16 = vpack.c.bf16 %v1416_v51, %v1416_v51 }
 0x46b   :  { %v1437_v18 = vpack.c.bf16 %v1414_v10, %v1414_v10 }
 0x46c   :  { %5207 = vmatmul.mubr.msk.bf16.vlgmr.msra.gmra.mrb[56].mxu1 %vm516_vm3, %v1438_v16 }
 0x46d   :  { %5201 = vmatmul.mubr.msk.bf16.vlgmr.msra.gmra.mrb[56].mxu0 %vm516_vm3, %v1437_v18  ;;  %5217 = vmatpush3.bf16.msra.mxu1 %v1992_v1 }
 0x46e   :  { %5211 = vmatpush3.bf16.msra.mxu0 %v1943_v50  ;;  %5218 = vmatprep.mubr.msk.bf16.mxu1 %vm5827_vm2, %v5826_v47 }
 0x46f   :  { %v5734_v59 = vpop.eup %5733  ;;  %5228 = vmatprep.subr.bf16.mxu1 %v5826_v47  ;;  %5212 = vmatprep.mubr.msk.bf16.mxu0 %vm5827_vm2, %v5826_v47 }
 0x470   :  { %v1420_v15 = vmul.f32 %v5734_v59, %v6262_v56  ;;  %5222 = vmatprep.subr.bf16.mxu0 %v5826_v47 }
 0x472   :  { %v1440_v25 = vpack.c.bf16 %v1420_v15, %v1420_v15 }
 0x474   :  { %5219 = vmatmul.mubr.msk.bf16.vlgmr.msra.gmra.mrb[60].mxu1 %vm516_vm3, %v1440_v25 }
 0x475   :  { %5229 = vmatpush3.bf16.msra.mxu1 %v2090_v19  ;;  %5230 = vmatprep.mubr.msk.bf16.mxu1 %vm5827_vm2, %v5826_v47 }
 0x476   :  { %5240 = vmatprep.subr.bf16.mxu1 %v5826_v47 }
 0x492   :  { %v1381_v61 = vpop.xlane.xlu1 %1380 }
 0x493   :  { %5735 = vrcp.f32 %v1381_v61 }
 0x496   :  { %v1387_v63 = vpop.xlane.xlu1 %1386 }
 0x497   :  { %5737 = vrcp.f32 %v1387_v63 }
 0x499   :  { %v1390_v56 = vpop.xlane.xlu0 %1389 }
 0x49a   :  { %5739 = vrcp.f32 %v1390_v56  ;;  %v1393_v13 = vpop.xlane.xlu1 %1392 }
 0x49d   :  { %v5736_v6 = vpop.eup %5735  ;;  %v1396_v4 = vpop.xlane.xlu0 %1395 }
 0x49e   :  { %5741 = vrcp.f32 %v1396_v4  ;;  %v1418_v7 = vmul.f32 %v5736_v6, %v6277_v17  ;;  %v2134_v17 = vpop.permute.xlu1 %2133 }
 0x49f   :  { %5743 = vrcp.f32 %v1393_v13  ;;  %v2139_v12 = vsel %vm1451_vm4, %v2134_v17, 0 }
 0x4a0   :  { %v1439_v53 = vpack.c.bf16 %v1418_v7, %v1418_v7 }
 0x4a1   :  { %v5738_v22 = vpop.eup %5737  ;;  %v2183_v48 = vpop.permute.xlu0 %2182 }
 0x4a2   :  { %5213 = vmatmul.mubr.msk.bf16.vlgmr.msra.gmra.mrb[60].mxu0 %vm516_vm3, %v1439_v53  ;;  %v1422_v54 = vmul.f32 %v5738_v22, %v6281_v30  ;;  %v2188_v9 = vsel %vm1451_vm4, %v2183_v48, 0 }
 0x4a3   :  { %5223 = vmatpush3.bf16.msra.mxu0 %v2041_v49  ;;  %5224 = vmatprep.mubr.msk.bf16.mxu0 %vm5827_vm2, %v5826_v47 }
 0x4a4   :  { %v5740_v21 = vpop.eup %5739  ;;  %5234 = vmatprep.subr.bf16.mxu0 %v5826_v47  ;;  %v1441_v0 = vpack.c.bf16 %v1422_v54, %v1422_v54 }
 0x4a5   :  { %v1424_v60 = vmul.f32 %v5740_v21, %v6289_v35 }
 0x4a7   :  { %v1442_v55 = vpack.c.bf16 %v1424_v60, %v1424_v60 }
 0x4a8   :  { %v5742_v29 = vpop.eup %5741 }
 0x4a9   :  { %v5744_v11 = vpop.eup %5743  ;;  %5231 = vmatmul.mubr.msk.bf16.vlgmr.msra.gmra.mrb[64].mxu1 %vm516_vm3, %v1442_v55  ;;  %v1428_v30 = vmul.f32 %v5742_v29, %v6295_v52 }
 0x4aa   :  { %5225 = vmatmul.mubr.msk.bf16.vlgmr.msra.gmra.mrb[64].mxu0 %vm516_vm3, %v1441_v0  ;;  %5241 = vmatpush3.bf16.msra.mxu1 %v2188_v9  ;;  %v1426_v35 = vmul.f32 %v5744_v11, %v6287_v14 }
 0x4ab   :  { %5235 = vmatpush3.bf16.msra.mxu0 %v2139_v12  ;;  %5236 = vmatprep.mubr.msk.bf16.mxu0 %vm5827_vm2, %v5826_v47  ;;  %v1444_v58 = vpack.c.bf16 %v1428_v30, %v1428_v30 }
 0x4ac   :  { %5242 = vmatprep.mubr.msk.bf16.mxu1 %vm5827_vm2, %v5826_v47  ;;  %5254 = vmatprep.subr.bf16.mxu1 %v6390_v2  ;;  %v1443_v62 = vpack.c.bf16 %v1426_v35, %v1426_v35 }
 0x4b1   :  { %5243 = vmatmul.mubr.msk.bf16.vlgmr.msra.gmra.mrb[68].mxu1 %vm516_vm3, %v1444_v58 }
 0x4b2   :  { %5237 = vmatmul.mubr.msk.bf16.vlgmr.msra.gmra.mrb[68].mxu0 %vm516_vm3, %v1443_v62  ;;  %5255 = vmatpush3.bf16.msra.mxu1 %v6390_v2 }
 0x4b3   :  { %5258 = vmatprep.mubr.msk.bf16.mxu1 %vm277_vm1, %v5977_v45  ;;  %5256 = vmatprep.subr.bf16.mxu1 %v6406_v8 }
 0x4b6   :  { %5257 = vmatpush3.bf16.msra.mxu1 %v6406_v8 }
 0x4b7   :  { %5270 = vmatprep.subr.bf16.mxu1 %v5826_v47 }
 0x4b9   :  { %5259 = vmatmul.mubr.msk.bf16.vlgmr.msra.gmra.mrb[72].mxu1 %vm277_vm1, %v5983_v46 }
 0x4ba   :  { %5272 = vmatprep.mubr.msk.bf16.mxu1 %vm5827_vm2, %v5826_v47 }
 0x4e7   :  { %v6420_v14 = vpop.f32.mrb[40].mxu1 }
 0x4e8   :  { %v5160_v52 = vpop.f32.mrb[41].mxu1 }
 0x4e9   :  { %v1541_v24 = vpop.f32.mrb[42].mxu1 }
 0x4ea   :  { %v5161_v5 = vpop.f32.mrb[43].mxu1 }
 0x4ee   :  { %v6422_v51 = vpop.f32.mrb[40].mxu0 }
 0x4ef   :  { %v6424_v45 = vpop.f32.mrb[44].mxu1  ;;  %v5154_v10 = vpop.f32.mrb[41].mxu0 }
 0x4f0   :  { %v5172_v16 = vpop.f32.mrb[45].mxu1  ;;  %v1492_v18 = vpop.f32.mrb[42].mxu0 }
 0x4f1   :  { %v1639_v1 = vpop.f32.mrb[46].mxu1  ;;  %v5155_v50 = vpop.f32.mrb[43].mxu0 }
 0x4f2   :  { %v5173_v59 = vpop.f32.mrb[47].mxu1 }
 0x4f3   :  { %v5677_v59 = vld [vmem:[%s7082_s4] sm:$0xff]  }
 0x4f4   :  { %5246 = vmatprep.subr.bf16.mxu0 %v5677_v59 }
 0x4f5   :  { %5247 = vmatpush3.bf16.msra.mxu0 %v5677_v59 }
 0x4f6   :  { %v6426_v15 = vpop.f32.mrb[44].mxu0 }
 0x4f7   :  { %v5166_v46 = vpop.f32.mrb[45].mxu0 }
 0x4f8   :  { %v1590_v57 = vpop.f32.mrb[46].mxu0 }
 0x4f9   :  { %v5167_v25 = vpop.f32.mrb[47].mxu0 }
 0x4fa   :  { %v5678_v25 = vld [vmem:[%s7082_s4 + $0x8] sm:$0xff]  }
 0x4fb   :  { %5248 = vmatprep.subr.bf16.mxu0 %v5678_v25 }
 0x4fc   :  { %5249 = vmatpush3.bf16.msra.mxu0 %v5678_v25 }
 0x52f   :  { %v1734_v19 = vpop.f32.mrb[48].mxu1 }
 0x530   :  { %v1685_v3 = vpop.f32.mrb[48].mxu0  ;;  %v5184_v61 = vpop.f32.mrb[49].mxu1 }
 0x531   :  { %v5541_v63 = vpack.i.bf16 %v1734_v19, %v1685_v3  ;;  %v5178_v56 = vpop.f32.mrb[49].mxu0  ;;  %v1737_v13 = vpop.f32.mrb[50].mxu1 }
 0x532   :  { %v1688_v6 = vpop.f32.mrb[50].mxu0  ;;  %v5185_v4 = vpop.f32.mrb[51].mxu1 }
 0x533   :  { %5542 = vrot.lane.b32.xlu1 %v5541_v63, %s5831_s3  ;;  %v5179_v7 = vpop.f32.mrb[51].mxu0 }
 0x537   :  { %v1832_v53 = vpop.f32.mrb[52].mxu1 }
 0x538   :  { %v1783_v22 = vpop.f32.mrb[52].mxu0  ;;  %v5196_v49 = vpop.f32.mrb[53].mxu1 }
 0x539   :  { %v5546_v21 = vpack.i.bf16 %v1832_v53, %v1783_v22  ;;  %v5190_v54 = vpop.f32.mrb[53].mxu0  ;;  %v1835_v60 = vpop.f32.mrb[54].mxu1 }
 0x53a   :  { %v1786_v48 = vpop.f32.mrb[54].mxu0  ;;  %v5197_v17 = vpop.f32.mrb[55].mxu1 }
 0x53b   :  { %5547 = vrot.lane.b32.xlu0 %v5546_v21, %s5831_s3  ;;  %v5191_v55 = vpop.f32.mrb[55].mxu0  ;;  %v4802_v17 = vld [vmem:[%s7080_s6 + $0x1] ss:$0 sm:$0xff] }
 0x53f   :  { %v1930_v29 = vpop.f32.mrb[56].mxu1 }
 0x540   :  { %v1881_v0 = vpop.f32.mrb[56].mxu0  ;;  %v5208_v11 = vpop.f32.mrb[57].mxu1 }
 0x541   :  { %v5551_v9 = vpack.i.bf16 %v1930_v29, %v1881_v0  ;;  %v5202_v12 = vpop.f32.mrb[57].mxu0  ;;  %v1933_v30 = vpop.f32.mrb[58].mxu1 }
 0x542   :  { %v1884_v35 = vpop.f32.mrb[58].mxu0  ;;  %v5209_v58 = vpop.f32.mrb[59].mxu1 }
 0x543   :  { %5552 = vrot.lane.b32.xlu1 %v5551_v9, %s5832_s17  ;;  %v5203_v62 = vpop.f32.mrb[59].mxu0 }
 0x547   :  { %v2028_v52 = vpop.f32.mrb[60].mxu1 }
 0x548   :  { %v5220_v24 = vpop.f32.mrb[61].mxu1 }
 0x549   :  { %v2031_v5 = vpop.f32.mrb[62].mxu1 }
 0x54a   :  { %v5221_v10 = vpop.f32.mrb[63].mxu1 }
 0x575   :  { %v1979_v16 = vpop.f32.mrb[60].mxu0 }
 0x576   :  { %v5556_v18 = vpack.i.bf16 %v2028_v52, %v1979_v16  ;;  %v5214_v1 = vpop.f32.mrb[61].mxu0 }
 0x577   :  { %v1982_v50 = vpop.f32.mrb[62].mxu0 }
 0x578   :  { %5557 = vrot.lane.b32.xlu0 %v5556_v18, %s5832_s17  ;;  %v5215_v46 = vpop.f32.mrb[63].mxu0 }
 0x57c   :  { %v2126_v57 = vpop.f32.mrb[64].mxu1 }
 0x57d   :  { %v2077_v19 = vpop.f32.mrb[64].mxu0  ;;  %v5232_v3 = vpop.f32.mrb[65].mxu1 }
 0x57e   :  { %v5561_v61 = vpack.i.bf16 %v2126_v57, %v2077_v19  ;;  %v5226_v63 = vpop.f32.mrb[65].mxu0  ;;  %v2129_v56 = vpop.f32.mrb[66].mxu1 }
 0x57f   :  { %v2080_v13 = vpop.f32.mrb[66].mxu0  ;;  %v5233_v6 = vpop.f32.mrb[67].mxu1 }
 0x580   :  { %5562 = vrot.lane.b32.xlu1 %v5561_v61, %s5833_s21  ;;  %v5227_v4 = vpop.f32.mrb[67].mxu0 }
 0x584   :  { %v2224_v7 = vpop.f32.mrb[68].mxu1  ;;  %2442 = vrot.lane.b32.xlu1 %v6390_v2, %s5825_s26 }
 0x585   :  { %v2175_v53 = vpop.f32.mrb[68].mxu0  ;;  %v5244_v22 = vpop.f32.mrb[69].mxu1 }
 0x586   :  { %v5566_v49 = vpack.i.bf16 %v2224_v7, %v2175_v53  ;;  %v5238_v21 = vpop.f32.mrb[69].mxu0  ;;  %v2227_v54 = vpop.f32.mrb[70].mxu1 }
 0x587   :  { %v2178_v60 = vpop.f32.mrb[70].mxu0  ;;  %v5245_v48 = vpop.f32.mrb[71].mxu1 }
 0x588   :  { %5567 = vrot.lane.b32.xlu0 %v5566_v49, %s5833_s21  ;;  %v5239_v55 = vpop.f32.mrb[71].mxu0  ;;  %2449 = vrot.lane.b32.xlu1 %v4802_v17, %s5825_s26 }
 0x58c   :  { %v5260_v29 = vpop.f32.mrb[72].mxu1  ;;  %2444 = vrot.lane.b32.xlu0 %v6406_v8, %s5825_s26 }
 0x58d   :  { %v2436_v2 = vadd.f32 %v5260_v29, %v4802_v17  ;;  %v2427_v0 = vpop.f32.mrb[73].mxu1 }
 0x58e   :  { %v2428_v11 = vadd.f32 %v4802_v17, %v2427_v0  ;;  %v5261_v9 = vpop.f32.mrb[74].mxu1 }
 0x58f   :  { %v2439_v12 = vadd.f32 %v5261_v9, %v4802_v17  ;;  %v2430_v30 = vpop.f32.mrb[75].mxu1  ;;  %v6448_v58 = vmul.f32 0.35355338, %v2436_v2 }
 0x590   :  { %v2431_v35 = vadd.f32 %v4802_v17, %v2430_v30  ;;  %v6452_v52 = vmul.f32 0.35355338, %v2428_v11 }
 0x591   :  { %v6450_v62 = vmul.f32 0.35355338, %v2439_v12 }
 0x592   :  { %v6454_v24 = vmul.f32 0.35355338, %v2431_v35 }
 0x593   :  { %v5586_v5 = vpack.i.bf16 %v6450_v62, %v6448_v58 }
 0x594   :  { %v5576_v8 = vpack.i.bf16 %v6454_v24, %v6452_v52 }
 0x596   :  { %5577 = vrot.lane.b32.xlu1 %v5576_v8, %s5828_s10 }
 0x59a   :  { %5587 = vrot.lane.b32.xlu1 %v5586_v5, %s5828_s10 }
 0x59e   :  { %5597 = vrot.lane.b32.xlu1 %v5576_v8, %s5829_s11 }
 0x5a2   :  { %5607 = vrot.lane.b32.xlu1 %v5586_v5, %s5829_s11 }
 0x5a5   :  { %v5543_v10 = vpop.permute.xlu1 %5542 }
 0x5a6   :  { %5617 = vrot.lane.b32.xlu1 %v5576_v8, %s5830_s12  ;;  %v5545_v18 = vunpack.i.h.bf16 %v5543_v10  ;;  %v5544_v1 = vunpack.i.l.bf16 %v5543_v10 }
 0x5a8   :  { %v2279_v25 = vsel %vm516_vm3, %v6420_v14, %v5545_v18  ;;  %v2278_v19 = vsel %vm516_vm3, %v6422_v51, %v5544_v1 }
 0x5aa   :  { %5627 = vrot.lane.b32.xlu1 %v5586_v5, %s5830_s12 }
 0x5ad   :  { %v5548_v46 = vpop.permute.xlu0 %5547 }
 0x5ae   :  { %v5550_v22 = vunpack.i.h.bf16 %v5548_v46  ;;  %v5549_v49 = vunpack.i.l.bf16 %v5548_v46 }
 0x5b0   :  { %v2281_v54 = vsel %vm516_vm3, %v6424_v45, %v5550_v22  ;;  %v2280_v60 = vsel %vm516_vm3, %v6426_v15, %v5549_v49 }
 0x5b5   :  { %v5553_v16 = vpop.permute.xlu1 %5552 }
 0x5b6   :  { %v5555_v50 = vunpack.i.h.bf16 %v5553_v16  ;;  %v5554_v59 = vunpack.i.l.bf16 %v5553_v16 }
 0x5b8   :  { %v2284_v63 = vsel %vm2282_vm5, %v2279_v25, %v5555_v50  ;;  %v2283_v56 = vsel %vm2282_vm5, %v2278_v19, %v5554_v59 }
 0x5ea   :  { %v5558_v13 = vpop.permute.xlu0 %5557 }
 0x5eb   :  { %v5560_v14 = vunpack.i.h.bf16 %v5558_v13  ;;  %v5559_v21 = vunpack.i.l.bf16 %v5558_v13 }
 0x5ed   :  { %v2286_v55 = vsel %vm2282_vm5, %v2281_v54, %v5560_v14  ;;  %v2285_v29 = vsel %vm2282_vm5, %v2280_v60, %v5559_v21 }
 0x5f2   :  { %v5563_v57 = vpop.permute.xlu1 %5562 }
 0x5f3   :  { %v5565_v3 = vunpack.i.h.bf16 %v5563_v57  ;;  %v5564_v61 = vunpack.i.l.bf16 %v5563_v57 }
 0x5f5   :  { %v2289_v6 = vsel %vm2287_vm6, %v2284_v63, %v5565_v3  ;;  %v2288_v4 = vsel %vm2287_vm6, %v2283_v56, %v5564_v61  ;;  %v2545_v61 = vpack.c.bf16 %v6452_v52, %v6452_v52  ;;  %v2546_v56 = vpack.c.bf16 %v6454_v24, %v6454_v24 }
 0x5f6   :  { %v2292_v7 = vpack.c.bf16 %v2289_v6, %v2288_v4  ;;  %v2443_v53 = vpop.permute.xlu1 %2442  ;;  %v2547_v24 = vpack.c.bf16 %v6448_v58, %v6448_v58  ;;  %v2548_v6 = vpack.c.bf16 %v6450_v62, %v6450_v62 }
 0x5f7   :  { %5262 = vmatprep.subr.bf16.mxu0 %v2443_v53 }
 0x5f8   :  { %5250 = vmatprep.mubr.msk.bf16.mxu0 %vm277_vm1, %v2292_v7 }
 0x5fa   :  { %v5568_v51 = vpop.permute.xlu0 %5567  ;;  %v2450_v35 = vpop.permute.xlu1 %2449 }
 0x5fb   :  { %v5570_v48 = vunpack.i.h.bf16 %v5568_v51  ;;  %v5569_v17 = vunpack.i.l.bf16 %v5568_v51 }
 0x5fd   :  { %v2291_v2 = vsel %vm2287_vm6, %v2286_v55, %v5570_v48  ;;  %v2290_v0 = vsel %vm2287_vm6, %v2285_v29, %v5569_v17 }
 0x5fe   :  { %v2293_v11 = vpack.c.bf16 %v2291_v2, %v2290_v0  ;;  %v2445_v9 = vpop.permute.xlu0 %2444 }
 0x600   :  { %5251 = vmatmul.mubr.msk.bf16.vlgmr.msra.gmra.mrb[72].mxu0 %vm277_vm1, %v2293_v11 }
 0x601   :  { %5263 = vmatpush3.bf16.msra.mxu0 %v2443_v53  ;;  %5266 = vmatprep.mubr.msk.bf16.mxu0 %vm277_vm1, %v5971_v44 }
 0x602   :  { %5264 = vmatprep.subr.bf16.mxu0 %v2445_v9 }
 0x605   :  { %5265 = vmatpush3.bf16.msra.mxu0 %v2445_v9 }
 0x606   :  { %5276 = vmatprep.subr.bf16.mxu0 %v5826_v47 }
 0x608   :  { %5267 = vmatmul.mubr.msk.bf16.vlgmr.msra.gmra.mrb[76].mxu0 %vm277_vm1, %v5963_v41  ;;  %v5578_v22 = vpop.permute.xlu1 %5577 }
 0x609   :  { %5278 = vmatprep.mubr.msk.bf16.mxu0 %vm5827_vm2, %v5826_v47  ;;  %v5580_v60 = vunpack.i.h.bf16 %v5578_v22  ;;  %v5579_v55 = vunpack.i.l.bf16 %v5578_v22 }
 0x60b   :  { %v2550_v2 = vpack.c.bf16 %v5580_v60, %v5580_v60  ;;  %v2549_v0 = vpack.c.bf16 %v5579_v55, %v5579_v55 }
 0x60c   :  { %v5588_v9 = vpop.permute.xlu1 %5587 }
 0x6d3   :  { %v6491_v45 = vpop.f32.mrb[72].mxu0 }
 0x6d4   :  { %v6493_v15 = vpop.f32.mrb[73].mxu0 }
 0x6d5   :  { %v6495_v12 = vpop.f32.mrb[74].mxu0 }
 0x6d6   :  { %v6497_v30 = vpop.f32.mrb[75].mxu0 }
 0x6db   :  { %v5268_v44 = vpop.f32.mrb[76].mxu0 }
 0x6dc   :  { %v2495_v5 = vadd.f32 %v5268_v44, %v2450_v35  ;;  %v2486_v8 = vpop.f32.mrb[77].mxu0 }
 0x6dd   :  { %v2487_v10 = vadd.f32 %v2486_v8, %v2450_v35  ;;  %v5269_v16 = vpop.f32.mrb[78].mxu0  ;;  %v5590_v8 = vunpack.i.h.bf16 %v5588_v9 }
 0x6de   :  { %v2498_v18 = vadd.f32 %v5269_v16, %v2450_v35  ;;  %v2489_v1 = vpop.f32.mrb[79].mxu0  ;;  %v2603_v41 = vpack.c.bf16 %v2495_v5, %v2495_v5 }
 0x6df   :  { %v2490_v50 = vadd.f32 %v2489_v1, %v2450_v35  ;;  %v2601_v59 = vpack.c.bf16 %v2487_v10, %v2487_v10 }
 0x6e0   :  { %3644 = vrot.lane.b32.xlu1 %v2603_v41, %s5825_s26  ;;  %v5581_v46 = vpack.i.bf16 %v2498_v18, %v2495_v5  ;;  %v2604_v63 = vpack.c.bf16 %v2498_v18, %v2498_v18  ;;  %v2713_v13 = vsel %vm516_vm3, %v2603_v41, 0  ;;  %v2552_v41 = vpack.c.bf16 %v5590_v8, %v5590_v8 }
 0x6e1   :  { %v2621_v57 = vsel %vm516_vm3, %v2601_v59, 0  ;;  %v5571_v25 = vpack.i.bf16 %v2490_v50, %v2487_v10  ;;  %v2602_v19 = vpack.c.bf16 %v2490_v50, %v2490_v50  ;;  %v5589_v10 = vunpack.i.l.bf16 %v5588_v9 }
 0x6e2   :  { %5271 = vmatpush3.bf16.xpose.msra.mxu1 %v2621_v57  ;;  %v2759_v52 = vsel %vm516_vm3, %v2604_v63, 0 }
 0x6e3   :  { %5572 = vrot.lane.b32.xlu0 %v5571_v25, %s5828_s10  ;;  %v2667_v3 = vsel %vm516_vm3, %v2602_v19, 0  ;;  %5282 = vmatprep.subr.bf16.mxu1 %v5826_v47  ;;  %v2551_v50 = vpack.c.bf16 %v5589_v10, %v5589_v10 }
 0x6e4   :  { %5277 = vmatpush3.bf16.xpose.msra.mxu0 %v2667_v3  ;;  %3546 = vrot.lane.b32.xlu1 %v2601_v59, %s5825_s26  ;;  %v5598_v59 = vpop.permute.xlu1 %5597 }
 0x6e5   :  { %5288 = vmatprep.subr.bf16.mxu0 %v5826_v47  ;;  %v5600_v3 = vunpack.i.h.bf16 %v5598_v59 }
 0x6e7   :  { %5582 = vrot.lane.b32.xlu0 %v5581_v46, %s5828_s10 }
 0x6e9   :  { %5273 = vmatmul.mubr.msk.bf16.vlgmr.msra.gmra.mrb[76].mxu1 %vm516_vm3, %v2545_v61  ;;  %v5599_v61 = vunpack.i.l.bf16 %v5598_v59 }
 0x6ea   :  { %5283 = vmatpush3.bf16.xpose.msra.mxu1 %v2713_v13  ;;  %5284 = vmatprep.mubr.msk.bf16.mxu1 %vm5827_vm2, %v5826_v47 }
 0x6eb   :  { %5279 = vmatmul.mubr.msk.bf16.vlgmr.msra.gmra.mrb[80].mxu0 %vm516_vm3, %v2546_v56  ;;  %5592 = vrot.lane.b32.xlu0 %v5571_v25, %s5829_s11 }
 0x6ec   :  { %5289 = vmatpush3.bf16.xpose.msra.mxu0 %v2759_v52  ;;  %5290 = vmatprep.mubr.msk.bf16.mxu0 %vm5827_vm2, %v5826_v47  ;;  %v2554_v52 = vpack.c.bf16 %v5600_v3, %v5600_v3 }
 0x6ed   :  { %5294 = vmatprep.subr.bf16.mxu1 %v5826_v47  ;;  %5300 = vmatprep.subr.bf16.mxu0 %v5826_v47 }
 0x6ef   :  { %5602 = vrot.lane.b32.xlu0 %v5581_v46, %s5829_s11 }
 0x6f1   :  { %5285 = vmatmul.mubr.msk.bf16.vlgmr.msra.gmra.mrb[80].mxu1 %vm516_vm3, %v2547_v24  ;;  %v2553_v24 = vpack.c.bf16 %v5599_v61, %v5599_v61 }
 0x6f2   :  { %5296 = vmatprep.mubr.msk.bf16.mxu1 %vm5827_vm2, %v5826_v47 }
 0x6f3   :  { %5291 = vmatmul.mubr.msk.bf16.vlgmr.msra.gmra.mrb[84].mxu0 %vm516_vm3, %v2548_v6  ;;  %5612 = vrot.lane.b32.xlu0 %v5571_v25, %s5830_s12  ;;  %v5608_v6 = vpop.permute.xlu1 %5607 }
 0x6f4   :  { %5302 = vmatprep.mubr.msk.bf16.mxu0 %vm5827_vm2, %v5826_v47  ;;  %v5609_v22 = vunpack.i.l.bf16 %v5608_v6 }
 0x6f6   :  { %v2555_v60 = vpack.c.bf16 %v5609_v22, %v5609_v22 }
 0x6f7   :  { %5622 = vrot.lane.b32.xlu0 %v5581_v46, %s5830_s12 }
 0x6fb   :  { %3693 = vrot.lane.b32.xlu0 %v2604_v63, %s5825_s26 }
 0x6ff   :  { %3595 = vrot.lane.b32.xlu0 %v2602_v19, %s5825_s26 }
 0x755   :  { %v5573_v58 = vpop.permute.xlu0 %5572 }
 0x756   :  { %v5575_v62 = vunpack.i.h.bf16 %v5573_v58  ;;  %v5574_v4 = vunpack.i.l.bf16 %v5573_v58 }
 0x758   :  { %v2606_v7 = vpack.c.bf16 %v5575_v62, %v5575_v62  ;;  %v2605_v53 = vpack.c.bf16 %v5574_v4, %v5574_v4 }
 0x759   :  { %v5583_v49 = vpop.permute.xlu0 %5582 }
 0x75a   :  { %v5585_v14 = vunpack.i.h.bf16 %v5583_v49  ;;  %v5584_v21 = vunpack.i.l.bf16 %v5583_v49  ;;  %v2805_v51 = vsel %vm516_vm3, %v2605_v53, 0  ;;  %v2851_v54 = vsel %vm516_vm3, %v2606_v7, 0 }
 0x75b   :  { %5295 = vmatpush3.bf16.xpose.msra.mxu1 %v2805_v51  ;;  %5301 = vmatpush3.bf16.xpose.msra.mxu0 %v2851_v54 }
 0x75c   :  { %v2608_v48 = vpack.c.bf16 %v5585_v14, %v5585_v14  ;;  %v2607_v17 = vpack.c.bf16 %v5584_v21, %v5584_v21  ;;  %5312 = vmatprep.subr.bf16.mxu0 %v5826_v47  ;;  %5306 = vmatprep.subr.bf16.mxu1 %v5826_v47  ;;  %v5618_v21 = vpop.permute.xlu1 %5617 }
 0x75d   :  { %v5593_v29 = vpop.permute.xlu0 %5592 }
 0x75e   :  { %3889 = vrot.lane.b32.xlu0 %v2608_v48, %s5825_s26  ;;  %3840 = vrot.lane.b32.xlu1 %v2607_v17, %s5825_s26  ;;  %v5594_v11 = vunpack.i.l.bf16 %v5593_v29  ;;  %v5595_v35 = vunpack.i.h.bf16 %v5593_v29  ;;  %v2897_v44 = vsel %vm516_vm3, %v2607_v17, 0  ;;  %v2943_v5 = vsel %vm516_vm3, %v2608_v48, 0 }
 0x760   :  { %v2609_v16 = vpack.c.bf16 %v5594_v11, %v5594_v11  ;;  %v6555_v18 = vpack.c.bf16 %v5595_v35, %v5595_v35  ;;  %v5628_v11 = vpop.permute.xlu1 %5627 }
 0x761   :  { %v5603_v1 = vpop.permute.xlu0 %5602 }
 0x762   :  { %3791 = vrot.lane.b32.xlu0 %v2606_v7, %s5825_s26  ;;  %5303 = vmatmul.mubr.msk.bf16.vlgmr.msra.gmra.mrb[88].mxu0 %vm516_vm3, %v2550_v2  ;;  %v5605_v46 = vunpack.i.h.bf16 %v5603_v1  ;;  %v5604_v57 = vunpack.i.l.bf16 %v5603_v1  ;;  %v2989_v25 = vsel %vm516_vm3, %v2609_v16, 0  ;;  %v3035_v19 = vsel %vm516_vm3, %v6555_v18, 0 }
 0x763   :  { %3742 = vrot.lane.b32.xlu1 %v2605_v53, %s5825_s26  ;;  %5297 = vmatmul.mubr.msk.bf16.vlgmr.msra.gmra.mrb[84].mxu1 %vm516_vm3, %v2549_v0  ;;  %v5610_v53 = vunpack.i.h.bf16 %v5608_v6  ;;  %v5620_v2 = vunpack.i.h.bf16 %v5618_v21  ;;  %v5619_v0 = vunpack.i.l.bf16 %v5618_v21 }
 0x764   :  { %5307 = vmatpush3.bf16.xpose.msra.mxu1 %v2897_v44  ;;  %5313 = vmatpush3.bf16.xpose.msra.mxu0 %v2943_v5  ;;  %v6569_v63 = vpack.c.bf16 %v5605_v46, %v5605_v46  ;;  %v6571_v56 = vpack.c.bf16 %v5604_v57, %v5604_v57  ;;  %v6605_v8 = vpop.permute.xlu1 %3644 }
 0x765   :  { %5308 = vmatprep.mubr.msk.bf16.mxu1 %vm5827_vm2, %v5826_v47  ;;  %5314 = vmatprep.mubr.msk.bf16.mxu0 %vm5827_vm2, %v5826_v47  ;;  %v5613_v13 = vpop.permute.xlu0 %5612  ;;  %v2556_v54 = vpack.c.bf16 %v5610_v53, %v5610_v53  ;;  %v2558_v44 = vpack.c.bf16 %v5620_v2, %v5620_v2  ;;  %v2557_v5 = vpack.c.bf16 %v5619_v0, %v5619_v0 }
 0x766   :  { %5318 = vmatprep.subr.bf16.mxu1 %v5826_v47  ;;  %5324 = vmatprep.subr.bf16.mxu0 %v5826_v47  ;;  %v5615_v58 = vunpack.i.h.bf16 %v5613_v13  ;;  %v5614_v62 = vunpack.i.l.bf16 %v5613_v13  ;;  %v3081_v4 = vsel %vm516_vm3, %v6571_v56, 0  ;;  %v3127_v7 = vsel %vm516_vm3, %v6569_v63, 0 }
 0x767   :  { %3938 = vrot.lane.b32.xlu1 %v2609_v16, %s5825_s26 }
 0x768   :  { %v6585_v49 = vpack.c.bf16 %v5615_v58, %v5615_v58  ;;  %v6587_v14 = vpack.c.bf16 %v5614_v62, %v5614_v62  ;;  %v3547_v59 = vpop.permute.xlu1 %3546 }
 0x769   :  { %v5623_v51 = vpop.permute.xlu0 %5622 }
 0x76a   :  { %v5625_v48 = vunpack.i.h.bf16 %v5623_v51  ;;  %v5624_v17 = vunpack.i.l.bf16 %v5623_v51  ;;  %v3173_v55 = vsel %vm516_vm3, %v6587_v14, 0  ;;  %v3219_v29 = vsel %vm516_vm3, %v6585_v49, 0 }
 0x76b   :  { %5309 = vmatmul.mubr.msk.bf16.vlgmr.msra.gmra.mrb[88].mxu1 %vm516_vm3, %v2551_v50  ;;  %5315 = vmatmul.mubr.msk.bf16.vlgmr.msra.gmra.mrb[92].mxu0 %vm516_vm3, %v2552_v41  ;;  %v5630_v41 = vunpack.i.h.bf16 %v5628_v11  ;;  %v5629_v50 = vunpack.i.l.bf16 %v5628_v11 }
 0x76c   :  { %5319 = vmatpush3.bf16.xpose.msra.mxu1 %v2989_v25  ;;  %5325 = vmatpush3.bf16.xpose.msra.mxu0 %v3035_v19  ;;  %v6601_v9 = vpack.c.bf16 %v5625_v48, %v5625_v48  ;;  %v6603_v35 = vpack.c.bf16 %v5624_v17, %v5624_v17  ;;  %v3552_v19 = vsel %vm1451_vm4, %v3547_v59, 0 }
 0x76d   :  { %5320 = vmatprep.mubr.msk.bf16.mxu1 %vm5827_vm2, %v5826_v47  ;;  %5326 = vmatprep.mubr.msk.bf16.mxu0 %vm5827_vm2, %v5826_v47  ;;  %v6607_v10 = vpop.permute.xlu0 %3693  ;;  %v2560_v57 = vpack.c.bf16 %v5630_v41, %v5630_v41  ;;  %v2559_v25 = vpack.c.bf16 %v5629_v50, %v5629_v50 }
 0x76e   :  { %5330 = vmatprep.subr.bf16.mxu1 %v5826_v47  ;;  %5336 = vmatprep.subr.bf16.mxu0 %v5826_v47  ;;  %v3265_v16 = vsel %vm516_vm3, %v6603_v35, 0  ;;  %v3311_v1 = vsel %vm516_vm3, %v6601_v9, 0 }
 0x771   :  { %v3596_v46 = vpop.permute.xlu0 %3595 }
 0x772   :  { %v3601_v3 = vsel %vm1451_vm4, %v3596_v46, 0 }
 0x773   :  { %5321 = vmatmul.mubr.msk.bf16.vlgmr.msra.gmra.mrb[92].mxu1 %vm516_vm3, %v2553_v24  ;;  %5327 = vmatmul.mubr.msk.bf16.vlgmr.msra.gmra.mrb[96].mxu0 %vm516_vm3, %v2554_v52 }
 0x774   :  { %5331 = vmatpush3.bf16.xpose.msra.mxu1 %v3081_v4  ;;  %5337 = vmatpush3.bf16.xpose.msra.mxu0 %v3127_v7 }
 0x775   :  { %5332 = vmatprep.mubr.msk.bf16.mxu1 %vm5827_vm2, %v5826_v47  ;;  %5338 = vmatprep.mubr.msk.bf16.mxu0 %vm5827_vm2, %v5826_v47 }
 0x776   :  { %5342 = vmatprep.subr.bf16.mxu1 %v5826_v47  ;;  %5348 = vmatprep.subr.bf16.mxu0 %v5826_v47 }
 0x77b   :  { %5333 = vmatmul.mubr.msk.bf16.vlgmr.msra.gmra.mrb[96].mxu1 %vm516_vm3, %v2555_v60  ;;  %5339 = vmatmul.mubr.msk.bf16.vlgmr.msra.gmra.mrb[100].mxu0 %vm516_vm3, %v2556_v54 }
 0x77c   :  { %5343 = vmatpush3.bf16.xpose.msra.mxu1 %v3173_v55  ;;  %5349 = vmatpush3.bf16.xpose.msra.mxu0 %v3219_v29 }
 0x77d   :  { %5344 = vmatprep.mubr.msk.bf16.mxu1 %vm5827_vm2, %v5826_v47  ;;  %5350 = vmatprep.mubr.msk.bf16.mxu0 %vm5827_vm2, %v5826_v47 }
 0x77e   :  { %5354 = vmatprep.subr.bf16.mxu1 %v5826_v47  ;;  %5360 = vmatprep.subr.bf16.mxu0 %v5826_v47 }
 0x783   :  { %5345 = vmatmul.mubr.msk.bf16.vlgmr.msra.gmra.mrb[100].mxu1 %vm516_vm3, %v2557_v5  ;;  %5351 = vmatmul.mubr.msk.bf16.vlgmr.msra.gmra.mrb[104].mxu0 %vm516_vm3, %v2558_v44 }
 0x784   :  { %5355 = vmatpush3.bf16.xpose.msra.mxu1 %v3265_v16  ;;  %5361 = vmatpush3.bf16.xpose.msra.mxu0 %v3311_v1 }
 0x785   :  { %5356 = vmatprep.mubr.msk.bf16.mxu1 %vm5827_vm2, %v5826_v47  ;;  %5362 = vmatprep.mubr.msk.bf16.mxu0 %vm5827_vm2, %v5826_v47 }
 0x786   :  { %5366 = vmatprep.subr.bf16.mxu1 %v5826_v47  ;;  %5372 = vmatprep.subr.bf16.mxu0 %v5826_v47 }
 0x78b   :  { %5357 = vmatmul.mubr.msk.bf16.vlgmr.msra.gmra.mrb[104].mxu1 %vm516_vm3, %v2559_v25  ;;  %5363 = vmatmul.mubr.msk.bf16.vlgmr.msra.gmra.mrb[108].mxu0 %vm516_vm3, %v2560_v57 }
 0x78c   :  { %5367 = vmatpush3.bf16.msra.mxu1 %v3552_v19  ;;  %5373 = vmatpush3.bf16.msra.mxu0 %v3601_v3 }
 0x78d   :  { %5374 = vmatprep.mubr.msk.bf16.mxu0 %vm5827_vm2, %v5826_v47  ;;  %5384 = vmatprep.subr.bf16.mxu0 %v5826_v47 }
 0x78e   :  { %5368 = vmatprep.mubr.msk.bf16.mxu1 %vm5827_vm2, %v5826_v47  ;;  %5378 = vmatprep.subr.bf16.mxu1 %v5826_v47 }
 0x7bc   :  { %v6631_v61 = vpop.f32.mrb[76].mxu1 }
 0x7bd   :  { %v5274_v13 = vpop.f32.mrb[77].mxu1  ;;  %v3353_v52 = vsel %vm516_vm3, %v6631_v61, -inf }
 0x7be   :  { %v6635_v24 = vpop.f32.mrb[80].mxu0  ;;  %3354 = vmax.xlane.f32.xlu0 %v3353_v52  ;;  %v2660_v6 = vpop.f32.mrb[78].mxu1 }
 0x7bf   :  { %v5275_v58 = vpop.f32.mrb[79].mxu1  ;;  %v5280_v62 = vpop.f32.mrb[81].mxu0  ;;  %v3356_v4 = vsel %vm516_vm3, %v6635_v24, -inf }
 0x7c0   :  { %v2706_v7 = vpop.f32.mrb[82].mxu0  ;;  %3357 = vmax.xlane.f32.xlu1 %v3356_v4 }
 0x7c1   :  { %v5281_v53 = vpop.f32.mrb[83].mxu0 }
 0x7c4   :  { %v6639_v22 = vpop.f32.mrb[80].mxu1 }
 0x7c5   :  { %v5286_v21 = vpop.f32.mrb[81].mxu1  ;;  %v3359_v51 = vsel %vm516_vm3, %v6639_v22, -inf }
 0x7c6   :  { %v6643_v54 = vpop.f32.mrb[84].mxu0  ;;  %3360 = vmax.xlane.f32.xlu0 %v3359_v51  ;;  %v2752_v60 = vpop.f32.mrb[82].mxu1 }
 0x7c7   :  { %v5287_v48 = vpop.f32.mrb[83].mxu1  ;;  %v5292_v17 = vpop.f32.mrb[85].mxu0  ;;  %v3362_v2 = vsel %vm516_vm3, %v6643_v54, -inf }
 0x7c8   :  { %v2798_v55 = vpop.f32.mrb[86].mxu0 }
 0x7c9   :  { %v5293_v29 = vpop.f32.mrb[87].mxu0 }
 0x7ca   :  { %3363 = vmax.xlane.f32.xlu0 %v3362_v2 }
 0x835   :  { %v6647_v0 = vpop.f32.mrb[88].mxu0 }
 0x836   :  { %v6649_v11 = vpop.f32.mrb[84].mxu1  ;;  %v5304_v44 = vpop.f32.mrb[89].mxu0  ;;  %v3368_v5 = vsel %vm516_vm3, %v6647_v0, -inf }
 0x837   :  { %v5298_v16 = vpop.f32.mrb[85].mxu1  ;;  %v2890_v1 = vpop.f32.mrb[90].mxu0  ;;  %3369 = vmax.xlane.f32.xlu0 %v3368_v5  ;;  %v3365_v41 = vsel %vm516_vm3, %v6649_v11, -inf }
 0x838   :  { %3366 = vmax.xlane.f32.xlu1 %v3365_v41  ;;  %v2844_v50 = vpop.f32.mrb[86].mxu1  ;;  %v5305_v59 = vpop.f32.mrb[91].mxu0 }
 0x839   :  { %v5299_v46 = vpop.f32.mrb[87].mxu1 }
 0x83e   :  { %v6655_v57 = vpop.f32.mrb[88].mxu1  ;;  %v6657_v25 = vpop.f32.mrb[92].mxu0 }
 0x83f   :  { %v5310_v19 = vpop.f32.mrb[89].mxu1  ;;  %v5316_v3 = vpop.f32.mrb[93].mxu0  ;;  %v3374_v13 = vsel %vm516_vm3, %v6657_v25, -inf  ;;  %v3371_v52 = vsel %vm516_vm3, %v6655_v57, -inf }
 0x840   :  { %v2982_v6 = vpop.f32.mrb[94].mxu0  ;;  %3375 = vmax.xlane.f32.xlu0 %v3374_v13  ;;  %3372 = vmax.xlane.f32.xlu1 %v3371_v52  ;;  %v2936_v58 = vpop.f32.mrb[90].mxu1 }
 0x841   :  { %v5311_v62 = vpop.f32.mrb[91].mxu1  ;;  %v5317_v4 = vpop.f32.mrb[95].mxu0 }
 0x846   :  { %v6663_v7 = vpop.f32.mrb[92].mxu1  ;;  %v6665_v53 = vpop.f32.mrb[96].mxu0 }
 0x847   :  { %v5322_v21 = vpop.f32.mrb[93].mxu1  ;;  %v5328_v51 = vpop.f32.mrb[97].mxu0  ;;  %v3380_v60 = vsel %vm516_vm3, %v6665_v53, -inf  ;;  %v3377_v48 = vsel %vm516_vm3, %v6663_v7, -inf }
 0x848   :  { %v3074_v17 = vpop.f32.mrb[98].mxu0  ;;  %3381 = vmax.xlane.f32.xlu0 %v3380_v60  ;;  %3378 = vmax.xlane.f32.xlu1 %v3377_v48  ;;  %v3028_v55 = vpop.f32.mrb[94].mxu1 }
 0x849   :  { %v5323_v29 = vpop.f32.mrb[95].mxu1  ;;  %v5329_v2 = vpop.f32.mrb[99].mxu0 }
 0x84e   :  { %v6671_v44 = vpop.f32.mrb[100].mxu0  ;;  %v6673_v5 = vpop.f32.mrb[96].mxu1 }
 0x84f   :  { %v5334_v16 = vpop.f32.mrb[97].mxu1  ;;  %v5340_v1 = vpop.f32.mrb[101].mxu0  ;;  %v3386_v41 = vsel %vm516_vm3, %v6671_v44, -inf  ;;  %v3383_v50 = vsel %vm516_vm3, %v6673_v5, -inf }
 0x850   :  { %v3166_v59 = vpop.f32.mrb[102].mxu0  ;;  %3387 = vmax.xlane.f32.xlu0 %v3386_v41  ;;  %3384 = vmax.xlane.f32.xlu1 %v3383_v50  ;;  %v3120_v46 = vpop.f32.mrb[98].mxu1 }
 0x851   :  { %v5335_v19 = vpop.f32.mrb[99].mxu1  ;;  %v5341_v3 = vpop.f32.mrb[103].mxu0 }
 0x852   :  { %v6695_v19 = vpop.permute.xlu0 %3889  ;;  %v6697_v3 = vpop.permute.xlu1 %3840 }
 0x856   :  { %v6679_v13 = vpop.f32.mrb[100].mxu1  ;;  %v6681_v52 = vpop.f32.mrb[104].mxu0 }
 0x857   :  { %v5346_v6 = vpop.f32.mrb[101].mxu1  ;;  %v5352_v58 = vpop.f32.mrb[105].mxu0  ;;  %v3392_v62 = vsel %vm516_vm3, %v6681_v52, -inf  ;;  %v3389_v4 = vsel %vm516_vm3, %v6679_v13, -inf }
 0x858   :  { %v3258_v21 = vpop.f32.mrb[106].mxu0  ;;  %3393 = vmax.xlane.f32.xlu0 %v3392_v62  ;;  %3390 = vmax.xlane.f32.xlu1 %v3389_v4  ;;  %v3212_v51 = vpop.f32.mrb[102].mxu1 }
 0x859   :  { %v5353_v60 = vpop.f32.mrb[107].mxu0  ;;  %v5347_v48 = vpop.f32.mrb[103].mxu1 }
 0x85a   :  { %v6701_v6 = vpop.permute.xlu0 %3791  ;;  %v6703_v58 = vpop.permute.xlu1 %3742 }
 0x85e   :  { %v6687_v17 = vpop.f32.mrb[104].mxu1  ;;  %v6689_v55 = vpop.f32.mrb[108].mxu0 }
 0x85f   :  { %v5358_v29 = vpop.f32.mrb[105].mxu1  ;;  %v5364_v2 = vpop.f32.mrb[109].mxu0  ;;  %v3398_v16 = vsel %vm516_vm3, %v6689_v55, -inf  ;;  %v3395_v1 = vsel %vm516_vm3, %v6687_v17, -inf }
 0x860   :  { %v3350_v41 = vpop.f32.mrb[110].mxu0  ;;  %3399 = vmax.xlane.f32.xlu0 %v3398_v16  ;;  %3396 = vmax.xlane.f32.xlu1 %v3395_v1  ;;  %v3304_v50 = vpop.f32.mrb[106].mxu1 }
 0x861   :  { %v5359_v59 = vpop.f32.mrb[107].mxu1  ;;  %v5365_v46 = vpop.f32.mrb[111].mxu0 }
 0x862   :  { %v3355_v62 = vpop.xlane.xlu0 %3354  ;;  %v6709_v4 = vpop.permute.xlu1 %3938 }
 0x866   :  { %v3361_v21 = vpop.xlane.xlu0 %3360  ;;  %v3358_v51 = vpop.xlane.xlu1 %3357 }
 0x867   :  { %v3402_v60 = vsub.f32 %v6635_v24, %v3358_v51 }
 0x869   :  { %v3419_v29 = vmul.f32 1.442695, %v3402_v60 }
 0x86a   :  { %v3364_v48 = vpop.xlane.xlu0 %3363 }
 0x86b   :  { %v3404_v2 = vsub.f32 %v6643_v54, %v3364_v48  ;;  %5745 = vpow2.f32 %v3419_v29 }
 0x86d   :  { %v3423_v1 = vmul.f32 1.442695, %v3404_v2 }
 0x871   :  { %4036 = vrot.lane.b32.xlu1 %v6571_v56, %s5825_s26  ;;  %v3401_v56 = vsub.f32 %v6631_v61, %v3355_v62 }
 0x873   :  { %v3417_v16 = vmul.f32 1.442695, %v3401_v56 }
 0x875   :  { %4085 = vrot.lane.b32.xlu1 %v6569_v63, %s5825_s26  ;;  %v3403_v63 = vsub.f32 %v6639_v22, %v3361_v21  ;;  %5747 = vpow2.f32 %v3417_v16 }
 0x876   :  { %3987 = vrot.lane.b32.xlu0 %v6555_v18, %s5825_s26  ;;  %5749 = vpow2.f32 %v3423_v1  ;;  %v6715_v18 = vpop.eup %5745 }
 0x877   :  { %v3421_v41 = vmul.f32 1.442695, %v3403_v63  ;;  %v3452_v24 = vsel %vm516_vm3, %v6715_v18, 0.0 }
 0x879   :  { %5751 = vpow2.f32 %v3421_v41 }
 0x87f   :  { %v6717_v50 = vpop.eup %5747 }
 0x880   :  { %v6721_v61 = vpop.eup %5749  ;;  %v3449_v22 = vsel %vm516_vm3, %v6717_v50, 0.0 }
 0x881   :  { %v3458_v54 = vsel %vm516_vm3, %v6721_v61, 0.0 }
 0x883   :  { %v6727_v59 = vpop.eup %5751 }
 0x884   :  { %v3455_v46 = vsel %vm516_vm3, %v6727_v59, 0.0 }
 0x895   :  { %3453 = vadd.xlane.f32.xlu0 %v3452_v24 }
 0x899   :  { %3459 = vadd.xlane.f32.xlu0 %v3458_v54  ;;  %3450 = vadd.xlane.f32.xlu1 %v3449_v22 }
 0x89d   :  { %3456 = vadd.xlane.f32.xlu1 %v3455_v46 }
 0x8c4   :  { %v3370_v62 = vpop.xlane.xlu0 %3369 }
 0x8c5   :  { %v3406_v21 = vsub.f32 %v6647_v0, %v3370_v62  ;;  %v3367_v51 = vpop.xlane.xlu1 %3366 }
 0x8c6   :  { %v3405_v60 = vsub.f32 %v6649_v11, %v3367_v51 }
 0x8c7   :  { %v3427_v48 = vmul.f32 1.442695, %v3406_v21 }
 0x8c8   :  { %v3425_v56 = vmul.f32 1.442695, %v3405_v60 }
 0x8c9   :  { %5753 = vpow2.f32 %v3427_v48 }
 0x8ca   :  { %5755 = vpow2.f32 %v3425_v56 }
 0x8cd   :  { %v3376_v29 = vpop.xlane.xlu0 %3375  ;;  %v3373_v2 = vpop.xlane.xlu1 %3372 }
 0x8ce   :  { %v3408_v16 = vsub.f32 %v6657_v25, %v3376_v29  ;;  %v3407_v63 = vsub.f32 %v6655_v57, %v3373_v2 }
 0x8d0   :  { %v3431_v1 = vmul.f32 1.442695, %v3408_v16  ;;  %v3429_v41 = vmul.f32 1.442695, %v3407_v63 }
 0x8d2   :  { %5757 = vpow2.f32 %v3431_v1 }
 0x8d3   :  { %v6735_v24 = vpop.eup %5753  ;;  %5759 = vpow2.f32 %v3429_v41 }
 0x8d4   :  { %v6737_v0 = vpop.eup %5755  ;;  %v3464_v11 = vsel %vm516_vm3, %v6735_v24, 0.0 }
 0x8d5   :  { %v3382_v54 = vpop.xlane.xlu0 %3381  ;;  %v3379_v22 = vpop.xlane.xlu1 %3378  ;;  %3465 = vadd.xlane.f32.xlu0 %v3464_v11  ;;  %v3461_v46 = vsel %vm516_vm3, %v6737_v0, 0.0 }
 0x8d6   :  { %v3410_v25 = vsub.f32 %v6665_v53, %v3382_v54  ;;  %v3409_v57 = vsub.f32 %v6663_v7, %v3379_v22  ;;  %3462 = vadd.xlane.f32.xlu1 %v3461_v46 }
 0x8d8   :  { %v3435_v62 = vmul.f32 1.442695, %v3410_v25  ;;  %v3433_v21 = vmul.f32 1.442695, %v3409_v57 }
 0x8da   :  { %5761 = vpow2.f32 %v3435_v62 }
 0x8db   :  { %5763 = vpow2.f32 %v3433_v21 }
 0x8dc   :  { %v6745_v51 = vpop.eup %5757 }
 0x8dd   :  { %v6747_v60 = vpop.eup %5759  ;;  %v3388_v48 = vpop.xlane.xlu0 %3387  ;;  %v3470_v29 = vsel %vm516_vm3, %v6745_v51, 0.0 }
 0x8de   :  { %v3385_v56 = vpop.xlane.xlu1 %3384  ;;  %v3412_v2 = vsub.f32 %v6671_v44, %v3388_v48  ;;  %3471 = vadd.xlane.f32.xlu0 %v3470_v29  ;;  %v3467_v7 = vsel %vm516_vm3, %v6747_v60, 0.0 }
 0x8df   :  { %v3411_v53 = vsub.f32 %v6673_v5, %v3385_v56  ;;  %3468 = vadd.xlane.f32.xlu1 %v3467_v7 }
 0x8e0   :  { %v3439_v16 = vmul.f32 1.442695, %v3412_v2 }
 0x8e1   :  { %v3437_v63 = vmul.f32 1.442695, %v3411_v53 }
 0x8e2   :  { %5765 = vpow2.f32 %v3439_v16 }
 0x8e3   :  { %5767 = vpow2.f32 %v3437_v63 }
 0x8e4   :  { %v6755_v1 = vpop.eup %5761 }
 0x8e5   :  { %v6757_v41 = vpop.eup %5763  ;;  %v3476_v11 = vsel %vm516_vm3, %v6755_v1, 0.0  ;;  %v3394_v25 = vpop.xlane.xlu0 %3393 }
 0x8e6   :  { %3477 = vadd.xlane.f32.xlu0 %v3476_v11  ;;  %v3473_v44 = vsel %vm516_vm3, %v6757_v41, 0.0  ;;  %v3391_v57 = vpop.xlane.xlu1 %3390  ;;  %v3414_v62 = vsub.f32 %v6681_v52, %v3394_v25 }
 0x8e7   :  { %3474 = vadd.xlane.f32.xlu1 %v3473_v44  ;;  %v3413_v21 = vsub.f32 %v6679_v13, %v3391_v57 }
 0x8e8   :  { %v3443_v29 = vmul.f32 1.442695, %v3414_v62 }
 0x8e9   :  { %v3441_v53 = vmul.f32 1.442695, %v3413_v21 }
 0x8ea   :  { %5769 = vpow2.f32 %v3443_v29 }
 0x8eb   :  { %5771 = vpow2.f32 %v3441_v53 }
 0x8ec   :  { %v6763_v5 = vpop.eup %5765 }
 0x8ed   :  { %v6765_v54 = vpop.eup %5767  ;;  %v3482_v22 = vsel %vm516_vm3, %v6763_v5, 0.0  ;;  %v3400_v48 = vpop.xlane.xlu0 %3399 }
 0x8ee   :  { %3483 = vadd.xlane.f32.xlu0 %v3482_v22  ;;  %v3479_v46 = vsel %vm516_vm3, %v6765_v54, 0.0  ;;  %v3397_v56 = vpop.xlane.xlu1 %3396  ;;  %v3416_v2 = vsub.f32 %v6689_v55, %v3400_v48 }
 0x8ef   :  { %3480 = vadd.xlane.f32.xlu1 %v3479_v46  ;;  %v3415_v7 = vsub.f32 %v6687_v17, %v3397_v56 }
 0x8f0   :  { %v3447_v16 = vmul.f32 1.442695, %v3416_v2 }
 0x8f1   :  { %v6781_v63 = vpop.permute.xlu0 %3987 }
 0x8f2   :  { %5773 = vpow2.f32 %v3447_v16  ;;  %v3699_v16 = vsel %vm1451_vm4, %v6607_v10, 0 }
 0x8f4   :  { %v6783_v52 = vpop.eup %5769 }
 0x8f5   :  { %v6785_v13 = vpop.eup %5771  ;;  %v3488_v17 = vsel %vm516_vm3, %v6783_v52, 0.0 }
 0x8f6   :  { %v3485_v22 = vsel %vm516_vm3, %v6785_v13, 0.0 }
 0x8fc   :  { %v6791_v44 = vpop.eup %5773 }
 0x8fd   :  { %v3494_v62 = vsel %vm516_vm3, %v6791_v44, 0.0 }
 0x900   :  { %4183 = vrot.lane.b32.xlu1 %v6585_v49, %s5825_s26  ;;  %v3445_v49 = vmul.f32 1.442695, %v3415_v7 }
 0x902   :  { %5775 = vpow2.f32 %v3445_v49 }
 0x904   :  { %4134 = vrot.lane.b32.xlu0 %v6587_v14, %s5825_s26  ;;  %v6779_v14 = vpop.permute.xlu1 %4036 }
 0x908   :  { %v6787_v11 = vpop.permute.xlu1 %4085 }
 0x90c   :  { %v6795_v46 = vpop.eup %5775 }
 0x90d   :  { %v3491_v21 = vsel %vm516_vm3, %v6795_v46, 0.0 }
 0x922   :  { %v3454_v55 = vpop.xlane.xlu0 %3453 }
 0x923   :  { %5777 = vrcp.f32 %v3454_v55  ;;  %3489 = vadd.xlane.f32.xlu0 %v3488_v17 }
 0x924   :  { %3486 = vadd.xlane.f32.xlu1 %v3485_v22  ;;  %v3650_v22 = vsel %vm1451_vm4, %v6605_v8, 0 }
 0x926   :  { %v3460_v25 = vpop.xlane.xlu0 %3459  ;;  %v3451_v57 = vpop.xlane.xlu1 %3450 }
 0x927   :  { %5779 = vrcp.f32 %v3460_v25  ;;  %3495 = vadd.xlane.f32.xlu0 %v3494_v62 }
 0x928   :  { %5781 = vrcp.f32 %v3451_v57  ;;  %3492 = vadd.xlane.f32.xlu1 %v3491_v21 }
 0x92a   :  { %v3457_v48 = vpop.xlane.xlu1 %3456 }
 0x92b   :  { %5783 = vrcp.f32 %v3457_v48 }
 0x92d   :  { %v5778_v56 = vpop.eup %5777 }
 0x92e   :  { %v3500_v29 = vmul.f32 %v5778_v56, %v6715_v18 }
 0x930   :  { %v3530_v2 = vpack.c.bf16 %v3500_v29, %v3500_v29  ;;  %v3895_v29 = vsel %vm1451_vm4, %v6695_v19, 0 }
 0x931   :  { %v5780_v53 = vpop.eup %5779 }
 0x932   :  { %v5782_v7 = vpop.eup %5781  ;;  %5375 = vmatmul.mubr.msk.bf16.vlgmr.msra.gmra.mrb[112].mxu0 %vm516_vm3, %v3530_v2  ;;  %v3504_v55 = vmul.f32 %v5780_v53, %v6721_v61  ;;  %v3797_v61 = vsel %vm1451_vm4, %v6701_v6, 0  ;;  %v3846_v2 = vsel %vm1451_vm4, %v6697_v3, 0 }
 0x933   :  { %v3498_v49 = vmul.f32 %v5782_v7, %v6717_v50  ;;  %5385 = vmatpush3.bf16.msra.mxu0 %v3699_v16  ;;  %5386 = vmatprep.mubr.msk.bf16.mxu0 %vm5827_vm2, %v5826_v47 }
 0x934   :  { %5396 = vmatprep.subr.bf16.mxu0 %v5826_v47  ;;  %v3532_v10 = vpack.c.bf16 %v3504_v55, %v3504_v55  ;;  %v3993_v55 = vsel %vm1451_vm4, %v6781_v63, 0 }
 0x935   :  { %v3529_v17 = vpack.c.bf16 %v3498_v49, %v3498_v49  ;;  %v5784_v18 = vpop.eup %5783 }
 0x936   :  { %v3502_v50 = vmul.f32 %v5784_v18, %v6727_v59  ;;  %v3944_v18 = vsel %vm1451_vm4, %v6709_v4, 0 }
 0x937   :  { %5369 = vmatmul.mubr.msk.bf16.vlgmr.msra.gmra.mrb[108].mxu1 %vm516_vm3, %v3529_v17 }
 0x938   :  { %5379 = vmatpush3.bf16.msra.mxu1 %v3650_v22  ;;  %5380 = vmatprep.mubr.msk.bf16.mxu1 %vm5827_vm2, %v5826_v47  ;;  %v3531_v8 = vpack.c.bf16 %v3502_v50, %v3502_v50 }
 0x939   :  { %4281 = vrot.lane.b32.xlu1 %v6601_v9, %s5825_s26  ;;  %5390 = vmatprep.subr.bf16.mxu1 %v5826_v47  ;;  %v3748_v9 = vsel %vm1451_vm4, %v6703_v58, 0 }
 0x93a   :  { %5387 = vmatmul.mubr.msk.bf16.vlgmr.msra.gmra.mrb[116].mxu0 %vm516_vm3, %v3532_v10 }
 0x93b   :  { %5397 = vmatpush3.bf16.msra.mxu0 %v3797_v61  ;;  %5398 = vmatprep.mubr.msk.bf16.mxu0 %vm5827_vm2, %v5826_v47  ;;  %v4091_v61 = vsel %vm1451_vm4, %v6787_v11, 0 }
 0x93c   :  { %5408 = vmatprep.subr.bf16.mxu0 %v5826_v47 }
 0x93d   :  { %4232 = vrot.lane.b32.xlu0 %v6603_v35, %s5825_s26 }
 0x93f   :  { %5381 = vmatmul.mubr.msk.bf16.vlgmr.msra.gmra.mrb[112].mxu1 %vm516_vm3, %v3531_v8  ;;  %v4042_v8 = vsel %vm1451_vm4, %v6779_v14, 0 }
 0x940   :  { %5391 = vmatpush3.bf16.msra.mxu1 %v3748_v9  ;;  %5392 = vmatprep.mubr.msk.bf16.mxu1 %vm5827_vm2, %v5826_v47 }
 0x941   :  { %5402 = vmatprep.subr.bf16.mxu1 %v5826_v47 }
 0x962   :  { %v3466_v6 = vpop.xlane.xlu0 %3465 }
 0x963   :  { %5785 = vrcp.f32 %v3466_v6  ;;  %v3463_v59 = vpop.xlane.xlu1 %3462 }
 0x964   :  { %5787 = vrcp.f32 %v3463_v59 }
 0x96b   :  { %v3472_v25 = vpop.xlane.xlu0 %3471 }
 0x96c   :  { %5789 = vrcp.f32 %v3472_v25  ;;  %v3469_v57 = vpop.xlane.xlu1 %3468 }
 0x96d   :  { %v5786_v35 = vpop.eup %5785  ;;  %5791 = vrcp.f32 %v3469_v57 }
 0x96e   :  { %v5788_v62 = vpop.eup %5787  ;;  %v3508_v58 = vmul.f32 %v5786_v35, %v6735_v24 }
 0x96f   :  { %v3506_v21 = vmul.f32 %v5788_v62, %v6737_v0 }
 0x970   :  { %v3534_v48 = vpack.c.bf16 %v3508_v58, %v3508_v58 }
 0x971   :  { %v3533_v56 = vpack.c.bf16 %v3506_v21, %v3506_v21 }
 0x972   :  { %5399 = vmatmul.mubr.msk.bf16.vlgmr.msra.gmra.mrb[120].mxu0 %vm516_vm3, %v3534_v48 }
 0x973   :  { %5409 = vmatpush3.bf16.msra.mxu0 %v3895_v29  ;;  %v3478_v53 = vpop.xlane.xlu0 %3477  ;;  %5393 = vmatmul.mubr.msk.bf16.vlgmr.msra.gmra.mrb[116].mxu1 %vm516_vm3, %v3533_v56 }
 0x974   :  { %5793 = vrcp.f32 %v3478_v53  ;;  %5403 = vmatpush3.bf16.msra.mxu1 %v3846_v2  ;;  %v3475_v7 = vpop.xlane.xlu1 %3474  ;;  %5404 = vmatprep.mubr.msk.bf16.mxu1 %vm5827_vm2, %v5826_v47 }
 0x975   :  { %5795 = vrcp.f32 %v3475_v7  ;;  %5410 = vmatprep.mubr.msk.bf16.mxu0 %vm5827_vm2, %v5826_v47  ;;  %5414 = vmatprep.subr.bf16.mxu1 %v5826_v47 }
 0x976   :  { %v5790_v19 = vpop.eup %5789  ;;  %5420 = vmatprep.subr.bf16.mxu0 %v5826_v47 }
 0x977   :  { %v5792_v3 = vpop.eup %5791  ;;  %v3512_v24 = vmul.f32 %v5790_v19, %v6745_v51 }
 0x978   :  { %v3510_v0 = vmul.f32 %v5792_v3, %v6747_v60 }
 0x979   :  { %v3536_v16 = vpack.c.bf16 %v3512_v24, %v3512_v24 }
 0x97a   :  { %v3535_v49 = vpack.c.bf16 %v3510_v0, %v3510_v0 }
 0x97b   :  { %5411 = vmatmul.mubr.msk.bf16.vlgmr.msra.gmra.mrb[124].mxu0 %vm516_vm3, %v3536_v16  ;;  %v3484_v17 = vpop.xlane.xlu0 %3483 }
 0x97c   :  { %5421 = vmatpush3.bf16.msra.mxu0 %v3993_v55  ;;  %5797 = vrcp.f32 %v3484_v17  ;;  %5405 = vmatmul.mubr.msk.bf16.vlgmr.msra.gmra.mrb[120].mxu1 %vm516_vm3, %v3535_v49  ;;  %v3481_v22 = vpop.xlane.xlu1 %3480 }
 0x97d   :  { %5415 = vmatpush3.bf16.msra.mxu1 %v3944_v18  ;;  %5799 = vrcp.f32 %v3481_v22  ;;  %5416 = vmatprep.mubr.msk.bf16.mxu1 %vm5827_vm2, %v5826_v47 }
 0x97e   :  { %v5794_v51 = vpop.eup %5793  ;;  %5422 = vmatprep.mubr.msk.bf16.mxu0 %vm5827_vm2, %v5826_v47  ;;  %5426 = vmatprep.subr.bf16.mxu1 %v5826_v47 }
 0x97f   :  { %v5796_v60 = vpop.eup %5795  ;;  %v3516_v63 = vmul.f32 %v5794_v51, %v6755_v1  ;;  %5432 = vmatprep.subr.bf16.mxu0 %v5826_v47  ;;  %v4135_v6 = vpop.permute.xlu0 %4134 }
 0x980   :  { %v3514_v4 = vmul.f32 %v5796_v60, %v6757_v41  ;;  %v4184_v9 = vpop.permute.xlu1 %4183  ;;  %v4140_v35 = vsel %vm1451_vm4, %v4135_v6, 0 }
 0x981   :  { %v3538_v10 = vpack.c.bf16 %v3516_v63, %v3516_v63  ;;  %v4189_v57 = vsel %vm1451_vm4, %v4184_v9, 0 }
 0x982   :  { %v3537_v50 = vpack.c.bf16 %v3514_v4, %v3514_v4 }
 0x983   :  { %5423 = vmatmul.mubr.msk.bf16.vlgmr.msra.gmra.mrb[128].mxu0 %vm516_vm3, %v3538_v10 }
 0x984   :  { %5417 = vmatmul.mubr.msk.bf16.vlgmr.msra.gmra.mrb[124].mxu1 %vm516_vm3, %v3537_v50  ;;  %5433 = vmatpush3.bf16.msra.mxu0 %v4091_v61 }
 0x985   :  { %5427 = vmatpush3.bf16.msra.mxu1 %v4042_v8  ;;  %5428 = vmatprep.mubr.msk.bf16.mxu1 %vm5827_vm2, %v5826_v47 }
 0x986   :  { %v5798_v1 = vpop.eup %5797  ;;  %5434 = vmatprep.mubr.msk.bf16.mxu0 %vm5827_vm2, %v5826_v47  ;;  %5438 = vmatprep.subr.bf16.mxu1 %v5826_v47 }
 0x987   :  { %v5800_v41 = vpop.eup %5799  ;;  %v3520_v11 = vmul.f32 %v5798_v1, %v6763_v5  ;;  %5444 = vmatprep.subr.bf16.mxu0 %v5826_v47 }
 0x988   :  { %v3518_v14 = vmul.f32 %v5800_v41, %v6765_v54 }
 0x989   :  { %v3540_v59 = vpack.c.bf16 %v3520_v11, %v3520_v11 }
 0x98a   :  { %v3539_v25 = vpack.c.bf16 %v3518_v14, %v3518_v14 }
 0x98b   :  { %5435 = vmatmul.mubr.msk.bf16.vlgmr.msra.gmra.mrb[132].mxu0 %vm516_vm3, %v3540_v59 }
 0x98c   :  { %5429 = vmatmul.mubr.msk.bf16.vlgmr.msra.gmra.mrb[128].mxu1 %vm516_vm3, %v3539_v25  ;;  %5445 = vmatpush3.bf16.msra.mxu0 %v4189_v57 }
 0x98d   :  { %5439 = vmatpush3.bf16.msra.mxu1 %v4140_v35  ;;  %5440 = vmatprep.mubr.msk.bf16.mxu1 %vm5827_vm2, %v5826_v47 }
 0x98e   :  { %5446 = vmatprep.mubr.msk.bf16.mxu0 %vm5827_vm2, %v5826_v47  ;;  %5450 = vmatprep.subr.bf16.mxu1 %v5826_v47 }
 0x98f   :  { %5456 = vmatprep.subr.bf16.mxu0 %v5826_v47 }
 0x9b0   :  { %v3490_v5 = vpop.xlane.xlu0 %3489 }
 0x9b1   :  { %5801 = vrcp.f32 %v3490_v5  ;;  %v3487_v54 = vpop.xlane.xlu1 %3486 }
 0x9b2   :  { %5803 = vrcp.f32 %v3487_v54 }
 0x9b4   :  { %v3496_v62 = vpop.xlane.xlu0 %3495 }
 0x9b5   :  { %5805 = vrcp.f32 %v3496_v62  ;;  %v3493_v58 = vpop.xlane.xlu1 %3492 }
 0x9b6   :  { %5807 = vrcp.f32 %v3493_v58 }
 0x9b8   :  { %v4233_v53 = vpop.permute.xlu0 %4232 }
 0x9b9   :  { %v4282_v2 = vpop.permute.xlu1 %4281  ;;  %v4238_v16 = vsel %vm1451_vm4, %v4233_v53, 0 }
 0x9ba   :  { %v4287_v0 = vsel %vm1451_vm4, %v4282_v2, 0 }
 0x9bb   :  { %v5802_v21 = vpop.eup %5801 }
 0x9bc   :  { %v5804_v48 = vpop.eup %5803  ;;  %v3524_v56 = vmul.f32 %v5802_v21, %v6783_v52 }
 0x9bd   :  { %v3522_v29 = vmul.f32 %v5804_v48, %v6785_v13 }
 0x9be   :  { %v3542_v7 = vpack.c.bf16 %v3524_v56, %v3524_v56 }
 0x9bf   :  { %v5806_v19 = vpop.eup %5805  ;;  %v3541_v3 = vpack.c.bf16 %v3522_v29, %v3522_v29 }
 0x9c0   :  { %v5808_v24 = vpop.eup %5807  ;;  %5447 = vmatmul.mubr.msk.bf16.vlgmr.msra.gmra.mrb[136].mxu0 %vm516_vm3, %v3542_v7  ;;  %v3528_v49 = vmul.f32 %v5806_v19, %v6791_v44 }
 0x9c1   :  { %5441 = vmatmul.mubr.msk.bf16.vlgmr.msra.gmra.mrb[132].mxu1 %vm516_vm3, %v3541_v3  ;;  %5457 = vmatpush3.bf16.msra.mxu0 %v4287_v0  ;;  %v3526_v52 = vmul.f32 %v5808_v24, %v6795_v46 }
 0x9c2   :  { %5451 = vmatpush3.bf16.msra.mxu1 %v4238_v16  ;;  %5452 = vmatprep.mubr.msk.bf16.mxu1 %vm5827_vm2, %v5826_v47  ;;  %v3544_v13 = vpack.c.bf16 %v3528_v49, %v3528_v49 }
 0x9c3   :  { %5458 = vmatprep.mubr.msk.bf16.mxu0 %vm5827_vm2, %v5826_v47  ;;  %v3543_v55 = vpack.c.bf16 %v3526_v52, %v3526_v52 }
 0x9c8   :  { %5459 = vmatmul.mubr.msk.bf16.vlgmr.msra.gmra.mrb[140].mxu0 %vm516_vm3, %v3544_v13 }
 0x9c9   :  { %5453 = vmatmul.mubr.msk.bf16.vlgmr.msra.gmra.mrb[136].mxu1 %vm516_vm3, %v3543_v55 }
 0xa05   :  { %v6901_v17 = vpop.f32.mrb[112].mxu0 }
 0xa06   :  { %v5376_v18 = vpop.f32.mrb[113].mxu0 }
 0xa07   :  { %v3640_v22 = vpop.f32.mrb[114].mxu0 }
 0xa08   :  { %v5377_v44 = vpop.f32.mrb[115].mxu0 }
 0xa0a   :  { %v6903_v51 = vpop.f32.mrb[108].mxu1 }
 0xa0b   :  { %v5370_v60 = vpop.f32.mrb[109].mxu1 }
 0xa0c   :  { %v3591_v63 = vpop.f32.mrb[110].mxu1 }
 0xa0d   :  { %v5371_v4 = vpop.f32.mrb[111].mxu1  ;;  %v6905_v46 = vpop.f32.mrb[116].mxu0 }
 0xa0e   :  { %v5388_v10 = vpop.f32.mrb[117].mxu0 }
 0xa0f   :  { %v3738_v47 = vpop.f32.mrb[118].mxu0 }
 0xa10   :  { %v5389_v50 = vpop.f32.mrb[119].mxu0 }
 0xa11   :  { %v5679_v50 = vld [vmem:[%s7082_s4 + $0x10] sm:$0xff]  }
 0xa12   :  { %v6907_v61 = vpop.f32.mrb[112].mxu1  ;;  %5462 = vmatprep.subr.bf16.mxu1 %v5679_v50 }
 0xa13   :  { %v5382_v8 = vpop.f32.mrb[113].mxu1  ;;  %5463 = vmatpush3.bf16.msra.mxu1 %v5679_v50 }
 0xa14   :  { %v3689_v1 = vpop.f32.mrb[114].mxu1  ;;  %v5680_v8 = vld [vmem:[%s7082_s4 + $0x18] sm:$0xff]  }
 0xa15   :  { %v5383_v41 = vpop.f32.mrb[115].mxu1  ;;  %5464 = vmatprep.subr.bf16.mxu1 %v5680_v8 }
 0xa17   :  { %5465 = vmatpush3.bf16.msra.mxu1 %v5680_v8 }
 0xa45   :  { %v3833_v11 = vpop.f32.mrb[120].mxu0 }
 0xa46   :  { %v3784_v14 = vpop.f32.mrb[116].mxu1  ;;  %v5400_v9 = vpop.f32.mrb[121].mxu0 }
 0xa47   :  { %v5631_v6 = vpack.i.bf16 %v3833_v11, %v3784_v14  ;;  %v5394_v59 = vpop.f32.mrb[117].mxu1  ;;  %v3836_v25 = vpop.f32.mrb[122].mxu0 }
 0xa48   :  { %v3787_v57 = vpop.f32.mrb[118].mxu1  ;;  %v5401_v35 = vpop.f32.mrb[123].mxu0 }
 0xa49   :  { %5632 = vrot.lane.b32.xlu0 %v5631_v6, %s5831_s3  ;;  %v5395_v5 = vpop.f32.mrb[119].mxu1 }
 0xa4e   :  { %v3931_v54 = vpop.f32.mrb[124].mxu0 }
 0xa4f   :  { %v3882_v62 = vpop.f32.mrb[120].mxu1  ;;  %v5412_v58 = vpop.f32.mrb[125].mxu0 }
 0xa50   :  { %v5636_v21 = vpack.i.bf16 %v3931_v54, %v3882_v62  ;;  %v5406_v48 = vpop.f32.mrb[121].mxu1  ;;  %v3934_v56 = vpop.f32.mrb[126].mxu0 }
 0xa51   :  { %v3885_v29 = vpop.f32.mrb[122].mxu1  ;;  %v5413_v2 = vpop.f32.mrb[127].mxu0 }
 0xa52   :  { %5637 = vrot.lane.b32.xlu1 %v5636_v21, %s5831_s3  ;;  %v5407_v53 = vpop.f32.mrb[123].mxu1 }
 0xa56   :  { %v4029_v7 = vpop.f32.mrb[128].mxu0 }
 0xa57   :  { %v3980_v19 = vpop.f32.mrb[124].mxu1  ;;  %v5424_v3 = vpop.f32.mrb[129].mxu0 }
 0xa58   :  { %v5641_v24 = vpack.i.bf16 %v4029_v7, %v3980_v19  ;;  %v5418_v0 = vpop.f32.mrb[125].mxu1  ;;  %v4032_v16 = vpop.f32.mrb[130].mxu0 }
 0xa59   :  { %v3983_v49 = vpop.f32.mrb[126].mxu1  ;;  %v5425_v52 = vpop.f32.mrb[131].mxu0 }
 0xa5a   :  { %5642 = vrot.lane.b32.xlu0 %v5641_v24, %s5832_s17  ;;  %v5419_v13 = vpop.f32.mrb[127].mxu1 }
 0xa5e   :  { %v4127_v55 = vpop.f32.mrb[132].mxu0 }
 0xa5f   :  { %v4078_v18 = vpop.f32.mrb[128].mxu1  ;;  %v5436_v22 = vpop.f32.mrb[133].mxu0 }
 0xa60   :  { %v5646_v44 = vpack.i.bf16 %v4127_v55, %v4078_v18  ;;  %v5430_v60 = vpop.f32.mrb[129].mxu1  ;;  %v4130_v63 = vpop.f32.mrb[134].mxu0 }
 0xa61   :  { %v4081_v4 = vpop.f32.mrb[130].mxu1  ;;  %v5437_v10 = vpop.f32.mrb[135].mxu0 }
 0xa62   :  { %5647 = vrot.lane.b32.xlu1 %v5646_v44, %s5832_s17  ;;  %v5431_v47 = vpop.f32.mrb[131].mxu1 }
 0xa93   :  { %v4225_v1 = vpop.f32.mrb[136].mxu0 }
 0xa94   :  { %v4176_v41 = vpop.f32.mrb[132].mxu1  ;;  %v5448_v11 = vpop.f32.mrb[137].mxu0 }
 0xa95   :  { %v5651_v14 = vpack.i.bf16 %v4225_v1, %v4176_v41  ;;  %v5442_v9 = vpop.f32.mrb[133].mxu1  ;;  %v4228_v6 = vpop.f32.mrb[138].mxu0 }
 0xa96   :  { %v4179_v59 = vpop.f32.mrb[134].mxu1  ;;  %v5449_v25 = vpop.f32.mrb[139].mxu0 }
 0xa97   :  { %5652 = vrot.lane.b32.xlu0 %v5651_v14, %s5833_s21  ;;  %v5443_v57 = vpop.f32.mrb[135].mxu1 }
 0xa9b   :  { %v4323_v35 = vpop.f32.mrb[140].mxu0 }
 0xa9c   :  { %v4274_v5 = vpop.f32.mrb[136].mxu1  ;;  %v5460_v54 = vpop.f32.mrb[141].mxu0 }
 0xa9d   :  { %v5656_v62 = vpack.i.bf16 %v4323_v35, %v4274_v5  ;;  %v5454_v58 = vpop.f32.mrb[137].mxu1  ;;  %v4326_v21 = vpop.f32.mrb[142].mxu0 }
 0xa9e   :  { %v4277_v48 = vpop.f32.mrb[138].mxu1  ;;  %v5461_v56 = vpop.f32.mrb[143].mxu0 }
 0xa9f   :  { %5657 = vrot.lane.b32.xlu1 %v5656_v62, %s5833_s21  ;;  %v5455_v29 = vpop.f32.mrb[139].mxu1 }
 0xabb   :  { %v5633_v2 = vpop.permute.xlu0 %5632 }
 0xabc   :  { %v5635_v7 = vunpack.i.h.bf16 %v5633_v2  ;;  %v5634_v19 = vunpack.i.l.bf16 %v5633_v2 }
 0xabe   :  { %v4378_v49 = vsel %vm516_vm3, %v6901_v17, %v5635_v7  ;;  %v4377_v52 = vsel %vm516_vm3, %v6903_v51, %v5634_v19 }
 0xac4   :  { %v5638_v0 = vpop.permute.xlu1 %5637 }
 0xac5   :  { %v5640_v10 = vunpack.i.h.bf16 %v5638_v0  ;;  %v5639_v47 = vunpack.i.l.bf16 %v5638_v0 }
 0xac7   :  { %v4380_v51 = vsel %vm516_vm3, %v6905_v46, %v5640_v10  ;;  %v4379_v1 = vsel %vm516_vm3, %v6907_v61, %v5639_v47  ;;  %v4841_v46 = vld [vmem:[%s7081_s5 + $0x3] ss:$0 sm:$0xff]  ;;  %v4789_v61 = vld [vmem:[%s7081_s5 + $0x2] ss:$0 sm:$0xff] }
 0xac8   :  { %v2351_v21 = vadd.f32 %v4789_v61, %v6493_v15  ;;  %v2359_v19 = vadd.f32 %v6491_v45, %v4789_v61  ;;  %v2354_v27 = vadd.f32 %v4789_v61, %v6497_v30  ;;  %v2362_v23 = vadd.f32 %v6495_v12, %v4789_v61 }
 0xaca   :  { %v4464_v37 = vadd.f32 %v2359_v19, %v140_v26 }
 0xacc   :  { %v5643_v53 = vpop.permute.xlu0 %5642  ;;  %v4474_v33 = vsel %vm277_vm1, %v4464_v37, 0.0 }
 0xacd   :  { %v5645_v3 = vunpack.i.h.bf16 %v5643_v53  ;;  %v5644_v24 = vunpack.i.l.bf16 %v5643_v53 }
 0xacf   :  { %v4382_v18 = vsel %vm2282_vm5, %v4378_v49, %v5645_v3  ;;  %v4381_v22 = vsel %vm2282_vm5, %v4377_v52, %v5644_v24  ;;  %v4462_v3 = vadd.f32 %v2351_v21, %v138_v32  ;;  %v4463_v32 = vadd.f32 %v2354_v27, %v139_v39 }
 0xad1   :  { %v4471_v20 = vsel %vm277_vm1, %v4463_v32, 0.0 }
 0xad4   :  { %v5648_v44 = vpop.permute.xlu1 %5647 }
 0xad5   :  { %v5650_v50 = vunpack.i.h.bf16 %v5648_v44  ;;  %v5649_v8 = vunpack.i.l.bf16 %v5648_v44 }
 0xad7   :  { %v4384_v14 = vsel %vm2282_vm5, %v4380_v51, %v5650_v50  ;;  %v4383_v9 = vsel %vm2282_vm5, %v4379_v1, %v5649_v8 }
 0xb09   :  { %v5653_v16 = vpop.permute.xlu0 %5652 }
 0xb0a   :  { %v5655_v13 = vunpack.i.h.bf16 %v5653_v16  ;;  %v5654_v55 = vunpack.i.l.bf16 %v5653_v16 }
 0xb0c   :  { %v4386_v60 = vsel %vm2287_vm6, %v4382_v18, %v5655_v13  ;;  %v4385_v63 = vsel %vm2287_vm6, %v4381_v22, %v5654_v55 }
 0xb0d   :  { %v4389_v4 = vpack.c.bf16 %v4386_v60, %v4385_v63 }
 0xb0f   :  { %5466 = vmatprep.mubr.msk.bf16.mxu1 %vm277_vm1, %v4389_v4 }
 0xb11   :  { %v5658_v17 = vpop.permute.xlu1 %5657 }
 0xb12   :  { %v5660_v41 = vunpack.i.h.bf16 %v5658_v17  ;;  %v5659_v11 = vunpack.i.l.bf16 %v5658_v17 }
 0xb14   :  { %v4388_v6 = vsel %vm2287_vm6, %v4384_v14, %v5660_v41  ;;  %v4387_v59 = vsel %vm2287_vm6, %v4383_v9, %v5659_v11 }
 0xb15   :  { %v4390_v25 = vpack.c.bf16 %v4388_v6, %v4387_v59 }
 0xb17   :  { %5467 = vmatmul.mubr.msk.bf16.vlgmr.msra.gmra.mrb[140].mxu1 %vm277_vm1, %v4390_v25 }
 0xbea   :  { %v5468_v57 = vpop.f32.mrb[140].mxu1 }
 0xbeb   :  { %v4447_v35 = vpop.f32.mrb[141].mxu1  ;;  %v4456_v5 = vadd.f32 %v5468_v57, %v4841_v46 }
 0xbec   :  { %v4448_v54 = vadd.f32 %v4841_v46, %v4447_v35  ;;  %v5469_v62 = vpop.f32.mrb[142].mxu1 }
 0xbed   :  { %v4450_v58 = vpop.f32.mrb[143].mxu1  ;;  %v4539_v29 = vadd.f32 %v4456_v5, %v247_v43  ;;  %v4459_v2 = vadd.f32 %v5469_v62, %v4841_v46 }
 0xbee   :  { %v4537_v48 = vadd.f32 %v4448_v54, %v245_v40  ;;  %v4451_v56 = vadd.f32 %v4841_v46, %v4450_v58 }
 0xbef   :  { %v4540_v31 = vadd.f32 %v4459_v2, %v248_v38  ;;  %v4549_v40 = vsel %vm277_vm1, %v4539_v29, 0.0  ;;  %v4465_v38 = vadd.f32 %v2362_v23, %v141_v36 }
 0xbf0   :  { %v4538_v53 = vadd.f32 %v4451_v56, %v246_v42  ;;  %v4543_v7 = vsel %vm277_vm1, %v4537_v48, 0.0  ;;  %v4468_v42 = vsel %vm277_vm1, %v4462_v3, 0.0 }
 0xbf1   :  { %4544 = vadd.xlane.f32.xlu0 %v4543_v7  ;;  %v4552_v43 = vsel %vm277_vm1, %v4540_v31, 0.0  ;;  %v4477_v26 = vsel %vm277_vm1, %v4465_v38, 0.0 }
 0xbf2   :  { %v4546_v15 = vsel %vm277_vm1, %v4538_v53, 0.0 }
 0xbf3   :  { %4547 = vadd.xlane.f32.xlu1 %v4546_v15 }
 0xbf5   :  { %4550 = vadd.xlane.f32.xlu0 %v4549_v40 }
 0xbf7   :  { %4469 = vadd.xlane.f32.xlu1 %v4468_v42  ;;  %v4849_v42 = vld [vmem:[%s7081_s5 + $0x7] ss:$0 sm:$0xff] }
 0xbf9   :  { %4553 = vadd.xlane.f32.xlu0 %v4552_v43 }
 0xbfb   :  { %4475 = vadd.xlane.f32.xlu1 %v4474_v33 }
 0xbfd   :  { %4472 = vadd.xlane.f32.xlu0 %v4471_v20 }
 0xc01   :  { %4478 = vadd.xlane.f32.xlu0 %v4477_v26 }
 0xc7e   :  { %v4545_v45 = vpop.xlane.xlu0 %4544 }
 0xc7f   :  { %v4555_v12 = vmul.f32 0.03125, %v4545_v45 }
 0xc80   :  { %v4548_v30 = vpop.xlane.xlu1 %4547 }
 0xc81   :  { %v6973_v34 = vsub.f32 %v4537_v48, %v4555_v12  ;;  %v4556_v39 = vmul.f32 0.03125, %v4548_v30 }
 0xc82   :  { %v4551_v24 = vpop.xlane.xlu0 %4550 }
 0xc83   :  { %v6975_v0 = vsub.f32 %v4538_v53, %v4556_v39  ;;  %v4557_v16 = vmul.f32 0.03125, %v4551_v24  ;;  %v4563_v28 = vmul.f32 %v6973_v34, %v6973_v34 }
 0xc84   :  { %v4470_v36 = vpop.xlane.xlu1 %4469 }
 0xc85   :  { %v6979_v49 = vsub.f32 %v4539_v29, %v4557_v16  ;;  %v4481_v52 = vmul.f32 0.03125, %v4470_v36  ;;  %v4567_v13 = vsel %vm277_vm1, %v4563_v28, 0.0  ;;  %v4564_v55 = vmul.f32 %v6975_v0, %v6975_v0 }
 0xc86   :  { %v4554_v18 = vpop.xlane.xlu0 %4553  ;;  %4568 = vadd.xlane.f32.xlu1 %v4567_v13 }
 0xc87   :  { %v6984_v22 = vsub.f32 %v4462_v3, %v4481_v52  ;;  %v4558_v44 = vmul.f32 0.03125, %v4554_v18  ;;  %v4570_v60 = vsel %vm277_vm1, %v4564_v55, 0.0  ;;  %v4565_v63 = vmul.f32 %v6979_v49, %v6979_v49 }
 0xc88   :  { %4571 = vadd.xlane.f32.xlu0 %v4570_v60  ;;  %v4476_v4 = vpop.xlane.xlu1 %4475 }
 0xc89   :  { %v4562_v10 = vsub.f32 %v4540_v31, %v4558_v44  ;;  %v4483_v47 = vmul.f32 0.03125, %v4476_v4  ;;  %v4573_v50 = vsel %vm277_vm1, %v4565_v63, 0.0  ;;  %v4489_v8 = vmul.f32 %v6984_v22, %v6984_v22  ;;  %v4848_v31 = vld [vmem:[%s7081_s5 + $0x6] ss:$0 sm:$0xff] }
 0xc8a   :  { %v4473_v17 = vpop.xlane.xlu0 %4472  ;;  %4574 = vadd.xlane.f32.xlu1 %v4573_v50 }
 0xc8b   :  { %v6992_v51 = vsub.f32 %v4464_v37, %v4483_v47  ;;  %v4482_v1 = vmul.f32 0.03125, %v4473_v17  ;;  %v4566_v41 = vmul.f32 %v4562_v10, %v4562_v10  ;;  %v4493_v9 = vsel %vm277_vm1, %v4489_v8, 0.0  ;;  %v4846_v17 = vld [vmem:[%s7081_s5 + $0x4] ss:$0 sm:$0xff] }
 0xc8d   :  { %v6994_v11 = vsub.f32 %v4463_v32, %v4482_v1  ;;  %v4576_v14 = vsel %vm277_vm1, %v4566_v41, 0.0  ;;  %v4491_v6 = vmul.f32 %v6992_v51, %v6992_v51 }
 0xc8e   :  { %4577 = vadd.xlane.f32.xlu0 %v4576_v14  ;;  %v4479_v59 = vpop.xlane.xlu0 %4478  ;;  %4494 = vadd.xlane.f32.xlu1 %v4493_v9 }
 0xc8f   :  { %v4484_v25 = vmul.f32 0.03125, %v4479_v59  ;;  %v4490_v46 = vmul.f32 %v6994_v11, %v6994_v11  ;;  %v4499_v35 = vsel %vm277_vm1, %v4491_v6, 0.0  ;;  %v4847_v6 = vld [vmem:[%s7081_s5 + $0x5] ss:$0 sm:$0xff]  ;;  %s5835_s5 = smov 64  }
 0xc91   :  { %v7002_v57 = vsub.f32 %v4465_v38, %v4484_v25  ;;  %v4496_v61 = vsel %vm277_vm1, %v4490_v46, 0.0 }
 0xc92   :  { %4497 = vadd.xlane.f32.xlu0 %v4496_v61  ;;  %4500 = vadd.xlane.f32.xlu1 %v4499_v35 }
 0xc93   :  { %v4492_v5 = vmul.f32 %v7002_v57, %v7002_v57 }
 0xc95   :  { %v4502_v54 = vsel %vm277_vm1, %v4492_v5, 0.0 }
 0xc96   :  { %4503 = vadd.xlane.f32.xlu0 %v4502_v54 }
 0xd13   :  { %v4569_v62 = vpop.xlane.xlu1 %4568 }
 0xd14   :  { %v4579_v58 = vmul.f32 0.03125, %v4569_v62 }
 0xd15   :  { %v4572_v21 = vpop.xlane.xlu0 %4571 }
 0xd16   :  { %v4583_v48 = vadd.f32 1e-05, %v4579_v58  ;;  %v4580_v56 = vmul.f32 0.03125, %v4572_v21 }
 0xd17   :  { %v4575_v29 = vpop.xlane.xlu1 %4574 }
 0xd18   :  { %5809 = vrsqrt.f32 %v4583_v48  ;;  %v4584_v2 = vadd.f32 1e-05, %v4580_v56  ;;  %v4581_v53 = vmul.f32 0.03125, %v4575_v29 }
 0xd1a   :  { %5811 = vrsqrt.f32 %v4584_v2  ;;  %v4585_v7 = vadd.f32 1e-05, %v4581_v53 }
 0xd1b   :  { %v4578_v19 = vpop.xlane.xlu0 %4577  ;;  %v4495_v16 = vpop.xlane.xlu1 %4494 }
 0xd1c   :  { %5813 = vrsqrt.f32 %v4585_v7  ;;  %v4582_v3 = vmul.f32 0.03125, %v4578_v19  ;;  %v4505_v36 = vmul.f32 0.03125, %v4495_v16 }
 0xd1e   :  { %v4586_v15 = vadd.f32 1e-05, %v4582_v3  ;;  %v4509_v18 = vadd.f32 1e-05, %v4505_v36 }
 0xd1f   :  { %v4498_v28 = vpop.xlane.xlu0 %4497 }
 0xd20   :  { %5815 = vrsqrt.f32 %v4586_v15  ;;  %v4506_v13 = vmul.f32 0.03125, %v4498_v28 }
 0xd21   :  { %5817 = vrsqrt.f32 %v4509_v18 }
 0xd22   :  { %v5810_v27 = vpop.eup %5809  ;;  %v4510_v44 = vadd.f32 1e-05, %v4506_v13 }
 0xd23   :  { %v4591_v40 = vmul.f32 %v5810_v27, %v6973_v34  ;;  %v4504_v52 = vpop.xlane.xlu0 %4503 }
 0xd24   :  { %v5812_v37 = vpop.eup %5811  ;;  %5819 = vrsqrt.f32 %v4510_v44 }
 0xd25   :  { %v4599_v23 = vmul.f32 %v4848_v31, %v4591_v40  ;;  %v4592_v32 = vmul.f32 %v5812_v37, %v6975_v0  ;;  %v4501_v0 = vpop.xlane.xlu1 %4500 }
 0xd26   :  { %v5814_v43 = vpop.eup %5813  ;;  %v4507_v55 = vmul.f32 0.03125, %v4501_v0 }
 0xd27   :  { %v4607_v33 = vadd.f32 %v4849_v42, %v4599_v23  ;;  %v4600_v38 = vmul.f32 %v4848_v31, %v4592_v32  ;;  %v4593_v20 = vmul.f32 %v5814_v43, %v6979_v49  ;;  %v4508_v49 = vmul.f32 0.03125, %v4504_v52 }
 0xd28   :  { %v4511_v60 = vadd.f32 1e-05, %v4507_v55 }
 0xd29   :  { %4615 = vrot.lane.b32.xlu1 %v4607_v33, %s5834_s9  ;;  %v4608_v26 = vadd.f32 %v4849_v42, %v4600_v38  ;;  %v4601_v45 = vmul.f32 %v4848_v31, %v4593_v20  ;;  %v4512_v63 = vadd.f32 1e-05, %v4508_v49 }
 0xd2a   :  { %v5816_v12 = vpop.eup %5815  ;;  %5821 = vrsqrt.f32 %v4511_v60 }
 0xd2b   :  { %4617 = vrot.lane.b32.xlu0 %v4608_v26, %s5834_s9  ;;  %v4609_v30 = vadd.f32 %v4849_v42, %v4601_v45  ;;  %v4594_v34 = vmul.f32 %v5816_v12, %v4562_v10  ;;  %5823 = vrsqrt.f32 %v4512_v63  ;;  %v5818_v4 = vpop.eup %5817 }
 0xd2c   :  { %v4517_v8 = vmul.f32 %v5818_v4, %v6984_v22 }
 0xd2d   :  { %4619 = vrot.lane.b32.xlu1 %v4609_v30, %s5834_s9  ;;  %v4602_v39 = vmul.f32 %v4848_v31, %v4594_v34 }
 0xd2e   :  { %v5820_v10 = vpop.eup %5819  ;;  %v4525_v9 = vmul.f32 %v4846_v17, %v4517_v8 }
 0xd2f   :  { %v4610_v24 = vadd.f32 %v4849_v42, %v4602_v39  ;;  %v4518_v1 = vmul.f32 %v5820_v10, %v6994_v11 }
 0xd30   :  { %v4533_v61 = vadd.f32 %v4847_v6, %v4525_v9 }
 0xd31   :  { %4621 = vrot.lane.b32.xlu1 %v4610_v24, %s5834_s9  ;;  %v4526_v59 = vmul.f32 %v4846_v17, %v4518_v1 }
 0xd33   :  { %v4534_v5 = vadd.f32 %v4847_v6, %v4526_v59 }
 0xd34   :  { %v5822_v47 = vpop.eup %5821 }
 0xd35   :  { %v5824_v50 = vpop.eup %5823  ;;  %v4519_v41 = vmul.f32 %v5822_v47, %v6992_v51 }
 0xd36   :  { %v4520_v14 = vmul.f32 %v5824_v50, %v7002_v57 }
 0xd37   :  { %v4527_v25 = vmul.f32 %v4846_v17, %v4519_v41 }
 0xd38   :  { %v4528_v46 = vmul.f32 %v4846_v17, %v4520_v14 }
 0xd39   :  { %v4535_v51 = vadd.f32 %v4847_v6, %v4527_v25 }
 0xd3a   :  { %v4536_v54 = vadd.f32 %v4847_v6, %v4528_v46 }
 0xd9b   :  { %v4616_v22 = vpop.permute.xlu1 %4615 }
 0xd9c   :  { %v7029_v35 = vsel %vm277_vm1, %v4533_v61, %v4616_v22 }
 0xd9d   :  { %v4618_v11 = vpop.permute.xlu0 %4617  ;;  %v4661_v57 = vrot.slane %v7029_v35, 3  ;;  %v4645_v58 = vrot.slane %v7029_v35, 1  ;;  %v4696_v21 = vrot.slane %v7029_v35, 7  ;;  %v4678_v48 = vrot.slane %v7029_v35, 5 }
 0xd9e   :  { %v4628_v62 = vsel %vm277_vm1, %v4534_v5, %v4618_v11  ;;  %v4654_v53 = vrot.slane %v7029_v35, 2  ;;  %v4688_v7 = vrot.slane %v7029_v35, 6  ;;  %v4670_v42 = vrot.slane %v7029_v35, 4 }
 0xd9f   :  { %v4620_v56 = vpop.permute.xlu1 %4619  ;;  %v4662_v29 = vrot.slane %v4628_v62, 2  ;;  %v4697_v2 = vrot.slane %v4628_v62, 6  ;;  %v4679_v3 = vrot.slane %v4628_v62, 4  ;;  %v4655_v15 = vrot.slane %v4628_v62, 1 }
 0xda0   :  { %v4629_v19 = vsel %vm277_vm1, %v4535_v51, %v4620_v56  ;;  %v4635_v27 = vrot.slane %v4628_v62, 7  ;;  %v4646_v23 = vsel %vm4636_vm7, %v4628_v62, %v4645_v58  ;;  %v4689_v33 = vrot.slane %v4628_v62, 5 }
 0xda1   :  { %v4663_v31 = vsel %vm4636_vm7, %v4662_v29, %v4661_v57  ;;  %v4664_v40 = vrot.slane %v4629_v19, 1  ;;  %v4647_v37 = vrot.slane %v4629_v19, 7  ;;  %v4698_v32 = vsel %vm4636_vm7, %v4697_v2, %v4696_v21 }
 0xda2   :  { %v4656_v43 = vsel %vm4636_vm7, %v4655_v15, %v4654_v53  ;;  %v4699_v26 = vrot.slane %v4629_v19, 5  ;;  %v4637_v12 = vsel %vm4636_vm7, %v4635_v27, %v7029_v35  ;;  %v4680_v34 = vsel %vm4636_vm7, %v4679_v3, %v4678_v48 }
 0xda3   :  { %v4622_v38 = vpop.permute.xlu1 %4621  ;;  %v4665_v20 = vsel %vm4639_vm8, %v4664_v40, %v4663_v31  ;;  %v4657_v45 = vsel %vm4639_vm8, %v4629_v19, %v4656_v43  ;;  %v4681_v39 = vrot.slane %v4629_v19, 3  ;;  %v4638_v24 = vrot.slane %v4629_v19, 6 }
 0xda4   :  { %v4630_v30 = vsel %vm277_vm1, %v4536_v54, %v4622_v38  ;;  %v4648_v28 = vsel %vm4639_vm8, %v4647_v37, %v4646_v23  ;;  %v4690_v49 = vsel %vm4636_vm7, %v4689_v33, %v4688_v7  ;;  %v4700_v44 = vsel %vm4639_vm8, %v4699_v26, %v4698_v32 }
 0xda5   :  { %v4666_v16 = vsel %vm4642_vm9, %v4630_v30, %v4665_v20  ;;  %v4649_v0 = vrot.slane %v4630_v30, 6  ;;  %v4701_v36 = vrot.slane %v4630_v30, 4  ;;  %v4658_v52 = vrot.slane %v4630_v30, 7 }
 0xda6   :  { %4667 = vrot.lane.b32.xlu1 %v4666_v16, %s5835_s5  ;;  %v4640_v13 = vsel %vm4639_vm8, %v4638_v24, %v4637_v12  ;;  %v4641_v55 = vrot.slane %v4630_v30, 5  ;;  %v4683_v60 = vrot.slane %v4630_v30, 2  ;;  %v4691_v63 = vrot.slane %v4629_v19, 4 }
 0xda7   :  { %v4650_v18 = vsel %vm4642_vm9, %v4649_v0, %v4648_v28  ;;  %v4659_v4 = vsel %vm4642_vm9, %v4658_v52, %v4657_v45  ;;  %v4693_v47 = vrot.slane %v4630_v30, 3  ;;  %v4671_v50 = vrot.slane %v4628_v62, 3 }
 0xda8   :  { %4651 = vrot.lane.b32.xlu0 %v4650_v18, %s5835_s5  ;;  %v4643_v10 = vsel %vm4642_vm9, %v4641_v55, %v4640_v13  ;;  %v4702_v8 = vsel %vm4642_vm9, %v4701_v36, %v4700_v44  ;;  %v4692_v17 = vsel %vm4639_vm8, %v4691_v63, %v4690_v49  ;;  %v4673_v1 = vrot.slane %v4629_v19, 2 }
 0xda9   :  { %v4675_v41 = vrot.slane %v4630_v30, 1  ;;  %v4682_v14 = vsel %vm4639_vm8, %v4681_v39, %v4680_v34  ;;  %v4694_v9 = vsel %vm4642_vm9, %v4693_v47, %v4692_v17  ;;  %v4672_v6 = vsel %vm4636_vm7, %v4671_v50, %v4670_v42 }
 0xdaa   :  { %4703 = vrot.lane.b32.xlu1 %v4702_v8, %s5835_s5  ;;  %v4684_v59 = vsel %vm4642_vm9, %v4683_v60, %v4682_v14  ;;  %v4674_v25 = vsel %vm4639_vm8, %v4673_v1, %v4672_v6 }
 0xdab   :  { %v4676_v46 = vsel %vm4642_vm9, %v4675_v41, %v4674_v25 }
 0xdac   :  { %4685 = vrot.lane.b32.xlu0 %v4684_v59, %s5835_s5 }
 0xe18   :  { %v4668_v61 = vpop.permute.xlu1 %4667 }
 0xe19   :  { %v4707_v35 = vsel %vm82_vm0, %v4659_v4, %v4668_v61 }
 0xe1a   :  { %v4652_v22 = vpop.permute.xlu0 %4651 }
 0xe1b   :  { %v4706_v5 = vsel %vm82_vm0, %v4643_v10, %v4652_v22 }
 0xe1c   :  { %v4714_v11 = vcombine.low %v4706_v5, %v4707_v35  ;;  %v4704_v51 = vpop.permute.xlu1 %4703 }
 0xe1d   :  { %v4709_v57 = vsel %vm82_vm0, %v4694_v9, %v4704_v51 }
 0xe1e   :  { %4718 = vst [vmem:[%s7083_s7] sm:$0xff] %v4714_v11  ;;  %v4686_v54 = vpop.permute.xlu0 %4685 }
 0xe1f   :  { %v4708_v62 = vsel %vm82_vm0, %v4676_v46, %v4686_v54 }
 0xe20   :  { %v4715_v58 = vcombine.low %v4708_v62, %v4709_v57 }
 0xe22   :  { %4719 = vst [vmem:[%s7083_s7 + $0x8] sm:$0xff] %v4715_v58 }

// kernel: loconet_forward.5
= control target key start
LH: loop header
LB: loop body
LE: loop exit
PB: predicated region body
PF: predicated region fallthrough
CT: control target
= control target key end

     0   :  { %vm35_vm0 = vcmask 519168   ;;  %vm37_vm1 = vcmask 518144   ;;  %v7892_v1 = vmov 0   ;;  %vm114_vm2 = vcmask 519169   ;;  %s6354_s23 = smov 64   ;;  %s7883_s0 = inlined_call_operand.vmem [shape: f32[2,2,8,64], index: 0, kind: input, shape index: {}]   ;;  %s7884_s1 = inlined_call_operand.vmem [shape: bf16[1344,64], index: 1, kind: input, shape index: {}]   ;;  %s7885_s2 = inlined_call_operand.vmem [shape: bf16[2,64,64], index: 2, kind: input, shape index: {}]   ;;  %s7886_s3 = inlined_call_operand.vmem [shape: bf16[64,192], index: 3, kind: input, shape index: {}]   ;;  %s7887_s4 = inlined_call_operand.vmem [shape: bf16[3,64,64], index: 4, kind: input, shape index: {}]   ;;  %s7888_s5 = inlined_call_operand.vmem [shape: f32[7,64], index: 5, kind: input, shape index: {}]   ;;  %s7889_s6 = inlined_call_operand.vmem [shape: f32[7,64], index: 6, kind: input, shape index: {}]   ;;  %s7890_s7 = inlined_call_operand.vmem [shape: f32[1,192], index: 7, kind: input, shape index: {}]   ;;  %s7891_s8 = inlined_call_operand.hbm [shape: f32[2,1024], index: 8, kind: output, shape index: {}]  }
   0x1   :  { %v31_v0 = vld [vmem:[%s7883_s0] sm:$0xff]  ;;  %36 = vst.msk [vmem:[#allocation2] sm:$0xf] %vm35_vm0, %v7892_v1  ;;  %39 = vst.msk [vmem:[#allocation2 + $0x8] sm:$0xf] %vm35_vm0, %v7892_v1  ;;  %v32_v3 = vld [vmem:[%s7883_s0 + $0x8] sm:$0xff] }
   0x2   :  { %38 = vst.msk [vmem:[#allocation2 + $0x4] sm:$0x7] %vm37_vm1, %v7892_v1  ;;  %40 = vst.msk [vmem:[#allocation2 + $0xc] sm:$0x7] %vm37_vm1, %v7892_v1  ;;  %v5388_v2 = vpack.c.bf16 %v31_v0, %v31_v0  ;;  %vm115_vm3 = vsmask.f32 7942  ;;  %v5389_v4 = vpack.c.bf16 %v32_v3, %v32_v3 }
   0x3   :  { %41 = vst.msk [vmem:[#allocation2 + $0x10] sm:$0xf] %vm35_vm0, %v7892_v1  ;;  %43 = vst.msk [vmem:[#allocation2 + $0x18] sm:$0xf] %vm35_vm0, %v7892_v1  ;;  %vm120_vm4 = vcmask 517120   ;;  %v33_v5 = vld [vmem:[%s7883_s0 + $0x10] sm:$0xff] }
   0x4   :  { %42 = vst.msk [vmem:[#allocation2 + $0x14] sm:$0x7] %vm37_vm1, %v7892_v1  ;;  %44 = vst.msk [vmem:[#allocation2 + $0x1c] sm:$0x7] %vm37_vm1, %v7892_v1  ;;  %vm121_vm5 = vsmask.f32 1280  ;;  %v5390_v8 = vpack.c.bf16 %v33_v5, %v33_v5 }
   0x5   :  { %45 = vst.msk [vmem:[#allocation2 + $0x20] sm:$0xf] %vm35_vm0, %v7892_v1  ;;  %47 = vst.msk [vmem:[#allocation2 + $0x28] sm:$0xf] %vm35_vm0, %v7892_v1  ;;  %v70_v6 = vshrl.u32 %v5388_v2, 16  ;;  %v73_v7 = vshll.u32 %v5388_v2, 16 }
   0x6   :  { %46 = vst.msk [vmem:[#allocation2 + $0x24] sm:$0x7] %vm37_vm1, %v7892_v1  ;;  %48 = vst.msk [vmem:[#allocation2 + $0x2c] sm:$0x7] %vm37_vm1, %v7892_v1  ;;  %v79_v9 = vshrl.u32 %v5389_v4, 16  ;;  %v82_v10 = vshll.u32 %v5389_v4, 16 }
   0x7   :  { %49 = vst.msk [vmem:[#allocation2 + $0x30] sm:$0xf] %vm35_vm0, %v7892_v1  ;;  %51 = vst.msk [vmem:[#allocation2 + $0x38] sm:$0xf] %vm35_vm0, %v7892_v1  ;;  %v6080_v11 = vld [vmem:[%s7884_s1 + $0x40] sm:$0xff]   ;;  %v72_v13 = vrot.slane %v70_v6, 6 }
   0x8   :  { %50 = vst.msk [vmem:[#allocation2 + $0x34] sm:$0x7] %vm37_vm1, %v7892_v1  ;;  %52 = vst.msk [vmem:[#allocation2 + $0x3c] sm:$0x7] %vm37_vm1, %v7892_v1  ;;  %v6081_v12 = vld [vmem:[%s7884_s1] sm:$0xff]   ;;  %v75_v14 = vrot.slane %v73_v7, 7  ;;  %5392 = vmatprep.subr.bf16.mxu0 %v6080_v11 }
   0x9   :  { %vm6458_vm6 = vmand %vm114_vm2, %vm115_vm3  ;;  %v88_v16 = vshrl.u32 %v5390_v8, 16  ;;  %v91_v17 = vshll.u32 %v5390_v8, 16  ;;  %v81_v19 = vrot.slane %v79_v9, 6  ;;  %v84_v20 = vrot.slane %v82_v10, 7  ;;  %v34_v21 = vld [vmem:[%s7883_s0 + $0x18] sm:$0xff]  ;;  %5393 = vmatpush3.bf16.msra.mxu0 %v6081_v12  ;;  %v6082_v25 = vld [vmem:[%s7884_s1 + $0x48] sm:$0xff]  }
   0xa   :  { %vm6464_vm7 = vmand %vm120_vm4, %vm121_vm5  ;;  %v76_v22 = vor.u32 %v75_v14, %v72_v13  ;;  %v6083_v26 = vld [vmem:[%s7884_s1 + $0x8] sm:$0xff]   ;;  %v6477_v27 = vld [vmem:[#allocation2] sm:$0xe]  ;;  %5394 = vmatprep.subr.bf16.mxu0 %v6082_v25  ;;  %v5391_v46 = vpack.c.bf16 %v34_v21, %v34_v21  ;;  %vm713_vm8 = vcmask 523264  }
   0xb   :  { %v90_v23 = vrot.slane %v88_v16, 6  ;;  %v93_v24 = vrot.slane %v91_v17, 7  ;;  %v6479_v28 = vld [vmem:[#allocation2 + $0x4] sm:$0x3]  ;;  %v144_v29 = vld [vmem:[#allocation2] sm:$0xf]  ;;  %v85_v30 = vor.u32 %v84_v20, %v81_v19 }
   0xc   :  { %v5098_v31 = vcombine.low %v6477_v27, %v6479_v28  ;;  %v6483_v32 = vld [vmem:[#allocation2 + $0x4] sm:$0x1]  ;;  %v77_v33 = vrot.slane %v76_v22, 4  ;;  %v117_v34 = vld [vmem:[#allocation2 + $0x8] sm:$0xe]  ;;  %v6084_v51 = vld [vmem:[%s7884_s1 + $0x50] sm:$0xff]  }
   0xd   :  { %v5090_v35 = vcombine.low %v144_v29, %v6483_v32  ;;  %v118_v36 = vsel %vm6458_vm6, %v76_v22, %v117_v34  ;;  %v123_v37 = vld [vmem:[#allocation2 + $0xc] sm:$0x3]  ;;  %v6488_v38 = vld [vmem:[#allocation2 + $0x20] sm:$0xe]  ;;  %v6490_v39 = vld [vmem:[#allocation2 + $0x24] sm:$0x3]  ;;  %v94_v40 = vor.u32 %v93_v24, %v90_v23  ;;  %5395 = vmatpush3.bf16.msra.mxu0 %v6083_v26 }
   0xe   :  { %v314_v42 = vshrl.u32 %v5098_v31, 16  ;;  %v317_v43 = vshll.u32 %v5098_v31, 16  ;;  %119 = vst [vmem:[#allocation2 + $0x8] sm:$0xe] %v118_v36  ;;  %v124_v44 = vsel %vm6464_vm7, %v77_v33, %v123_v37  ;;  %v126_v45 = vld [vmem:[#allocation2 + $0x10] sm:$0xe]  ;;  %v5100_v54 = vcombine.low %v6488_v38, %v6490_v39  ;;  %5396 = vmatprep.subr.bf16.mxu0 %v6084_v51 }
   0xf   :  { %v250_v47 = vshrl.u32 %v5090_v35, 16  ;;  %v252_v48 = vshll.u32 %v5090_v35, 16  ;;  %125 = vst [vmem:[#allocation2 + $0xc] sm:$0x3] %v124_v44  ;;  %v127_v49 = vsel %vm6458_vm6, %v85_v30, %v126_v45  ;;  %v86_v50 = vrot.slane %v85_v30, 4  ;;  %v6085_v45 = vld [vmem:[%s7884_s1 + $0x10] sm:$0xff]  }
  0x10   :  { %v316_v52 = vrot.slane %v314_v42, 1  ;;  %v319_v53 = vrot.slane %v317_v43, 2  ;;  %128 = vst [vmem:[#allocation2 + $0x10] sm:$0xe] %v127_v49  ;;  %v129_v55 = vld [vmem:[#allocation2 + $0x14] sm:$0x3] }
  0x11   :  { %v254_v56 = vrot.slane %v252_v48, 1  ;;  %v130_v57 = vsel %vm6464_vm7, %v86_v50, %v129_v55  ;;  %v95_v58 = vrot.slane %v94_v40, 4  ;;  %v132_v60 = vld [vmem:[#allocation2 + $0x28] sm:$0xe]  ;;  %v135_v61 = vld [vmem:[#allocation2 + $0x2c] sm:$0x3]  ;;  %5397 = vmatpush3.bf16.msra.mxu0 %v6085_v45 }
  0x12   :  { %v320_v59 = vor.u32 %v319_v53, %v316_v52  ;;  %131 = vst [vmem:[#allocation2 + $0x14] sm:$0x3] %v130_v57  ;;  %v146_v63 = vld [vmem:[#allocation2 + $0x20] sm:$0xf]  ;;  %v6505_v0 = vld [vmem:[#allocation2 + $0x24] sm:$0x1]  ;;  %v133_v2 = vsel %vm6458_vm6, %v94_v40, %v132_v60 }
  0x13   :  { %v255_v62 = vor.u32 %v254_v56, %v250_v47  ;;  %v97_v3 = vshrl.u32 %v5391_v46, 16  ;;  %v330_v4 = vshrl.u32 %v5100_v54, 16  ;;  %v333_v5 = vshll.u32 %v5100_v54, 16  ;;  %134 = vst [vmem:[#allocation2 + $0x28] sm:$0xe] %v133_v2  ;;  %v6086_v49 = vld [vmem:[%s7884_s1 + $0x58] sm:$0xff]  }
  0x14   :  { %345 = vrot.lane.b32.xlu0 %v320_v59, %s6354_s23  ;;  %v136_v6 = vsel %vm6464_vm7, %v95_v58, %v135_v61  ;;  %v6522_v12 = vcombine.low %v146_v63, %v6505_v0  ;;  %v100_v13 = vshll.u32 %v5391_v46, 16  ;;  %v6527_v17 = vld [vmem:[#allocation2] sm:$0xc]  ;;  %v164_v23 = vld [vmem:[#allocation2 + $0x4] sm:$0x7]  ;;  %v6087_v55 = vld [vmem:[%s7884_s1 + $0x18] sm:$0xff]   ;;  %5398 = vmatprep.subr.bf16.mxu0 %v6086_v49 }
  0x15   :  { %277 = vrot.lane.b32.xlu1 %v255_v62, %s6354_s23  ;;  %v6513_v7 = vld [vmem:[#allocation2 + $0x8] sm:$0xe]  ;;  %137 = vst [vmem:[#allocation2 + $0x2c] sm:$0x3] %v136_v6  ;;  %v99_v19 = vrot.slane %v97_v3, 6  ;;  %v332_v20 = vrot.slane %v330_v4, 1  ;;  %v5106_v47 = vcombine.low %v6527_v17, %v164_v23  ;;  %5399 = vmatpush3.bf16.msra.mxu0 %v6087_v55 }
  0x16   :  { %v145_v8 = vld [vmem:[#allocation2 + $0x8] sm:$0xf]  ;;  %v6517_v10 = vld [vmem:[#allocation2 + $0xc] sm:$0x3]  ;;  %v335_v21 = vrot.slane %v333_v5, 2  ;;  %v266_v33 = vshll.u32 %v6522_v12, 16 }
  0x17   :  { %v6519_v11 = vld [vmem:[#allocation2 + $0xc] sm:$0x1]  ;;  %v5099_v14 = vcombine.low %v6513_v7, %v6517_v10  ;;  %v6529_v22 = vld [vmem:[#allocation2 + $0x10] sm:$0xe]  ;;  %v102_v36 = vrot.slane %v100_v13, 7  ;;  %v264_v52 = vshrl.u32 %v6522_v12, 16 }
  0x18   :  { %v5091_v16 = vcombine.low %v145_v8, %v6519_v11  ;;  %v173_v31 = vld [vmem:[#allocation2 + $0x10] sm:$0xf]  ;;  %v6554_v53 = vld [vmem:[#allocation2 + $0x8] sm:$0xf]  ;;  %v6556_v54 = vld [vmem:[#allocation2 + $0xc] sm:$0x1]  ;;  %v336_v56 = vor.u32 %v335_v21, %v332_v20 }
  0x19   :  { %v322_v24 = vshrl.u32 %v5099_v14, 16  ;;  %v325_v25 = vshll.u32 %v5099_v14, 16  ;;  %v185_v30 = vld [vmem:[#allocation2 + $0x14] sm:$0x3]  ;;  %v6545_v46 = vld [vmem:[#allocation2 + $0x10] sm:$0xc]  ;;  %v5115_v57 = vcombine.low %v173_v31, %v173_v31  ;;  %v6569_v61 = vcombine.low %v6554_v53, %v6556_v54 }
  0x1a   :  { %v257_v26 = vshrl.u32 %v5091_v16, 16  ;;  %v259_v29 = vshll.u32 %v5091_v16, 16  ;;  %v6532_v34 = vld [vmem:[#allocation2 + $0x14] sm:$0x1]  ;;  %v6535_v35 = vcombine.low %v6529_v22, %v185_v30  ;;  %v6540_v44 = vld [vmem:[#allocation2 + $0x28] sm:$0xe]  ;;  %v5131_v63 = vcombine.low %v6545_v46, %v185_v30 }
  0x1b   :  { %v324_v37 = vrot.slane %v322_v24, 1  ;;  %v327_v40 = vrot.slane %v325_v25, 2  ;;  %v6538_v43 = vcombine.low %v173_v31, %v6532_v34  ;;  %v6563_v59 = vld [vmem:[#allocation2 + $0xc] sm:$0x3]  ;;  %v6565_v60 = vld [vmem:[#allocation2 + $0x8] sm:$0xe]  ;;  %v103_v5 = vor.u32 %v102_v36, %v99_v19 }
  0x1c   :  { %v261_v42 = vrot.slane %v259_v29, 1  ;;  %v6548_v48 = vld [vmem:[#allocation2 + $0x2c] sm:$0x3]  ;;  %v268_v62 = vrot.slane %v266_v33, 1  ;;  %v147_v2 = vld [vmem:[#allocation2 + $0x28] sm:$0xf]  ;;  %v6578_v4 = vcombine.low %v6565_v60, %v6563_v59  ;;  %v5123_v14 = vcombine.low %v6529_v22, %v6532_v34 }
  0x1d   :  { %7905 = vst [vmem:[#allocation6_spill] sm:$0xff] %v6548_v48  ;;  %v328_v50 = vor.u32 %v327_v40, %v324_v37  ;;  %v5101_v58 = vcombine.low %v6540_v44, %v6548_v48  ;;  %v6574_v3 = vld [vmem:[#allocation2 + $0x2c] sm:$0x1]  ;;  %v382_v6 = vshrl.u32 %v5106_v47, 16  ;;  %v138_v8 = vld [vmem:[#allocation2 + $0x30] sm:$0xe]  ;;  %v5114_v55 = vcombine.low %v6554_v53, %v6554_v53 }
  0x1e   :  { %v262_v51 = vor.u32 %v261_v42, %v257_v26  ;;  %v6088_v12 = vld [vmem:[%s7884_s1 + $0x60] sm:$0xff]   ;;  %v385_v13 = vshll.u32 %v5106_v47, 16  ;;  %v6586_v20 = vcombine.low %v147_v2, %v6574_v3  ;;  %v6588_v21 = vld [vmem:[#allocation2 + $0x8] sm:$0xc]  ;;  %v6590_v23 = vld [vmem:[#allocation2 + $0xc] sm:$0x7]  ;;  %v269_v19 = vor.u32 %v268_v62, %v264_v52 }
  0x1f   :  { %347 = vrot.lane.b32.xlu0 %v328_v50, %s6354_s23  ;;  %v338_v16 = vshrl.u32 %v5101_v58, 16  ;;  %5400 = vmatprep.subr.bf16.mxu0 %v6088_v12  ;;  %v578_v24 = vrot.slane %v5131_v63, 2  ;;  %v341_v25 = vshll.u32 %v5101_v58, 16  ;;  %v139_v26 = vsel %vm6458_vm6, %v103_v5, %v138_v8  ;;  %v6089_v22 = vld [vmem:[%s7884_s1 + $0x20] sm:$0xff]   ;;  %v188_v30 = vld [vmem:[#allocation2 + $0x8] sm:$0xc] }
  0x20   :  { %279 = vrot.lane.b32.xlu1 %v262_v51, %s6354_s23  ;;  %v384_v29 = vrot.slane %v382_v6, 2  ;;  %140 = vst [vmem:[#allocation2 + $0x30] sm:$0xe] %v139_v26  ;;  %v6599_v31 = vld [vmem:[#allocation2 + $0x20] sm:$0xc]  ;;  %v6090_v34 = vld [vmem:[%s7884_s1 + $0x68] sm:$0xff]   ;;  %v5107_v37 = vcombine.low %v6588_v21, %v6590_v23  ;;  %5401 = vmatpush3.bf16.msra.mxu0 %v6089_v22  ;;  %v5130_v2 = vcombine.low %v188_v30, %v6563_v59 }
  0x21   :  { %v141_v33 = vld [vmem:[#allocation2 + $0x34] sm:$0x3]  ;;  %v387_v36 = vrot.slane %v385_v13, 3  ;;  %v6606_v15 = vld [vmem:[#allocation2 + $0x28] sm:$0xf]  ;;  %v104_v40 = vrot.slane %v103_v5, 4  ;;  %5402 = vmatprep.subr.bf16.mxu0 %v6090_v34 }
  0x22   :  { %v6608_v42 = vld [vmem:[#allocation2 + $0x2c] sm:$0x1]  ;;  %v510_v45 = vrot.slane %v5123_v14, 1  ;;  %v340_v47 = vrot.slane %v338_v16, 1  ;;  %v273_v49 = vshll.u32 %v6586_v20, 16  ;;  %v6092_v63 = vld [vmem:[%s7884_s1 + $0xc0] sm:$0xff]  }
  0x23   :  { %349 = vrot.lane.b32.xlu0 %v336_v56, %s6354_s23  ;;  %v166_v50 = vld [vmem:[#allocation2 + $0x24] sm:$0x7]  ;;  %v6613_v51 = vcombine.low %v6606_v15, %v6608_v42  ;;  %v6091_v52 = vld [vmem:[%s7884_s1 + $0x28] sm:$0xff]   ;;  %v343_v56 = vrot.slane %v341_v25, 2  ;;  %v142_v58 = vsel %vm6464_vm7, %v104_v40, %v141_v33  ;;  %v390_v53 = vshrl.u32 %v5107_v37, 16  ;;  %5420 = vmatprep.subr.bf16.mxu1 %v6092_v63  ;;  %v6093_v22 = vld [vmem:[%s7884_s1 + $0x70] sm:$0xff]  }
  0x24   :  { %451 = vrot.lane.b32.xlu1 %v5115_v57, %s6354_s23  ;;  %v6622_v57 = vld [vmem:[#allocation2 + $0x2c] sm:$0x3]  ;;  %v6626_v62 = vld [vmem:[#allocation2 + $0x28] sm:$0xe]  ;;  %143 = vst [vmem:[#allocation2 + $0x34] sm:$0x3] %v142_v58  ;;  %v5108_v6 = vcombine.low %v6599_v31, %v166_v50  ;;  %5403 = vmatpush3.bf16.msra.mxu0 %v6091_v52  ;;  %v388_v18 = vor.u32 %v387_v36, %v384_v29 }
  0x25   :  { %v6634_v5 = vcombine.low %v6626_v62, %v6622_v57  ;;  %v6637_v8 = vld [vmem:[#allocation2 + $0xc] sm:$0x7]  ;;  %v271_v12 = vshrl.u32 %v6586_v20, 16  ;;  %v6643_v14 = vld [vmem:[#allocation2 + $0x14] sm:$0x7]  ;;  %v344_v59 = vor.u32 %v343_v56, %v340_v47  ;;  %v275_v16 = vrot.slane %v273_v49, 1  ;;  %5404 = vmatprep.subr.bf16.mxu0 %v6093_v22 }
  0x26   :  { %v6641_v13 = vcombine.low %v188_v30, %v6637_v8  ;;  %v167_v25 = vld [vmem:[#allocation2 + $0x2c] sm:$0x7]  ;;  %v6651_v26 = vcombine.low %v6545_v46, %v6643_v14  ;;  %v577_v20 = vrot.slane %v5130_v2, 2  ;;  %v392_v29 = vrot.slane %v390_v53, 2  ;;  %v190_v33 = vld [vmem:[#allocation2 + $0x28] sm:$0xc] }
  0x27   :  { %281 = vrot.lane.b32.xlu0 %v269_v19, %s6354_s23  ;;  %v393_v19 = vshll.u32 %v5107_v37, 16  ;;  %v398_v30 = vshrl.u32 %v5108_v6, 16  ;;  %v201_v34 = vld [vmem:[#allocation2 + $0x10] sm:$0xf]  ;;  %v276_v46 = vor.u32 %v275_v16, %v271_v12  ;;  %v5122_v47 = vcombine.low %v6565_v60, %v6556_v54  ;;  %v6686_v12 = vld [vmem:[#allocation2 + $0x1c] sm:$0x1] }
  0x28   :  { %583 = vrot.lane.b32.xlu1 %v578_v24, %s6354_s23  ;;  %7906 = vst [vmem:[#allocation7_spill] sm:$0xff] %v6641_v13  ;;  %v6647_v24 = vld [vmem:[#allocation2 + $0x28] sm:$0xc]  ;;  %7907 = vst [vmem:[#allocation8_spill] sm:$0xff] %v6651_v26  ;;  %v6656_v36 = vld [vmem:[#allocation2 + $0x30] sm:$0xf]  ;;  %v5132_v54 = vcombine.low %v190_v33, %v6622_v57  ;;  %v5124_v57 = vcombine.low %v6626_v62, %v6608_v42 }
  0x29   :  { %v5109_v37 = vcombine.low %v6647_v24, %v167_v25  ;;  %v6659_v40 = vld [vmem:[#allocation2 + $0x30] sm:$0xe]  ;;  %v395_v49 = vrot.slane %v393_v19, 3  ;;  %v401_v56 = vshll.u32 %v5108_v6, 16  ;;  %v509_v6 = vrot.slane %v5122_v47, 1 }
  0x2a   :  { %v400_v16 = vrot.slane %v398_v30, 2  ;;  %v196_v19 = vld [vmem:[#allocation2 + $0x8] sm:$0x8]  ;;  %v6692_v22 = vld [vmem:[#allocation2 + $0x10] sm:$0xc] }
  0x2b   :  { %449 = vrot.lane.b32.xlu0 %v5114_v55, %s6354_s23  ;;  %v6667_v50 = vld [vmem:[#allocation2 + $0x34] sm:$0x3]  ;;  %v6094_v55 = vld [vmem:[%s7884_s1 + $0x80] sm:$0xff]   ;;  %v406_v60 = vshrl.u32 %v5109_v37, 16  ;;  %v409_v2 = vshll.u32 %v5109_v37, 16  ;;  %v403_v25 = vrot.slane %v401_v56, 3  ;;  %v5138_v62 = vcombine.low %v196_v19, %v6637_v8 }
  0x2c   :  { %515 = vrot.lane.b32.xlu1 %v510_v45, %s6354_s23  ;;  %v6661_v45 = vld [vmem:[#allocation2 + $0x14] sm:$0x1]  ;;  %v6680_v63 = vcombine.low %v6659_v40, %v6667_v50  ;;  %5421 = vmatpush3.bf16.msra.mxu1 %v6094_v55  ;;  %v6697_v55 = vrot.slane %v5132_v54, 2  ;;  %v197_v47 = vld [vmem:[#allocation2 + $0x10] sm:$0x8]  ;;  %v5117_v56 = vcombine.low %v6656_v36, %v6656_v36 }
  0x2d   :  { %v6669_v52 = vld [vmem:[#allocation2 + $0x34] sm:$0x1]  ;;  %v6684_v53 = vcombine.low %v201_v34, %v6661_v45  ;;  %v408_v30 = vrot.slane %v406_v60, 2  ;;  %v6714_v60 = vld [vmem:[#allocation2 + $0x18] sm:$0xc]  ;;  %v404_v8 = vor.u32 %v403_v25, %v400_v16  ;;  %v6734_v9 = vrot.slane %v5138_v62, 3 }
  0x2e   :  { %v6676_v58 = vcombine.low %v6656_v36, %v6669_v52  ;;  %v221_v37 = vld [vmem:[#allocation2 + $0x14] sm:$0x7]  ;;  %v191_v19 = vld [vmem:[#allocation2 + $0x30] sm:$0xc]  ;;  %v228_v26 = vld [vmem:[#allocation2 + $0x38] sm:$0x8] }
  0x2f   :  { %413 = vrot.lane.b32.xlu0 %v388_v18, %s6354_s23  ;;  %v202_v18 = vld [vmem:[#allocation2 + $0x18] sm:$0xf]  ;;  %v6095_v34 = vld [vmem:[%s7884_s1 + $0x30] sm:$0xff]   ;;  %v680_v42 = vshll.u32 %v6684_v53, 16  ;;  %v5158_v54 = vcombine.low %v6692_v22, %v221_v37  ;;  %v678_v36 = vshrl.u32 %v6684_v53, 16  ;;  %v5133_v53 = vcombine.low %v191_v19, %v6667_v50 }
  0x30   :  { %351 = vrot.lane.b32.xlu1 %v344_v59, %s6354_s23  ;;  %v396_v59 = vor.u32 %v395_v49, %v392_v29  ;;  %v6096_v29 = vld [vmem:[%s7884_s1 + $0xc8] sm:$0xff]   ;;  %5405 = vmatpush3.bf16.msra.mxu0 %v6095_v34  ;;  %v5116_v49 = vcombine.low %v6606_v15, %v6606_v15  ;;  %v6718_v34 = vrot.slane %v5124_v57, 1  ;;  %v6097_v15 = vld [vmem:[%s7884_s1 + $0x78] sm:$0xff]   ;;  %v227_v25 = vld [vmem:[#allocation2 + $0x30] sm:$0x8] }
  0x31   :  { %5422 = vmatprep.subr.bf16.mxu1 %v6096_v29  ;;  %v5139_v29 = vcombine.low %v197_v47, %v6643_v14  ;;  %v6737_v41 = vld [vmem:[#allocation2 + $0x10] sm:$0xe]  ;;  %5406 = vmatprep.subr.bf16.mxu0 %v6097_v15  ;;  %v899_v37 = vshrl.u32 %v5158_v54, 16  ;;  %v5125_v14 = vcombine.low %v6659_v40, %v6669_v52  ;;  %v6750_v62 = vld [vmem:[#allocation2 + $0x3c] sm:$0x7]  ;;  %v580_v50 = vrot.slane %v5133_v53, 2 }
  0x32   :  { %v5165_v47 = vcombine.low %v228_v26, %v6750_v62  ;;  %v6753_v15 = vld [vmem:[#allocation2 + $0x18] sm:$0xe]  ;;  %v6765_v26 = vld [vmem:[#allocation2 + $0x1c] sm:$0x3] }
  0x33   :  { %581 = vrot.lane.b32.xlu0 %v577_v20, %s6354_s23  ;;  %v6700_v20 = vcombine.low %v202_v18, %v6686_v12  ;;  %v6716_v18 = vld [vmem:[#allocation2 + $0x2c] sm:$0x7]  ;;  %v6794_v13 = vld [vmem:[#allocation2 + $0x3c] sm:$0x1] }
  0x34   :  { %283 = vrot.lane.b32.xlu1 %v276_v46, %s6354_s23  ;;  %v411_v46 = vrot.slane %v409_v2, 3  ;;  %v222_v2 = vld [vmem:[#allocation2 + $0x1c] sm:$0x7]  ;;  %v6763_v52 = vrot.slane %v5165_v47, 3  ;;  %v5151_v47 = vcombine.low %v6753_v15, %v6765_v26 }
  0x35   :  { %v687_v1 = vshll.u32 %v6700_v20, 16 }
  0x36   :  { %v412_v57 = vor.u32 %v411_v46, %v408_v30  ;;  %v5159_v30 = vcombine.low %v6714_v60, %v222_v2  ;;  %v6745_v46 = vld [vmem:[#allocation2 + $0x34] sm:$0x7]  ;;  %7911 = vst [vmem:[#allocation12_spill] sm:$0xff] %v6763_v52  ;;  %v512_v2 = vrot.slane %v5125_v14, 1 }
  0x37   :  { %513 = vrot.lane.b32.xlu0 %v509_v6, %s6354_s23  ;;  %v6721_v6 = vcombine.low %v190_v33, %v6716_v18  ;;  %v682_v33 = vrot.slane %v680_v42, 1  ;;  %v5164_v42 = vcombine.low %v227_v25, %v6745_v46  ;;  %v6767_v25 = vrot.slane %v899_v37, 1  ;;  %v6790_v52 = vld [vmem:[#allocation2 + $0x34] sm:$0x1] }
  0x38   :  { %415 = vrot.lane.b32.xlu1 %v396_v59, %s6354_s23  ;;  %v6723_v59 = vld [vmem:[#allocation2 + $0x34] sm:$0x7] }
  0x39   :  { %7908 = vst [vmem:[#allocation9_spill] sm:$0xff] %v6721_v6  ;;  %v6732_v16 = vcombine.low %v191_v19, %v6723_v59  ;;  %v6739_v6 = vld [vmem:[#allocation2 + $0x14] sm:$0x3]  ;;  %v689_v19 = vrot.slane %v687_v1, 1  ;;  %v6099_v1 = vld [vmem:[%s7884_s1 + $0x38] sm:$0xff]   ;;  %v683_v37 = vor.u32 %v682_v33, %v678_v36  ;;  %v842_v33 = vshrl.u32 %v5151_v47, 16 }
  0x3a   :  { %v6761_v40 = vcombine.low %v6737_v41, %v6739_v6  ;;  %5407 = vmatpush3.bf16.msra.mxu0 %v6099_v1  ;;  %v198_v36 = vld [vmem:[#allocation2 + $0x28] sm:$0x8] }
  0x3b   :  { %7909 = vst [vmem:[#allocation10_spill] sm:$0xff] %v6732_v16  ;;  %453 = vrot.lane.b32.xlu0 %v5116_v49, %s6354_s23  ;;  %v902_v16 = vshll.u32 %v5158_v54, 16  ;;  %v646_v49 = vrot.slane %v5139_v29, 3  ;;  %v907_v54 = vshrl.u32 %v5159_v30, 16 }
  0x3c   :  { %455 = vrot.lane.b32.xlu1 %v5117_v56, %s6354_s23  ;;  %v6755_v56 = vrot.slane %v5164_v42, 3  ;;  %v910_v42 = vshll.u32 %v5159_v30, 16  ;;  %v835_v53 = vshrl.u32 %v6761_v40, 16  ;;  %v837_v14 = vshll.u32 %v6761_v40, 16 }
  0x3d   :  { %v6769_v29 = vrot.slane %v902_v16, 2  ;;  %v909_v30 = vrot.slane %v907_v54, 1  ;;  %v199_v54 = vld [vmem:[#allocation2 + $0x30] sm:$0x8]  ;;  %v6835_v16 = vld [vmem:[#allocation2 + $0x38] sm:$0xc] }
  0x3e   :  { %7910 = vst [vmem:[#allocation11_spill] sm:$0xff] %v6755_v56  ;;  %v204_v56 = vld [vmem:[#allocation2 + $0x38] sm:$0xf] }
  0x3f   :  { %417 = vrot.lane.b32.xlu0 %v404_v8, %s6354_s23  ;;  %v203_v8 = vld [vmem:[#allocation2 + $0x30] sm:$0xf]  ;;  %v5145_v40 = vcombine.low %v204_v56, %v6794_v13 }
  0x40   :  { %419 = vrot.lane.b32.xlu1 %v412_v57, %s6354_s23  ;;  %v6098_v57 = vld [vmem:[%s7884_s1 + $0x88] sm:$0xff]   ;;  %v5144_v48 = vcombine.low %v203_v8, %v6790_v52  ;;  %v6101_v56 = vld [vmem:[%s7884_s1 + $0x90] sm:$0xff]  }
  0x41   :  { %5423 = vmatpush3.bf16.msra.mxu1 %v6098_v57  ;;  %v7912_v57 = vshrl.u32 %v6700_v20, 16 }
  0x42   :  { %v694_v20 = vshll.u32 %v5144_v48, 16 }
  0x43   :  { %585 = vrot.lane.b32.xlu0 %v6697_v55, %s6354_s23  ;;  %v690_v1 = vor.u32 %v689_v19, %v7912_v57  ;;  %v912_v55 = vrot.slane %v910_v42, 2  ;;  %v6100_v19 = vld [vmem:[%s7884_s1 + $0xd0] sm:$0xff]   ;;  %v701_v42 = vshll.u32 %v5145_v40, 16  ;;  %v692_v57 = vshrl.u32 %v5144_v48, 16  ;;  %v6107_v48 = vld [vmem:[%s7884_s1 + $0x98] sm:$0xff]  }
  0x44   :  { %587 = vrot.lane.b32.xlu1 %v580_v50, %s6354_s23  ;;  %v844_v50 = vshll.u32 %v5151_v47, 16  ;;  %5424 = vmatprep.subr.bf16.mxu1 %v6100_v19  ;;  %v6837_v19 = vld [vmem:[#allocation2 + $0x34] sm:$0x3] }
  0x45   :  { %v913_v47 = vor.u32 %v912_v55, %v909_v30  ;;  %5425 = vmatpush3.bf16.msra.mxu1 %v6101_v56  ;;  %v6847_v55 = vld [vmem:[#allocation2 + $0x3c] sm:$0x3]  ;;  %v6110_v56 = vld [vmem:[%s7884_s1 + $0xe0] sm:$0xff]  }
  0x46   :  { %v846_v8 = vrot.slane %v844_v50, 1  ;;  %v696_v50 = vrot.slane %v694_v20, 1  ;;  %v6853_v20 = vld [vmem:[#allocation2 + $0x30] sm:$0xe] }
  0x47   :  { %517 = vrot.lane.b32.xlu0 %v6718_v34, %s6354_s23  ;;  %v839_v34 = vrot.slane %v837_v14, 1  ;;  %v905_v14 = vor.u32 %v6769_v29, %v6767_v25 }
  0x48   :  { %519 = vrot.lane.b32.xlu1 %v512_v2, %s6354_s23  ;;  %v6819_v2 = vld [vmem:[#allocation2 + $0x30] sm:$0xc]  ;;  %v847_v30 = vor.u32 %v846_v8, %v842_v33  ;;  %v5141_v33 = vcombine.low %v199_v54, %v6723_v59  ;;  %v6111_v8 = vld [vmem:[%s7884_s1 + $0xa0] sm:$0xff]  }
  0x49   :  { %v5160_v25 = vcombine.low %v6819_v2, %v6745_v46  ;;  %v840_v29 = vor.u32 %v839_v34, %v835_v53  ;;  %v5156_v46 = vcombine.low %v6819_v2, %v6837_v19  ;;  %v5157_v53 = vcombine.low %v6835_v16, %v6847_v55 }
  0x4a   :  { %v5140_v34 = vcombine.low %v198_v36, %v6716_v18  ;;  %v5148_v36 = vcombine.low %v6853_v20, %v6790_v52 }
  0x4b   :  { %705 = vrot.lane.b32.xlu0 %v683_v37, %s6354_s23  ;;  %v6102_v37 = vld [vmem:[%s7884_s1 + $0x140] sm:$0xff]  }
  0x4c   :  { %707 = vrot.lane.b32.xlu1 %v690_v1, %s6354_s23  ;;  %v699_v1 = vshrl.u32 %v5145_v40, 16  ;;  %5448 = vmatprep.subr.bf16.mxu0 %v6102_v37  ;;  %v5161_v40 = vcombine.low %v6835_v16, %v6750_v62  ;;  %v915_v62 = vshrl.u32 %v5160_v25, 16  ;;  %v697_v37 = vor.u32 %v696_v50, %v692_v57  ;;  %v6114_v50 = vld [vmem:[%s7884_s1 + $0xe8] sm:$0xff]  }
  0x4d   :  { %v648_v57 = vrot.slane %v5141_v33, 3 }
  0x4e   :  { %v923_v18 = vshrl.u32 %v5161_v40, 16  ;;  %v926_v59 = vshll.u32 %v5161_v40, 16 }
  0x4f   :  { %649 = vrot.lane.b32.xlu0 %v6734_v9, %s6354_s23  ;;  %v6106_v9 = vld [vmem:[%s7884_s1 + $0xd8] sm:$0xff]  }
  0x50   :  { %651 = vrot.lane.b32.xlu1 %v646_v49, %s6354_s23  ;;  %v703_v49 = vrot.slane %v701_v42, 1  ;;  %5426 = vmatprep.subr.bf16.mxu1 %v6106_v9  ;;  %v6855_v42 = vld [vmem:[#allocation2 + $0x38] sm:$0xe]  ;;  %v5152_v9 = vcombine.low %v6853_v20, %v6837_v19  ;;  %v928_v40 = vrot.slane %v926_v59, 2 }
  0x51   :  { %5427 = vmatpush3.bf16.msra.mxu1 %v6107_v48  ;;  %v5153_v54 = vcombine.low %v6855_v42, %v6847_v55  ;;  %v647_v48 = vrot.slane %v5140_v34, 3 }
  0x52   :  { %5428 = vmatprep.subr.bf16.mxu1 %v6110_v56  ;;  %v851_v34 = vshll.u32 %v5152_v9, 16  ;;  %v849_v56 = vshrl.u32 %v5152_v9, 16  ;;  %v6125_v9 = vld [vmem:[%s7884_s1 + $0xf8] sm:$0xff]  }
  0x53   :  { %930 = vrot.lane.b32.xlu0 %v905_v14, %s6354_s23  ;;  %v704_v14 = vor.u32 %v703_v49, %v699_v1  ;;  %v917_v1 = vrot.slane %v915_v62, 1  ;;  %v858_v33 = vshll.u32 %v5153_v54, 16  ;;  %v6121_v62 = vld [vmem:[%s7884_s1 + $0xf0] sm:$0xff]  }
  0x54   :  { %932 = vrot.lane.b32.xlu1 %v913_v47, %s6354_s23  ;;  %v918_v47 = vshll.u32 %v5160_v25, 16 }
  0x55   :  { %5429 = vmatpush3.bf16.msra.mxu1 %v6111_v8  ;;  %v856_v8 = vshrl.u32 %v5153_v54, 16  ;;  %v860_v59 = vrot.slane %v858_v33, 1  ;;  %v6126_v54 = vld [vmem:[%s7884_s1 + $0xb8] sm:$0xff]   ;;  %v7913_v33 = vcombine.low %v6477_v27, %v6483_v32  ;;  %v6313_v32 = vld [vmem:[#allocation2] sm:$0xf] }
  0x56   :  { %v920_v25 = vrot.slane %v918_v47, 2  ;;  %5430 = vmatprep.subr.bf16.mxu1 %v6114_v50  ;;  %v6122_v47 = vld [vmem:[%s7884_s1 + $0xb0] sm:$0xff]   ;;  %v542_v50 = vshrl.u32 %v6535_v35, 16 }
  0x57   :  { %862 = vrot.lane.b32.xlu0 %v840_v29, %s6354_s23  ;;  %v6115_v29 = vld [vmem:[%s7884_s1 + $0xa8] sm:$0xff]  }
  0x58   :  { %864 = vrot.lane.b32.xlu1 %v847_v30, %s6354_s23  ;;  %v925_v30 = vrot.slane %v923_v18, 1  ;;  %v853_v18 = vrot.slane %v851_v34, 1  ;;  %v472_v34 = vshll.u32 %v6569_v61, 16 }
  0x59   :  { %5431 = vmatpush3.bf16.msra.mxu1 %v6115_v29  ;;  %v545_v29 = vshll.u32 %v6535_v35, 16 }
  0x5a   :  { %5432 = vmatprep.subr.bf16.mxu1 %v6121_v62  ;;  %v7914_v62 = vcombine.low %v6513_v7, %v6519_v11  ;;  %v6314_v11 = vld [vmem:[#allocation2 + $0x8] sm:$0xf] }
  0x5b   :  { %709 = vrot.lane.b32.xlu0 %v697_v37, %s6354_s23  ;;  %v921_v37 = vor.u32 %v920_v25, %v917_v1  ;;  %v6130_v1 = vld [vmem:[%s7884_s1 + $0x1c0] sm:$0xff]   ;;  %v479_v25 = vshll.u32 %v6538_v43, 16 }
  0x5c   :  { %711 = vrot.lane.b32.xlu1 %v704_v14, %s6354_s23  ;;  %v929_v14 = vor.u32 %v928_v40, %v925_v30 }
  0x5d   :  { %5433 = vmatpush3.bf16.msra.mxu1 %v6122_v47  ;;  %v168_v47 = vld [vmem:[#allocation2] sm:$0x8] }
  0x5e   :  { %5434 = vmatprep.subr.bf16.mxu1 %v6125_v9  ;;  %v6105_v9 = vld [vmem:[%s7884_s1 + $0x100] sm:$0xff]  }
  0x5f   :  { %653 = vrot.lane.b32.xlu0 %v647_v48, %s6354_s23  ;;  %v854_v48 = vor.u32 %v853_v18, %v849_v56  ;;  %v297_v56 = vrot.slane %v7913_v33, 1  ;;  %v537_v18 = vshll.u32 %v6578_v4, 16  ;;  %v6108_v33 = vld [vmem:[%s7884_s1 + $0x148] sm:$0xff]  }
  0x60   :  { %655 = vrot.lane.b32.xlu1 %v648_v57, %s6354_s23  ;;  %v861_v57 = vor.u32 %v860_v59, %v856_v8  ;;  %v298_v8 = vrot.slane %v7914_v62, 1 }
  0x61   :  { %5435 = vmatpush3.bf16.msra.mxu1 %v6126_v54  ;;  %v6312_v54 = vld [vmem:[#allocation2 + $0x4] sm:$0x7] }
  0x62   :  { %5476 = vmatprep.subr.bf16.mxu1 %v6130_v1 }
  0x63   :  { %934 = vrot.lane.b32.xlu0 %v921_v37, %s6354_s23  ;;  %v169_v37 = vld [vmem:[#allocation2 + $0x8] sm:$0x8] }
  0x64   :  { %936 = vrot.lane.b32.xlu1 %v929_v14, %s6354_s23  ;;  %v534_v14 = vshrl.u32 %v6578_v4, 16  ;;  %v5111_v27 = vcombine.low %v169_v37, %v6590_v23  ;;  %v6934_v37 = vrot.slane %v542_v50, 1 }
  0x67   :  { %866 = vrot.lane.b32.xlu0 %v854_v48, %s6354_s23  ;;  %v5110_v48 = vcombine.low %v168_v47, %v6312_v54  ;;  %v7915_v47 = vcombine.low %v6488_v38, %v6505_v0  ;;  %v6112_v38 = vld [vmem:[%s7884_s1 + $0x150] sm:$0xff]   ;;  %v434_v0 = vrot.slane %v5111_v27, 3 }
  0x68   :  { %868 = vrot.lane.b32.xlu1 %v861_v57, %s6354_s23 }
  0x69   :  { %v299_v23 = vrot.slane %v7915_v47, 1 }
  0x86   :  { %v346_v30 = vpop.permute.xlu0 %345 }
  0x87   :  { %v278_v40 = vpop.permute.xlu1 %277  ;;  %v728_v1 = vsel %vm713_vm8, %v297_v56, %v346_v30  ;;  %v6109_v30 = vld [vmem:[%s7884_s1 + $0x108] sm:$0xff]   ;;  %v433_v56 = vrot.slane %v5110_v48, 3  ;;  %v6118_v48 = vld [vmem:[%s7884_s1 + $0x158] sm:$0xff]  }
  0x88   :  { %v716_v7 = vsel %vm713_vm8, %v6313_v32, %v278_v40 }
  0x91   :  { %v348_v35 = vpop.permute.xlu0 %347 }
  0x92   :  { %v280_v59 = vpop.permute.xlu1 %279  ;;  %v731_v4 = vsel %vm713_vm8, %v298_v8, %v348_v35  ;;  %v7916_v8 = vcombine.low %v6540_v44, %v6574_v3 }
  0x93   :  { %v719_v57 = vsel %vm713_vm8, %v6314_v11, %v280_v59  ;;  %v5172_v49 = vcombine.low %v728_v1, %v731_v4  ;;  %v547_v59 = vrot.slane %v545_v29, 2  ;;  %v6113_v29 = vld [vmem:[%s7884_s1 + $0x110] sm:$0xff]  }
  0x94   :  { %v5171_v62 = vcombine.low %v716_v7, %v719_v57  ;;  %v300_v35 = vrot.slane %v7916_v8, 1  ;;  %v539_v7 = vrot.slane %v537_v18, 2 }
  0x95   :  { %v350_v40 = vpop.permute.xlu0 %349  ;;  %1831 = vmatprep.mubr.bf16.mxu0 %v5172_v49 }
  0x96   :  { %v452_v54 = vpop.permute.xlu1 %451  ;;  %1832 = vmatmul.mubr.bf16.vlgmr.msra.gmra.mrb[0].mxu0 %v5171_v62 }
  0x97   :  { %5449 = vmatpush3.bf16.msra.mxu0 %v6105_v9  ;;  %v755_v27 = vsel %vm713_vm8, %v434_v0, %v452_v54  ;;  %v536_v9 = vrot.slane %v534_v14, 1 }
  0x98   :  { %5450 = vmatprep.subr.bf16.mxu0 %v6108_v33 }
  0x99   :  { %v282_v49 = vpop.permute.xlu0 %281 }
  0x9a   :  { %v584_v50 = vpop.permute.xlu1 %583 }
  0x9b   :  { %5451 = vmatpush3.bf16.msra.mxu0 %v6109_v30 }
  0x9c   :  { %5452 = vmatprep.subr.bf16.mxu0 %v6112_v38 }
  0x9d   :  { %v450_v44 = vpop.permute.xlu0 %449 }
  0x9e   :  { %v516_v3 = vpop.permute.xlu1 %515  ;;  %v752_v32 = vsel %vm713_vm8, %v433_v56, %v450_v44 }
  0x9f   :  { %13 = vsyncpa [#allocation4], 0  ;;  %5453 = vmatpush3.bf16.msra.mxu0 %v6113_v29  ;;  %v5174_v11 = vcombine.low %v752_v32, %v755_v27  ;;  %v6120_v57 = vld [vmem:[%s7884_s1 + $0x118] sm:$0xff]   ;;  %v477_v1 = vshrl.u32 %v6538_v43, 16  ;;  %v481_v4 = vrot.slane %v479_v25, 1  ;;  %v6123_v33 = vld [vmem:[%s7884_s1 + $0x160] sm:$0xff]   ;;  %v734_v54 = vsel %vm713_vm8, %v299_v23, %v350_v40 }
  0xa0   :  { %5454 = vmatprep.subr.bf16.mxu0 %v6118_v48  ;;  %v470_v14 = vshrl.u32 %v6569_v61, 16  ;;  %v474_v18 = vrot.slane %v472_v34, 1  ;;  %v548_v30 = vor.u32 %v547_v59, %v6934_v37  ;;  %v540_v8 = vor.u32 %v539_v7, %v536_v9  ;;  %v170_v43 = vld [vmem:[#allocation2 + $0x20] sm:$0x8]  ;;  %v171_v25 = vld [vmem:[#allocation2 + $0x28] sm:$0x8] }
  0xa1   :  { %v414_v62 = vpop.permute.xlu0 %413  ;;  %1880 = vmatprep.mubr.bf16.mxu1 %v5174_v11  ;;  %v6124_v0 = vld [vmem:[%s7884_s1 + $0x120] sm:$0xff]   ;;  %v482_v29 = vor.u32 %v481_v4, %v477_v1  ;;  %v7917_v61 = vcombine.low %v6527_v17, %v6479_v28  ;;  %v6127_v23 = vld [vmem:[%s7884_s1 + $0x168] sm:$0xff]   ;;  %s6357_s19 = smov 96   ;;  %vm6358_vm9 = vmmov 0   ;;  %s6359_s20 = smov 80   ;;  %vm2736_vm10 = vcmask 130048  }
  0xa2   :  { %v352_v47 = vpop.permute.xlu1 %351  ;;  %v475_v59 = vor.u32 %v474_v18, %v470_v14  ;;  %v6315_v44 = vld [vmem:[#allocation2 + $0x24] sm:$0x7]  ;;  %v6316_v27 = vld [vmem:[#allocation2 + $0x2c] sm:$0x7]  ;;  %v6317_v7 = vld [vmem:[#allocation2 + $0x20] sm:$0xf]  ;;  %v779_v17 = vsel %vm713_vm8, %v548_v30, %v584_v50 }
  0xa3   :  { %v737_v56 = vsel %vm713_vm8, %v300_v35, %v352_v47  ;;  %5455 = vmatpush3.bf16.msra.mxu0 %v6120_v57  ;;  %v365_v34 = vrot.slane %v7917_v61, 2  ;;  %v7918_v35 = vcombine.low %v6588_v21, %v6517_v10  ;;  %v5112_v32 = vcombine.low %v170_v43, %v6315_v44  ;;  %v6318_v57 = vld [vmem:[#allocation2 + $0x28] sm:$0xf]  ;;  %s6360_s21 = smov 16   ;;  %s6361_s24 = smov 32  }
  0xa4   :  { %v5183_v38 = vcombine.low %v734_v54, %v737_v56  ;;  %5456 = vmatprep.subr.bf16.mxu0 %v6123_v33  ;;  %v5113_v9 = vcombine.low %v171_v25, %v6316_v27  ;;  %v722_v28 = vsel %vm713_vm8, %v6317_v7, %v282_v49  ;;  %v6129_v10 = vld [vmem:[%s7884_s1 + $0x128] sm:$0xff]   ;;  %v550_v21 = vshrl.u32 %v6634_v5, 16  ;;  %v6132_v49 = vld [vmem:[%s7884_s1 + $0x170] sm:$0xff]   ;;  %s6362_s9 = smov 48  }
  0xa5   :  { %v582_v37 = vpop.permute.xlu0 %581  ;;  %v366_v48 = vrot.slane %v7918_v35, 2  ;;  %v553_v47 = vshll.u32 %v6634_v5, 16  ;;  %v558_v50 = vshrl.u32 %v6680_v63, 16  ;;  %v561_v14 = vshll.u32 %v6680_v63, 16  ;;  %v6133_v63 = vld [vmem:[%s7884_s1 + $0x180] sm:$0xff]   ;;  %v7920_v35 = vld [vmem:[#allocation6_spill] sm:$0xff] }
  0xa6   :  { %1839 = vmatprep.mubr.bf16.mxu0 %v5183_v38  ;;  %v284_v40 = vpop.permute.xlu1 %283  ;;  %v776_v11 = vsel %vm713_vm8, %v540_v8, %v582_v37  ;;  %v435_v30 = vrot.slane %v5112_v32, 3  ;;  %v436_v56 = vrot.slane %v5113_v9, 3  ;;  %v6991_v8 = vsel %vm713_vm8, %v482_v29, %v516_v3  ;;  %v6135_v3 = vld [vmem:[%s7884_s1 + $0x130] sm:$0xff]  }
  0xa7   :  { %v725_v1 = vsel %vm713_vm8, %v6318_v57, %v284_v40  ;;  %v5176_v4 = vcombine.low %v776_v11, %v779_v17  ;;  %5457 = vmatpush3.bf16.msra.mxu0 %v6124_v0  ;;  %v740_v43 = vsel %vm713_vm8, %v365_v34, %v414_v62  ;;  %v6136_v62 = vld [vmem:[%s7884_s1 + $0x1c8] sm:$0xff]   ;;  %v486_v29 = vshll.u32 %v6613_v51, 16  ;;  %v6138_v34 = vld [vmem:[%s7884_s1 + $0x178] sm:$0xff]  }
  0xa8   :  { %v5182_v33 = vcombine.low %v722_v28, %v725_v1  ;;  %5458 = vmatprep.subr.bf16.mxu0 %v6127_v23  ;;  %v493_v61 = vshll.u32 %v6676_v58, 16  ;;  %v7919_v40 = vcombine.low %v6599_v31, %v6490_v39  ;;  %v552_v32 = vrot.slane %v550_v21, 1  ;;  %v6139_v28 = vld [vmem:[%s7884_s1 + $0x188] sm:$0xff]   ;;  %v6141_v39 = vld [vmem:[%s7884_s1 + $0x138] sm:$0xff]   ;;  %v6142_v31 = vld [vmem:[%s7884_s1 + $0x1d0] sm:$0xff]  }
  0xa9   :  { %v514_v18 = vpop.permute.xlu0 %513  ;;  %v555_v27 = vrot.slane %v553_v47, 2  ;;  %v560_v17 = vrot.slane %v558_v50, 1  ;;  %v563_v11 = vrot.slane %v561_v14, 2  ;;  %v488_v21 = vrot.slane %v486_v29, 1  ;;  %v6143_v14 = vld [vmem:[%s7884_s1 + $0x190] sm:$0xff]  }
  0xaa   :  { %1840 = vmatmul.mubr.bf16.gmra.mrb[4].mxu0 %v5182_v33  ;;  %v416_v54 = vpop.permute.xlu1 %415  ;;  %v6995_v5 = vsel %vm713_vm8, %v475_v59, %v514_v18  ;;  %v367_v59 = vrot.slane %v7919_v40, 2  ;;  %v491_v47 = vshrl.u32 %v6676_v58, 16  ;;  %v6146_v58 = vld [vmem:[%s7884_s1 + $0x1d8] sm:$0xff]   ;;  %vm3714_vm11 = vcmask 1043456  }
  0xab   :  { %v743_v25 = vsel %vm713_vm8, %v366_v48, %v416_v54  ;;  %1929 = vmatprep.mubr.bf16.mxu0 %v5176_v4  ;;  %v5175_v38 = vcombine.low %v6995_v5, %v6991_v8  ;;  %5459 = vmatpush3.bf16.msra.mxu0 %v6129_v10  ;;  %v7921_v48 = vcombine.low %v6647_v24, %v7920_v35  ;;  %v6144_v24 = vld [vmem:[%s7884_s1 + $0x240] sm:$0xff]   ;;  %v484_v10 = vshrl.u32 %v6613_v51, 16  ;;  %v7922_v8 = vld [vmem:[#allocation7_spill] sm:$0xff] }
  0xac   :  { %v5173_v0 = vcombine.low %v740_v43, %v743_v25  ;;  %5460 = vmatprep.subr.bf16.mxu0 %v6132_v49  ;;  %v556_v33 = vor.u32 %v555_v27, %v552_v32  ;;  %v564_v18 = vor.u32 %v563_v11, %v560_v17  ;;  %v495_v54 = vrot.slane %v493_v61, 1  ;;  %v6145_v51 = vld [vmem:[%s7884_s1 + $0x200] sm:$0xff]  }
  0xad   :  { %v454_v23 = vpop.permute.xlu0 %453  ;;  %v368_v44 = vrot.slane %v7921_v48, 2  ;;  %v602_v43 = vshrl.u32 %v7922_v8, 16  ;;  %v605_v5 = vshll.u32 %v7922_v8, 16  ;;  %v7923_v25 = vld [vmem:[#allocation8_spill] sm:$0xff]  ;;  %vm3518_vm12 = vcmask 64512  }
  0xae   :  { %1881 = vmatmul.mubr.bf16.vlgmr.msra.gmra.mrb[0].mxu1 %v5173_v0  ;;  %v456_v37 = vpop.permute.xlu1 %455  ;;  %v758_v9 = vsel %vm713_vm8, %v435_v30, %v454_v23  ;;  %v613_v29 = vshll.u32 %v7923_v25, 16  ;;  %v6147_v23 = vld [vmem:[%s7884_s1 + $0x198] sm:$0xff]   ;;  %v6150_v35 = vld [vmem:[%s7884_s1 + $0x1e0] sm:$0xff]   ;;  %vm4500_vm13 = vcmask 261120   ;;  %vm4505_vm14 = vcmask 392192  }
  0xaf   :  { %5477 = vmatpush3.bf16.msra.mxu1 %v6133_v63  ;;  %v761_v7 = vsel %vm713_vm8, %v436_v56, %v456_v37  ;;  %5461 = vmatpush3.bf16.msra.mxu0 %v6135_v3  ;;  %v6148_v56 = vld [vmem:[%s7884_s1 + $0x248] sm:$0xff]   ;;  %v610_v63 = vshrl.u32 %v7923_v25, 16  ;;  %v496_v37 = vor.u32 %v495_v54, %v491_v47  ;;  %v604_v32 = vrot.slane %v602_v43, 2  ;;  %v6320_v47 = vld [vmem:[#allocation2 + $0x18] sm:$0xf] }
  0xb0   :  { %v5185_v57 = vcombine.low %v758_v9, %v761_v7  ;;  %5478 = vmatprep.subr.bf16.mxu1 %v6136_v62  ;;  %5462 = vmatprep.subr.bf16.mxu0 %v6138_v34  ;;  %v489_v62 = vor.u32 %v488_v21, %v484_v10  ;;  %v607_v27 = vrot.slane %v605_v5, 3  ;;  %v615_v11 = vrot.slane %v613_v29, 3  ;;  %v6319_v10 = vld [vmem:[#allocation2 + $0x10] sm:$0xf]  ;;  %v6157_v54 = vld [vmem:[%s7884_s1 + $0x218] sm:$0xff]   ;;  %v6163_v29 = vld [vmem:[%s7884_s1 + $0x220] sm:$0xff]  }
  0xb1   :  { %v418_v1 = vpop.permute.xlu0 %417  ;;  %v612_v17 = vrot.slane %v610_v63, 2  ;;  %v7924_v5 = vcombine.low %v6692_v22, %v6739_v6  ;;  %v6160_v63 = vld [vmem:[%s7884_s1 + $0x1b0] sm:$0xff]   ;;  %v6164_v22 = vld [vmem:[%s7884_s1 + $0x1f8] sm:$0xff]   ;;  %v6167_v6 = vld [vmem:[%s7884_s1 + $0x268] sm:$0xff]   ;;  %vm4940_vm15 = vcmask 1041409  }
  0xb2   :  { %1888 = vmatprep.mubr.bf16.mxu1 %v5185_v57  ;;  %v420_v4 = vpop.permute.xlu1 %419  ;;  %v746_v49 = vsel %vm713_vm8, %v367_v59, %v418_v1  ;;  %v6149_v59 = vld [vmem:[%s7884_s1 + $0x208] sm:$0xff]  }
  0xb3   :  { %5479 = vmatpush3.bf16.msra.mxu1 %v6139_v28  ;;  %v749_v50 = vsel %vm713_vm8, %v368_v44, %v420_v4  ;;  %5463 = vmatpush3.bf16.msra.mxu0 %v6141_v39  ;;  %v6151_v28 = vld [vmem:[%s7884_s1 + $0x1a0] sm:$0xff]   ;;  %v6153_v39 = vld [vmem:[%s7884_s1 + $0x210] sm:$0xff]   ;;  %v882_v25 = vrot.slane %v7924_v5, 1 }
  0xb4   :  { %v5184_v30 = vcombine.low %v746_v49, %v749_v50  ;;  %5480 = vmatprep.subr.bf16.mxu1 %v6142_v31  ;;  %5504 = vmatprep.subr.bf16.mxu0 %v6144_v24  ;;  %v6154_v31 = vld [vmem:[%s7884_s1 + $0x1e8] sm:$0xff]   ;;  %v6156_v24 = vld [vmem:[%s7884_s1 + $0x258] sm:$0xff]  }
  0xb5   :  { %v586_v0 = vpop.permute.xlu0 %585  ;;  %v6155_v50 = vld [vmem:[%s7884_s1 + $0x1a8] sm:$0xff]  }
  0xb6   :  { %1889 = vmatmul.mubr.bf16.gmra.mrb[4].mxu1 %v5184_v30  ;;  %v588_v3 = vpop.permute.xlu1 %587  ;;  %v782_v61 = vsel %vm713_vm8, %v556_v33, %v586_v0  ;;  %1930 = vmatmul.mubr.bf16.vlgmr.msra.gmra.mrb[8].mxu0 %v5175_v38  ;;  %v6152_v38 = vld [vmem:[%s7884_s1 + $0x250] sm:$0xff]   ;;  %v608_v33 = vor.u32 %v607_v27, %v604_v32  ;;  %v7925_v0 = vcombine.low %v6714_v60, %v6765_v26  ;;  %v6169_v27 = vld [vmem:[%s7884_s1 + $0x228] sm:$0xff]  }
  0xb7   :  { %5481 = vmatpush3.bf16.msra.mxu1 %v6143_v14  ;;  %v785_v34 = vsel %vm713_vm8, %v564_v18, %v588_v3  ;;  %5505 = vmatpush3.bf16.msra.mxu0 %v6145_v51  ;;  %v616_v14 = vor.u32 %v615_v11, %v612_v17  ;;  %v6158_v30 = vld [vmem:[%s7884_s1 + $0x1f0] sm:$0xff]   ;;  %v6161_v51 = vld [vmem:[%s7884_s1 + $0x260] sm:$0xff]   ;;  %v226_v17 = vld [vmem:[#allocation2 + $0x18] sm:$0x8] }
  0xb8   :  { %v5187_v40 = vcombine.low %v782_v61, %v785_v34  ;;  %5482 = vmatprep.subr.bf16.mxu1 %v6146_v58  ;;  %5506 = vmatprep.subr.bf16.mxu0 %v6148_v56  ;;  %v883_v3 = vrot.slane %v7925_v0, 1  ;;  %v7926_v61 = vld [vmem:[#allocation9_spill] sm:$0xff] }
  0xb9   :  { %v518_v48 = vpop.permute.xlu0 %517  ;;  %v618_v34 = vshrl.u32 %v7926_v61, 16  ;;  %v621_v60 = vshll.u32 %v7926_v61, 16 }
  0xba   :  { %1937 = vmatprep.mubr.bf16.mxu0 %v5187_v40  ;;  %v520_v44 = vpop.permute.xlu1 %519  ;;  %v770_v9 = vsel %vm713_vm8, %v489_v62, %v518_v48  ;;  %v6166_v48 = vld [vmem:[%s7884_s1 + $0x1b8] sm:$0xff]  }
  0xbb   :  { %5483 = vmatpush3.bf16.msra.mxu1 %v6147_v23  ;;  %v773_v7 = vsel %vm713_vm8, %v496_v37, %v520_v44  ;;  %5507 = vmatpush3.bf16.msra.mxu0 %v6149_v59  ;;  %v7927_v37 = vld [vmem:[#allocation10_spill] sm:$0xff] }
  0xbc   :  { %v5186_v57 = vcombine.low %v770_v9, %v773_v7  ;;  %5484 = vmatprep.subr.bf16.mxu1 %v6150_v35  ;;  %5508 = vmatprep.subr.bf16.mxu0 %v6152_v38  ;;  %v626_v40 = vshrl.u32 %v7927_v37, 16  ;;  %v629_v59 = vshll.u32 %v7927_v37, 16  ;;  %v6170_v9 = vld [vmem:[%s7884_s1 + $0x270] sm:$0xff]   ;;  %v6171_v7 = vld [vmem:[%s7884_s1 + $0x280] sm:$0xff]  }
  0xbd   :  { %v706_v1 = vpop.permute.xlu0 %705 }
  0xbe   :  { %v708_v4 = vpop.permute.xlu1 %707  ;;  %v800_v21 = vsel %vm713_vm8, %v6319_v10, %v706_v1  ;;  %1938 = vmatmul.mubr.bf16.gmra.mrb[12].mxu0 %v5186_v57  ;;  %v7928_v1 = vcombine.low %v6737_v41, %v6661_v45  ;;  %v6174_v41 = vld [vmem:[%s7884_s1 + $0x288] sm:$0xff]   ;;  %v6321_v45 = vld [vmem:[#allocation2 + $0x14] sm:$0x7] }
  0xbf   :  { %5485 = vmatpush3.bf16.msra.mxu1 %v6151_v28  ;;  %v803_v49 = vsel %vm713_vm8, %v6320_v47, %v708_v4  ;;  %5509 = vmatpush3.bf16.msra.mxu0 %v6153_v39  ;;  %v225_v28 = vld [vmem:[#allocation2 + $0x10] sm:$0x8]  ;;  %v631_v47 = vrot.slane %v629_v59, 3 }
  0xc0   :  { %v5178_v18 = vcombine.low %v800_v21, %v803_v49  ;;  %5486 = vmatprep.subr.bf16.mxu1 %v6154_v31  ;;  %5510 = vmatprep.subr.bf16.mxu0 %v6156_v24  ;;  %v620_v31 = vrot.slane %v618_v34, 2  ;;  %v623_v24 = vrot.slane %v621_v60, 3  ;;  %v628_v21 = vrot.slane %v626_v40, 2  ;;  %v6180_v40 = vld [vmem:[%s7884_s1 + $0x298] sm:$0xff]  }
  0xc1   :  { %v650_v58 = vpop.permute.xlu0 %649 }
  0xc2   :  { %1978 = vmatprep.mubr.bf16.mxu1 %v5178_v18  ;;  %v652_v56 = vpop.permute.xlu1 %651  ;;  %v788_v8 = vsel %vm713_vm8, %v608_v33, %v650_v58  ;;  %v7929_v33 = vcombine.low %v6753_v15, %v6686_v12  ;;  %v5162_v18 = vcombine.low %v225_v28, %v6321_v45  ;;  %v6173_v15 = vld [vmem:[%s7884_s1 + $0x278] sm:$0xff]  }
  0xc3   :  { %5487 = vmatpush3.bf16.msra.mxu1 %v6155_v50  ;;  %v791_v43 = vsel %vm713_vm8, %v616_v14, %v652_v56  ;;  %5511 = vmatpush3.bf16.msra.mxu0 %v6157_v54  ;;  %v6172_v14 = vld [vmem:[%s7884_s1 + $0x230] sm:$0xff]   ;;  %v6322_v54 = vld [vmem:[#allocation2 + $0x1c] sm:$0x7] }
  0xc4   :  { %v5177_v62 = vcombine.low %v788_v8, %v791_v43  ;;  %5488 = vmatprep.subr.bf16.mxu1 %v6158_v30  ;;  %5512 = vmatprep.subr.bf16.mxu0 %v6161_v51  ;;  %v5163_v12 = vcombine.low %v226_v17, %v6322_v54  ;;  %v6323_v56 = vld [vmem:[#allocation2 + $0x30] sm:$0xf]  ;;  %v6324_v43 = vld [vmem:[#allocation2 + $0x38] sm:$0xf]  ;;  %v7932_v17 = vld [vmem:[#allocation12_spill] sm:$0xff] }
  0xc5   :  { %v931_v26 = vpop.permute.xlu0 %930  ;;  %v7931_v28 = vld [vmem:[#allocation11_spill] sm:$0xff] }
  0xc6   :  { %v933_v23 = vpop.permute.xlu1 %932  ;;  %v968_v35 = vsel %vm713_vm8, %v882_v25, %v931_v26  ;;  %v624_v25 = vor.u32 %v623_v24, %v620_v31  ;;  %v884_v26 = vrot.slane %v5156_v46, 1 }
  0xc7   :  { %5489 = vmatpush3.bf16.msra.mxu1 %v6160_v63  ;;  %v971_v38 = vsel %vm713_vm8, %v883_v3, %v933_v23  ;;  %v987_v44 = vrot.slane %v968_v35, 1  ;;  %5513 = vmatpush3.bf16.msra.mxu0 %v6163_v29  ;;  %v632_v63 = vor.u32 %v631_v47, %v628_v21  ;;  %v6175_v3 = vld [vmem:[%s7884_s1 + $0x238] sm:$0xff]   ;;  %v5166_v29 = vrot.slane %v5162_v18, 3 }
  0xc8   :  { %v990_v32 = vrot.slane %v971_v38, 1  ;;  %5490 = vmatprep.subr.bf16.mxu1 %v6164_v22  ;;  %5514 = vmatprep.subr.bf16.mxu0 %v6167_v6  ;;  %v5167_v22 = vrot.slane %v5163_v12, 3  ;;  %v885_v23 = vrot.slane %v5157_v53, 1 }
  0xc9   :  { %v863_v11 = vpop.permute.xlu0 %862 }
  0xca   :  { %v865_v57 = vpop.permute.xlu1 %864  ;;  %v5180_v39 = vcombine.low %v987_v44, %v990_v32  ;;  %v956_v4 = vsel %vm713_vm8, %v7928_v1, %v863_v11  ;;  %v5181_v59 = vcombine.low %v5166_v29, %v5167_v22  ;;  %v7930_v32 = vcombine.low %v6855_v42, %v6794_v13 }
  0xcb   :  { %5491 = vmatpush3.bf16.msra.mxu1 %v6166_v48  ;;  %v959_v10 = vsel %vm713_vm8, %v7929_v33, %v865_v57  ;;  %v986_v49 = vrot.slane %v956_v4, 1  ;;  %5515 = vmatpush3.bf16.msra.mxu0 %v6169_v27  ;;  %v7933_v11 = vcombine.low %v7931_v28, %v7932_v17  ;;  %v5170_v33 = vld [vmem:[%s7888_s5] ss:$0 sm:$0xff] }
  0xcc   :  { %v989_v50 = vrot.slane %v959_v10, 1  ;;  %2027 = vmatprep.mubr.bf16.mxu0 %v5180_v39  ;;  %5516 = vmatprep.subr.bf16.mxu0 %v6170_v9 }
  0xcd   :  { %5632 = vmatprep.subr.bf16.mxu1 %v6171_v7  ;;  %v710_v51 = vpop.permute.xlu0 %709 }
  0xce   :  { %v5179_v30 = vcombine.low %v986_v49, %v989_v50  ;;  %1979 = vmatmul.mubr.bf16.vlgmr.msra.gmra.mrb[8].mxu1 %v5177_v62  ;;  %v712_v58 = vpop.permute.xlu1 %711  ;;  %v806_v8 = vsel %vm713_vm8, %v6323_v56, %v710_v51  ;;  %v6177_v62 = vld [vmem:[%s7884_s1 + $0x290] sm:$0xff]  }
  0xcf   :  { %v809_v5 = vsel %vm713_vm8, %v6324_v43, %v712_v58  ;;  %5633 = vmatpush3.bf16.msra.mxu1 %v6171_v7  ;;  %5517 = vmatpush3.bf16.msra.mxu0 %v6172_v14 }
  0xd0   :  { %v5189_v0 = vcombine.low %v806_v8, %v809_v5  ;;  %5634 = vmatprep.subr.bf16.mxu1 %v6174_v41  ;;  %5518 = vmatprep.subr.bf16.mxu0 %v6173_v15 }
  0xd1   :  { %v654_v6 = vpop.permute.xlu0 %653 }
  0xd2   :  { %1986 = vmatprep.mubr.bf16.mxu1 %v5189_v0  ;;  %v656_v61 = vpop.permute.xlu1 %655  ;;  %v794_v34 = vsel %vm713_vm8, %v624_v25, %v654_v6 }
  0xd3   :  { %v797_v60 = vsel %vm713_vm8, %v632_v63, %v656_v61  ;;  %5635 = vmatpush3.bf16.msra.mxu1 %v6174_v41  ;;  %5519 = vmatpush3.bf16.msra.mxu0 %v6175_v3 }
  0xd4   :  { %v5188_v37 = vcombine.low %v794_v34, %v797_v60  ;;  %5636 = vmatprep.subr.bf16.mxu1 %v6177_v62 }
  0xd5   :  { %v935_v35 = vpop.permute.xlu0 %934 }
  0xd6   :  { %1987 = vmatmul.mubr.bf16.gmra.mrb[12].mxu1 %v5188_v37  ;;  %v937_v38 = vpop.permute.xlu1 %936  ;;  %v974_v48 = vsel %vm713_vm8, %v884_v26, %v935_v35  ;;  %2028 = vmatmul.mubr.bf16.vlgmr.msra.gmra.mrb[16].mxu0 %v5179_v30 }
  0xd7   :  { %v977_v2 = vsel %vm713_vm8, %v885_v23, %v937_v38  ;;  %5637 = vmatpush3.bf16.msra.mxu1 %v6177_v62  ;;  %v993_v19 = vrot.slane %v974_v48, 1  ;;  %5640 = vmatprep.mubr.msk.bf16.mxu1 %vm713_vm8, %v5181_v59 }
  0xd8   :  { %v996_v16 = vrot.slane %v977_v2, 1  ;;  %5638 = vmatprep.subr.bf16.mxu1 %v6180_v40 }
  0xd9   :  { %v867_v55 = vpop.permute.xlu0 %866 }
  0xda   :  { %v869_v46 = vpop.permute.xlu1 %868  ;;  %v5191_v53 = vcombine.low %v993_v19, %v996_v16  ;;  %v962_v44 = vsel %vm713_vm8, %v5148_v36, %v867_v55 }
  0xdb   :  { %v965_v27 = vsel %vm713_vm8, %v7930_v32, %v869_v46  ;;  %5639 = vmatpush3.bf16.msra.mxu1 %v6180_v40  ;;  %v992_v9 = vrot.slane %v962_v44, 1 }
  0xdc   :  { %v995_v7 = vrot.slane %v965_v27, 1  ;;  %2035 = vmatprep.mubr.bf16.mxu0 %v5191_v53 }
  0xde   :  { %5641 = vmatmul.mubr.msk.bf16.vlgmr.msra.gmra.mrb[16].mxu1 %vm713_vm8, %v7933_v11  ;;  %v5190_v57 = vcombine.low %v992_v9, %v995_v7 }
  0xe0   :  { %2036 = vmatmul.mubr.bf16.gmra.mrb[20].mxu0 %v5190_v57 }
 0x169   :  { %v5408_v39 = vpop.f32.mrb[0].mxu0 }
 0x16a   :  { %v5409_v52 = vpop.f32.mrb[1].mxu0 }
 0x16b   :  { %v5410_v20 = vadd.f32 %v5409_v52, %v5408_v39  ;;  %v5411_v36 = vpop.f32.mrb[2].mxu0 }
 0x16c   :  { %v5412_v31 = vpop.f32.mrb[3].mxu0 }
 0x16d   :  { %v5413_v24 = vadd.f32 %v5412_v31, %v5411_v36  ;;  %v1834_v50 = vadd.f32 %v5410_v20, %v5170_v33 }
 0x16f   :  { %v1837_v18 = vadd.f32 %v5413_v24, %v5170_v33 }
 0x17d   :  { %v5414_v13 = vpop.f32.mrb[4].mxu0 }
 0x17e   :  { %v5415_v42 = vpop.f32.mrb[5].mxu0 }
 0x17f   :  { %v5416_v1 = vadd.f32 %v5415_v42, %v5414_v13  ;;  %v5417_v4 = vpop.f32.mrb[6].mxu0 }
 0x180   :  { %v5418_v10 = vpop.f32.mrb[7].mxu0 }
 0x181   :  { %v5419_v21 = vadd.f32 %v5418_v10, %v5417_v4  ;;  %v5436_v47 = vpop.f32.mrb[0].mxu1  ;;  %v1842_v56 = vadd.f32 %v5416_v1, %v5170_v33 }
 0x182   :  { %v5437_v49 = vpop.f32.mrb[1].mxu1 }
 0x183   :  { %v5438_v14 = vadd.f32 %v5437_v49, %v5436_v47  ;;  %v5439_v41 = vpop.f32.mrb[2].mxu1  ;;  %v1845_v3 = vadd.f32 %v5419_v21, %v5170_v33 }
 0x184   :  { %v5440_v45 = vpop.f32.mrb[3].mxu1 }
 0x185   :  { %v1883_v54 = vadd.f32 %v5438_v14, %v1834_v50  ;;  %v5441_v12 = vadd.f32 %v5440_v45, %v5439_v41 }
 0x187   :  { %v1886_v15 = vadd.f32 %v5441_v12, %v1837_v18 }
 0x189   :  { %v5442_v30 = vpop.f32.mrb[4].mxu1  ;;  %v5464_v51 = vpop.f32.mrb[8].mxu0 }
 0x18a   :  { %v5443_v58 = vpop.f32.mrb[5].mxu1  ;;  %v5465_v43 = vpop.f32.mrb[9].mxu0 }
 0x18b   :  { %v5444_v8 = vadd.f32 %v5443_v58, %v5442_v30  ;;  %v5445_v5 = vpop.f32.mrb[6].mxu1  ;;  %v5466_v25 = vadd.f32 %v5465_v43, %v5464_v51  ;;  %v5467_v63 = vpop.f32.mrb[10].mxu0 }
 0x18c   :  { %v5446_v0 = vpop.f32.mrb[7].mxu1  ;;  %v5468_v22 = vpop.f32.mrb[11].mxu0 }
 0x18d   :  { %v1891_v62 = vadd.f32 %v5444_v8, %v1842_v56  ;;  %v5447_v29 = vadd.f32 %v5446_v0, %v5445_v5  ;;  %v1932_v6 = vadd.f32 %v5466_v25, %v1883_v54  ;;  %v5469_v61 = vadd.f32 %v5468_v22, %v5467_v63 }
 0x18f   :  { %v1894_v34 = vadd.f32 %v5447_v29, %v1845_v3  ;;  %v1935_v60 = vadd.f32 %v5469_v61, %v1886_v15 }
 0x191   :  { %v5470_v26 = vpop.f32.mrb[12].mxu0 }
 0x192   :  { %v5471_v23 = vpop.f32.mrb[13].mxu0 }
 0x193   :  { %v5472_v37 = vadd.f32 %v5471_v23, %v5470_v26  ;;  %v5473_v40 = vpop.f32.mrb[14].mxu0 }
 0x194   :  { %v5474_v59 = vpop.f32.mrb[15].mxu0 }
 0x195   :  { %v1940_v35 = vadd.f32 %v5472_v37, %v1891_v62  ;;  %v5475_v38 = vadd.f32 %v5474_v59, %v5473_v40 }
 0x197   :  { %v1943_v48 = vadd.f32 %v5475_v38, %v1894_v34 }
 0x1a1   :  { %v5492_v2 = vpop.f32.mrb[8].mxu1 }
 0x1a2   :  { %v5493_v19 = vpop.f32.mrb[9].mxu1 }
 0x1a3   :  { %v5494_v16 = vadd.f32 %v5493_v19, %v5492_v2  ;;  %v5495_v55 = vpop.f32.mrb[10].mxu1  ;;  %v6184_v2 = vld [vmem:[%s7885_s2] sm:$0xff]   ;;  %v6185_v19 = vld [vmem:[%s7885_s2 + $0x8] sm:$0xff]  }
 0x1a4   :  { %v5496_v46 = vpop.f32.mrb[11].mxu1  ;;  %5644 = vmatprep.subr.bf16.mxu1 %v6184_v2 }
 0x1a5   :  { %v1981_v53 = vadd.f32 %v5494_v16, %v1932_v6  ;;  %v5497_v44 = vadd.f32 %v5496_v46, %v5495_v55  ;;  %5645 = vmatpush3.bf16.msra.mxu1 %v6184_v2  ;;  %v6186_v16 = vld [vmem:[%s7885_s2 + $0x10] sm:$0xff]   ;;  %v6187_v55 = vld [vmem:[%s7885_s2 + $0x18] sm:$0xff]   ;;  %v6188_v46 = vld [vmem:[%s7885_s2 + $0x20] sm:$0xff]  }
 0x1a6   :  { %5646 = vmatprep.subr.bf16.mxu1 %v6185_v19  ;;  %5656 = vmatprep.subr.bf16.mxu0 %v6188_v46 }
 0x1a7   :  { %v1984_v32 = vadd.f32 %v5497_v44, %v1935_v60  ;;  %5657 = vmatpush3.bf16.msra.mxu0 %v6188_v46  ;;  %v6326_v46 = vld [vmem:[%s7883_s0 + $0x8] sm:$0xff] }
 0x1a9   :  { %v5498_v27 = vpop.f32.mrb[12].mxu1  ;;  %v5520_v9 = vpop.f32.mrb[16].mxu0  ;;  %5647 = vmatpush3.bf16.msra.mxu1 %v6185_v19  ;;  %v6325_v19 = vld [vmem:[%s7883_s0] sm:$0xff] }
 0x1aa   :  { %v5499_v7 = vpop.f32.mrb[13].mxu1  ;;  %v5521_v17 = vpop.f32.mrb[17].mxu0  ;;  %5648 = vmatprep.subr.bf16.mxu1 %v6186_v16 }
 0x1ab   :  { %v5500_v28 = vadd.f32 %v5499_v7, %v5498_v27  ;;  %v5501_v11 = vpop.f32.mrb[14].mxu1  ;;  %v5522_v57 = vadd.f32 %v5521_v17, %v5520_v9  ;;  %v5523_v39 = vpop.f32.mrb[18].mxu0 }
 0x1ac   :  { %v5502_v52 = vpop.f32.mrb[15].mxu1  ;;  %v5524_v31 = vpop.f32.mrb[19].mxu0 }
 0x1ad   :  { %v1989_v20 = vadd.f32 %v5500_v28, %v1940_v35  ;;  %v5503_v36 = vadd.f32 %v5502_v52, %v5501_v11  ;;  %v5525_v24 = vadd.f32 %v5524_v31, %v5523_v39  ;;  %v2030_v13 = vadd.f32 %v5522_v57, %v1981_v53  ;;  %5649 = vmatpush3.bf16.msra.mxu1 %v6186_v16  ;;  %v6189_v53 = vld [vmem:[%s7885_s2 + $0x28] sm:$0xff]   ;;  %v5279_v31 = vld [vmem:[%s7888_s5 + $0x1] ss:$0 sm:$0xff] }
 0x1ae   :  { %5650 = vmatprep.subr.bf16.mxu1 %v6187_v55  ;;  %5658 = vmatprep.subr.bf16.mxu0 %v6189_v53 }
 0x1af   :  { %v1992_v42 = vadd.f32 %v5503_v36, %v1943_v48  ;;  %v2033_v1 = vadd.f32 %v5525_v24, %v1984_v32  ;;  %5659 = vmatpush3.bf16.msra.mxu0 %v6189_v53 }
 0x1b1   :  { %v5642_v4 = vpop.f32.mrb[16].mxu1  ;;  %5651 = vmatpush3.bf16.msra.mxu1 %v6187_v55 }
 0x1b2   :  { %v2078_v33 = vpop.f32.mrb[17].mxu1 }
 0x1b3   :  { %v2079_v10 = vadd.f32 %v2078_v33, %v2030_v13  ;;  %v5526_v21 = vpop.f32.mrb[20].mxu0  ;;  %v5643_v47 = vpop.f32.mrb[18].mxu1 }
 0x1b4   :  { %v5527_v49 = vpop.f32.mrb[21].mxu0  ;;  %v2081_v50 = vpop.f32.mrb[19].mxu1 }
 0x1b5   :  { %v5528_v14 = vadd.f32 %v5527_v49, %v5526_v21  ;;  %v2082_v41 = vadd.f32 %v2081_v50, %v2033_v1  ;;  %v5529_v45 = vpop.f32.mrb[22].mxu0  ;;  %v2095_v18 = vsel %vm713_vm8, %v2079_v10, 0.0 }
 0x1b6   :  { %2096 = vadd.xlane.f32.xlu0 %v2095_v18  ;;  %v5530_v54 = vpop.f32.mrb[23].mxu0 }
 0x1b7   :  { %v2038_v12 = vadd.f32 %v5528_v14, %v1989_v20  ;;  %v5531_v15 = vadd.f32 %v5530_v54, %v5529_v45  ;;  %v2098_v30 = vsel %vm713_vm8, %v2082_v41, 0.0 }
 0x1b8   :  { %2099 = vadd.xlane.f32.xlu1 %v2098_v30  ;;  %v7934_v30 = vmov 0  }
 0x1b9   :  { %v2041_v51 = vadd.f32 %v5531_v15, %v1992_v42  ;;  %v2087_v58 = vadd.f32 %v5642_v4, %v2038_v12  ;;  %v5280_v4 = vld [vmem:[%s7888_s5 + $0x2] ss:$0 sm:$0xff] }
 0x1bb   :  { %v2101_v56 = vsel %vm713_vm8, %v2087_v58, 0.0  ;;  %v2090_v8 = vadd.f32 %v5643_v47, %v2041_v51  ;;  %v6190_v51 = vld [vmem:[%s7885_s2 + $0x30] sm:$0xff]  }
 0x1bc   :  { %2102 = vadd.xlane.f32.xlu0 %v2101_v56  ;;  %5660 = vmatprep.subr.bf16.mxu0 %v6190_v51  ;;  %v5281_v56 = vld [vmem:[%s7888_s5 + $0x3] ss:$0 sm:$0xff] }
 0x1bd   :  { %v2104_v43 = vsel %vm713_vm8, %v2090_v8, 0.0  ;;  %5661 = vmatpush3.bf16.msra.mxu0 %v6190_v51  ;;  %v6198_v51 = vld [vmem:[%s7886_s3 + $0x20] ss:$8 sps:$4 sm:$0xff]  }
 0x1c0   :  { %2105 = vadd.xlane.f32.xlu0 %v2104_v43 }
 0x243   :  { %v2097_v5 = vpop.xlane.xlu0 %2096 }
 0x244   :  { %v2108_v25 = vmul.f32 0.015625, %v2097_v5 }
 0x245   :  { %v2100_v63 = vpop.xlane.xlu1 %2099 }
 0x246   :  { %v2112_v0 = vsub.f32 %v2079_v10, %v2108_v25  ;;  %v2109_v3 = vmul.f32 0.015625, %v2100_v63 }
 0x248   :  { %v2113_v62 = vsub.f32 %v2082_v41, %v2109_v3  ;;  %v2116_v29 = vmul.f32 %v2112_v0, %v2112_v0 }
 0x249   :  { %v2103_v22 = vpop.xlane.xlu0 %2102 }
 0x24a   :  { %v2110_v6 = vmul.f32 0.015625, %v2103_v22  ;;  %v2120_v61 = vsel %vm713_vm8, %v2116_v29, 0.0  ;;  %v2117_v34 = vmul.f32 %v2113_v62, %v2113_v62 }
 0x24b   :  { %2121 = vadd.xlane.f32.xlu1 %v2120_v61 }
 0x24c   :  { %v2114_v60 = vsub.f32 %v2087_v58, %v2110_v6  ;;  %v2123_v26 = vsel %vm713_vm8, %v2117_v34, 0.0  ;;  %v6191_v58 = vld [vmem:[%s7885_s2 + $0x38] sm:$0xff]  }
 0x24d   :  { %v2106_v23 = vpop.xlane.xlu0 %2105  ;;  %2124 = vadd.xlane.f32.xlu0 %v2123_v26  ;;  %5662 = vmatprep.subr.bf16.mxu0 %v6191_v58  ;;  %v5296_v26 = vld [vmem:[%s7888_s5 + $0x4] ss:$0 sm:$0xff] }
 0x24e   :  { %v2111_v37 = vmul.f32 0.015625, %v2106_v23  ;;  %v2118_v40 = vmul.f32 %v2114_v60, %v2114_v60  ;;  %5663 = vmatpush3.bf16.msra.mxu0 %v6191_v58  ;;  %v6203_v58 = vld [vmem:[%s7886_s3 + $0x34] ss:$8 sps:$4 sm:$0xff]  }
 0x250   :  { %v2115_v59 = vsub.f32 %v2090_v8, %v2111_v37  ;;  %v2126_v35 = vsel %vm713_vm8, %v2118_v40, 0.0 }
 0x251   :  { %2127 = vadd.xlane.f32.xlu1 %v2126_v35 }
 0x252   :  { %v2119_v38 = vmul.f32 %v2115_v59, %v2115_v59 }
 0x254   :  { %v2129_v48 = vsel %vm713_vm8, %v2119_v38, 0.0 }
 0x255   :  { %2130 = vadd.xlane.f32.xlu0 %v2129_v48 }
 0x2d8   :  { %v2122_v44 = vpop.xlane.xlu1 %2121 }
 0x2d9   :  { %v2132_v32 = vmul.f32 0.015625, %v2122_v44  ;;  %v6327_v44 = vld [vmem:[%s7883_s0 + $0x10] sm:$0xff] }
 0x2da   :  { %v2125_v27 = vpop.xlane.xlu0 %2124 }
 0x2db   :  { %v2136_v9 = vadd.f32 1e-05, %v2132_v32  ;;  %v2133_v7 = vmul.f32 0.015625, %v2125_v27 }
 0x2dd   :  { %6216 = vrsqrt.f32 %v2136_v9  ;;  %v2137_v28 = vadd.f32 1e-05, %v2133_v7  ;;  %v6328_v9 = vld [vmem:[%s7883_s0 + $0x18] sm:$0xff] }
 0x2de   :  { %v2128_v17 = vpop.xlane.xlu1 %2127 }
 0x2df   :  { %6218 = vrsqrt.f32 %v2137_v28  ;;  %v2134_v11 = vmul.f32 0.015625, %v2128_v17 }
 0x2e1   :  { %v2138_v57 = vadd.f32 1e-05, %v2134_v11 }
 0x2e2   :  { %v2131_v39 = vpop.xlane.xlu0 %2130 }
 0x2e3   :  { %6220 = vrsqrt.f32 %v2138_v57  ;;  %v2135_v52 = vmul.f32 0.015625, %v2131_v39 }
 0x2e5   :  { %v2139_v20 = vadd.f32 1e-05, %v2135_v52 }
 0x2e7   :  { %v6217_v36 = vpop.eup %6216  ;;  %6222 = vrsqrt.f32 %v2139_v20 }
 0x2e8   :  { %v2144_v24 = vmul.f32 %v6217_v36, %v2112_v0 }
 0x2e9   :  { %v6219_v13 = vpop.eup %6218 }
 0x2ea   :  { %v2145_v42 = vmul.f32 %v6219_v13, %v2113_v62  ;;  %v2152_v1 = vmul.f32 %v5279_v31, %v2144_v24 }
 0x2ec   :  { %v2153_v33 = vmul.f32 %v5279_v31, %v2145_v42  ;;  %v2160_v47 = vadd.f32 %v5280_v4, %v2152_v1 }
 0x2ed   :  { %v6221_v10 = vpop.eup %6220 }
 0x2ee   :  { %v2146_v21 = vmul.f32 %v6221_v10, %v2114_v60  ;;  %v2161_v49 = vadd.f32 %v5280_v4, %v2153_v33 }
 0x2f0   :  { %v2164_v50 = vpack.c.bf16 %v2161_v49, %v2160_v47  ;;  %v2154_v45 = vmul.f32 %v5279_v31, %v2146_v21 }
 0x2f1   :  { %v6223_v14 = vpop.eup %6222 }
 0x2f2   :  { %v2147_v41 = vmul.f32 %v6223_v14, %v2115_v59  ;;  %5652 = vmatprep.mubr.msk.bf16.mxu1 %vm713_vm8, %v2164_v50  ;;  %v2162_v54 = vadd.f32 %v5280_v4, %v2154_v45  ;;  %v6194_v45 = vld [vmem:[%s7886_s3 + $0x4] ss:$8 sps:$4 sm:$0xff]  }
 0x2f3   :  { %2508 = vmatprep.subr.bf16.mxu1 %v6194_v45 }
 0x2f4   :  { %v2155_v18 = vmul.f32 %v5279_v31, %v2147_v41 }
 0x2f6   :  { %v2163_v12 = vadd.f32 %v5280_v4, %v2155_v18  ;;  %v6192_v18 = vld [vmem:[%s7886_s3] ss:$8 sps:$4 sm:$0xff]  }
 0x2f8   :  { %v2165_v15 = vpack.c.bf16 %v2163_v12, %v2162_v54  ;;  %v6197_v54 = vld [vmem:[%s7886_s3 + $0x14] ss:$8 sps:$4 sm:$0xff]   ;;  %v6195_v12 = vld [vmem:[%s7886_s3 + $0x10] ss:$8 sps:$4 sm:$0xff]  }
 0x2fa   :  { %5653 = vmatmul.mubr.msk.bf16.vlgmr.msra.gmra.mrb[20].mxu1 %vm713_vm8, %v2165_v15  ;;  %v6200_v15 = vld [vmem:[%s7886_s3 + $0x24] ss:$8 sps:$4 sm:$0xff]  }
 0x2fb   :  { %2540 = vmatprep.mubr.bf16.mxu1 %v7934_v30  ;;  %2509 = vmatpush1.bf16.msra.mxu1 %v6192_v18 }
 0x2fc   :  { %2510 = vmatprep.subr.bf16.mxu1 %v6197_v54 }
 0x2ff   :  { %2511 = vmatpush1.bf16.msra.mxu1 %v6195_v12 }
 0x300   :  { %2512 = vmatprep.subr.bf16.mxu1 %v6200_v15 }
 0x303   :  { %2513 = vmatpush1.bf16.msra.mxu1 %v6198_v51 }
 0x304   :  { %2514 = vmatprep.subr.bf16.mxu1 %v6203_v58 }
 0x3cd   :  { %v5654_v8 = vpop.f32.mrb[20].mxu1 }
 0x3ce   :  { %v2252_v43 = vadd.f32 %v5654_v8, %v5281_v56  ;;  %v2243_v5 = vpop.f32.mrb[21].mxu1 }
 0x3cf   :  { %v2244_v25 = vadd.f32 %v5281_v56, %v2243_v5  ;;  %v5655_v63 = vpop.f32.mrb[22].mxu1 }
 0x3d0   :  { %v2255_v0 = vadd.f32 %v5655_v63, %v5281_v56  ;;  %v2246_v3 = vpop.f32.mrb[23].mxu1  ;;  %v2260_v29 = vmax.f32 %v2252_v43, 0.0 }
 0x3d1   :  { %v2247_v62 = vadd.f32 %v5281_v56, %v2246_v3  ;;  %v2258_v6 = vmax.f32 %v2244_v25, 0.0  ;;  %v6201_v56 = vld [vmem:[%s7886_s3 + $0x30] ss:$8 sps:$4 sm:$0xff]  }
 0x3d2   :  { %v2261_v22 = vmax.f32 %v2255_v0, 0.0  ;;  %2515 = vmatpush1.bf16.msra.mxu1 %v6201_v56 }
 0x3d3   :  { %v2259_v61 = vmax.f32 %v2247_v62, 0.0 }
 0x3d4   :  { %v2263_v34 = vpack.c.bf16 %v2261_v22, %v2260_v29 }
 0x3d5   :  { %v2262_v60 = vpack.c.bf16 %v2259_v61, %v2258_v6 }
 0x3d7   :  { %5664 = vmatprep.mubr.msk.bf16.mxu0 %vm713_vm8, %v2262_v60  ;;  %v5303_v60 = vld [vmem:[%s7888_s5 + $0x5] ss:$0 sm:$0xff] }
 0x3d8   :  { %5665 = vmatmul.mubr.msk.bf16.vlgmr.msra.gmra.mrb[24].mxu0 %vm713_vm8, %v2263_v34 }
 0x4ab   :  { %v5666_v23 = vpop.f32.mrb[24].mxu0 }
 0x4ac   :  { %v2342_v37 = vpop.f32.mrb[25].mxu0  ;;  %v2351_v40 = vadd.f32 %v5666_v23, %v5296_v26 }
 0x4ad   :  { %v2343_v59 = vadd.f32 %v5296_v26, %v2342_v37  ;;  %v5667_v35 = vpop.f32.mrb[26].mxu0 }
 0x4ae   :  { %v2345_v38 = vpop.f32.mrb[27].mxu0  ;;  %v2354_v48 = vadd.f32 %v5667_v35, %v5296_v26  ;;  %v2359_v32 = vadd.f32 %v6327_v44, %v2351_v40  ;;  %v5304_v35 = vld [vmem:[%s7888_s5 + $0x6] ss:$0 sm:$0xff] }
 0x4af   :  { %v2346_v2 = vadd.f32 %v5296_v26, %v2345_v38  ;;  %v2357_v16 = vadd.f32 %v6325_v19, %v2343_v59 }
 0x4b0   :  { %v2360_v7 = vadd.f32 %v6328_v9, %v2354_v48  ;;  %v2369_v28 = vsel %vm713_vm8, %v2359_v32, 0.0 }
 0x4b1   :  { %v2363_v55 = vsel %vm713_vm8, %v2357_v16, 0.0  ;;  %v2358_v53 = vadd.f32 %v6326_v46, %v2346_v2 }
 0x4b2   :  { %2364 = vadd.xlane.f32.xlu1 %v2363_v55  ;;  %v2372_v17 = vsel %vm713_vm8, %v2360_v7, 0.0 }
 0x4b3   :  { %v2366_v27 = vsel %vm713_vm8, %v2358_v53, 0.0 }
 0x4b4   :  { %2367 = vadd.xlane.f32.xlu0 %v2366_v27 }
 0x4b6   :  { %2370 = vadd.xlane.f32.xlu1 %v2369_v28 }
 0x4b8   :  { %2373 = vadd.xlane.f32.xlu0 %v2372_v17 }
 0x53f   :  { %v2365_v11 = vpop.xlane.xlu1 %2364 }
 0x540   :  { %v2375_v57 = vmul.f32 0.015625, %v2365_v11  ;;  %v2439_v11 = vld [vmem:[%s7890_s7] sm:$0x3]  ;;  %s6355_s7 = smov 112  }
 0x541   :  { %v2368_v39 = vpop.xlane.xlu0 %2367 }
 0x542   :  { %v2379_v52 = vsub.f32 %v2357_v16, %v2375_v57  ;;  %v2376_v20 = vmul.f32 0.015625, %v2368_v39 }
 0x543   :  { %v2371_v36 = vpop.xlane.xlu1 %2370 }
 0x544   :  { %v2380_v31 = vsub.f32 %v2358_v53, %v2376_v20  ;;  %v2377_v24 = vmul.f32 0.015625, %v2371_v36  ;;  %v2383_v13 = vmul.f32 %v2379_v52, %v2379_v52 }
 0x545   :  { %v2374_v42 = vpop.xlane.xlu0 %2373 }
 0x546   :  { %v2381_v1 = vsub.f32 %v2359_v32, %v2377_v24  ;;  %v2378_v4 = vmul.f32 0.015625, %v2374_v42  ;;  %v2387_v33 = vsel %vm713_vm8, %v2383_v13, 0.0  ;;  %v2384_v10 = vmul.f32 %v2380_v31, %v2380_v31 }
 0x547   :  { %2388 = vadd.xlane.f32.xlu1 %v2387_v33 }
 0x548   :  { %v2382_v21 = vsub.f32 %v2360_v7, %v2378_v4  ;;  %v2390_v47 = vsel %vm713_vm8, %v2384_v10, 0.0  ;;  %v2385_v49 = vmul.f32 %v2381_v1, %v2381_v1  ;;  %v2452_v7 = vlaneseq }
 0x549   :  { %2391 = vadd.xlane.f32.xlu0 %v2390_v47 }
 0x54a   :  { %v2393_v50 = vsel %vm713_vm8, %v2385_v49, 0.0  ;;  %v2386_v14 = vmul.f32 %v2382_v21, %v2382_v21  ;;  %v7302_v28 = vshrl.u32 %v2452_v7, 7 }
 0x54b   :  { %2394 = vadd.xlane.f32.xlu1 %v2393_v50 }
 0x54c   :  { %v2396_v41 = vsel %vm713_vm8, %v2386_v14, 0.0  ;;  %v2454_v17 = vsub.s32 0, %v7302_v28 }
 0x54d   :  { %2397 = vadd.xlane.f32.xlu0 %v2396_v41 }
 0x54e   :  { %v2455_v57 = vrot.slane %v2439_v11, %v2454_v17 }
 0x5d4   :  { %v2389_v8 = vpop.xlane.xlu1 %2388 }
 0x5d5   :  { %v2399_v43 = vmul.f32 0.015625, %v2389_v8 }
 0x5d6   :  { %v2392_v5 = vpop.xlane.xlu0 %2391 }
 0x5d7   :  { %v2403_v25 = vadd.f32 1e-05, %v2399_v43  ;;  %v2400_v63 = vmul.f32 0.015625, %v2392_v5 }
 0x5d8   :  { %v2395_v0 = vpop.xlane.xlu1 %2394 }
 0x5d9   :  { %6224 = vrsqrt.f32 %v2403_v25  ;;  %v2404_v3 = vadd.f32 1e-05, %v2400_v63  ;;  %v2401_v62 = vmul.f32 0.015625, %v2395_v0 }
 0x5da   :  { %v2398_v29 = vpop.xlane.xlu0 %2397 }
 0x5db   :  { %6226 = vrsqrt.f32 %v2404_v3  ;;  %v2405_v22 = vadd.f32 1e-05, %v2401_v62  ;;  %v2402_v6 = vmul.f32 0.015625, %v2398_v29 }
 0x5dd   :  { %6228 = vrsqrt.f32 %v2405_v22  ;;  %v2406_v61 = vadd.f32 1e-05, %v2402_v6 }
 0x5df   :  { %6230 = vrsqrt.f32 %v2406_v61 }
 0x5e3   :  { %v6225_v34 = vpop.eup %6224 }
 0x5e4   :  { %v2411_v26 = vmul.f32 %v6225_v34, %v2379_v52 }
 0x5e5   :  { %v6227_v23 = vpop.eup %6226 }
 0x5e6   :  { %v2419_v37 = vmul.f32 %v5303_v60, %v2411_v26  ;;  %v2412_v40 = vmul.f32 %v6227_v23, %v2380_v31 }
 0x5e7   :  { %v6229_v59 = vpop.eup %6228 }
 0x5e8   :  { %v2420_v38 = vmul.f32 %v5303_v60, %v2412_v40  ;;  %v7287_v19 = vadd.f32 %v5304_v35, %v2419_v37  ;;  %v2413_v55 = vmul.f32 %v6229_v59, %v2381_v1 }
 0x5e9   :  { %v6231_v48 = vpop.eup %6230 }
 0x5ea   :  { %v2414_v2 = vmul.f32 %v6231_v48, %v2382_v21  ;;  %v7289_v16 = vadd.f32 %v5304_v35, %v2420_v38  ;;  %v2421_v44 = vmul.f32 %v5303_v60, %v2413_v55  ;;  %v6356_v21 = vmov 0.0  }
 0x5eb   :  { %5668 = vmatprep.subr.bf16.mxu0 %v6356_v21  ;;  %5680 = vmatprep.subr.bf16.mxu1 %v6356_v21 }
 0x5ec   :  { %v2449_v46 = vpack.c.bf16 %v7289_v16, %v7287_v19  ;;  %v2422_v53 = vmul.f32 %v5303_v60, %v2414_v2  ;;  %v7297_v27 = vadd.f32 %v5304_v35, %v2421_v44  ;;  %5670 = vmatprep.mubr.msk.bf16.mxu0 %vm6358_vm9, %v6356_v21 }
 0x5ee   :  { %5313 = vmatmul.mubr.msk.bf16.vlgmr.msra.gmra.mrb[24].mxu1 %vm713_vm8, %v2449_v46  ;;  %v7295_v32 = vadd.f32 %v5304_v35, %v2422_v53 }
 0x5ef   :  { %2550 = vmatprep.mubr.bf16.mxu1 %v7934_v30  ;;  %v2458_v30 = vsub.s32 1, %v7302_v28 }
 0x5f0   :  { %v2450_v9 = vpack.c.bf16 %v7295_v32, %v7297_v27 }
 0x5f1   :  { %v2459_v52 = vrot.slane %v2439_v11, %v2458_v30 }
 0x5f6   :  { %5314 = vmatmul.mubr.msk.bf16.gmra.mrb[28].mxu1 %vm713_vm8, %v2450_v9 }
 0x5f7   :  { %5682 = vmatprep.mubr.msk.bf16.mxu1 %vm6358_vm9, %v6356_v21 }
 0x6c1   :  { %v2542_v39 = vpop.f32.mrb[24].mxu1 }
 0x6c2   :  { %v2544_v20 = vpop.f32.mrb[25].mxu1  ;;  %v2543_v36 = vadd.f32 %v2542_v39, %v2455_v57 }
 0x6c3   :  { %v2546_v31 = vpop.f32.mrb[26].mxu1  ;;  %v7311_v1 = vadd.f32 %v2544_v20, %v2459_v52 }
 0x6c4   :  { %v2547_v24 = vadd.f32 %v2546_v31, %v2455_v57  ;;  %v2548_v13 = vpop.f32.mrb[27].mxu1  ;;  %v7313_v33 = vmul.f32 0.25, %v2543_v36  ;;  %v2661_v5 = vpack.c.bf16 %v2543_v36, %v2543_v36 }
 0x6c5   :  { %v7309_v42 = vadd.f32 %v2548_v13, %v2459_v52 }
 0x6c6   :  { %v5908_v4 = vpack.i.bf16 %v2547_v24, %v2543_v36  ;;  %v7315_v10 = vmul.f32 0.25, %v2547_v24  ;;  %v2662_v25 = vpack.c.bf16 %v2547_v24, %v2547_v24  ;;  %v2605_v7 = vpack.c.bf16 %v7313_v33, %v7313_v33 }
 0x6c7   :  { %v7321_v47 = vpack.i.bf16 %v7309_v42, %v7311_v1 }
 0x6c8   :  { %5909 = vrot.lane.b32.xlu1 %v5908_v4, %s6355_s7  ;;  %v7325_v50 = vpack.i.bf16 %v7315_v10, %v7313_v33  ;;  %v2606_v24 = vpack.c.bf16 %v7315_v10, %v7315_v10 }
 0x6c9   :  { %v2552_v49 = vpop.f32.mrb[28].mxu1 }
 0x6ca   :  { %v2554_v14 = vpop.f32.mrb[29].mxu1  ;;  %v2553_v41 = vadd.f32 %v2552_v49, %v2455_v57 }
 0x6cb   :  { %v7328_v45 = vadd.f32 %v2554_v14, %v2459_v52  ;;  %v2556_v18 = vpop.f32.mrb[30].mxu1 }
 0x6cc   :  { %v2557_v54 = vadd.f32 %v2556_v18, %v2455_v57  ;;  %5919 = vrot.lane.b32.xlu1 %v5908_v4, %s6357_s19  ;;  %v2558_v12 = vpop.f32.mrb[31].mxu1  ;;  %v7335_v58 = vmul.f32 0.25, %v2553_v41  ;;  %v2663_v0 = vpack.c.bf16 %v2553_v41, %v2553_v41 }
 0x6cd   :  { %v7331_v15 = vadd.f32 %v2558_v12, %v2459_v52 }
 0x6ce   :  { %v5923_v51 = vpack.i.bf16 %v2557_v54, %v2553_v41  ;;  %v7337_v56 = vmul.f32 0.25, %v2557_v54  ;;  %v2664_v63 = vpack.c.bf16 %v2557_v54, %v2557_v54 }
 0x6cf   :  { %v7343_v8 = vpack.i.bf16 %v7331_v15, %v7328_v45 }
 0x6d0   :  { %5924 = vrot.lane.b32.xlu1 %v5923_v51, %s6357_s19  ;;  %5914 = vrot.lane.b32.xlu0 %v5923_v51, %s6355_s7  ;;  %v7349_v43 = vpack.i.bf16 %v7337_v56, %v7335_v58  ;;  %v2608_v54 = vpack.c.bf16 %v7337_v56, %v7337_v56 }
 0x6d4   :  { %2734 = vrot.lane.b32.xlu1 %v2661_v5, %s6354_s23  ;;  %5929 = vrot.lane.b32.xlu0 %v5908_v4, %s6359_s20  ;;  %v2607_v4 = vpack.c.bf16 %v7335_v58, %v7335_v58 }
 0x6d8   :  { %2784 = vrot.lane.b32.xlu1 %v2662_v25, %s6354_s23  ;;  %5934 = vrot.lane.b32.xlu0 %v5923_v51, %s6359_s20 }
 0x6dc   :  { %2882 = vrot.lane.b32.xlu1 %v2664_v63, %s6354_s23  ;;  %2833 = vrot.lane.b32.xlu0 %v2663_v0, %s6354_s23 }
 0x73a   :  { %v5910_v3 = vpop.permute.xlu1 %5909 }
 0x73b   :  { %v5912_v62 = vunpack.i.h.bf16 %v5910_v3  ;;  %v5911_v29 = vunpack.i.l.bf16 %v5910_v3 }
 0x73d   :  { %v2666_v22 = vpack.c.bf16 %v5912_v62, %v5912_v62  ;;  %v2665_v6 = vpack.c.bf16 %v5911_v29, %v5911_v29 }
 0x73e   :  { %v5920_v61 = vpop.permute.xlu1 %5919 }
 0x73f   :  { %2980 = vrot.lane.b32.xlu1 %v2666_v22, %s6354_s23  ;;  %2931 = vrot.lane.b32.xlu0 %v2665_v6, %s6354_s23  ;;  %v5921_v37 = vunpack.i.l.bf16 %v5920_v61  ;;  %v5922_v2 = vunpack.i.h.bf16 %v5920_v61 }
 0x741   :  { %v2669_v55 = vpack.c.bf16 %v5921_v37, %v5921_v37  ;;  %v2670_v44 = vpack.c.bf16 %v5922_v2, %v5922_v2 }
 0x742   :  { %v5915_v34 = vpop.permute.xlu0 %5914  ;;  %v5925_v60 = vpop.permute.xlu1 %5924 }
 0x743   :  { %v5917_v26 = vunpack.i.h.bf16 %v5915_v34  ;;  %v5916_v23 = vunpack.i.l.bf16 %v5915_v34  ;;  %5939 = vrot.lane.b32.xlu0 %v7325_v50, %s6355_s7  ;;  %v5926_v9 = vunpack.i.l.bf16 %v5925_v60  ;;  %v5927_v17 = vunpack.i.h.bf16 %v5925_v60 }
 0x745   :  { %v2668_v40 = vpack.c.bf16 %v5917_v26, %v5917_v26  ;;  %v2667_v59 = vpack.c.bf16 %v5916_v23, %v5916_v23  ;;  %v2671_v39 = vpack.c.bf16 %v5926_v9, %v5926_v9  ;;  %v2672_v52 = vpack.c.bf16 %v5927_v17, %v5927_v17 }
 0x746   :  { %v5930_v35 = vpop.permute.xlu0 %5929  ;;  %v2735_v38 = vpop.permute.xlu1 %2734 }
 0x747   :  { %v2741_v48 = vsel %vm2736_vm10, %v2735_v38, 0  ;;  %3029 = vrot.lane.b32.xlu1 %v2667_v59, %s6354_s23  ;;  %3078 = vrot.lane.b32.xlu0 %v2668_v40, %s6354_s23  ;;  %v5931_v20 = vunpack.i.l.bf16 %v5930_v35  ;;  %v5932_v36 = vunpack.i.h.bf16 %v5930_v35 }
 0x748   :  { %5669 = vmatpush3.bf16.xpose.msra.mxu0 %v2741_v48 }
 0x749   :  { %5674 = vmatprep.subr.bf16.mxu0 %v6356_v21  ;;  %v2673_v13 = vpack.c.bf16 %v5931_v20, %v5931_v20  ;;  %v2674_v49 = vpack.c.bf16 %v5932_v36, %v5932_v36 }
 0x74a   :  { %v5935_v46 = vpop.permute.xlu0 %5934  ;;  %v2785_v53 = vpop.permute.xlu1 %2784 }
 0x74b   :  { %5944 = vrot.lane.b32.xlu1 %v7349_v43, %s6355_s7  ;;  %3127 = vrot.lane.b32.xlu0 %v2669_v55, %s6354_s23  ;;  %v2790_v30 = vsel %vm2736_vm10, %v2785_v53, 0  ;;  %v5936_v14 = vunpack.i.l.bf16 %v5935_v46  ;;  %v5937_v10 = vunpack.i.h.bf16 %v5935_v46 }
 0x74d   :  { %v2675_v41 = vpack.c.bf16 %v5936_v14, %v5936_v14  ;;  %v2676_v18 = vpack.c.bf16 %v5937_v10, %v5937_v10 }
 0x74e   :  { %v2834_v11 = vpop.permute.xlu0 %2833  ;;  %v2883_v31 = vpop.permute.xlu1 %2882 }
 0x74f   :  { %v2839_v57 = vsel %vm2736_vm10, %v2834_v11, 0  ;;  %5671 = vmatmul.mubr.msk.bf16.vlgmr.msra.gmra.mrb[28].mxu0 %vm2736_vm10, %v2605_v7  ;;  %3176 = vrot.lane.b32.xlu1 %v2670_v44, %s6354_s23  ;;  %v2888_v33 = vsel %vm2736_vm10, %v2883_v31, 0 }
 0x750   :  { %5949 = vrot.lane.b32.xlu0 %v7325_v50, %s6357_s19  ;;  %5675 = vmatpush3.bf16.xpose.msra.mxu0 %v2790_v30 }
 0x751   :  { %5681 = vmatpush3.bf16.xpose.msra.mxu1 %v2839_v57  ;;  %5676 = vmatprep.mubr.msk.bf16.mxu0 %vm6358_vm9, %v6356_v21 }
 0x752   :  { %5686 = vmatprep.subr.bf16.mxu0 %v6356_v21  ;;  %5692 = vmatprep.subr.bf16.mxu1 %v6356_v21 }
 0x753   :  { %3225 = vrot.lane.b32.xlu1 %v2671_v39, %s6354_s23 }
 0x754   :  { %3274 = vrot.lane.b32.xlu0 %v2672_v52, %s6354_s23 }
 0x757   :  { %5677 = vmatmul.mubr.msk.bf16.vlgmr.msra.gmra.mrb[32].mxu0 %vm2736_vm10, %v2606_v24  ;;  %5954 = vrot.lane.b32.xlu1 %v7349_v43, %s6357_s19 }
 0x758   :  { %5683 = vmatmul.mubr.msk.bf16.vlgmr.msra.gmra.mrb[32].mxu1 %vm2736_vm10, %v2607_v4  ;;  %3323 = vrot.lane.b32.xlu0 %v2673_v13, %s6354_s23 }
 0x759   :  { %5687 = vmatpush3.bf16.xpose.msra.mxu0 %v2888_v33  ;;  %5688 = vmatprep.mubr.msk.bf16.mxu0 %vm6358_vm9, %v6356_v21 }
 0x75a   :  { %5698 = vmatprep.subr.bf16.mxu0 %v6356_v21  ;;  %5694 = vmatprep.mubr.msk.bf16.mxu1 %vm6358_vm9, %v6356_v21 }
 0x75b   :  { %3372 = vrot.lane.b32.xlu1 %v2674_v49, %s6354_s23 }
 0x75c   :  { %5959 = vrot.lane.b32.xlu0 %v7325_v50, %s6359_s20 }
 0x75f   :  { %3421 = vrot.lane.b32.xlu1 %v2675_v41, %s6354_s23 }
 0x760   :  { %5689 = vmatmul.mubr.msk.bf16.vlgmr.msra.gmra.mrb[36].mxu0 %vm2736_vm10, %v2608_v54  ;;  %3470 = vrot.lane.b32.xlu0 %v2676_v18, %s6354_s23 }
 0x761   :  { %5700 = vmatprep.mubr.msk.bf16.mxu0 %vm6358_vm9, %v6356_v21 }
 0x763   :  { %5964 = vrot.lane.b32.xlu1 %v7349_v43, %s6359_s20 }
 0x7b1   :  { %v2981_v12 = vpop.permute.xlu1 %2980  ;;  %v2932_v51 = vpop.permute.xlu0 %2931 }
 0x7b2   :  { %v2986_v50 = vsel %vm2736_vm10, %v2981_v12, 0  ;;  %v2937_v58 = vsel %vm2736_vm10, %v2932_v51, 0  ;;  %v2717_v12 = vpack.c.bf16 %v7311_v1, %v7311_v1  ;;  %v2718_v51 = vpack.c.bf16 %v7309_v42, %v7309_v42 }
 0x7b3   :  { %5693 = vmatpush3.bf16.xpose.msra.mxu1 %v2937_v58  ;;  %5699 = vmatpush3.bf16.xpose.msra.mxu0 %v2986_v50 }
 0x7b4   :  { %5704 = vmatprep.subr.bf16.mxu1 %v6356_v21  ;;  %5710 = vmatprep.subr.bf16.mxu0 %v6356_v21 }
 0x7b5   :  { %v5940_v56 = vpop.permute.xlu0 %5939 }
 0x7b6   :  { %v5942_v5 = vunpack.i.h.bf16 %v5940_v56  ;;  %v5941_v25 = vunpack.i.l.bf16 %v5940_v56  ;;  %v3716_v56 = vsel %vm3714_vm11, %v2717_v12, 0 }
 0x7b8   :  { %v2610_v63 = vpack.c.bf16 %v5942_v5, %v5942_v5  ;;  %v2609_v0 = vpack.c.bf16 %v5941_v25, %v5941_v25  ;;  %v3762_v5 = vsel %vm3714_vm11, %v2718_v51, 0 }
 0x7b9   :  { %v3030_v3 = vpop.permute.xlu1 %3029  ;;  %v3079_v62 = vpop.permute.xlu0 %3078 }
 0x7ba   :  { %v3035_v43 = vsel %vm2736_vm10, %v3030_v3, 0  ;;  %v3084_v29 = vsel %vm2736_vm10, %v3079_v62, 0  ;;  %5695 = vmatmul.mubr.msk.bf16.vlgmr.msra.gmra.mrb[36].mxu1 %vm2736_vm10, %v2609_v0  ;;  %5701 = vmatmul.mubr.msk.bf16.vlgmr.msra.gmra.mrb[40].mxu0 %vm2736_vm10, %v2610_v63 }
 0x7bb   :  { %5705 = vmatpush3.bf16.xpose.msra.mxu1 %v3035_v43  ;;  %5711 = vmatpush3.bf16.xpose.msra.mxu0 %v3084_v29 }
 0x7bc   :  { %5706 = vmatprep.mubr.msk.bf16.mxu1 %vm6358_vm9, %v6356_v21  ;;  %5712 = vmatprep.mubr.msk.bf16.mxu0 %vm6358_vm9, %v6356_v21 }
 0x7bd   :  { %v5945_v22 = vpop.permute.xlu1 %5944  ;;  %v3128_v6 = vpop.permute.xlu0 %3127  ;;  %5716 = vmatprep.subr.bf16.mxu1 %v6356_v21  ;;  %5722 = vmatprep.subr.bf16.mxu0 %v6356_v21 }
 0x7be   :  { %v5947_v61 = vunpack.i.h.bf16 %v5945_v22  ;;  %v5946_v34 = vunpack.i.l.bf16 %v5945_v22  ;;  %v3133_v37 = vsel %vm2736_vm10, %v3128_v6, 0 }
 0x7c0   :  { %v2612_v60 = vpack.c.bf16 %v5947_v61, %v5947_v61  ;;  %v2611_v26 = vpack.c.bf16 %v5946_v34, %v5946_v34 }
 0x7c1   :  { %v3177_v23 = vpop.permute.xlu1 %3176 }
 0x7c2   :  { %v3182_v40 = vsel %vm2736_vm10, %v3177_v23, 0  ;;  %v5950_v59 = vpop.permute.xlu0 %5949  ;;  %5707 = vmatmul.mubr.msk.bf16.vlgmr.msra.gmra.mrb[40].mxu1 %vm2736_vm10, %v2611_v26  ;;  %5713 = vmatmul.mubr.msk.bf16.vlgmr.msra.gmra.mrb[44].mxu0 %vm2736_vm10, %v2612_v60 }
 0x7c3   :  { %5717 = vmatpush3.bf16.xpose.msra.mxu1 %v3133_v37  ;;  %5723 = vmatpush3.bf16.xpose.msra.mxu0 %v3182_v40  ;;  %v5952_v35 = vunpack.i.h.bf16 %v5950_v59  ;;  %v5951_v38 = vunpack.i.l.bf16 %v5950_v59 }
 0x7c4   :  { %5718 = vmatprep.mubr.msk.bf16.mxu1 %vm6358_vm9, %v6356_v21  ;;  %5724 = vmatprep.mubr.msk.bf16.mxu0 %vm6358_vm9, %v6356_v21 }
 0x7c5   :  { %v3226_v48 = vpop.permute.xlu1 %3225  ;;  %5728 = vmatprep.subr.bf16.mxu1 %v6356_v21  ;;  %5734 = vmatprep.subr.bf16.mxu0 %v6356_v21  ;;  %v2614_v55 = vpack.c.bf16 %v5952_v35, %v5952_v35  ;;  %v2613_v46 = vpack.c.bf16 %v5951_v38, %v5951_v38 }
 0x7c6   :  { %v3275_v2 = vpop.permute.xlu0 %3274  ;;  %v3231_v44 = vsel %vm2736_vm10, %v3226_v48, 0 }
 0x7c7   :  { %v3280_v9 = vsel %vm2736_vm10, %v3275_v2, 0 }
 0x7c9   :  { %v5955_v53 = vpop.permute.xlu1 %5954 }
 0x7ca   :  { %5719 = vmatmul.mubr.msk.bf16.vlgmr.msra.gmra.mrb[44].mxu1 %vm2736_vm10, %v2613_v46  ;;  %5725 = vmatmul.mubr.msk.bf16.vlgmr.msra.gmra.mrb[48].mxu0 %vm2736_vm10, %v2614_v55  ;;  %v3324_v7 = vpop.permute.xlu0 %3323  ;;  %v5957_v17 = vunpack.i.h.bf16 %v5955_v53  ;;  %v5956_v11 = vunpack.i.l.bf16 %v5955_v53 }
 0x7cb   :  { %5729 = vmatpush3.bf16.xpose.msra.mxu1 %v3231_v44  ;;  %5735 = vmatpush3.bf16.xpose.msra.mxu0 %v3280_v9  ;;  %v3329_v20 = vsel %vm2736_vm10, %v3324_v7, 0 }
 0x7cc   :  { %5730 = vmatprep.mubr.msk.bf16.mxu1 %vm6358_vm9, %v6356_v21  ;;  %5736 = vmatprep.mubr.msk.bf16.mxu0 %vm6358_vm9, %v6356_v21  ;;  %v2616_v57 = vpack.c.bf16 %v5957_v17, %v5957_v17  ;;  %v2615_v39 = vpack.c.bf16 %v5956_v11, %v5956_v11 }
 0x7cd   :  { %v3373_v30 = vpop.permute.xlu1 %3372  ;;  %5740 = vmatprep.subr.bf16.mxu1 %v6356_v21  ;;  %5746 = vmatprep.subr.bf16.mxu0 %v6356_v21 }
 0x7ce   :  { %v5960_v52 = vpop.permute.xlu0 %5959  ;;  %v3378_v36 = vsel %vm2736_vm10, %v3373_v30, 0 }
 0x7cf   :  { %v5962_v24 = vunpack.i.h.bf16 %v5960_v52  ;;  %v5961_v13 = vunpack.i.l.bf16 %v5960_v52 }
 0x7d1   :  { %v3422_v31 = vpop.permute.xlu1 %3421  ;;  %v2618_v33 = vpack.c.bf16 %v5962_v24, %v5962_v24  ;;  %v2617_v49 = vpack.c.bf16 %v5961_v13, %v5961_v13 }
 0x7d2   :  { %5731 = vmatmul.mubr.msk.bf16.vlgmr.msra.gmra.mrb[48].mxu1 %vm2736_vm10, %v2615_v39  ;;  %5737 = vmatmul.mubr.msk.bf16.vlgmr.msra.gmra.mrb[52].mxu0 %vm2736_vm10, %v2616_v57  ;;  %v3471_v4 = vpop.permute.xlu0 %3470  ;;  %v3427_v10 = vsel %vm2736_vm10, %v3422_v31, 0 }
 0x7d3   :  { %5741 = vmatpush3.bf16.xpose.msra.mxu1 %v3329_v20  ;;  %5747 = vmatpush3.bf16.xpose.msra.mxu0 %v3378_v36  ;;  %v3476_v41 = vsel %vm2736_vm10, %v3471_v4, 0 }
 0x7d4   :  { %5742 = vmatprep.mubr.msk.bf16.mxu1 %vm6358_vm9, %v6356_v21  ;;  %5748 = vmatprep.mubr.msk.bf16.mxu0 %vm6358_vm9, %v6356_v21 }
 0x7d5   :  { %5752 = vmatprep.subr.bf16.mxu1 %v6356_v21  ;;  %5758 = vmatprep.subr.bf16.mxu0 %v6356_v21  ;;  %v5965_v14 = vpop.permute.xlu1 %5964 }
 0x7d6   :  { %v5967_v18 = vunpack.i.h.bf16 %v5965_v14  ;;  %v5966_v54 = vunpack.i.l.bf16 %v5965_v14 }
 0x7d8   :  { %v2620_v50 = vpack.c.bf16 %v5967_v18, %v5967_v18  ;;  %v2619_v58 = vpack.c.bf16 %v5966_v54, %v5966_v54 }
 0x7da   :  { %5743 = vmatmul.mubr.msk.bf16.vlgmr.msra.gmra.mrb[52].mxu1 %vm2736_vm10, %v2617_v49  ;;  %5749 = vmatmul.mubr.msk.bf16.vlgmr.msra.gmra.mrb[56].mxu0 %vm2736_vm10, %v2618_v33 }
 0x7db   :  { %5753 = vmatpush3.bf16.xpose.msra.mxu1 %v3427_v10  ;;  %5759 = vmatpush3.bf16.xpose.msra.mxu0 %v3476_v41 }
 0x7dc   :  { %5754 = vmatprep.mubr.msk.bf16.mxu1 %vm6358_vm9, %v6356_v21  ;;  %5760 = vmatprep.mubr.msk.bf16.mxu0 %vm6358_vm9, %v6356_v21 }
 0x7dd   :  { %5764 = vmatprep.subr.bf16.mxu1 %v6356_v21  ;;  %5770 = vmatprep.subr.bf16.mxu0 %v6356_v21 }
 0x7e2   :  { %5755 = vmatmul.mubr.msk.bf16.vlgmr.msra.gmra.mrb[56].mxu1 %vm2736_vm10, %v2619_v58  ;;  %5761 = vmatmul.mubr.msk.bf16.vlgmr.msra.gmra.mrb[60].mxu0 %vm2736_vm10, %v2620_v50 }
 0x7e3   :  { %5765 = vmatpush3.bf16.msra.mxu1 %v3716_v56  ;;  %5771 = vmatpush3.bf16.msra.mxu0 %v3762_v5 }
 0x7e4   :  { %5772 = vmatprep.mubr.msk.bf16.mxu0 %vm6358_vm9, %v6356_v21  ;;  %5782 = vmatprep.subr.bf16.mxu0 %v6356_v21 }
 0x7e5   :  { %5766 = vmatprep.mubr.msk.bf16.mxu1 %vm6358_vm9, %v6356_v21  ;;  %5776 = vmatprep.subr.bf16.mxu1 %v6356_v21 }
 0x822   :  { %v7477_v42 = vpop.f32.mrb[28].mxu0 }
 0x823   :  { %v5672_v1 = vpop.f32.mrb[29].mxu0  ;;  %v3519_v25 = vsel %vm3518_vm12, %v7477_v42, -inf }
 0x824   :  { %v2780_v63 = vpop.f32.mrb[30].mxu0  ;;  %3520 = vmax.xlane.f32.xlu0 %v3519_v25 }
 0x825   :  { %v5673_v0 = vpop.f32.mrb[31].mxu0 }
 0x82a   :  { %v7481_v3 = vpop.f32.mrb[32].mxu0 }
 0x82b   :  { %v7483_v62 = vpop.f32.mrb[32].mxu1  ;;  %v5678_v43 = vpop.f32.mrb[33].mxu0  ;;  %v3522_v29 = vsel %vm3518_vm12, %v7481_v3, -inf }
 0x82c   :  { %v5684_v22 = vpop.f32.mrb[33].mxu1  ;;  %v2829_v6 = vpop.f32.mrb[34].mxu0  ;;  %3523 = vmax.xlane.f32.xlu1 %v3522_v29  ;;  %v3525_v61 = vsel %vm3518_vm12, %v7483_v62, -inf }
 0x82d   :  { %v2878_v34 = vpop.f32.mrb[34].mxu1  ;;  %3526 = vmax.xlane.f32.xlu0 %v3525_v61  ;;  %v5679_v60 = vpop.f32.mrb[35].mxu0 }
 0x82e   :  { %v5685_v26 = vpop.f32.mrb[35].mxu1 }
 0x833   :  { %v7489_v23 = vpop.f32.mrb[36].mxu0 }
 0x834   :  { %v5690_v37 = vpop.f32.mrb[37].mxu0  ;;  %v3528_v40 = vsel %vm3518_vm12, %v7489_v23, -inf }
 0x835   :  { %v2927_v59 = vpop.f32.mrb[38].mxu0  ;;  %3529 = vmax.xlane.f32.xlu0 %v3528_v40 }
 0x836   :  { %v5691_v35 = vpop.f32.mrb[39].mxu0 }
 0x88d   :  { %v7493_v38 = vpop.f32.mrb[36].mxu1  ;;  %v7495_v48 = vpop.f32.mrb[40].mxu0 }
 0x88e   :  { %v5696_v2 = vpop.f32.mrb[37].mxu1  ;;  %v5702_v55 = vpop.f32.mrb[41].mxu0  ;;  %v3534_v46 = vsel %vm3518_vm12, %v7495_v48, -inf  ;;  %v3531_v53 = vsel %vm3518_vm12, %v7493_v38, -inf }
 0x88f   :  { %3535 = vmax.xlane.f32.xlu0 %v3534_v46  ;;  %v3025_v44 = vpop.f32.mrb[42].mxu0  ;;  %3532 = vmax.xlane.f32.xlu1 %v3531_v53  ;;  %v2976_v9 = vpop.f32.mrb[38].mxu1 }
 0x890   :  { %v5697_v7 = vpop.f32.mrb[39].mxu1  ;;  %v5703_v17 = vpop.f32.mrb[43].mxu0 }
 0x895   :  { %v7501_v11 = vpop.f32.mrb[40].mxu1  ;;  %v7503_v30 = vpop.f32.mrb[44].mxu0 }
 0x896   :  { %v5708_v57 = vpop.f32.mrb[41].mxu1  ;;  %v5714_v39 = vpop.f32.mrb[45].mxu0  ;;  %v3540_v52 = vsel %vm3518_vm12, %v7503_v30, -inf }
 0x897   :  { %3541 = vmax.xlane.f32.xlu0 %v3540_v52  ;;  %v3074_v20 = vpop.f32.mrb[42].mxu1  ;;  %v3123_v36 = vpop.f32.mrb[46].mxu0  ;;  %v3537_v52 = vsel %vm3518_vm12, %v7501_v11, -inf }
 0x898   :  { %v5709_v31 = vpop.f32.mrb[43].mxu1  ;;  %v5715_v24 = vpop.f32.mrb[47].mxu0 }
 0x89d   :  { %v7507_v13 = vpop.f32.mrb[44].mxu1  ;;  %v7509_v4 = vpop.f32.mrb[48].mxu0 }
 0x89e   :  { %v5720_v33 = vpop.f32.mrb[45].mxu1  ;;  %v5726_v49 = vpop.f32.mrb[49].mxu0  ;;  %v3546_v14 = vsel %vm3518_vm12, %v7509_v4, -inf  ;;  %v3543_v36 = vsel %vm3518_vm12, %v7507_v13, -inf }
 0x89f   :  { %3547 = vmax.xlane.f32.xlu0 %v3546_v14  ;;  %v3172_v10 = vpop.f32.mrb[46].mxu1  ;;  %v3221_v41 = vpop.f32.mrb[50].mxu0 }
 0x8a0   :  { %v5727_v18 = vpop.f32.mrb[51].mxu0  ;;  %5969 = vrot.lane.b32.xlu1 %v7321_v47, %s6355_s7  ;;  %v5721_v54 = vpop.f32.mrb[47].mxu1 }
 0x8a5   :  { %v7515_v12 = vpop.f32.mrb[48].mxu1  ;;  %v7517_v51 = vpop.f32.mrb[52].mxu0 }
 0x8a6   :  { %v5732_v50 = vpop.f32.mrb[49].mxu1  ;;  %v5738_v58 = vpop.f32.mrb[53].mxu0  ;;  %v3552_v56 = vsel %vm3518_vm12, %v7517_v51, -inf }
 0x8a7   :  { %3553 = vmax.xlane.f32.xlu0 %v3552_v56  ;;  %v3270_v5 = vpop.f32.mrb[50].mxu1  ;;  %v3319_v1 = vpop.f32.mrb[54].mxu0 }
 0x8a8   :  { %v5733_v25 = vpop.f32.mrb[51].mxu1  ;;  %v5739_v63 = vpop.f32.mrb[55].mxu0 }
 0x8ad   :  { %v7521_v0 = vpop.f32.mrb[52].mxu1  ;;  %v7523_v43 = vpop.f32.mrb[56].mxu0 }
 0x8ae   :  { %v5744_v29 = vpop.f32.mrb[53].mxu1  ;;  %v5750_v22 = vpop.f32.mrb[57].mxu0  ;;  %v3558_v6 = vsel %vm3518_vm12, %v7523_v43, -inf }
 0x8af   :  { %3559 = vmax.xlane.f32.xlu0 %v3558_v6  ;;  %v3368_v61 = vpop.f32.mrb[54].mxu1  ;;  %v3417_v34 = vpop.f32.mrb[58].mxu0 }
 0x8b0   :  { %v5745_v60 = vpop.f32.mrb[55].mxu1  ;;  %v5751_v26 = vpop.f32.mrb[59].mxu0 }
 0x8b1   :  { %v3521_v57 = vpop.xlane.xlu0 %3520 }
 0x8b2   :  { %v3567_v39 = vsub.f32 %v7477_v42, %v3521_v57  ;;  %v3555_v42 = vsel %vm3518_vm12, %v7521_v0, -inf }
 0x8b4   :  { %v3583_v20 = vmul.f32 1.442695, %v3567_v39 }
 0x8b5   :  { %v7527_v37 = vpop.f32.mrb[56].mxu1  ;;  %v7529_v40 = vpop.f32.mrb[60].mxu0 }
 0x8b6   :  { %v5756_v59 = vpop.f32.mrb[57].mxu1  ;;  %v5762_v35 = vpop.f32.mrb[61].mxu0  ;;  %v3564_v2 = vsel %vm3518_vm12, %v7529_v40, -inf  ;;  %v3561_v33 = vsel %vm3518_vm12, %v7527_v37, -inf }
 0x8b7   :  { %3565 = vmax.xlane.f32.xlu0 %v3564_v2  ;;  %v3466_v55 = vpop.f32.mrb[58].mxu1  ;;  %v3515_v46 = vpop.f32.mrb[62].mxu0 }
 0x8b8   :  { %v5757_v53 = vpop.f32.mrb[59].mxu1  ;;  %v5763_v44 = vpop.f32.mrb[63].mxu0 }
 0x8b9   :  { %v3524_v9 = vpop.xlane.xlu1 %3523 }
 0x8ba   :  { %v3568_v7 = vsub.f32 %v7481_v3, %v3524_v9  ;;  %v3549_v3 = vsel %vm3518_vm12, %v7515_v12, -inf  ;;  %v3527_v10 = vpop.xlane.xlu0 %3526 }
 0x8bb   :  { %v3569_v50 = vsub.f32 %v7483_v62, %v3527_v10 }
 0x8bc   :  { %v3585_v17 = vmul.f32 1.442695, %v3568_v7 }
 0x8bd   :  { %v3587_v56 = vmul.f32 1.442695, %v3569_v50 }
 0x8be   :  { %6232 = vpow2.f32 %v3585_v17 }
 0x8bf   :  { %6234 = vpow2.f32 %v3583_v20 }
 0x8c2   :  { %v3530_v41 = vpop.xlane.xlu0 %3529 }
 0x8c3   :  { %v3570_v18 = vsub.f32 %v7489_v23, %v3530_v41 }
 0x8c4   :  { %3538 = vmax.xlane.f32.xlu1 %v3537_v52 }
 0x8c5   :  { %v3589_v54 = vmul.f32 1.442695, %v3570_v18 }
 0x8c7   :  { %6236 = vpow2.f32 %v3589_v54 }
 0x8c8   :  { %v7539_v31 = vpop.eup %6232  ;;  %3544 = vmax.xlane.f32.xlu1 %v3543_v36  ;;  %6238 = vpow2.f32 %v3587_v56 }
 0x8c9   :  { %v3618_v24 = vsel %vm3518_vm12, %v7539_v31, 0.0  ;;  %v7549_v49 = vpop.eup %6234 }
 0x8ca   :  { %3619 = vadd.xlane.f32.xlu0 %v3618_v24  ;;  %v3615_v14 = vsel %vm3518_vm12, %v7549_v49, 0.0 }
 0x8cc   :  { %3550 = vmax.xlane.f32.xlu1 %v3549_v3 }
 0x8d0   :  { %3556 = vmax.xlane.f32.xlu1 %v3555_v42 }
 0x8d1   :  { %v7559_v58 = vpop.eup %6236 }
 0x8d2   :  { %v3624_v5 = vsel %vm3518_vm12, %v7559_v58, 0.0  ;;  %v7563_v1 = vpop.eup %6238 }
 0x8d3   :  { %v3621_v23 = vsel %vm3518_vm12, %v7563_v1, 0.0 }
 0x8d4   :  { %3562 = vmax.xlane.f32.xlu1 %v3561_v33 }
 0x8d8   :  { %3616 = vadd.xlane.f32.xlu1 %v3615_v14 }
 0x8e0   :  { %5974 = vrot.lane.b32.xlu0 %v7343_v8, %s6355_s7 }
 0x8e9   :  { %5979 = vrot.lane.b32.xlu1 %v7321_v47, %s6357_s19 }
 0x8ff   :  { %3625 = vadd.xlane.f32.xlu0 %v3624_v5 }
 0x90d   :  { %3622 = vadd.xlane.f32.xlu1 %v3621_v23 }
 0x91c   :  { %v3536_v25 = vpop.xlane.xlu0 %3535  ;;  %v3533_v63 = vpop.xlane.xlu1 %3532 }
 0x91d   :  { %v3572_v29 = vsub.f32 %v7495_v48, %v3536_v25  ;;  %v3571_v62 = vsub.f32 %v7493_v38, %v3533_v63 }
 0x91f   :  { %v3593_v22 = vmul.f32 1.442695, %v3572_v29  ;;  %v3591_v6 = vmul.f32 1.442695, %v3571_v62 }
 0x920   :  { %v7587_v9 = vpop.permute.xlu1 %5969 }
 0x921   :  { %6240 = vpow2.f32 %v3593_v22 }
 0x922   :  { %6242 = vpow2.f32 %v3591_v6 }
 0x924   :  { %v3542_v61 = vpop.xlane.xlu0 %3541 }
 0x925   :  { %v3574_v34 = vsub.f32 %v7503_v30, %v3542_v61 }
 0x927   :  { %v3597_v60 = vmul.f32 1.442695, %v3574_v34 }
 0x929   :  { %6244 = vpow2.f32 %v3597_v60 }
 0x92b   :  { %v7570_v26 = vpop.eup %6240 }
 0x92c   :  { %v7572_v59 = vpop.eup %6242  ;;  %v3548_v35 = vpop.xlane.xlu0 %3547  ;;  %v3630_v2 = vsel %vm3518_vm12, %v7570_v26, 0.0 }
 0x92d   :  { %v3576_v48 = vsub.f32 %v7509_v4, %v3548_v35  ;;  %3631 = vadd.xlane.f32.xlu0 %v3630_v2  ;;  %v3627_v38 = vsel %vm3518_vm12, %v7572_v59, 0.0 }
 0x92e   :  { %3628 = vadd.xlane.f32.xlu1 %v3627_v38  ;;  %v2719_v38 = vpack.c.bf16 %v7328_v45, %v7328_v45 }
 0x92f   :  { %v3601_v55 = vmul.f32 1.442695, %v3576_v48 }
 0x931   :  { %6246 = vpow2.f32 %v3601_v55 }
 0x933   :  { %v7579_v30 = vpop.eup %6244 }
 0x934   :  { %v3636_v46 = vsel %vm3518_vm12, %v7579_v30, 0.0  ;;  %v3554_v4 = vpop.xlane.xlu0 %3553 }
 0x935   :  { %3637 = vadd.xlane.f32.xlu0 %v3636_v46  ;;  %v3578_v3 = vsub.f32 %v7517_v51, %v3554_v4  ;;  %v3808_v4 = vsel %vm3714_vm11, %v2719_v38, 0 }
 0x937   :  { %v3605_v10 = vmul.f32 1.442695, %v3578_v3 }
 0x93b   :  { %v7583_v53 = vpop.eup %6246 }
 0x93c   :  { %v3642_v44 = vsel %vm3518_vm12, %v7583_v53, 0.0  ;;  %v3560_v7 = vpop.xlane.xlu0 %3559 }
 0x93d   :  { %3643 = vadd.xlane.f32.xlu0 %v3642_v44  ;;  %v3580_v41 = vsub.f32 %v7523_v43, %v3560_v7  ;;  %v2720_v43 = vpack.c.bf16 %v7331_v15, %v7331_v15 }
 0x93f   :  { %v3609_v50 = vmul.f32 1.442695, %v3580_v41 }
 0x944   :  { %v3566_v39 = vpop.xlane.xlu0 %3565 }
 0x945   :  { %v3582_v25 = vsub.f32 %v7529_v40, %v3566_v39  ;;  %v5972_v39 = vunpack.i.h.bf16 %v7587_v9 }
 0x947   :  { %v3613_v15 = vmul.f32 1.442695, %v3582_v25 }
 0x951   :  { %v3539_v17 = vpop.xlane.xlu1 %3538 }
 0x952   :  { %v3573_v57 = vsub.f32 %v7501_v11, %v3539_v17 }
 0x954   :  { %v3595_v52 = vmul.f32 1.442695, %v3573_v57 }
 0x955   :  { %v3545_v20 = vpop.xlane.xlu1 %3544 }
 0x956   :  { %6248 = vpow2.f32 %v3595_v52  ;;  %v3575_v36 = vsub.f32 %v7507_v13, %v3545_v20 }
 0x957   :  { %v3620_v24 = vpop.xlane.xlu0 %3619 }
 0x958   :  { %v3599_v42 = vmul.f32 1.442695, %v3575_v36  ;;  %6250 = vrcp.f32 %v3620_v24  ;;  %v2722_v24 = vpack.c.bf16 %v5972_v39, %v5972_v39 }
 0x959   :  { %v3551_v33 = vpop.xlane.xlu1 %3550 }
 0x95a   :  { %6252 = vpow2.f32 %v3599_v42  ;;  %v3577_v14 = vsub.f32 %v7515_v12, %v3551_v33 }
 0x95b   :  { %v5975_v7 = vpop.permute.xlu0 %5974 }
 0x95c   :  { %v3603_v18 = vmul.f32 1.442695, %v3577_v14  ;;  %v5971_v14 = vunpack.i.l.bf16 %v7587_v9 }
 0x95d   :  { %v3557_v11 = vpop.xlane.xlu1 %3556 }
 0x95e   :  { %6254 = vpow2.f32 %v3603_v18 }
 0x95f   :  { %6256 = vpow2.f32 %v3605_v10  ;;  %v2721_v10 = vpack.c.bf16 %v5971_v14, %v5971_v14 }
 0x960   :  { %v7594_v54 = vpop.eup %6248  ;;  %6258 = vpow2.f32 %v3609_v50 }
 0x961   :  { %v3563_v13 = vpop.xlane.xlu1 %3562  ;;  %v3633_v51 = vsel %vm3518_vm12, %v7594_v54, 0.0 }
 0x962   :  { %v6251_v56 = vpop.eup %6250  ;;  %v3581_v5 = vsub.f32 %v7527_v37, %v3563_v13  ;;  %3634 = vadd.xlane.f32.xlu1 %v3633_v51  ;;  %v3854_v37 = vsel %vm3714_vm11, %v2720_v43, 0  ;;  %v5977_v13 = vunpack.i.h.bf16 %v5975_v7  ;;  %v5976_v51 = vunpack.i.l.bf16 %v5975_v7 }
 0x963   :  { %v3666_v12 = vmul.f32 %v6251_v56, %v7539_v31 }
 0x964   :  { %v7602_v23 = vpop.eup %6252  ;;  %v3611_v63 = vmul.f32 1.442695, %v3581_v5  ;;  %v2723_v25 = vpack.c.bf16 %v5976_v51, %v5976_v51 }
 0x965   :  { %v3617_v29 = vpop.xlane.xlu1 %3616  ;;  %v3639_v62 = vsel %vm3518_vm12, %v7602_v23, 0.0  ;;  %v3696_v22 = vpack.c.bf16 %v3666_v12, %v3666_v12  ;;  %v2724_v12 = vpack.c.bf16 %v5977_v13, %v5977_v13 }
 0x966   :  { %3640 = vadd.xlane.f32.xlu1 %v3639_v62  ;;  %6260 = vrcp.f32 %v3617_v29 }
 0x967   :  { %5773 = vmatmul.mubr.msk.bf16.vlgmr.msra.gmra.mrb[64].mxu0 %vm3518_vm12, %v3696_v22  ;;  %6262 = vpow2.f32 %v3611_v63 }
 0x968   :  { %v7609_v31 = vpop.eup %6254  ;;  %5783 = vmatpush3.bf16.msra.mxu0 %v3854_v37  ;;  %5784 = vmatprep.mubr.msk.bf16.mxu0 %vm6358_vm9, %v6356_v21  ;;  %6264 = vpow2.f32 %v3613_v15  ;;  %v4038_v37 = vsel %vm3714_vm11, %v2724_v12, 0  ;;  %v3992_v15 = vsel %vm3714_vm11, %v2723_v25, 0 }
 0x969   :  { %v3645_v40 = vsel %vm3518_vm12, %v7609_v31, 0.0  ;;  %5794 = vmatprep.subr.bf16.mxu0 %v6356_v21  ;;  %v7616_v6 = vpop.eup %6256  ;;  %v7648_v20 = vpop.permute.xlu1 %5979 }
 0x96a   :  { %3646 = vadd.xlane.f32.xlu0 %v3645_v40  ;;  %v3648_v61 = vsel %vm3518_vm12, %v7616_v6, 0.0  ;;  %v7620_v34 = vpop.eup %6258  ;;  %v5982_v62 = vunpack.i.h.bf16 %v7648_v20 }
 0x96b   :  { %v3654_v35 = vsel %vm3518_vm12, %v7620_v34, 0.0 }
 0x96e   :  { %3649 = vadd.xlane.f32.xlu0 %v3648_v61 }
 0x970   :  { %v6261_v60 = vpop.eup %6260 }
 0x971   :  { %v7624_v2 = vpop.eup %6262  ;;  %v3664_v48 = vmul.f32 %v6261_v60, %v7549_v49  ;;  %v3579_v49 = vsub.f32 %v7521_v0, %v3557_v11  ;;  %v3900_v11 = vsel %vm3714_vm11, %v2721_v10, 0 }
 0x972   :  { %3655 = vadd.xlane.f32.xlu0 %v3654_v35  ;;  %v3657_v46 = vsel %vm3518_vm12, %v7624_v2, 0.0  ;;  %v7631_v44 = vpop.eup %6264 }
 0x973   :  { %v3695_v55 = vpack.c.bf16 %v3664_v48, %v3664_v48  ;;  %v3660_v45 = vsel %vm3518_vm12, %v7631_v44, 0.0  ;;  %v3607_v17 = vmul.f32 1.442695, %v3579_v49 }
 0x975   :  { %5767 = vmatmul.mubr.msk.bf16.vlgmr.msra.gmra.mrb[60].mxu1 %vm3518_vm12, %v3695_v55  ;;  %6266 = vpow2.f32 %v3607_v17 }
 0x976   :  { %3658 = vadd.xlane.f32.xlu0 %v3657_v46  ;;  %5777 = vmatpush3.bf16.msra.mxu1 %v3808_v4  ;;  %v5981_v46 = vunpack.i.l.bf16 %v7648_v20 }
 0x977   :  { %5984 = vrot.lane.b32.xlu1 %v7343_v8, %s6357_s19  ;;  %5778 = vmatprep.mubr.msk.bf16.mxu1 %vm6358_vm9, %v6356_v21 }
 0x978   :  { %5788 = vmatprep.subr.bf16.mxu1 %v6356_v21 }
 0x97a   :  { %3661 = vadd.xlane.f32.xlu0 %v3660_v45 }
 0x97f   :  { %v7646_v52 = vpop.eup %6266 }
 0x980   :  { %v3651_v0 = vsel %vm3518_vm12, %v7646_v52, 0.0 }
 0x98c   :  { %v3626_v57 = vpop.xlane.xlu0 %3625 }
 0x98d   :  { %6268 = vrcp.f32 %v3626_v57  ;;  %v2725_v57 = vpack.c.bf16 %v5981_v46, %v5981_v46 }
 0x990   :  { %5989 = vrot.lane.b32.xlu0 %v7321_v47, %s6359_s20  ;;  %v3946_v47 = vsel %vm3714_vm11, %v2722_v24, 0 }
 0x997   :  { %v6269_v36 = vpop.eup %6268 }
 0x998   :  { %v3670_v3 = vmul.f32 %v6269_v36, %v7559_v58 }
 0x99a   :  { %v3623_v42 = vpop.xlane.xlu1 %3622  ;;  %v3698_v33 = vpack.c.bf16 %v3670_v3, %v3670_v3 }
 0x99b   :  { %6270 = vrcp.f32 %v3623_v42  ;;  %3652 = vadd.xlane.f32.xlu1 %v3651_v0  ;;  %v4084_v0 = vsel %vm3714_vm11, %v2725_v57, 0 }
 0x99c   :  { %5785 = vmatmul.mubr.msk.bf16.vlgmr.msra.gmra.mrb[68].mxu0 %vm3518_vm12, %v3698_v33 }
 0x99d   :  { %5795 = vmatpush3.bf16.msra.mxu0 %v3946_v47  ;;  %5796 = vmatprep.mubr.msk.bf16.mxu0 %vm6358_vm9, %v6356_v21 }
 0x99e   :  { %5806 = vmatprep.subr.bf16.mxu0 %v6356_v21 }
 0x9a5   :  { %v6271_v58 = vpop.eup %6270 }
 0x9a6   :  { %v3668_v41 = vmul.f32 %v6271_v58, %v7563_v1 }
 0x9a8   :  { %v3697_v18 = vpack.c.bf16 %v3668_v41, %v3668_v41 }
 0x9aa   :  { %5779 = vmatmul.mubr.msk.bf16.vlgmr.msra.gmra.mrb[64].mxu1 %vm3518_vm12, %v3697_v18 }
 0x9ab   :  { %5789 = vmatpush3.bf16.msra.mxu1 %v3900_v11  ;;  %5790 = vmatprep.mubr.msk.bf16.mxu1 %vm6358_vm9, %v6356_v21 }
 0x9ac   :  { %5994 = vrot.lane.b32.xlu1 %v7343_v8, %s6359_s20  ;;  %5800 = vmatprep.subr.bf16.mxu1 %v6356_v21 }
 0x9ba   :  { %v3632_v50 = vpop.xlane.xlu0 %3631 }
 0x9bb   :  { %6272 = vrcp.f32 %v3632_v50  ;;  %v3629_v9 = vpop.xlane.xlu1 %3628 }
 0x9bc   :  { %6274 = vrcp.f32 %v3629_v9 }
 0x9c2   :  { %v3638_v1 = vpop.xlane.xlu0 %3637 }
 0x9c3   :  { %6276 = vrcp.f32 %v3638_v1 }
 0x9c5   :  { %v6273_v56 = vpop.eup %6272 }
 0x9c6   :  { %v6275_v5 = vpop.eup %6274  ;;  %v3674_v43 = vmul.f32 %v6273_v56, %v7570_v26 }
 0x9c7   :  { %v3672_v63 = vmul.f32 %v6275_v5, %v7572_v59  ;;  %v2726_v59 = vpack.c.bf16 %v5982_v62, %v5982_v62 }
 0x9c8   :  { %v3700_v29 = vpack.c.bf16 %v3674_v43, %v3674_v43 }
 0x9c9   :  { %v3699_v8 = vpack.c.bf16 %v3672_v63, %v3672_v63  ;;  %v4130_v60 = vsel %vm3714_vm11, %v2726_v59, 0 }
 0x9ca   :  { %v3644_v22 = vpop.xlane.xlu0 %3643  ;;  %5797 = vmatmul.mubr.msk.bf16.vlgmr.msra.gmra.mrb[72].mxu0 %vm3518_vm12, %v3700_v29 }
 0x9cb   :  { %6278 = vrcp.f32 %v3644_v22  ;;  %5791 = vmatmul.mubr.msk.bf16.vlgmr.msra.gmra.mrb[68].mxu1 %vm3518_vm12, %v3699_v8  ;;  %5807 = vmatpush3.bf16.msra.mxu0 %v4038_v37 }
 0x9cc   :  { %5801 = vmatpush3.bf16.msra.mxu1 %v3992_v15  ;;  %5808 = vmatprep.mubr.msk.bf16.mxu0 %vm6358_vm9, %v6356_v21 }
 0x9cd   :  { %v6277_v26 = vpop.eup %6276  ;;  %5818 = vmatprep.subr.bf16.mxu0 %v6356_v21  ;;  %5802 = vmatprep.mubr.msk.bf16.mxu1 %vm6358_vm9, %v6356_v21 }
 0x9ce   :  { %v3678_v40 = vmul.f32 %v6277_v26, %v7579_v30  ;;  %5812 = vmatprep.subr.bf16.mxu1 %v6356_v21 }
 0x9d0   :  { %v3702_v61 = vpack.c.bf16 %v3678_v40, %v3678_v40 }
 0x9d2   :  { %5809 = vmatmul.mubr.msk.bf16.vlgmr.msra.gmra.mrb[76].mxu0 %vm3518_vm12, %v3702_v61 }
 0x9d3   :  { %5819 = vmatpush3.bf16.msra.mxu0 %v4130_v60  ;;  %5820 = vmatprep.mubr.msk.bf16.mxu0 %vm6358_vm9, %v6356_v21 }
 0x9d4   :  { %5830 = vmatprep.subr.bf16.mxu0 %v6356_v21 }
 0x9d5   :  { %v6279_v35 = vpop.eup %6278 }
 0x9d6   :  { %v3682_v48 = vmul.f32 %v6279_v35, %v7583_v53 }
 0x9d8   :  { %v3704_v38 = vpack.c.bf16 %v3682_v48, %v3682_v48 }
 0x9da   :  { %5821 = vmatmul.mubr.msk.bf16.vlgmr.msra.gmra.mrb[80].mxu0 %vm3518_vm12, %v3704_v38 }
 0x9db   :  { %5832 = vmatprep.mubr.msk.bf16.mxu0 %vm6358_vm9, %v6356_v21 }
 0x9ef   :  { %v3635_v30 = vpop.xlane.xlu1 %3634 }
 0x9f0   :  { %6280 = vrcp.f32 %v3635_v30 }
 0x9f3   :  { %v3641_v55 = vpop.xlane.xlu1 %3640 }
 0x9f4   :  { %6282 = vrcp.f32 %v3641_v55 }
 0x9f7   :  { %v3647_v4 = vpop.xlane.xlu0 %3646  ;;  %v5985_v45 = vpop.permute.xlu1 %5984 }
 0x9f8   :  { %v5987_v49 = vunpack.i.h.bf16 %v5985_v45  ;;  %6284 = vrcp.f32 %v3647_v4  ;;  %v5986_v42 = vunpack.i.l.bf16 %v5985_v45 }
 0x9fa   :  { %v6281_v7 = vpop.eup %6280  ;;  %v2728_v17 = vpack.c.bf16 %v5987_v49, %v5987_v49  ;;  %v2727_v33 = vpack.c.bf16 %v5986_v42, %v5986_v42 }
 0x9fb   :  { %v3676_v53 = vmul.f32 %v6281_v7, %v7594_v54  ;;  %v3650_v39 = vpop.xlane.xlu0 %3649 }
 0x9fc   :  { %6286 = vrcp.f32 %v3650_v39  ;;  %v4222_v36 = vsel %vm3714_vm11, %v2728_v17, 0  ;;  %v4176_v11 = vsel %vm3714_vm11, %v2727_v33, 0 }
 0x9fd   :  { %5831 = vmatpush3.bf16.msra.mxu0 %v4222_v36  ;;  %v3701_v24 = vpack.c.bf16 %v3676_v53, %v3676_v53 }
 0x9fe   :  { %v6283_v3 = vpop.eup %6282  ;;  %5842 = vmatprep.subr.bf16.mxu0 %v6356_v21 }
 0x9ff   :  { %v3656_v20 = vpop.xlane.xlu0 %3655  ;;  %5803 = vmatmul.mubr.msk.bf16.vlgmr.msra.gmra.mrb[72].mxu1 %vm3518_vm12, %v3701_v24  ;;  %v3680_v54 = vmul.f32 %v6283_v3, %v7602_v23 }
 0xa00   :  { %5813 = vmatpush3.bf16.msra.mxu1 %v4084_v0  ;;  %5814 = vmatprep.mubr.msk.bf16.mxu1 %vm6358_vm9, %v6356_v21  ;;  %6288 = vrcp.f32 %v3656_v20 }
 0xa01   :  { %5824 = vmatprep.subr.bf16.mxu1 %v6356_v21  ;;  %v3703_v58 = vpack.c.bf16 %v3680_v54, %v3680_v54 }
 0xa02   :  { %v6285_v14 = vpop.eup %6284 }
 0xa03   :  { %v3659_v47 = vpop.xlane.xlu0 %3658  ;;  %v3684_v23 = vmul.f32 %v6285_v14, %v7609_v31 }
 0xa05   :  { %v3705_v51 = vpack.c.bf16 %v3684_v23, %v3684_v23 }
 0xa06   :  { %v6287_v10 = vpop.eup %6286 }
 0xa07   :  { %v3686_v41 = vmul.f32 %v6287_v10, %v7616_v6  ;;  %v3662_v18 = vpop.xlane.xlu0 %3661  ;;  %5815 = vmatmul.mubr.msk.bf16.vlgmr.msra.gmra.mrb[76].mxu1 %vm3518_vm12, %v3703_v58 }
 0xa08   :  { %5825 = vmatpush3.bf16.msra.mxu1 %v4176_v11  ;;  %5826 = vmatprep.mubr.msk.bf16.mxu1 %vm6358_vm9, %v6356_v21  ;;  %6290 = vrcp.f32 %v3662_v18 }
 0xa09   :  { %v3706_v50 = vpack.c.bf16 %v3686_v41, %v3686_v41  ;;  %5836 = vmatprep.subr.bf16.mxu1 %v6356_v21 }
 0xa0a   :  { %v6289_v9 = vpop.eup %6288 }
 0xa0b   :  { %v5990_v13 = vpop.permute.xlu0 %5989  ;;  %5833 = vmatmul.mubr.msk.bf16.vlgmr.msra.gmra.mrb[84].mxu0 %vm3518_vm12, %v3706_v50  ;;  %v3690_v56 = vmul.f32 %v6289_v9, %v7620_v34 }
 0xa0c   :  { %v5992_v1 = vunpack.i.h.bf16 %v5990_v13  ;;  %v5991_v6 = vunpack.i.l.bf16 %v5990_v13  ;;  %5844 = vmatprep.mubr.msk.bf16.mxu0 %vm6358_vm9, %v6356_v21 }
 0xa0d   :  { %v3708_v25 = vpack.c.bf16 %v3690_v56, %v3690_v56 }
 0xa0e   :  { %v2730_v5 = vpack.c.bf16 %v5992_v1, %v5992_v1  ;;  %v2729_v12 = vpack.c.bf16 %v5991_v6, %v5991_v6 }
 0xa0f   :  { %5827 = vmatmul.mubr.msk.bf16.vlgmr.msra.gmra.mrb[80].mxu1 %vm3518_vm12, %v3705_v51 }
 0xa10   :  { %v4268_v31 = vsel %vm3714_vm11, %v2729_v12, 0  ;;  %v4314_v43 = vsel %vm3714_vm11, %v2730_v5, 0  ;;  %5838 = vmatprep.mubr.msk.bf16.mxu1 %vm6358_vm9, %v6356_v21 }
 0xa11   :  { %5837 = vmatpush3.bf16.msra.mxu1 %v4268_v31  ;;  %5843 = vmatpush3.bf16.msra.mxu0 %v4314_v43  ;;  %v6204_v31 = vld [vmem:[%s7887_s4] sm:$0xff]  }
 0xa12   :  { %5854 = vmatprep.subr.bf16.mxu0 %v6356_v21  ;;  %5848 = vmatprep.subr.bf16.mxu1 %v6356_v21  ;;  %v6291_v63 = vpop.eup %6290 }
 0xa13   :  { %v3694_v62 = vmul.f32 %v6291_v63, %v7631_v44 }
 0xa14   :  { %5845 = vmatmul.mubr.msk.bf16.vlgmr.msra.gmra.mrb[88].mxu0 %vm3518_vm12, %v3708_v25 }
 0xa15   :  { %5856 = vmatprep.mubr.msk.bf16.mxu0 %vm6358_vm9, %v6356_v21  ;;  %v3710_v59 = vpack.c.bf16 %v3694_v62, %v3694_v62 }
 0xa28   :  { %v3653_v34 = vpop.xlane.xlu1 %3652 }
 0xa29   :  { %6292 = vrcp.f32 %v3653_v34 }
 0xa2a   :  { %6294 = vrcp.f32 %v3659_v47 }
 0xa2c   :  { %v5995_v29 = vpop.permute.xlu1 %5994 }
 0xa2d   :  { %v5997_v8 = vunpack.i.h.bf16 %v5995_v29  ;;  %v5996_v37 = vunpack.i.l.bf16 %v5995_v29 }
 0xa2f   :  { %v2732_v22 = vpack.c.bf16 %v5997_v8, %v5997_v8  ;;  %v2731_v61 = vpack.c.bf16 %v5996_v37, %v5996_v37 }
 0xa31   :  { %v4406_v15 = vsel %vm3714_vm11, %v2732_v22, 0  ;;  %v4360_v48 = vsel %vm3714_vm11, %v2731_v61, 0 }
 0xa32   :  { %5855 = vmatpush3.bf16.msra.mxu0 %v4406_v15 }
 0xa33   :  { %v6293_v26 = vpop.eup %6292 }
 0xa34   :  { %v3688_v40 = vmul.f32 %v6293_v26, %v7646_v52  ;;  %v6295_v35 = vpop.eup %6294 }
 0xa35   :  { %5857 = vmatmul.mubr.msk.bf16.vlgmr.msra.gmra.mrb[92].mxu0 %vm3518_vm12, %v3710_v59  ;;  %v3692_v44 = vmul.f32 %v6295_v35, %v7624_v2 }
 0xa36   :  { %v3707_v60 = vpack.c.bf16 %v3688_v40, %v3688_v40 }
 0xa37   :  { %v3709_v46 = vpack.c.bf16 %v3692_v44, %v3692_v44  ;;  %v6205_v44 = vld [vmem:[%s7887_s4 + $0x8] sm:$0xff]  }
 0xa38   :  { %5839 = vmatmul.mubr.msk.bf16.vlgmr.msra.gmra.mrb[84].mxu1 %vm3518_vm12, %v3707_v60 }
 0xa39   :  { %5849 = vmatpush3.bf16.msra.mxu1 %v4360_v48  ;;  %5850 = vmatprep.mubr.msk.bf16.mxu1 %vm6358_vm9, %v6356_v21 }
 0xa3a   :  { %v7730_v38 = vpop.f32.mrb[64].mxu0  ;;  %5860 = vmatprep.subr.bf16.mxu1 %v6204_v31 }
 0xa3b   :  { %v5774_v30 = vpop.f32.mrb[65].mxu0 }
 0xa3c   :  { %v3801_v55 = vpop.f32.mrb[66].mxu0  ;;  %v6206_v30 = vld [vmem:[%s7887_s4 + $0x10] sm:$0xff]  }
 0xa3d   :  { %v5775_v52 = vpop.f32.mrb[67].mxu0 }
 0xa40   :  { %5851 = vmatmul.mubr.msk.bf16.vlgmr.msra.gmra.mrb[88].mxu1 %vm3518_vm12, %v3709_v46 }
 0xa41   :  { %5861 = vmatpush3.bf16.msra.mxu1 %v6204_v31 }
 0xa42   :  { %5862 = vmatprep.subr.bf16.mxu1 %v6205_v44 }
 0xa45   :  { %5863 = vmatpush3.bf16.msra.mxu1 %v6205_v44 }
 0xa46   :  { %5864 = vmatprep.subr.bf16.mxu1 %v6206_v30 }
 0xa48   :  { %v7733_v4 = vpop.f32.mrb[60].mxu1 }
 0xa49   :  { %v5768_v45 = vpop.f32.mrb[61].mxu1  ;;  %5865 = vmatpush3.bf16.msra.mxu1 %v6206_v30 }
 0xa4a   :  { %v3755_v49 = vpop.f32.mrb[62].mxu1 }
 0xa4b   :  { %v5769_v7 = vpop.f32.mrb[63].mxu1 }
 0xa4c   :  { %v6207_v7 = vld [vmem:[%s7887_s4 + $0x18] sm:$0xff]  }
 0xa4d   :  { %5866 = vmatprep.subr.bf16.mxu1 %v6207_v7 }
 0xa4e   :  { %5867 = vmatpush3.bf16.msra.mxu1 %v6207_v7 }
 0xa6f   :  { %v7735_v17 = vpop.f32.mrb[68].mxu0 }
 0xa70   :  { %v5786_v57 = vpop.f32.mrb[69].mxu0 }
 0xa71   :  { %v3893_v53 = vpop.f32.mrb[70].mxu0 }
 0xa72   :  { %v5787_v21 = vpop.f32.mrb[71].mxu0 }
 0xa7d   :  { %v7737_v39 = vpop.f32.mrb[64].mxu1 }
 0xa7e   :  { %v5780_v2 = vpop.f32.mrb[65].mxu1 }
 0xa7f   :  { %v3847_v36 = vpop.f32.mrb[66].mxu1 }
 0xa80   :  { %v5781_v24 = vpop.f32.mrb[67].mxu1 }
 0xa9d   :  { %v3982_v3 = vpop.f32.mrb[72].mxu0 }
 0xa9e   :  { %v3936_v42 = vpop.f32.mrb[68].mxu1  ;;  %v5798_v20 = vpop.f32.mrb[73].mxu0 }
 0xa9f   :  { %v5998_v0 = vpack.i.bf16 %v3982_v3, %v3936_v42  ;;  %v5792_v54 = vpop.f32.mrb[69].mxu1  ;;  %v3985_v33 = vpop.f32.mrb[74].mxu0 }
 0xaa0   :  { %v3939_v47 = vpop.f32.mrb[70].mxu1  ;;  %v5799_v14 = vpop.f32.mrb[75].mxu0 }
 0xaa1   :  { %5999 = vrot.lane.b32.xlu1 %v5998_v0, %s6360_s21  ;;  %v5793_v58 = vpop.f32.mrb[71].mxu1 }
 0xaa5   :  { %v4074_v10 = vpop.f32.mrb[76].mxu0 }
 0xaa6   :  { %v5810_v41 = vpop.f32.mrb[77].mxu0 }
 0xaa7   :  { %v4077_v18 = vpop.f32.mrb[78].mxu0 }
 0xaa8   :  { %v5811_v11 = vpop.f32.mrb[79].mxu0 }
 0xaad   :  { %v4166_v23 = vpop.f32.mrb[80].mxu0 }
 0xaae   :  { %v5822_v50 = vpop.f32.mrb[81].mxu0 }
 0xaaf   :  { %v4169_v9 = vpop.f32.mrb[82].mxu0 }
 0xab0   :  { %v5823_v13 = vpop.f32.mrb[83].mxu0 }
 0xad2   :  { %v4028_v1 = vpop.f32.mrb[72].mxu1 }
 0xad3   :  { %v6003_v6 = vpack.i.bf16 %v4074_v10, %v4028_v1  ;;  %v5804_v51 = vpop.f32.mrb[73].mxu1 }
 0xad4   :  { %v4031_v56 = vpop.f32.mrb[74].mxu1 }
 0xad5   :  { %6004 = vrot.lane.b32.xlu1 %v6003_v6, %s6360_s21  ;;  %v5805_v5 = vpop.f32.mrb[75].mxu1 }
 0xada   :  { %v4120_v12 = vpop.f32.mrb[76].mxu1 }
 0xadb   :  { %v6008_v43 = vpack.i.bf16 %v4166_v23, %v4120_v12  ;;  %v5816_v25 = vpop.f32.mrb[77].mxu1 }
 0xadc   :  { %v4123_v34 = vpop.f32.mrb[78].mxu1 }
 0xadd   :  { %6009 = vrot.lane.b32.xlu1 %v6008_v43, %s6361_s24  ;;  %v5817_v63 = vpop.f32.mrb[79].mxu1 }
 0xade   :  { %v4258_v29 = vpop.f32.mrb[84].mxu0 }
 0xadf   :  { %v5834_v8 = vpop.f32.mrb[85].mxu0 }
 0xae0   :  { %v4261_v62 = vpop.f32.mrb[86].mxu0 }
 0xae1   :  { %v5835_v22 = vpop.f32.mrb[87].mxu0 }
 0xae2   :  { %v4212_v37 = vpop.f32.mrb[80].mxu1 }
 0xae3   :  { %v6013_v15 = vpack.i.bf16 %v4258_v29, %v4212_v37  ;;  %v5828_v26 = vpop.f32.mrb[81].mxu1 }
 0xae4   :  { %v4215_v59 = vpop.f32.mrb[82].mxu1 }
 0xae5   :  { %6014 = vrot.lane.b32.xlu1 %v6013_v15, %s6361_s24  ;;  %v5829_v40 = vpop.f32.mrb[83].mxu1 }
 0xae7   :  { %v4350_v61 = vpop.f32.mrb[88].mxu0 }
 0xae8   :  { %v5846_v60 = vpop.f32.mrb[89].mxu0 }
 0xae9   :  { %v4353_v35 = vpop.f32.mrb[90].mxu0 }
 0xaea   :  { %v5847_v48 = vpop.f32.mrb[91].mxu0 }
 0xb08   :  { %v4442_v55 = vpop.f32.mrb[92].mxu0 }
 0xb09   :  { %v5858_v52 = vpop.f32.mrb[93].mxu0 }
 0xb0a   :  { %v4445_v46 = vpop.f32.mrb[94].mxu0 }
 0xb0b   :  { %v4304_v45 = vpop.f32.mrb[84].mxu1  ;;  %v5859_v49 = vpop.f32.mrb[95].mxu0 }
 0xb0c   :  { %v6018_v57 = vpack.i.bf16 %v4350_v61, %v4304_v45  ;;  %v5840_v53 = vpop.f32.mrb[85].mxu1 }
 0xb0d   :  { %v4307_v21 = vpop.f32.mrb[86].mxu1 }
 0xb0e   :  { %6019 = vrot.lane.b32.xlu0 %v6018_v57, %s6362_s9  ;;  %v5841_v2 = vpop.f32.mrb[87].mxu1 }
 0xb13   :  { %v4396_v36 = vpop.f32.mrb[88].mxu1  ;;  %v6000_v0 = vpop.permute.xlu1 %5999 }
 0xb14   :  { %v6023_v24 = vpack.i.bf16 %v4442_v55, %v4396_v36  ;;  %v5852_v3 = vpop.f32.mrb[89].mxu1  ;;  %v6002_v47 = vunpack.i.h.bf16 %v6000_v0  ;;  %v6001_v14 = vunpack.i.l.bf16 %v6000_v0 }
 0xb15   :  { %v4399_v42 = vpop.f32.mrb[90].mxu1 }
 0xb16   :  { %6024 = vrot.lane.b32.xlu1 %v6023_v24, %s6362_s9  ;;  %v5853_v20 = vpop.f32.mrb[91].mxu1  ;;  %v4497_v18 = vsel %vm2736_vm10, %v7730_v38, %v6002_v47  ;;  %v4496_v11 = vsel %vm2736_vm10, %v7733_v4, %v6001_v14 }
 0xb47   :  { %v6005_v54 = vpop.permute.xlu1 %6004 }
 0xb48   :  { %v6007_v5 = vunpack.i.h.bf16 %v6005_v54  ;;  %v6006_v12 = vunpack.i.l.bf16 %v6005_v54 }
 0xb4a   :  { %v4499_v4 = vsel %vm2736_vm10, %v7735_v17, %v6007_v5  ;;  %v4498_v25 = vsel %vm2736_vm10, %v7737_v39, %v6006_v12  ;;  %v5347_v17 = vld [vmem:[%s7889_s6] ss:$0 sm:$0xff] }
 0xb4f   :  { %v6010_v33 = vpop.permute.xlu1 %6009 }
 0xb50   :  { %v6012_v58 = vunpack.i.h.bf16 %v6010_v33  ;;  %v6011_v10 = vunpack.i.l.bf16 %v6010_v33 }
 0xb52   :  { %v4502_v9 = vsel %vm4500_vm13, %v4497_v18, %v6012_v58  ;;  %v4501_v13 = vsel %vm4500_vm13, %v4496_v11, %v6011_v10  ;;  %v6208_v10 = vld [vmem:[%s7887_s4 + $0x20] sm:$0xff]   ;;  %v6210_v18 = vld [vmem:[%s7887_s4 + $0x30] sm:$0xff]   ;;  %v6211_v11 = vld [vmem:[%s7887_s4 + $0x38] sm:$0xff]  }
 0xb53   :  { %5872 = vmatprep.subr.bf16.mxu0 %v6208_v10 }
 0xb54   :  { %5873 = vmatpush3.bf16.msra.mxu0 %v6208_v10 }
 0xb57   :  { %v6015_v1 = vpop.permute.xlu1 %6014 }
 0xb58   :  { %v6017_v31 = vunpack.i.h.bf16 %v6015_v1  ;;  %v6016_v43 = vunpack.i.l.bf16 %v6015_v1 }
 0xb5a   :  { %v4504_v29 = vsel %vm4500_vm13, %v4499_v4, %v6017_v31  ;;  %v4503_v8 = vsel %vm4500_vm13, %v4498_v25, %v6016_v43 }
 0xb80   :  { %v6020_v41 = vpop.permute.xlu0 %6019 }
 0xb81   :  { %v6022_v23 = vunpack.i.h.bf16 %v6020_v41  ;;  %v6021_v50 = vunpack.i.l.bf16 %v6020_v41  ;;  %v6209_v41 = vld [vmem:[%s7887_s4 + $0x28] sm:$0xff]  }
 0xb82   :  { %5874 = vmatprep.subr.bf16.mxu0 %v6209_v41 }
 0xb83   :  { %v4507_v6 = vsel %vm4505_vm14, %v4502_v9, %v6022_v23  ;;  %v4506_v51 = vsel %vm4505_vm14, %v4501_v13, %v6021_v50  ;;  %5875 = vmatpush3.bf16.msra.mxu0 %v6209_v41  ;;  %v6212_v23 = vld [vmem:[%s7887_s4 + $0x40] sm:$0xff]   ;;  %v6213_v50 = vld [vmem:[%s7887_s4 + $0x48] sm:$0xff]  }
 0xb84   :  { %v4510_v56 = vpack.c.bf16 %v4507_v6, %v4506_v51  ;;  %5876 = vmatprep.subr.bf16.mxu0 %v6210_v18  ;;  %5884 = vmatprep.subr.bf16.mxu1 %v6212_v23 }
 0xb86   :  { %5868 = vmatprep.mubr.msk.bf16.mxu1 %vm713_vm8, %v4510_v56 }
 0xb87   :  { %5877 = vmatpush3.bf16.msra.mxu0 %v6210_v18 }
 0xb88   :  { %v6025_v38 = vpop.permute.xlu1 %6024  ;;  %5878 = vmatprep.subr.bf16.mxu0 %v6211_v11 }
 0xb89   :  { %v6027_v34 = vunpack.i.h.bf16 %v6025_v38  ;;  %v6026_v63 = vunpack.i.l.bf16 %v6025_v38 }
 0xb8b   :  { %v4509_v62 = vsel %vm4505_vm14, %v4504_v29, %v6027_v34  ;;  %v4508_v22 = vsel %vm4505_vm14, %v4503_v8, %v6026_v63  ;;  %5879 = vmatpush3.bf16.msra.mxu0 %v6211_v11  ;;  %v5354_v34 = vld [vmem:[%s7889_s6 + $0x1] ss:$0 sm:$0xff] }
 0xb8c   :  { %v4511_v37 = vpack.c.bf16 %v4509_v62, %v4508_v22 }
 0xb8e   :  { %5869 = vmatmul.mubr.msk.bf16.vlgmr.msra.gmra.mrb[92].mxu1 %vm713_vm8, %v4511_v37  ;;  %v5355_v37 = vld [vmem:[%s7889_s6 + $0x2] ss:$0 sm:$0xff] }
 0xb8f   :  { %5885 = vmatpush3.bf16.msra.mxu1 %v6212_v23 }
 0xb90   :  { %5886 = vmatprep.subr.bf16.mxu1 %v6213_v50 }
 0xb93   :  { %5887 = vmatpush3.bf16.msra.mxu1 %v6213_v50 }
 0xc61   :  { %v5870_v15 = vpop.f32.mrb[92].mxu1 }
 0xc62   :  { %v4580_v26 = vpop.f32.mrb[93].mxu1  ;;  %v4589_v39 = vadd.f32 %v5870_v15, %v5347_v17 }
 0xc63   :  { %v4581_v59 = vadd.f32 %v5347_v17, %v4580_v26  ;;  %v5871_v40 = vpop.f32.mrb[94].mxu1 }
 0xc64   :  { %v4583_v61 = vpop.f32.mrb[95].mxu1  ;;  %v4597_v48 = vadd.f32 %v4589_v39, %v7297_v27  ;;  %v4592_v44 = vadd.f32 %v5871_v40, %v5347_v17 }
 0xc65   :  { %v4595_v60 = vadd.f32 %v4581_v59, %v7287_v19  ;;  %v4584_v35 = vadd.f32 %v5347_v17, %v4583_v61 }
 0xc66   :  { %v4598_v46 = vadd.f32 %v4592_v44, %v7295_v32  ;;  %v4607_v45 = vsel %vm713_vm8, %v4597_v48, 0.0 }
 0xc67   :  { %v4596_v30 = vadd.f32 %v4584_v35, %v7289_v16  ;;  %v4601_v55 = vsel %vm713_vm8, %v4595_v60, 0.0 }
 0xc68   :  { %4602 = vadd.xlane.f32.xlu0 %v4601_v55  ;;  %v4610_v49 = vsel %vm713_vm8, %v4598_v46, 0.0  ;;  %v6214_v55 = vld [vmem:[%s7887_s4 + $0x50] sm:$0xff]  }
 0xc69   :  { %v4604_v52 = vsel %vm713_vm8, %v4596_v30, 0.0  ;;  %5888 = vmatprep.subr.bf16.mxu1 %v6214_v55 }
 0xc6a   :  { %4605 = vadd.xlane.f32.xlu1 %v4604_v52  ;;  %5889 = vmatpush3.bf16.msra.mxu1 %v6214_v55  ;;  %v6215_v52 = vld [vmem:[%s7887_s4 + $0x58] sm:$0xff]  }
 0xc6b   :  { %5890 = vmatprep.subr.bf16.mxu1 %v6215_v52 }
 0xc6c   :  { %4608 = vadd.xlane.f32.xlu0 %v4607_v45 }
 0xc6e   :  { %5891 = vmatpush3.bf16.msra.mxu1 %v6215_v52 }
 0xc70   :  { %4611 = vadd.xlane.f32.xlu0 %v4610_v49 }
 0xcf5   :  { %v4603_v19 = vpop.xlane.xlu0 %4602 }
 0xcf6   :  { %v4613_v7 = vmul.f32 0.015625, %v4603_v19 }
 0xcf7   :  { %v4606_v27 = vpop.xlane.xlu1 %4605 }
 0xcf8   :  { %v4617_v57 = vsub.f32 %v4595_v60, %v4613_v7  ;;  %v4614_v53 = vmul.f32 0.015625, %v4606_v27 }
 0xcf9   :  { %v4609_v16 = vpop.xlane.xlu0 %4608 }
 0xcfa   :  { %v4618_v21 = vsub.f32 %v4596_v30, %v4614_v53  ;;  %v4615_v2 = vmul.f32 0.015625, %v4609_v16  ;;  %v4621_v36 = vmul.f32 %v4617_v57, %v4617_v57 }
 0xcfc   :  { %v4619_v24 = vsub.f32 %v4597_v48, %v4615_v2  ;;  %v4625_v3 = vsel %vm713_vm8, %v4621_v36, 0.0  ;;  %v4622_v42 = vmul.f32 %v4618_v21, %v4618_v21 }
 0xcfd   :  { %4626 = vadd.xlane.f32.xlu1 %v4625_v3  ;;  %v4612_v32 = vpop.xlane.xlu0 %4611 }
 0xcfe   :  { %v4616_v20 = vmul.f32 0.015625, %v4612_v32  ;;  %v4628_v0 = vsel %vm713_vm8, %v4622_v42, 0.0  ;;  %v4623_v54 = vmul.f32 %v4619_v24, %v4619_v24  ;;  %v5379_v32 = vld [vmem:[%s7889_s6 + $0x4] ss:$0 sm:$0xff] }
 0xcff   :  { %4629 = vadd.xlane.f32.xlu0 %v4628_v0 }
 0xd00   :  { %v4620_v33 = vsub.f32 %v4598_v46, %v4616_v20  ;;  %v4631_v47 = vsel %vm713_vm8, %v4623_v54, 0.0  ;;  %v5364_v46 = vld [vmem:[%s7889_s6 + $0x3] ss:$0 sm:$0xff] }
 0xd01   :  { %4632 = vadd.xlane.f32.xlu1 %v4631_v47 }
 0xd02   :  { %v4624_v14 = vmul.f32 %v4620_v33, %v4620_v33 }
 0xd04   :  { %v4634_v58 = vsel %vm713_vm8, %v4624_v14, 0.0 }
 0xd05   :  { %4635 = vadd.xlane.f32.xlu0 %v4634_v58 }
 0xd8a   :  { %v4627_v9 = vpop.xlane.xlu1 %4626 }
 0xd8b   :  { %v4637_v13 = vmul.f32 0.015625, %v4627_v9 }
 0xd8c   :  { %v4630_v1 = vpop.xlane.xlu0 %4629 }
 0xd8d   :  { %v4641_v6 = vadd.f32 1e-05, %v4637_v13  ;;  %v4638_v51 = vmul.f32 0.015625, %v4630_v1 }
 0xd8e   :  { %v4633_v56 = vpop.xlane.xlu1 %4632 }
 0xd8f   :  { %6296 = vrsqrt.f32 %v4641_v6  ;;  %v4642_v5 = vadd.f32 1e-05, %v4638_v51  ;;  %v4639_v12 = vmul.f32 0.015625, %v4633_v56 }
 0xd91   :  { %6298 = vrsqrt.f32 %v4642_v5  ;;  %v4643_v31 = vadd.f32 1e-05, %v4639_v12 }
 0xd92   :  { %v4636_v43 = vpop.xlane.xlu0 %4635 }
 0xd93   :  { %6300 = vrsqrt.f32 %v4643_v31  ;;  %v4640_v38 = vmul.f32 0.015625, %v4636_v43 }
 0xd95   :  { %v4644_v4 = vadd.f32 1e-05, %v4640_v38 }
 0xd97   :  { %6302 = vrsqrt.f32 %v4644_v4 }
 0xd99   :  { %v6297_v25 = vpop.eup %6296 }
 0xd9a   :  { %v4649_v63 = vmul.f32 %v6297_v25, %v4617_v57 }
 0xd9b   :  { %v6299_v29 = vpop.eup %6298 }
 0xd9c   :  { %v4650_v8 = vmul.f32 %v6299_v29, %v4618_v21  ;;  %v4657_v62 = vmul.f32 %v5354_v34, %v4649_v63 }
 0xd9d   :  { %v6301_v22 = vpop.eup %6300 }
 0xd9e   :  { %v4651_v17 = vmul.f32 %v6301_v22, %v4619_v24  ;;  %v4658_v15 = vmul.f32 %v5354_v34, %v4650_v8  ;;  %v4665_v26 = vadd.f32 %v5355_v37, %v4657_v62 }
 0xda0   :  { %v4666_v39 = vadd.f32 %v5355_v37, %v4658_v15  ;;  %v4659_v40 = vmul.f32 %v5354_v34, %v4651_v17 }
 0xda1   :  { %v6303_v59 = vpop.eup %6302 }
 0xda2   :  { %v4652_v61 = vmul.f32 %v6303_v59, %v4620_v33  ;;  %v4669_v60 = vpack.c.bf16 %v4666_v39, %v4665_v26  ;;  %v4667_v48 = vadd.f32 %v5355_v37, %v4659_v40 }
 0xda4   :  { %v4660_v35 = vmul.f32 %v5354_v34, %v4652_v61  ;;  %5880 = vmatprep.mubr.msk.bf16.mxu0 %vm713_vm8, %v4669_v60 }
 0xda6   :  { %v4668_v44 = vadd.f32 %v5355_v37, %v4660_v35 }
 0xda8   :  { %v4670_v30 = vpack.c.bf16 %v4668_v44, %v4667_v48 }
 0xdaa   :  { %5881 = vmatmul.mubr.msk.bf16.vlgmr.msra.gmra.mrb[96].mxu0 %vm713_vm8, %v4670_v30 }
 0xe7d   :  { %v5882_v45 = vpop.f32.mrb[96].mxu0 }
 0xe7e   :  { %v4758_v49 = vadd.f32 %v5882_v45, %v5364_v46  ;;  %v4749_v19 = vpop.f32.mrb[97].mxu0 }
 0xe7f   :  { %v4750_v7 = vadd.f32 %v5364_v46, %v4749_v19  ;;  %v5883_v27 = vpop.f32.mrb[98].mxu0 }
 0xe80   :  { %v4761_v57 = vadd.f32 %v5883_v27, %v5364_v46  ;;  %v4752_v53 = vpop.f32.mrb[99].mxu0  ;;  %v4766_v21 = vmax.f32 %v4758_v49, 0.0  ;;  %v5386_v49 = vld [vmem:[%s7889_s6 + $0x5] ss:$0 sm:$0xff]  ;;  %v5387_v27 = vld [vmem:[%s7889_s6 + $0x6] ss:$0 sm:$0xff] }
 0xe81   :  { %v4753_v16 = vadd.f32 %v5364_v46, %v4752_v53  ;;  %v4764_v36 = vmax.f32 %v4750_v7, 0.0  ;;  %s6364_s6 = smov [#allocation3]  }
 0xe82   :  { %v4767_v2 = vmax.f32 %v4761_v57, 0.0 }
 0xe83   :  { %v4765_v24 = vmax.f32 %v4753_v16, 0.0 }
 0xe84   :  { %v4769_v3 = vpack.c.bf16 %v4767_v2, %v4766_v21 }
 0xe85   :  { %v4768_v42 = vpack.c.bf16 %v4765_v24, %v4764_v36 }
 0xe87   :  { %5892 = vmatprep.mubr.msk.bf16.mxu1 %vm713_vm8, %v4768_v42 }
 0xe88   :  { %5893 = vmatmul.mubr.msk.bf16.vlgmr.msra.gmra.mrb[96].mxu1 %vm713_vm8, %v4769_v3 }
 0xf5b   :  { %v5894_v20 = vpop.f32.mrb[96].mxu1 }
 0xf5c   :  { %v4848_v0 = vpop.f32.mrb[97].mxu1  ;;  %v4857_v54 = vadd.f32 %v5894_v20, %v5379_v32 }
 0xf5d   :  { %v4849_v33 = vadd.f32 %v5379_v32, %v4848_v0  ;;  %v5895_v47 = vpop.f32.mrb[98].mxu1 }
 0xf5e   :  { %v4851_v14 = vpop.f32.mrb[99].mxu1  ;;  %v4860_v10 = vadd.f32 %v5895_v47, %v5379_v32  ;;  %v4865_v18 = vadd.f32 %v4857_v54, %v4667_v48 }
 0xf5f   :  { %v4863_v58 = vadd.f32 %v4849_v33, %v4665_v26  ;;  %v4852_v41 = vadd.f32 %v5379_v32, %v4851_v14 }
 0xf60   :  { %v4866_v50 = vadd.f32 %v4860_v10, %v4668_v44  ;;  %v4875_v13 = vsel %vm713_vm8, %v4865_v18, 0.0 }
 0xf61   :  { %v4864_v11 = vadd.f32 %v4852_v41, %v4666_v39  ;;  %v4869_v23 = vsel %vm713_vm8, %v4863_v58, 0.0 }
 0xf62   :  { %4870 = vadd.xlane.f32.xlu1 %v4869_v23  ;;  %v4878_v1 = vsel %vm713_vm8, %v4866_v50, 0.0 }
 0xf63   :  { %v4872_v9 = vsel %vm713_vm8, %v4864_v11, 0.0 }
 0xf64   :  { %4873 = vadd.xlane.f32.xlu0 %v4872_v9 }
 0xf66   :  { %4876 = vadd.xlane.f32.xlu1 %v4875_v13 }
 0xf68   :  { %4879 = vadd.xlane.f32.xlu0 %v4878_v1 }
 0xfef   :  { %v4871_v6 = vpop.xlane.xlu1 %4870 }
 0xff0   :  { %v4881_v51 = vmul.f32 0.015625, %v4871_v6 }
 0xff1   :  { %v4874_v56 = vpop.xlane.xlu0 %4873 }
 0xff2   :  { %v4885_v5 = vsub.f32 %v4863_v58, %v4881_v51  ;;  %v4882_v12 = vmul.f32 0.015625, %v4874_v56 }
 0xff3   :  { %v4877_v31 = vpop.xlane.xlu1 %4876 }
 0xff4   :  { %v4886_v43 = vsub.f32 %v4864_v11, %v4882_v12  ;;  %v4883_v38 = vmul.f32 0.015625, %v4877_v31  ;;  %v4889_v4 = vmul.f32 %v4885_v5, %v4885_v5 }
 0xff5   :  { %v4880_v25 = vpop.xlane.xlu0 %4879 }
 0xff6   :  { %v4887_v34 = vsub.f32 %v4865_v18, %v4883_v38  ;;  %v4884_v63 = vmul.f32 0.015625, %v4880_v25  ;;  %v4893_v29 = vsel %vm713_vm8, %v4889_v4, 0.0  ;;  %v4890_v8 = vmul.f32 %v4886_v43, %v4886_v43 }
 0xff7   :  { %4894 = vadd.xlane.f32.xlu1 %v4893_v29 }
 0xff8   :  { %v4888_v62 = vsub.f32 %v4866_v50, %v4884_v63  ;;  %v4896_v22 = vsel %vm713_vm8, %v4890_v8, 0.0  ;;  %v4891_v37 = vmul.f32 %v4887_v34, %v4887_v34 }
 0xff9   :  { %4897 = vadd.xlane.f32.xlu0 %v4896_v22 }
 0xffa   :  { %v4899_v17 = vsel %vm713_vm8, %v4891_v37, 0.0  ;;  %v4892_v15 = vmul.f32 %v4888_v62, %v4888_v62 }
 0xffb   :  { %4900 = vadd.xlane.f32.xlu1 %v4899_v17 }
 0xffc   :  { %v4902_v26 = vsel %vm713_vm8, %v4892_v15, 0.0 }
 0xffd   :  { %4903 = vadd.xlane.f32.xlu0 %v4902_v26 }
0x1084   :  { %v4895_v39 = vpop.xlane.xlu1 %4894 }
0x1085   :  { %v4905_v59 = vmul.f32 0.015625, %v4895_v39 }
0x1086   :  { %v4898_v40 = vpop.xlane.xlu0 %4897 }
0x1087   :  { %v4909_v61 = vadd.f32 1e-05, %v4905_v59  ;;  %v4906_v60 = vmul.f32 0.015625, %v4898_v40 }
0x1088   :  { %v4901_v35 = vpop.xlane.xlu1 %4900 }
0x1089   :  { %6304 = vrsqrt.f32 %v4909_v61  ;;  %v4910_v48 = vadd.f32 1e-05, %v4906_v60  ;;  %v4907_v44 = vmul.f32 0.015625, %v4901_v35 }
0x108a   :  { %v4904_v30 = vpop.xlane.xlu0 %4903 }
0x108b   :  { %6306 = vrsqrt.f32 %v4910_v48  ;;  %v4911_v55 = vadd.f32 1e-05, %v4907_v44  ;;  %v4908_v52 = vmul.f32 0.015625, %v4904_v30 }
0x108d   :  { %6308 = vrsqrt.f32 %v4911_v55  ;;  %v4912_v46 = vadd.f32 1e-05, %v4908_v52 }
0x108f   :  { %6310 = vrsqrt.f32 %v4912_v46 }
0x1093   :  { %v6305_v45 = vpop.eup %6304 }
0x1094   :  { %v4917_v19 = vmul.f32 %v6305_v45, %v4885_v5  ;;  %v6363_v45 = vmov 1983009808  }
0x1095   :  { %v6307_v7 = vpop.eup %6306 }
0x1096   :  { %v4925_v57 = vmul.f32 %v5386_v49, %v4917_v19  ;;  %v4918_v53 = vmul.f32 %v6307_v7, %v4886_v43 }
0x1097   :  { %v6309_v16 = vpop.eup %6308 }
0x1098   :  { %v4933_v21 = vadd.f32 %v5387_v27, %v4925_v57  ;;  %v4919_v2 = vmul.f32 %v6309_v16, %v4887_v34  ;;  %v4926_v24 = vmul.f32 %v5386_v49, %v4918_v53 }
0x1099   :  { %v6311_v36 = vpop.eup %6310 }
0x109a   :  { %v4927_v3 = vmul.f32 %v5386_v49, %v4919_v2  ;;  %v4920_v42 = vmul.f32 %v6311_v36, %v4888_v62  ;;  %v4943_v0 = vrot.slane %v4933_v21, 1  ;;  %v4934_v54 = vadd.f32 %v5387_v27, %v4926_v24 }
0x109b   :  { %v4952_v33 = vrot.slane %v4933_v21, 3  ;;  %v4962_v41 = vrot.slane %v4933_v21, 5  ;;  %v4972_v9 = vrot.slane %v4933_v21, 7  ;;  %v4948_v13 = vrot.slane %v4933_v21, 2 }
0x109c   :  { %v4935_v32 = vadd.f32 %v5387_v27, %v4927_v3  ;;  %v4928_v20 = vmul.f32 %v5386_v49, %v4920_v42  ;;  %v4958_v1 = vrot.slane %v4933_v21, 4  ;;  %v4983_v6 = vrot.slane %v4934_v54, 1 }
0x109d   :  { %v4968_v5 = vrot.slane %v4933_v21, 6  ;;  %v4998_v63 = vrot.slane %v4934_v54, 4  ;;  %v4988_v62 = vrot.slane %v4934_v54, 2  ;;  %v5002_v37 = vrot.slane %v4934_v54, 5 }
0x109e   :  { %v4936_v47 = vadd.f32 %v5387_v27, %v4928_v20  ;;  %v4944_v14 = vsel %vm4940_vm15, %v4935_v32, %v4943_v0  ;;  %v4953_v58 = vrot.slane %v4935_v32, 2  ;;  %v4963_v10 = vrot.slane %v4935_v32, 4 }
0x109f   :  { %4945 = vrot.lane.b32.xlu1 %v4944_v14, %s6354_s23  ;;  %v4939_v18 = vrot.slane %v4935_v32, 7  ;;  %v4949_v11 = vrot.slane %v4935_v32, 1  ;;  %v4959_v23 = vrot.slane %v4935_v32, 3  ;;  %v4973_v51 = vrot.slane %v4935_v32, 6 }
0x10a0   :  { %v4954_v50 = vsel %vm4940_vm15, %v4953_v58, %v4952_v33  ;;  %v4964_v12 = vsel %vm4940_vm15, %v4963_v10, %v4962_v41  ;;  %v4980_v38 = vrot.slane %v4936_v47, 7  ;;  %v4984_v4 = vsel %vm4940_vm15, %v4936_v47, %v4983_v6 }
0x10a1   :  { %4955 = vrot.lane.b32.xlu0 %v4954_v50, %s6354_s23  ;;  %v4941_v56 = vsel %vm4940_vm15, %v4939_v18, %v4933_v21  ;;  %v4950_v31 = vsel %vm4940_vm15, %v4949_v11, %v4948_v13  ;;  %v4960_v43 = vsel %vm4940_vm15, %v4959_v23, %v4958_v1  ;;  %v5003_v25 = vrot.slane %v4936_v47, 4 }
0x10a2   :  { %v4969_v34 = vrot.slane %v4935_v32, 5  ;;  %v4981_v29 = vsel %vm4940_vm15, %v4980_v38, %v4934_v54  ;;  %v4999_v8 = vrot.slane %v4936_v47, 3  ;;  %v4989_v22 = vrot.slane %v4936_v47, 1 }
0x10a3   :  { %4965 = vrot.lane.b32.xlu1 %v4964_v12, %s6354_s23  ;;  %v5008_v15 = vrot.slane %v4934_v54, 6  ;;  %v5009_v26 = vrot.slane %v4936_v47, 5  ;;  %v4974_v39 = vsel %vm4940_vm15, %v4973_v51, %v4972_v9  ;;  %v4993_v59 = vrot.slane %v4936_v47, 2 }
0x10a4   :  { %v4970_v17 = vsel %vm4940_vm15, %v4969_v34, %v4968_v5  ;;  %v5000_v40 = vsel %vm4940_vm15, %v4999_v8, %v4998_v63  ;;  %v4990_v61 = vsel %vm4940_vm15, %v4989_v22, %v4988_v62  ;;  %v5004_v35 = vsel %vm4940_vm15, %v5003_v25, %v5002_v37 }
0x10a5   :  { %4985 = vrot.lane.b32.xlu0 %v4984_v4, %s6354_s23  ;;  %v5010_v60 = vsel %vm4940_vm15, %v5009_v26, %v5008_v15  ;;  %v4992_v48 = vrot.slane %v4934_v54, 3  ;;  %v5013_v30 = vrot.slane %v4936_v47, 6  ;;  %v5012_v55 = vrot.slane %v4934_v54, 7 }
0x10a6   :  { %v5037_v49 = vunpack.c.l.s4 %v6363_v45 }
0x10a7   :  { %4975 = vrot.lane.b32.xlu1 %v4974_v39, %s6354_s23  ;;  %v4994_v44 = vsel %vm4940_vm15, %v4993_v59, %v4992_v48  ;;  %v5014_v52 = vsel %vm4940_vm15, %v5013_v30, %v5012_v55 }
0x10a8   :  { %v5038_v57 = vunpack.c.0.s8 %v5037_v49 }
0x10a9   :  { %5005 = vrot.lane.b32.xlu0 %v5004_v35, %s6354_s23 }
0x10aa   :  { %v5041_v21 = vsub.s32 %v5038_v57, %v7302_v28 }
0x10ab   :  { %4995 = vrot.lane.b32.xlu1 %v4994_v44, %s6354_s23 }
0x10af   :  { %5015 = vrot.lane.b32.xlu1 %v5014_v52, %s6354_s23  ;;  %s5078_s23 = sshll.u32 %s6364_s6, 4  ;;  %s5079_s23 = int_to_ptr.vmem [resolvable:$true] %s5078_s23 }
0x10b0   :  { %s6329_s12 = scalar_lea.vmem %s5079_s23, 256  ;;  %p6334_p1 = scmp.lt.s32.totalorder %s5079_s23, %s5079_s23 }
0x10b1   :  { %p6330_p0 = scmp.ne.s32.totalorder %s5079_s23, %s6329_s12  ;;  %p6335_p2 = scmp.lt.s32.totalorder %s6329_s12, %s6329_s12 }
0x10b3   :  { %p6336_p3 = por %p6335_p2, %p6334_p1 }
0x10b5   :  { %p6337_p4 = pnand %p6336_p3, %p6330_p0 }
0x1111   :  { %v4946_v46 = vpop.permute.xlu1 %4945 }
0x1112   :  { %v5018_v7 = vsel %vm713_vm8, %v4941_v56, %v4946_v46 }
0x1113   :  { %v4956_v19 = vpop.permute.xlu0 %4955 }
0x1114   :  { %v5019_v27 = vsel %vm713_vm8, %v4950_v31, %v4956_v19 }
0x1115   :  { %v5034_v53 = vcombine.low %v5018_v7, %v5019_v27  ;;  %v4966_v16 = vpop.permute.xlu1 %4965 }
0x1116   :  { %v5020_v24 = vsel %vm713_vm8, %v4960_v43, %v4966_v16 }
0x1117   :  { %v4986_v2 = vpop.permute.xlu0 %4985  ;;  %v5042_v32 = vrot.slane %v5034_v53, %v5041_v21 }
0x1118   :  { %v5022_v54 = vsel %vm713_vm8, %v4981_v29, %v4986_v2 }
0x1119   :  { %v4976_v36 = vpop.permute.xlu1 %4975 }
0x111a   :  { %v5021_v3 = vsel %vm713_vm8, %v4970_v17, %v4976_v36 }
0x111b   :  { %v5035_v42 = vcombine.low %v5020_v24, %v5021_v3  ;;  %v5006_v47 = vpop.permute.xlu0 %5005 }
0x111c   :  { %v5024_v28 = vsel %vm713_vm8, %v5000_v40, %v5006_v47 }
0x111d   :  { %v5049_v20 = vrot.slane %v5035_v42, %v5041_v21  ;;  %v4996_v0 = vpop.permute.xlu1 %4995 }
0x111e   :  { %v5023_v33 = vsel %vm713_vm8, %v4990_v61, %v4996_v0 }
0x111f   :  { %v5051_v14 = vcombine.low %v5022_v54, %v5023_v33  ;;  %v5050_v58 = vcombine.low %v5042_v32, %v5049_v20 }
0x1121   :  { %v5016_v10 = vpop.permute.xlu1 %5015  ;;  %5070 = vst [vmem:[#allocation3] sm:$0xff] %v5050_v58  ;;  %v5059_v11 = vrot.slane %v5051_v14, %v5041_v21 }
0x1122   :  { %v5025_v41 = vsel %vm713_vm8, %v5010_v60, %v5016_v10 }
0x1123   :  { %v5052_v18 = vcombine.low %v5024_v28, %v5025_v41 }
0x1125   :  { %v5066_v23 = vrot.slane %v5052_v18, %v5041_v21 }
0x1127   :  { %v5067_v50 = vcombine.low %v5059_v11, %v5066_v23 }
0x1129   :  { %5071 = vst [vmem:[#allocation3 + $0x8] sm:$0xff] %v5067_v50 }
0x112a   :  { %6340 = shalt.err (!%p6337_p4)
}
0x112b   :  { %s6341_s2 = scalar_lea.hbm %s7891_s8, 256 }
0x112c   :  { %p6342_p5 = scmp.ne.s32.totalorder %s7891_s8, %s6341_s2  ;;  %p6345_p6 = scmp.lt.u32.totalorder %s6341_s2, %s7891_s8 }
0x112e   :  { %p6347_p7 = pnand %p6345_p6, %p6342_p5 }
0x1130   :  { %6350 = shalt.err (!%p6347_p7)
}
0x1131   :  { %5081 = dma.vmem_to_hbm [thread:$0]  %s5079_s23, 256, %s7891_s8, [#allocation4]  }
0x1132   :  { %6351 = dma.done.wait [#allocation4], 256  }
0x1133   :  { %6352 = vsyncadd [#allocation4], 4294967040 }
0x1134   :  { %5085 = vsyncpa [#allocation4], 1 }

// kernel: loconet_forward.4
= control target key start
LH: loop header
LB: loop body
LE: loop exit
PB: predicated region body
PF: predicated region fallthrough
CT: control target
= control target key end

     0   :  { %vm34_vm0 = vcmask 519168   ;;  %vm36_vm1 = vcmask 518144   ;;  %v7825_v0 = vmov 0   ;;  %vm113_vm2 = vcmask 519169   ;;  %s6316_s19 = smov 64   ;;  %s6319_s20 = smov 96   ;;  %s7816_s0 = inlined_call_operand.vmem [shape: f32[2,2,8,64], index: 0, kind: input, shape index: {}]   ;;  %s7817_s1 = inlined_call_operand.vmem [shape: bf16[1344,64], index: 1, kind: input, shape index: {}]   ;;  %s7818_s5 = inlined_call_operand.vmem [shape: f32[7,64], index: 5, kind: input, shape index: {}]   ;;  %s7819_s2 = inlined_call_operand.vmem [shape: bf16[2,64,64], index: 2, kind: input, shape index: {}]   ;;  %s7820_s3 = inlined_call_operand.vmem [shape: bf16[64,192], index: 3, kind: input, shape index: {}]   ;;  %s7821_s7 = inlined_call_operand.vmem [shape: f32[1,192], index: 7, kind: input, shape index: {}]   ;;  %s7822_s4 = inlined_call_operand.vmem [shape: bf16[3,64,64], index: 4, kind: input, shape index: {}]   ;;  %s7823_s6 = inlined_call_operand.vmem [shape: f32[7,64], index: 6, kind: input, shape index: {}]   ;;  %s7824_s8 = inlined_call_operand.vmem [shape: f32[2,1024], index: 8, kind: output, shape index: {}]  }
   0x1   :  { %35 = vst.msk [vmem:[#allocation2] sm:$0xf] %vm34_vm0, %v7825_v0  ;;  %38 = vst.msk [vmem:[#allocation2 + $0x8] sm:$0xf] %vm34_vm0, %v7825_v0  ;;  %v30_v1 = vld [vmem:[%s7816_s0] sm:$0xff]  ;;  %v31_v3 = vld [vmem:[%s7816_s0 + $0x8] sm:$0xff] }
   0x2   :  { %37 = vst.msk [vmem:[#allocation2 + $0x4] sm:$0x7] %vm36_vm1, %v7825_v0  ;;  %39 = vst.msk [vmem:[#allocation2 + $0xc] sm:$0x7] %vm36_vm1, %v7825_v0  ;;  %v5377_v2 = vpack.c.bf16 %v30_v1, %v30_v1  ;;  %vm114_vm3 = vsmask.f32 7942  ;;  %v5378_v5 = vpack.c.bf16 %v31_v3, %v31_v3 }
   0x3   :  { %40 = vst.msk [vmem:[#allocation2 + $0x10] sm:$0xf] %vm34_vm0, %v7825_v0  ;;  %42 = vst.msk [vmem:[#allocation2 + $0x18] sm:$0xf] %vm34_vm0, %v7825_v0  ;;  %v32_v4 = vld [vmem:[%s7816_s0 + $0x10] sm:$0xff]  ;;  %vm119_vm4 = vcmask 517120  }
   0x4   :  { %41 = vst.msk [vmem:[#allocation2 + $0x14] sm:$0x7] %vm36_vm1, %v7825_v0  ;;  %43 = vst.msk [vmem:[#allocation2 + $0x1c] sm:$0x7] %vm36_vm1, %v7825_v0  ;;  %vm120_vm5 = vsmask.f32 1280  ;;  %v5379_v6 = vpack.c.bf16 %v32_v4, %v32_v4 }
   0x5   :  { %44 = vst.msk [vmem:[#allocation2 + $0x20] sm:$0xf] %vm34_vm0, %v7825_v0  ;;  %46 = vst.msk [vmem:[#allocation2 + $0x28] sm:$0xf] %vm34_vm0, %v7825_v0  ;;  %v33_v7 = vld [vmem:[%s7816_s0 + $0x18] sm:$0xff]  ;;  %v69_v8 = vshrl.u32 %v5377_v2, 16 }
   0x6   :  { %45 = vst.msk [vmem:[#allocation2 + $0x24] sm:$0x7] %vm36_vm1, %v7825_v0  ;;  %47 = vst.msk [vmem:[#allocation2 + $0x2c] sm:$0x7] %vm36_vm1, %v7825_v0  ;;  %v72_v9 = vshll.u32 %v5377_v2, 16  ;;  %v6068_v10 = vld [vmem:[%s7817_s1 + $0x40] sm:$0xff]   ;;  %v6427_v19 = vpack.c.bf16 %v33_v7, %v33_v7 }
   0x7   :  { %48 = vst.msk [vmem:[#allocation2 + $0x30] sm:$0xf] %vm34_vm0, %v7825_v0  ;;  %50 = vst.msk [vmem:[#allocation2 + $0x38] sm:$0xf] %vm34_vm0, %v7825_v0  ;;  %v6069_v11 = vld [vmem:[%s7817_s1] sm:$0xff]   ;;  %v78_v12 = vshrl.u32 %v5378_v5, 16  ;;  %5381 = vmatprep.subr.bf16.mxu0 %v6068_v10 }
   0x8   :  { %49 = vst.msk [vmem:[#allocation2 + $0x34] sm:$0x7] %vm36_vm1, %v7825_v0  ;;  %51 = vst.msk [vmem:[#allocation2 + $0x3c] sm:$0x7] %vm36_vm1, %v7825_v0  ;;  %v81_v13 = vshll.u32 %v5378_v5, 16  ;;  %v87_v14 = vshrl.u32 %v5379_v6, 16  ;;  %5382 = vmatpush3.bf16.msra.mxu0 %v6069_v11 }
   0x9   :  { %v90_v15 = vshll.u32 %v5379_v6, 16  ;;  %v71_v16 = vrot.slane %v69_v8, 6  ;;  %v74_v17 = vrot.slane %v72_v9, 7  ;;  %vm6423_vm6 = vmand %vm113_vm2, %vm114_vm3  ;;  %v80_v21 = vrot.slane %v78_v12, 6  ;;  %v6435_v25 = vld [vmem:[#allocation2] sm:$0xe] }
   0xa   :  { %vm6431_vm7 = vmand %vm119_vm4, %vm120_vm5  ;;  %v83_v22 = vrot.slane %v81_v13, 7  ;;  %v89_v23 = vrot.slane %v87_v14, 6  ;;  %v6437_v26 = vld [vmem:[#allocation2 + $0x4] sm:$0x3]  ;;  %v143_v27 = vld [vmem:[#allocation2] sm:$0xf] }
   0xb   :  { %v92_v24 = vrot.slane %v90_v15, 7  ;;  %v75_v28 = vor.u32 %v74_v17, %v71_v16  ;;  %v5087_v29 = vcombine.low %v6435_v25, %v6437_v26  ;;  %v6441_v30 = vld [vmem:[#allocation2 + $0x4] sm:$0x1]  ;;  %v116_v31 = vld [vmem:[#allocation2 + $0x8] sm:$0xe]  ;;  %v96_v43 = vshrl.u32 %v6427_v19, 16 }
   0xc   :  { %v122_v32 = vld [vmem:[#allocation2 + $0xc] sm:$0x3]  ;;  %v84_v33 = vor.u32 %v83_v22, %v80_v21  ;;  %v5079_v34 = vcombine.low %v143_v27, %v6441_v30  ;;  %v6446_v37 = vld [vmem:[#allocation2 + $0x20] sm:$0xe]  ;;  %v125_v42 = vld [vmem:[#allocation2 + $0x10] sm:$0xe] }
   0xd   :  { %v76_v35 = vrot.slane %v75_v28, 4  ;;  %v117_v36 = vsel %vm6423_vm6, %v75_v28, %v116_v31  ;;  %v6448_v38 = vld [vmem:[#allocation2 + $0x24] sm:$0x3]  ;;  %v93_v39 = vor.u32 %v92_v24, %v89_v23  ;;  %v313_v40 = vshrl.u32 %v5087_v29, 16  ;;  %v128_v52 = vld [vmem:[#allocation2 + $0x14] sm:$0x3] }
   0xe   :  { %v316_v41 = vshll.u32 %v5087_v29, 16  ;;  %118 = vst [vmem:[#allocation2 + $0x8] sm:$0xe] %v117_v36  ;;  %v249_v45 = vshrl.u32 %v5079_v34, 16  ;;  %v251_v46 = vshll.u32 %v5079_v34, 16  ;;  %v126_v48 = vsel %vm6423_vm6, %v84_v33, %v125_v42  ;;  %v6070_v57 = vld [vmem:[%s7817_s1 + $0x48] sm:$0xff]  }
   0xf   :  { %v123_v47 = vsel %vm6431_vm7, %v76_v35, %v122_v32  ;;  %v315_v49 = vrot.slane %v313_v40, 1  ;;  %v5089_v51 = vcombine.low %v6446_v37, %v6448_v38  ;;  %127 = vst [vmem:[#allocation2 + $0x10] sm:$0xe] %v126_v48  ;;  %v85_v54 = vrot.slane %v84_v33, 4  ;;  %v131_v59 = vld [vmem:[#allocation2 + $0x28] sm:$0xe]  ;;  %5383 = vmatprep.subr.bf16.mxu0 %v6070_v57 }
  0x10   :  { %v318_v50 = vrot.slane %v316_v41, 2  ;;  %124 = vst [vmem:[#allocation2 + $0xc] sm:$0x3] %v123_v47  ;;  %v253_v53 = vrot.slane %v251_v46, 1  ;;  %v94_v55 = vrot.slane %v93_v39, 4  ;;  %v99_v56 = vshll.u32 %v6427_v19, 16 }
  0x11   :  { %v134_v60 = vld [vmem:[#allocation2 + $0x2c] sm:$0x3]  ;;  %v129_v62 = vsel %vm6431_vm7, %v85_v54, %v128_v52  ;;  %v98_v63 = vrot.slane %v96_v43, 6  ;;  %v329_v1 = vshrl.u32 %v5089_v51, 16  ;;  %v332_v2 = vshll.u32 %v5089_v51, 16  ;;  %s6321_s21 = smov 80  }
  0x12   :  { %v319_v58 = vor.u32 %v318_v50, %v315_v49  ;;  %v254_v61 = vor.u32 %v253_v53, %v249_v45  ;;  %v145_v3 = vld [vmem:[#allocation2 + $0x20] sm:$0xf]  ;;  %v6466_v4 = vld [vmem:[#allocation2 + $0x24] sm:$0x1]  ;;  %130 = vst [vmem:[#allocation2 + $0x14] sm:$0x3] %v129_v62  ;;  %v132_v5 = vsel %vm6423_vm6, %v93_v39, %v131_v59  ;;  %v135_v8 = vsel %vm6431_vm7, %v94_v55, %v134_v60 }
  0x13   :  { %133 = vst [vmem:[#allocation2 + $0x28] sm:$0xe] %v132_v5  ;;  %v101_v9 = vrot.slane %v99_v56, 7  ;;  %136 = vst [vmem:[#allocation2 + $0x2c] sm:$0x3] %v135_v8  ;;  %v5081_v14 = vcombine.low %v145_v3, %v6466_v4  ;;  %v331_v19 = vrot.slane %v329_v1, 1 }
  0x14   :  { %344 = vrot.lane.b32.xlu0 %v319_v58, %s6316_s19  ;;  %276 = vrot.lane.b32.xlu1 %v254_v61, %s6316_s19  ;;  %v137_v10 = vld [vmem:[#allocation2 + $0x30] sm:$0xe]  ;;  %v334_v21 = vrot.slane %v332_v2, 2  ;;  %v6489_v23 = vld [vmem:[#allocation2] sm:$0xc]  ;;  %v6071_v45 = vld [vmem:[%s7817_s1 + $0x8] sm:$0xff]  }
  0x15   :  { %v6471_v6 = vld [vmem:[#allocation2 + $0x8] sm:$0xe]  ;;  %v6482_v15 = vor.u32 %v101_v9, %v98_v63  ;;  %v163_v24 = vld [vmem:[#allocation2 + $0x4] sm:$0x7]  ;;  %v265_v40 = vshll.u32 %v5081_v14, 16  ;;  %v6072_v50 = vld [vmem:[%s7817_s1 + $0x50] sm:$0xff]   ;;  %5384 = vmatpush3.bf16.msra.mxu0 %v6071_v45 }
  0x16   :  { %v144_v7 = vld [vmem:[#allocation2 + $0x8] sm:$0xf]  ;;  %v172_v36 = vld [vmem:[#allocation2 + $0x10] sm:$0xf]  ;;  %v5095_v58 = vcombine.low %v6489_v23, %v163_v24  ;;  %5385 = vmatprep.subr.bf16.mxu0 %v6072_v50  ;;  %v335_v60 = vor.u32 %v334_v21, %v331_v19  ;;  %v263_v61 = vshrl.u32 %v5081_v14, 16  ;;  %v6074_v3 = vld [vmem:[%s7817_s1 + $0x58] sm:$0xff]  }
  0x17   :  { %v6477_v12 = vld [vmem:[#allocation2 + $0xc] sm:$0x3]  ;;  %v6487_v22 = vld [vmem:[#allocation2 + $0x8] sm:$0xf]  ;;  %v138_v29 = vsel %vm6423_vm6, %v6482_v15, %v137_v10  ;;  %v180_v42 = vld [vmem:[#allocation2 + $0x10] sm:$0xe]  ;;  %v5104_v63 = vcombine.low %v172_v36, %v172_v36 }
  0x18   :  { %v6479_v13 = vld [vmem:[#allocation2 + $0xc] sm:$0x1]  ;;  %v5088_v16 = vcombine.low %v6471_v6, %v6477_v12  ;;  %v6500_v39 = vld [vmem:[#allocation2 + $0x8] sm:$0xe]  ;;  %139 = vst [vmem:[#allocation2 + $0x30] sm:$0xe] %v138_v29  ;;  %v5103_v45 = vcombine.low %v6487_v22, %v6487_v22 }
  0x19   :  { %v5080_v17 = vcombine.low %v144_v7, %v6479_v13  ;;  %v6491_v27 = vld [vmem:[#allocation2 + $0xc] sm:$0x3]  ;;  %v184_v41 = vld [vmem:[#allocation2 + $0x14] sm:$0x3]  ;;  %v6516_v51 = vld [vmem:[#allocation2 + $0x10] sm:$0xc] }
  0x1a   :  { %v6493_v28 = vld [vmem:[#allocation2 + $0xc] sm:$0x1]  ;;  %v321_v32 = vshrl.u32 %v5088_v16, 16  ;;  %v324_v33 = vshll.u32 %v5088_v16, 16  ;;  %v6508_v18 = vcombine.low %v6500_v39, %v6491_v27  ;;  %v176_v49 = vld [vmem:[#allocation2 + $0x14] sm:$0x1]  ;;  %v6520_v53 = vcombine.low %v180_v42, %v184_v41 }
  0x1b   :  { %v256_v34 = vshrl.u32 %v5080_v17, 16  ;;  %v258_v35 = vshll.u32 %v5080_v17, 16  ;;  %v6504_v43 = vcombine.low %v6487_v22, %v6493_v28  ;;  %v6518_v52 = vcombine.low %v172_v36, %v176_v49  ;;  %v6522_v54 = vld [vmem:[#allocation2 + $0x28] sm:$0xe]  ;;  %v6524_v55 = vld [vmem:[#allocation2 + $0x2c] sm:$0x3] }
  0x1c   :  { %v323_v46 = vrot.slane %v321_v32, 1  ;;  %v326_v47 = vrot.slane %v324_v33, 2  ;;  %v6073_v59 = vld [vmem:[%s7817_s1 + $0x10] sm:$0xff]   ;;  %v267_v62 = vrot.slane %v265_v40, 1  ;;  %v5120_v1 = vcombine.low %v6516_v51, %v184_v41  ;;  %v146_v5 = vld [vmem:[#allocation2 + $0x28] sm:$0xf] }
  0x1d   :  { %v260_v48 = vrot.slane %v258_v35, 1  ;;  %v5090_v2 = vcombine.low %v6522_v54, %v6524_v55  ;;  %v6538_v7 = vld [vmem:[#allocation2 + $0x2c] sm:$0x1]  ;;  %5386 = vmatpush3.bf16.msra.mxu0 %v6073_v59  ;;  %v381_v8 = vshrl.u32 %v5095_v58, 16  ;;  %v384_v9 = vshll.u32 %v5095_v58, 16  ;;  %v6075_v33 = vld [vmem:[%s7817_s1 + $0x18] sm:$0xff]  }
  0x1e   :  { %v327_v56 = vor.u32 %v326_v47, %v323_v46  ;;  %5387 = vmatprep.subr.bf16.mxu0 %v6074_v3  ;;  %v268_v10 = vor.u32 %v267_v62, %v263_v61  ;;  %v5112_v14 = vcombine.low %v180_v42, %v176_v49  ;;  %v6540_v16 = vld [vmem:[#allocation2 + $0x8] sm:$0xc]  ;;  %v140_v17 = vld [vmem:[#allocation2 + $0x34] sm:$0x3]  ;;  %v577_v19 = vrot.slane %v5120_v1, 2  ;;  %v6077_v59 = vld [vmem:[%s7817_s1 + $0x20] sm:$0xff]  }
  0x1f   :  { %v261_v57 = vor.u32 %v260_v48, %v256_v34  ;;  %v337_v21 = vshrl.u32 %v5090_v2, 16  ;;  %v340_v24 = vshll.u32 %v5090_v2, 16  ;;  %v5082_v29 = vcombine.low %v146_v5, %v6538_v7  ;;  %v6545_v32 = vld [vmem:[#allocation2 + $0xc] sm:$0x7]  ;;  %v6550_v34 = vld [vmem:[#allocation2 + $0x28] sm:$0xf] }
  0x20   :  { %346 = vrot.lane.b32.xlu0 %v327_v56, %s6316_s19  ;;  %v103_v35 = vrot.slane %v6482_v15, 4  ;;  %v6553_v36 = vld [vmem:[#allocation2 + $0x2c] sm:$0x1]  ;;  %v383_v40 = vrot.slane %v381_v8, 2  ;;  %v386_v41 = vrot.slane %v384_v9, 3  ;;  %v509_v46 = vrot.slane %v5112_v14, 1 }
  0x21   :  { %278 = vrot.lane.b32.xlu1 %v261_v57, %s6316_s19  ;;  %v6557_v42 = vcombine.low %v6550_v34, %v6553_v36  ;;  %5388 = vmatpush3.bf16.msra.mxu0 %v6075_v33  ;;  %v187_v47 = vld [vmem:[#allocation2 + $0x8] sm:$0xc]  ;;  %v5096_v48 = vcombine.low %v6540_v16, %v6545_v32  ;;  %v6563_v49 = vld [vmem:[#allocation2 + $0x2c] sm:$0x3]  ;;  %v6076_v15 = vld [vmem:[%s7817_s1 + $0x60] sm:$0xff]   ;;  %v339_v50 = vrot.slane %v337_v21, 1 }
  0x22   :  { %v342_v56 = vrot.slane %v340_v24, 2  ;;  %v272_v57 = vshll.u32 %v5082_v29, 16  ;;  %v141_v22 = vsel %vm6431_vm7, %v103_v35, %v140_v17  ;;  %v6572_v58 = vld [vmem:[#allocation2 + $0x28] sm:$0xe]  ;;  %v6581_v61 = vld [vmem:[#allocation2 + $0xc] sm:$0x7]  ;;  %5389 = vmatprep.subr.bf16.mxu0 %v6076_v15  ;;  %v5119_v2 = vcombine.low %v187_v47, %v6491_v27 }
  0x23   :  { %7843 = vst [vmem:[#allocation3_spill] sm:$0xff] %v6557_v42  ;;  %142 = vst [vmem:[#allocation2 + $0x34] sm:$0x3] %v141_v22  ;;  %v6583_v62 = vld [vmem:[#allocation2 + $0x20] sm:$0xc]  ;;  %v6588_v20 = vcombine.low %v187_v47, %v6581_v61  ;;  %v6078_v1 = vld [vmem:[%s7817_s1 + $0x68] sm:$0xff]   ;;  %v5111_v47 = vcombine.low %v6500_v39, %v6493_v28 }
  0x24   :  { %348 = vrot.lane.b32.xlu0 %v335_v60, %s6316_s19  ;;  %v6579_v60 = vcombine.low %v6572_v58, %v6563_v49  ;;  %v389_v3 = vshrl.u32 %v5096_v48, 16  ;;  %v392_v5 = vshll.u32 %v5096_v48, 16  ;;  %v6594_v8 = vld [vmem:[#allocation2 + $0x28] sm:$0xc]  ;;  %v343_v14 = vor.u32 %v342_v56, %v339_v50  ;;  %v6601_v21 = vld [vmem:[#allocation2 + $0x2c] sm:$0x7] }
  0x25   :  { %450 = vrot.lane.b32.xlu1 %v5104_v63, %s6316_s19  ;;  %v6585_v63 = vld [vmem:[#allocation2 + $0x24] sm:$0x7]  ;;  %7844 = vst [vmem:[#allocation4_spill] sm:$0xff] %v6588_v20  ;;  %5390 = vmatpush3.bf16.msra.mxu0 %v6077_v59  ;;  %v6079_v9 = vld [vmem:[%s7817_s1 + $0x28] sm:$0xff]   ;;  %v270_v17 = vshrl.u32 %v5082_v29, 16  ;;  %v576_v35 = vrot.slane %v5119_v2, 2  ;;  %v5098_v29 = vcombine.low %v6594_v8, %v6601_v21 }
  0x26   :  { %v6603_v24 = vld [vmem:[#allocation2 + $0x14] sm:$0x7]  ;;  %5391 = vmatprep.subr.bf16.mxu0 %v6078_v1  ;;  %v5097_v33 = vcombine.low %v6583_v62, %v6585_v63  ;;  %v6624_v50 = vld [vmem:[#allocation2 + $0x30] sm:$0xe]  ;;  %v189_v1 = vld [vmem:[#allocation2 + $0x28] sm:$0xc] }
  0x27   :  { %v6607_v27 = vcombine.low %v6516_v51, %v6603_v24  ;;  %v405_v2 = vshrl.u32 %v5098_v29, 16  ;;  %v200_v28 = vld [vmem:[#allocation2 + $0x10] sm:$0xf]  ;;  %v6633_v39 = vld [vmem:[#allocation2 + $0x14] sm:$0x1]  ;;  %vm712_vm8 = vcmask 523264  }
  0x28   :  { %280 = vrot.lane.b32.xlu0 %v268_v10, %s6316_s19  ;;  %v387_v10 = vor.u32 %v386_v41, %v383_v40  ;;  %v174_v40 = vld [vmem:[#allocation2 + $0x30] sm:$0xf]  ;;  %v6080_v41 = vld [vmem:[%s7817_s1 + $0xc0] sm:$0xff]   ;;  %v397_v22 = vshrl.u32 %v5097_v33, 16  ;;  %v400_v59 = vshll.u32 %v5097_v33, 16  ;;  %7847 = vst [vmem:[#allocation7_spill] sm:$0xff] %v6633_v39  ;;  %v6646_v33 = vcombine.low %v200_v28, %v6633_v39 }
  0x29   :  { %582 = vrot.lane.b32.xlu1 %v577_v19, %s6316_s19  ;;  %v274_v19 = vrot.slane %v272_v57, 1  ;;  %7845 = vst [vmem:[#allocation5_spill] sm:$0xff] %v6607_v27  ;;  %5392 = vmatpush3.bf16.msra.mxu0 %v6079_v9  ;;  %v195_v0 = vld [vmem:[#allocation2 + $0x8] sm:$0x8]  ;;  %v6657_v28 = vld [vmem:[#allocation2 + $0x10] sm:$0xc] }
  0x2a   :  { %v6620_v48 = vld [vmem:[#allocation2 + $0x34] sm:$0x3]  ;;  %5409 = vmatprep.subr.bf16.mxu1 %v6080_v41  ;;  %v198_v39 = vld [vmem:[#allocation2 + $0x30] sm:$0x8]  ;;  %vm6320_vm9 = vmmov 0   ;;  %vm2735_vm10 = vcmask 130048  }
  0x2b   :  { %v275_v51 = vor.u32 %v274_v19, %v270_v17  ;;  %v6622_v15 = vld [vmem:[#allocation2 + $0x34] sm:$0x1]  ;;  %v6631_v57 = vcombine.low %v6624_v50, %v6620_v48  ;;  %v6641_v17 = vld [vmem:[#allocation2 + $0x2c] sm:$0x7]  ;;  %v5113_v19 = vcombine.low %v6572_v58, %v6553_v36  ;;  %v5105_v36 = vcombine.low %v6550_v34, %v6550_v34  ;;  %v6668_v34 = vld [vmem:[#allocation2 + $0x18] sm:$0xc] }
  0x2c   :  { %448 = vrot.lane.b32.xlu0 %v5103_v45, %s6316_s19  ;;  %v391_v45 = vrot.slane %v389_v3, 2  ;;  %v6627_v56 = vcombine.low %v174_v40, %v6622_v15  ;;  %v408_v3 = vshll.u32 %v5098_v29, 16  ;;  %v201_v29 = vld [vmem:[#allocation2 + $0x18] sm:$0xf]  ;;  %v6651_v41 = vcombine.low %v189_v1, %v6641_v17  ;;  %v220_v11 = vld [vmem:[#allocation2 + $0x14] sm:$0x7] }
  0x2d   :  { %514 = vrot.lane.b32.xlu1 %v509_v46, %s6316_s19  ;;  %v394_v46 = vrot.slane %v392_v5, 3  ;;  %v508_v5 = vrot.slane %v5111_v47, 1  ;;  %v5106_v58 = vcombine.low %v174_v40, %v174_v40  ;;  %vm3713_vm11 = vcmask 1043456   ;;  %s6322_s22 = smov 16   ;;  %s6323_s24 = smov 32  }
  0x2e   :  { %7846 = vst [vmem:[#allocation6_spill] sm:$0xff] %v6627_v56  ;;  %7849 = vst [vmem:[#allocation9_spill] sm:$0xff] %v6651_v41  ;;  %v410_v47 = vrot.slane %v408_v3, 3  ;;  %v6082_v3 = vld [vmem:[%s7817_s1 + $0x80] sm:$0xff]   ;;  %v227_v41 = vld [vmem:[#allocation2 + $0x38] sm:$0x8] }
  0x2f   :  { %v395_v9 = vor.u32 %v394_v46, %v391_v45  ;;  %v399_v45 = vrot.slane %v397_v22, 2  ;;  %v402_v46 = vrot.slane %v400_v59, 3  ;;  %v196_v59 = vld [vmem:[#allocation2 + $0x10] sm:$0x8]  ;;  %5410 = vmatpush3.bf16.msra.mxu1 %v6082_v3  ;;  %v221_v56 = vld [vmem:[#allocation2 + $0x1c] sm:$0x7] }
  0x30   :  { %412 = vrot.lane.b32.xlu0 %v387_v10, %s6316_s19  ;;  %v6081_v10 = vld [vmem:[%s7817_s1 + $0x70] sm:$0xff]   ;;  %vm3517_vm12 = vcmask 64512   ;;  %s6324_s9 = smov 48   ;;  %vm4499_vm13 = vcmask 261120   ;;  %vm4504_vm14 = vcmask 392192   ;;  %vm4939_vm15 = vcmask 1041409  }
  0x31   :  { %350 = vrot.lane.b32.xlu1 %v343_v14, %s6316_s19  ;;  %v5121_v14 = vcombine.low %v189_v1, %v6563_v49  ;;  %5393 = vmatprep.subr.bf16.mxu0 %v6081_v10  ;;  %v190_v49 = vld [vmem:[#allocation2 + $0x30] sm:$0xc]  ;;  %v6673_v10 = vld [vmem:[#allocation2 + $0x34] sm:$0x7] }
  0x32   :  { %v226_v1 = vld [vmem:[#allocation2 + $0x30] sm:$0x8]  ;;  %v5122_v20 = vcombine.low %v190_v49, %v6620_v48  ;;  %v5148_v48 = vcombine.low %v6668_v34, %v221_v56  ;;  %v6703_v56 = vld [vmem:[#allocation2 + $0x1c] sm:$0x3] }
  0x33   :  { %v578_v31 = vrot.slane %v5121_v14, 2  ;;  %v5127_v14 = vcombine.low %v195_v0, %v6581_v61  ;;  %v5153_v44 = vcombine.low %v226_v1, %v6673_v10  ;;  %v5128_v0 = vcombine.low %v196_v59, %v6603_v24  ;;  %v6083_v59 = vld [vmem:[%s7817_s1 + $0x30] sm:$0xff]  }
  0x34   :  { %580 = vrot.lane.b32.xlu0 %v576_v35, %s6316_s19  ;;  %v6648_v35 = vld [vmem:[#allocation2 + $0x1c] sm:$0x1]  ;;  %v579_v24 = vrot.slane %v5122_v20, 2  ;;  %v6708_v3 = vld [vmem:[#allocation2 + $0x10] sm:$0xe]  ;;  %5394 = vmatpush3.bf16.msra.mxu0 %v6083_v59 }
  0x35   :  { %282 = vrot.lane.b32.xlu1 %v275_v51, %s6316_s19  ;;  %7848 = vst [vmem:[#allocation8_spill] sm:$0xff] %v6648_v35  ;;  %v407_v51 = vrot.slane %v405_v2, 2  ;;  %v6660_v22 = vcombine.low %v201_v29, %v6648_v35  ;;  %v6662_v2 = vld [vmem:[#allocation2 + $0x34] sm:$0x7]  ;;  %v5147_v29 = vcombine.low %v6657_v28, %v220_v11  ;;  %v6684_v11 = vld [vmem:[#allocation2 + $0x3c] sm:$0x7] }
  0x36   :  { %v6671_v40 = vcombine.low %v190_v49, %v6662_v2  ;;  %v6687_v1 = vrot.slane %v5153_v44, 3  ;;  %7853 = vst [vmem:[#allocation13_spill] sm:$0xff] %v6708_v3  ;;  %v6726_v20 = vld [vmem:[#allocation2 + $0x34] sm:$0x1] }
  0x37   :  { %v411_v27 = vor.u32 %v410_v47, %v407_v51  ;;  %v686_v42 = vshll.u32 %v6660_v22, 16  ;;  %v684_v61 = vshrl.u32 %v6660_v22, 16  ;;  %v645_v47 = vrot.slane %v5128_v0, 3  ;;  %v6701_v22 = vld [vmem:[#allocation2 + $0x14] sm:$0x3] }
  0x38   :  { %512 = vrot.lane.b32.xlu0 %v508_v5, %s6316_s19  ;;  %v510_v5 = vrot.slane %v5113_v19, 1  ;;  %7850 = vst [vmem:[#allocation10_spill] sm:$0xff] %v6671_v40  ;;  %v403_v19 = vor.u32 %v402_v46, %v399_v45  ;;  %v677_v40 = vshrl.u32 %v6646_v33, 16  ;;  %7851 = vst [vmem:[#allocation11_spill] sm:$0xff] %v6687_v1  ;;  %v898_v45 = vshrl.u32 %v5147_v29, 16 }
  0x39   :  { %414 = vrot.lane.b32.xlu1 %v395_v9, %s6316_s19  ;;  %v679_v9 = vshll.u32 %v6646_v33, 16  ;;  %v5114_v46 = vcombine.low %v6624_v50, %v6622_v15  ;;  %v901_v49 = vshll.u32 %v5147_v29, 16  ;;  %v906_v50 = vshrl.u32 %v5148_v48, 16 }
  0x3a   :  { %v6716_v15 = vrot.slane %v898_v45, 1  ;;  %v909_v0 = vshll.u32 %v5148_v48, 16 }
  0x3b   :  { %v681_v44 = vrot.slane %v679_v9, 1  ;;  %v6718_v9 = vld [vmem:[#allocation2 + $0x18] sm:$0xe]  ;;  %v903_v48 = vrot.slane %v901_v49, 2 }
  0x3c   :  { %452 = vrot.lane.b32.xlu0 %v5105_v36, %s6316_s19  ;;  %v5154_v36 = vcombine.low %v227_v41, %v6684_v11  ;;  %v688_v41 = vrot.slane %v686_v42, 1  ;;  %7854 = vst [vmem:[#allocation14_spill] sm:$0xff] %v6718_v9  ;;  %v203_v42 = vld [vmem:[#allocation2 + $0x38] sm:$0xf]  ;;  %v911_v45 = vrot.slane %v909_v0, 2 }
  0x3d   :  { %454 = vrot.lane.b32.xlu1 %v5106_v58, %s6316_s19  ;;  %v6690_v58 = vrot.slane %v5127_v14, 3  ;;  %v6732_v14 = vld [vmem:[#allocation2 + $0x3c] sm:$0x1]  ;;  %v682_v33 = vor.u32 %v681_v44, %v677_v40  ;;  %v6084_v40 = vld [vmem:[%s7817_s1 + $0xc8] sm:$0xff]   ;;  %v6757_v0 = vld [vmem:[#allocation2 + $0x30] sm:$0xc] }
  0x3e   :  { %v6699_v51 = vrot.slane %v5154_v36, 3  ;;  %v202_v36 = vld [vmem:[#allocation2 + $0x30] sm:$0xf]  ;;  %v689_v29 = vor.u32 %v688_v41, %v684_v61  ;;  %v6085_v44 = vld [vmem:[%s7817_s1 + $0x78] sm:$0xff]   ;;  %5411 = vmatprep.subr.bf16.mxu1 %v6084_v40 }
  0x3f   :  { %5395 = vmatprep.subr.bf16.mxu0 %v6085_v44  ;;  %v6765_v41 = vld [vmem:[#allocation2 + $0x38] sm:$0xc]  ;;  %v6090_v44 = vld [vmem:[%s7817_s1 + $0x140] sm:$0xff]  }
  0x40   :  { %416 = vrot.lane.b32.xlu0 %v403_v19, %s6316_s19  ;;  %7852 = vst [vmem:[#allocation12_spill] sm:$0xff] %v6699_v51  ;;  %v511_v19 = vrot.slane %v5114_v46, 1  ;;  %v5140_v46 = vcombine.low %v6718_v9, %v6703_v56  ;;  %v197_v9 = vld [vmem:[#allocation2 + $0x28] sm:$0x8] }
  0x41   :  { %418 = vrot.lane.b32.xlu1 %v411_v27, %s6316_s19  ;;  %v5133_v27 = vcombine.low %v202_v36, %v6726_v20 }
  0x43   :  { %v693_v36 = vshll.u32 %v5133_v27, 16  ;;  %v691_v1 = vshrl.u32 %v5133_v27, 16  ;;  %v5150_v27 = vcombine.low %v6765_v41, %v6684_v11  ;;  %v5130_v11 = vcombine.low %v198_v39, %v6662_v2 }
  0x44   :  { %584 = vrot.lane.b32.xlu0 %v578_v31, %s6316_s19  ;;  %v5139_v31 = vcombine.low %v6708_v3, %v6701_v22 }
  0x45   :  { %586 = vrot.lane.b32.xlu1 %v579_v24, %s6316_s19  ;;  %v908_v24 = vrot.slane %v906_v50, 1  ;;  %v6086_v50 = vld [vmem:[%s7817_s1 + $0x88] sm:$0xff]   ;;  %v695_v3 = vrot.slane %v693_v36, 1  ;;  %v5129_v36 = vcombine.low %v197_v9, %v6641_v17  ;;  %v925_v39 = vshll.u32 %v5150_v27, 16 }
  0x46   :  { %v834_v61 = vshrl.u32 %v5139_v31, 16  ;;  %v836_v49 = vshll.u32 %v5139_v31, 16  ;;  %5412 = vmatpush3.bf16.msra.mxu1 %v6086_v50  ;;  %v6088_v31 = vld [vmem:[%s7817_s1 + $0xd0] sm:$0xff]   ;;  %v841_v50 = vshrl.u32 %v5140_v46, 16 }
  0x47   :  { %v912_v59 = vor.u32 %v911_v45, %v908_v24  ;;  %5413 = vmatprep.subr.bf16.mxu1 %v6088_v31  ;;  %v6779_v45 = vld [vmem:[#allocation2 + $0x34] sm:$0x3]  ;;  %v6789_v24 = vld [vmem:[#allocation2 + $0x30] sm:$0xe] }
  0x48   :  { %516 = vrot.lane.b32.xlu0 %v510_v5, %s6316_s19  ;;  %v5134_v5 = vcombine.low %v203_v42, %v6732_v14  ;;  %v6087_v42 = vld [vmem:[%s7817_s1 + $0x38] sm:$0xff]   ;;  %v838_v51 = vrot.slane %v836_v49, 1  ;;  %v5141_v17 = vcombine.low %v6789_v24, %v6779_v45 }
  0x49   :  { %518 = vrot.lane.b32.xlu1 %v511_v19, %s6316_s19  ;;  %v843_v19 = vshll.u32 %v5140_v46, 16  ;;  %5396 = vmatpush3.bf16.msra.mxu0 %v6087_v42  ;;  %v6791_v46 = vld [vmem:[#allocation2 + $0x38] sm:$0xe]  ;;  %v6795_v49 = vld [vmem:[#allocation2 + $0x3c] sm:$0x3] }
  0x4a   :  { %v700_v40 = vshll.u32 %v5134_v5, 16  ;;  %v698_v35 = vshrl.u32 %v5134_v5, 16  ;;  %5437 = vmatprep.subr.bf16.mxu0 %v6090_v44  ;;  %v6099_v44 = vld [vmem:[%s7817_s1 + $0xa0] sm:$0xff]   ;;  %v5142_v2 = vcombine.low %v6791_v46, %v6795_v49 }
  0x4b   :  { %v845_v42 = vrot.slane %v843_v19, 1  ;;  %v5145_v19 = vcombine.low %v6757_v0, %v6779_v45 }
  0x4c   :  { %704 = vrot.lane.b32.xlu0 %v682_v33, %s6316_s19  ;;  %v6089_v33 = vld [vmem:[%s7817_s1 + $0x90] sm:$0xff]  }
  0x4d   :  { %706 = vrot.lane.b32.xlu1 %v689_v29, %s6316_s19  ;;  %v904_v29 = vor.u32 %v903_v48, %v6716_v15  ;;  %v5149_v15 = vcombine.low %v6757_v0, %v6673_v10  ;;  %5414 = vmatpush3.bf16.msra.mxu1 %v6089_v33  ;;  %v702_v48 = vrot.slane %v700_v40, 1  ;;  %v839_v10 = vor.u32 %v838_v51, %v834_v61  ;;  %v6098_v51 = vld [vmem:[%s7817_s1 + $0xe0] sm:$0xff]  }
  0x4e   :  { %v846_v5 = vor.u32 %v845_v42, %v841_v50  ;;  %v5146_v40 = vcombine.low %v6765_v41, %v6795_v49  ;;  %v6102_v50 = vld [vmem:[%s7817_s1 + $0xe8] sm:$0xff]   ;;  %v5138_v42 = vcombine.low %v6791_v46, %v6732_v14 }
  0x4f   :  { %v914_v31 = vshrl.u32 %v5149_v15, 16  ;;  %v917_v33 = vshll.u32 %v5149_v15, 16  ;;  %v703_v61 = vor.u32 %v702_v48, %v698_v35  ;;  %v646_v35 = vrot.slane %v5129_v36, 3  ;;  %v6109_v36 = vld [vmem:[%s7817_s1 + $0xf0] sm:$0xff]  }
  0x50   :  { %648 = vrot.lane.b32.xlu0 %v6690_v58, %s6316_s19  ;;  %v6094_v58 = vld [vmem:[%s7817_s1 + $0xd8] sm:$0xff]  }
  0x51   :  { %650 = vrot.lane.b32.xlu1 %v645_v47, %s6316_s19  ;;  %v6095_v47 = vld [vmem:[%s7817_s1 + $0x98] sm:$0xff]   ;;  %5415 = vmatprep.subr.bf16.mxu1 %v6094_v58  ;;  %v916_v9 = vrot.slane %v914_v31, 1  ;;  %v919_v15 = vrot.slane %v917_v33, 2  ;;  %v6103_v58 = vld [vmem:[%s7817_s1 + $0xa8] sm:$0xff]   ;;  %v6110_v31 = vld [vmem:[%s7817_s1 + $0xb0] sm:$0xff]  }
  0x52   :  { %5416 = vmatpush3.bf16.msra.mxu1 %v6095_v47  ;;  %v927_v47 = vrot.slane %v925_v39, 2 }
  0x53   :  { %5417 = vmatprep.subr.bf16.mxu1 %v6098_v51  ;;  %v920_v33 = vor.u32 %v919_v15, %v916_v9  ;;  %v7855_v9 = vcombine.low %v6435_v25, %v6441_v30  ;;  %v7856_v15 = vcombine.low %v6471_v6, %v6479_v13  ;;  %v6093_v30 = vld [vmem:[%s7817_s1 + $0x100] sm:$0xff]   ;;  %v168_v13 = vld [vmem:[#allocation2 + $0x8] sm:$0x8] }
  0x54   :  { %929 = vrot.lane.b32.xlu0 %v904_v29, %s6316_s19  ;;  %v922_v29 = vshrl.u32 %v5150_v27, 16  ;;  %v850_v27 = vshll.u32 %v5141_v17, 16  ;;  %v167_v6 = vld [vmem:[#allocation2] sm:$0x8] }
  0x55   :  { %931 = vrot.lane.b32.xlu1 %v912_v59, %s6316_s19  ;;  %v696_v59 = vor.u32 %v695_v3, %v691_v1  ;;  %v5137_v1 = vcombine.low %v6789_v24, %v6726_v20  ;;  %v647_v3 = vrot.slane %v5130_v11, 3  ;;  %v855_v11 = vshrl.u32 %v5142_v2, 16 }
  0x56   :  { %5418 = vmatpush3.bf16.msra.mxu1 %v6099_v44  ;;  %v924_v48 = vrot.slane %v922_v29, 1  ;;  %v6113_v29 = vld [vmem:[%s7817_s1 + $0xf8] sm:$0xff]  }
  0x57   :  { %5419 = vmatprep.subr.bf16.mxu1 %v6102_v50  ;;  %v296_v50 = vrot.slane %v7855_v9, 1 }
  0x58   :  { %861 = vrot.lane.b32.xlu0 %v839_v10, %s6316_s19  ;;  %v857_v10 = vshll.u32 %v5142_v2, 16  ;;  %v928_v51 = vor.u32 %v927_v47, %v924_v48  ;;  %v6118_v2 = vld [vmem:[%s7817_s1 + $0x1c0] sm:$0xff]  }
  0x59   :  { %863 = vrot.lane.b32.xlu1 %v846_v5, %s6316_s19  ;;  %v848_v5 = vshrl.u32 %v5141_v17, 16  ;;  %v6114_v17 = vld [vmem:[%s7817_s1 + $0xb8] sm:$0xff]  }
  0x5a   :  { %5420 = vmatpush3.bf16.msra.mxu1 %v6103_v58  ;;  %v297_v58 = vrot.slane %v7856_v15, 1  ;;  %v533_v15 = vshrl.u32 %v6508_v18, 16 }
  0x5b   :  { %5421 = vmatprep.subr.bf16.mxu1 %v6109_v36 }
  0x5c   :  { %708 = vrot.lane.b32.xlu0 %v696_v59, %s6316_s19  ;;  %v852_v59 = vrot.slane %v850_v27, 1  ;;  %v6300_v27 = vld [vmem:[#allocation2] sm:$0xf] }
  0x5d   :  { %710 = vrot.lane.b32.xlu1 %v703_v61, %s6316_s19  ;;  %v859_v61 = vrot.slane %v857_v10, 1 }
  0x5e   :  { %5422 = vmatpush3.bf16.msra.mxu1 %v6110_v31  ;;  %v853_v44 = vor.u32 %v852_v59, %v848_v5  ;;  %v6301_v5 = vld [vmem:[#allocation2 + $0x8] sm:$0xf] }
  0x5f   :  { %v860_v39 = vor.u32 %v859_v61, %v855_v11  ;;  %5423 = vmatprep.subr.bf16.mxu1 %v6113_v29  ;;  %v6302_v29 = vld [vmem:[#allocation2 + $0x4] sm:$0x7] }
  0x60   :  { %652 = vrot.lane.b32.xlu0 %v646_v35, %s6316_s19 }
  0x61   :  { %654 = vrot.lane.b32.xlu1 %v647_v3, %s6316_s19 }
  0x62   :  { %5424 = vmatpush3.bf16.msra.mxu1 %v6114_v17  ;;  %v6097_v17 = vld [vmem:[%s7817_s1 + $0x108] sm:$0xff]  }
  0x63   :  { %5465 = vmatprep.subr.bf16.mxu1 %v6118_v2  ;;  %v6100_v2 = vld [vmem:[%s7817_s1 + $0x150] sm:$0xff]  }
  0x64   :  { %933 = vrot.lane.b32.xlu0 %v920_v33, %s6316_s19 }
  0x65   :  { %935 = vrot.lane.b32.xlu1 %v928_v51, %s6316_s19  ;;  %v6096_v51 = vld [vmem:[%s7817_s1 + $0x148] sm:$0xff]  }
  0x68   :  { %865 = vrot.lane.b32.xlu0 %v853_v44, %s6316_s19  ;;  %v5099_v44 = vcombine.low %v167_v6, %v6302_v29 }
  0x69   :  { %867 = vrot.lane.b32.xlu1 %v860_v39, %s6316_s19  ;;  %v5100_v39 = vcombine.low %v168_v13, %v6545_v32  ;;  %v536_v32 = vshll.u32 %v6508_v18, 16 }
  0x6b   :  { %v538_v29 = vrot.slane %v536_v32, 2 }
  0x86   :  { %v345_v35 = vpop.permute.xlu0 %344  ;;  %v277_v3 = vpop.permute.xlu1 %276 }
  0x87   :  { %v715_v10 = vsel %vm712_vm8, %v6300_v27, %v277_v3  ;;  %v727_v11 = vsel %vm712_vm8, %v296_v50, %v345_v35  ;;  %v541_v35 = vshrl.u32 %v6520_v53, 16  ;;  %v544_v3 = vshll.u32 %v6520_v53, 16  ;;  %v6106_v53 = vld [vmem:[%s7817_s1 + $0x158] sm:$0xff]  }
  0x88   :  { %v478_v27 = vshll.u32 %v6518_v52, 16 }
  0x92   :  { %v347_v48 = vpop.permute.xlu0 %346 }
  0x93   :  { %v279_v47 = vpop.permute.xlu1 %278  ;;  %v730_v31 = vsel %vm712_vm8, %v297_v58, %v347_v48  ;;  %v432_v58 = vrot.slane %v5099_v44, 3  ;;  %v433_v48 = vrot.slane %v5100_v39, 3  ;;  %v480_v39 = vrot.slane %v478_v27, 1 }
  0x94   :  { %v718_v36 = vsel %vm712_vm8, %v6301_v5, %v279_v47  ;;  %v5161_v25 = vcombine.low %v727_v11, %v730_v31  ;;  %v6101_v47 = vld [vmem:[%s7817_s1 + $0x110] sm:$0xff]   ;;  %v7857_v5 = vcombine.low %v6446_v37, %v6466_v4  ;;  %v546_v11 = vrot.slane %v544_v3, 2  ;;  %v6108_v37 = vld [vmem:[%s7817_s1 + $0x118] sm:$0xff]  }
  0x95   :  { %v5160_v33 = vcombine.low %v715_v10, %v718_v36  ;;  %v471_v10 = vshll.u32 %v6504_v43, 16  ;;  %v543_v36 = vrot.slane %v541_v35, 1  ;;  %v476_v4 = vshrl.u32 %v6518_v52, 16  ;;  %v170_v52 = vld [vmem:[#allocation2 + $0x28] sm:$0x8] }
  0x96   :  { %v349_v59 = vpop.permute.xlu0 %348  ;;  %1830 = vmatprep.mubr.bf16.mxu0 %v5161_v25  ;;  %v298_v18 = vrot.slane %v7857_v5, 1  ;;  %v7858_v25 = vcombine.low %v6522_v54, %v6538_v7  ;;  %v6111_v54 = vld [vmem:[%s7817_s1 + $0x160] sm:$0xff]  }
  0x97   :  { %v451_v61 = vpop.permute.xlu1 %450  ;;  %1831 = vmatmul.mubr.bf16.vlgmr.msra.gmra.mrb[0].mxu0 %v5160_v33  ;;  %v547_v3 = vor.u32 %v546_v11, %v543_v36  ;;  %v481_v27 = vor.u32 %v480_v39, %v476_v4  ;;  %v7860_v36 = vcombine.low %v6540_v16, %v6477_v12  ;;  %v6117_v12 = vld [vmem:[%s7817_s1 + $0x128] sm:$0xff]   ;;  %v549_v16 = vshrl.u32 %v6579_v60, 16 }
  0x98   :  { %5438 = vmatpush3.bf16.msra.mxu0 %v6093_v30  ;;  %v299_v30 = vrot.slane %v7858_v25, 1  ;;  %v754_v13 = vsel %vm712_vm8, %v433_v48, %v451_v61  ;;  %v469_v61 = vshrl.u32 %v6504_v43, 16  ;;  %v733_v35 = vsel %vm712_vm8, %v298_v18, %v349_v59  ;;  %v6115_v59 = vld [vmem:[%s7817_s1 + $0x168] sm:$0xff]  }
  0x99   :  { %5439 = vmatprep.subr.bf16.mxu0 %v6096_v51  ;;  %v535_v51 = vrot.slane %v533_v15, 1  ;;  %v365_v11 = vrot.slane %v7860_v36, 2  ;;  %v5102_v25 = vcombine.low %v170_v52, %v6601_v21  ;;  %v6120_v21 = vld [vmem:[%s7817_s1 + $0x170] sm:$0xff]   ;;  %v7863_v36 = vcombine.low %v6583_v62, %v6448_v38  ;;  %v6132_v62 = vld [vmem:[%s7817_s1 + $0x240] sm:$0xff]  }
  0x9a   :  { %v281_v9 = vpop.permute.xlu0 %280  ;;  %v6130_v38 = vld [vmem:[%s7817_s1 + $0x1d0] sm:$0xff]  }
  0x9b   :  { %v583_v50 = vpop.permute.xlu1 %582  ;;  %v539_v32 = vor.u32 %v538_v29, %v535_v51 }
  0x9c   :  { %5440 = vmatpush3.bf16.msra.mxu0 %v6097_v17 }
  0x9d   :  { %5441 = vmatprep.subr.bf16.mxu0 %v6100_v2  ;;  %v473_v2 = vrot.slane %v471_v10, 1 }
  0x9e   :  { %v449_v31 = vpop.permute.xlu0 %448 }
  0x9f   :  { %v515_v33 = vpop.permute.xlu1 %514  ;;  %v751_v6 = vsel %vm712_vm8, %v432_v58, %v449_v31  ;;  %v169_v58 = vld [vmem:[#allocation2 + $0x20] sm:$0x8]  ;;  %v474_v18 = vor.u32 %v473_v2, %v469_v61 }
  0xa0   :  { %5442 = vmatpush3.bf16.msra.mxu0 %v6101_v47  ;;  %v5163_v44 = vcombine.low %v751_v6, %v754_v13  ;;  %v6112_v47 = vld [vmem:[%s7817_s1 + $0x120] sm:$0xff]   ;;  %v5101_v31 = vcombine.low %v169_v58, %v6585_v63  ;;  %v6304_v13 = vld [vmem:[#allocation2 + $0x28] sm:$0xf]  ;;  %v552_v63 = vshll.u32 %v6579_v60, 16  ;;  %v7862_v58 = vld [vmem:[#allocation6_spill] sm:$0xff] }
  0xa1   :  { %5443 = vmatprep.subr.bf16.mxu0 %v6106_v53  ;;  %v7859_v53 = vcombine.low %v6489_v23, %v6437_v26  ;;  %v778_v23 = vsel %vm712_vm8, %v547_v3, %v583_v50  ;;  %v560_v50 = vshll.u32 %v6631_v57, 16  ;;  %v492_v52 = vshll.u32 %v7862_v58, 16 }
  0xa2   :  { %v413_v7 = vpop.permute.xlu0 %412  ;;  %1879 = vmatprep.mubr.bf16.mxu1 %v5163_v44  ;;  %v434_v39 = vrot.slane %v5101_v31, 3  ;;  %v6127_v31 = vld [vmem:[%s7817_s1 + $0x188] sm:$0xff]  }
  0xa3   :  { %v351_v17 = vpop.permute.xlu1 %350  ;;  %v364_v43 = vrot.slane %v7859_v53, 2  ;;  %v551_v53 = vrot.slane %v549_v16, 1  ;;  %v6131_v16 = vld [vmem:[%s7817_s1 + $0x190] sm:$0xff]  }
  0xa4   :  { %v736_v15 = vsel %vm712_vm8, %v299_v30, %v351_v17  ;;  %5444 = vmatpush3.bf16.msra.mxu0 %v6108_v37  ;;  %v6303_v30 = vld [vmem:[#allocation2 + $0x20] sm:$0xf]  ;;  %v6930_v17 = vsel %vm712_vm8, %v481_v27, %v515_v33  ;;  %v6123_v33 = vld [vmem:[%s7817_s1 + $0x130] sm:$0xff]  }
  0xa5   :  { %v5172_v48 = vcombine.low %v733_v35, %v736_v15  ;;  %5445 = vmatprep.subr.bf16.mxu0 %v6111_v54  ;;  %v721_v26 = vsel %vm712_vm8, %v6303_v30, %v281_v9  ;;  %v557_v9 = vshrl.u32 %v6631_v57, 16  ;;  %v435_v54 = vrot.slane %v5102_v25, 3  ;;  %v6121_v57 = vld [vmem:[%s7817_s1 + $0x180] sm:$0xff]  }
  0xa6   :  { %v581_v10 = vpop.permute.xlu0 %580  ;;  %v739_v61 = vsel %vm712_vm8, %v364_v43, %v413_v7  ;;  %v6124_v7 = vld [vmem:[%s7817_s1 + $0x1c8] sm:$0xff]   ;;  %v7861_v15 = vld [vmem:[#allocation3_spill] sm:$0xff]  ;;  %v554_v43 = vrot.slane %v552_v63, 2  ;;  %v7864_v25 = vcombine.low %v6594_v8, %v6524_v55  ;;  %v490_v63 = vshrl.u32 %v7862_v58, 16 }
  0xa7   :  { %1838 = vmatprep.mubr.bf16.mxu0 %v5172_v48  ;;  %v283_v5 = vpop.permute.xlu1 %282  ;;  %v775_v6 = vsel %vm712_vm8, %v539_v32, %v581_v10  ;;  %v485_v32 = vshll.u32 %v7861_v15, 16  ;;  %v6126_v48 = vld [vmem:[%s7817_s1 + $0x178] sm:$0xff]   ;;  %v562_v10 = vrot.slane %v560_v50, 2  ;;  %v6133_v50 = vld [vmem:[%s7817_s1 + $0x200] sm:$0xff]  }
  0xa8   :  { %v724_v51 = vsel %vm712_vm8, %v6304_v13, %v283_v5  ;;  %v5165_v29 = vcombine.low %v775_v6, %v778_v23  ;;  %5446 = vmatpush3.bf16.msra.mxu0 %v6112_v47  ;;  %v367_v30 = vrot.slane %v7864_v25, 2  ;;  %v6129_v23 = vld [vmem:[%s7817_s1 + $0x138] sm:$0xff]   ;;  %v555_v8 = vor.u32 %v554_v43, %v551_v53  ;;  %v6141_v25 = vld [vmem:[%s7817_s1 + $0x210] sm:$0xff]  }
  0xa9   :  { %v5171_v44 = vcombine.low %v721_v26, %v724_v51  ;;  %5447 = vmatprep.subr.bf16.mxu0 %v6115_v59  ;;  %v559_v59 = vrot.slane %v557_v9, 1  ;;  %v483_v51 = vshrl.u32 %v7861_v15, 16 }
  0xaa   :  { %v513_v37 = vpop.permute.xlu0 %512 }
  0xab   :  { %1839 = vmatmul.mubr.bf16.gmra.mrb[4].mxu0 %v5171_v44  ;;  %v415_v4 = vpop.permute.xlu1 %414  ;;  %v6934_v60 = vsel %vm712_vm8, %v474_v18, %v513_v37  ;;  %v563_v13 = vor.u32 %v562_v10, %v559_v59  ;;  %v6134_v37 = vld [vmem:[%s7817_s1 + $0x1d8] sm:$0xff]  }
  0xac   :  { %v742_v2 = vsel %vm712_vm8, %v365_v11, %v415_v4  ;;  %1928 = vmatprep.mubr.bf16.mxu0 %v5165_v29  ;;  %v5164_v35 = vcombine.low %v6934_v60, %v6930_v17  ;;  %5448 = vmatpush3.bf16.msra.mxu0 %v6117_v12  ;;  %v366_v11 = vrot.slane %v7863_v36, 2  ;;  %v487_v29 = vrot.slane %v485_v32, 1  ;;  %v6136_v4 = vld [vmem:[%s7817_s1 + $0x248] sm:$0xff]   ;;  %v6135_v32 = vld [vmem:[%s7817_s1 + $0x198] sm:$0xff]  }
  0xad   :  { %v5162_v3 = vcombine.low %v739_v61, %v742_v2  ;;  %5449 = vmatprep.subr.bf16.mxu0 %v6120_v21  ;;  %v494_v21 = vrot.slane %v492_v52, 1  ;;  %v7866_v61 = vld [vmem:[#allocation5_spill] sm:$0xff] }
  0xae   :  { %v453_v47 = vpop.permute.xlu0 %452  ;;  %v609_v60 = vshrl.u32 %v7866_v61, 16 }
  0xaf   :  { %1880 = vmatmul.mubr.bf16.vlgmr.msra.gmra.mrb[0].mxu1 %v5162_v3  ;;  %v455_v27 = vpop.permute.xlu1 %454  ;;  %v757_v5 = vsel %vm712_vm8, %v434_v39, %v453_v47  ;;  %v7865_v39 = vld [vmem:[#allocation4_spill] sm:$0xff]  ;;  %v488_v3 = vor.u32 %v487_v29, %v483_v51  ;;  %v495_v58 = vor.u32 %v494_v21, %v490_v63  ;;  %v6138_v47 = vld [vmem:[%s7817_s1 + $0x1e0] sm:$0xff]  }
  0xb0   :  { %5466 = vmatpush3.bf16.msra.mxu1 %v6121_v57  ;;  %v760_v18 = vsel %vm712_vm8, %v435_v54, %v455_v27  ;;  %5450 = vmatpush3.bf16.msra.mxu0 %v6123_v33  ;;  %v601_v54 = vshrl.u32 %v7865_v39, 16  ;;  %v604_v17 = vshll.u32 %v7865_v39, 16  ;;  %v612_v33 = vshll.u32 %v7866_v61, 16  ;;  %v6143_v51 = vld [vmem:[%s7817_s1 + $0x1a8] sm:$0xff]   ;;  %v6149_v63 = vld [vmem:[%s7817_s1 + $0x260] sm:$0xff]  }
  0xb1   :  { %v5174_v26 = vcombine.low %v757_v5, %v760_v18  ;;  %5467 = vmatprep.subr.bf16.mxu1 %v6124_v7  ;;  %5451 = vmatprep.subr.bf16.mxu0 %v6126_v48  ;;  %v6137_v48 = vld [vmem:[%s7817_s1 + $0x208] sm:$0xff]   ;;  %v6139_v18 = vld [vmem:[%s7817_s1 + $0x1a0] sm:$0xff]   ;;  %v611_v36 = vrot.slane %v609_v60, 2 }
  0xb2   :  { %v417_v6 = vpop.permute.xlu0 %416  ;;  %v603_v43 = vrot.slane %v601_v54, 2  ;;  %v606_v59 = vrot.slane %v604_v17, 3  ;;  %v6148_v54 = vld [vmem:[%s7817_s1 + $0x1b0] sm:$0xff]   ;;  %v7868_v17 = vcombine.low %v6668_v34, %v6703_v56 }
  0xb3   :  { %1887 = vmatprep.mubr.bf16.mxu1 %v5174_v26  ;;  %v419_v55 = vpop.permute.xlu1 %418  ;;  %v745_v44 = vsel %vm712_vm8, %v366_v11, %v417_v6  ;;  %v614_v11 = vrot.slane %v612_v33, 3  ;;  %v6144_v26 = vld [vmem:[%s7817_s1 + $0x258] sm:$0xff]   ;;  %v6305_v6 = vld [vmem:[#allocation2 + $0x10] sm:$0xf] }
  0xb4   :  { %5468 = vmatpush3.bf16.msra.mxu1 %v6127_v31  ;;  %v748_v12 = vsel %vm712_vm8, %v367_v30, %v419_v55  ;;  %5452 = vmatpush3.bf16.msra.mxu0 %v6129_v23  ;;  %v6142_v30 = vld [vmem:[%s7817_s1 + $0x1e8] sm:$0xff]   ;;  %v882_v61 = vrot.slane %v7868_v17, 1 }
  0xb5   :  { %v5173_v9 = vcombine.low %v745_v44, %v748_v12  ;;  %5469 = vmatprep.subr.bf16.mxu1 %v6130_v38  ;;  %5493 = vmatprep.subr.bf16.mxu0 %v6132_v62  ;;  %v607_v62 = vor.u32 %v606_v59, %v603_v43  ;;  %v615_v29 = vor.u32 %v614_v11, %v611_v36  ;;  %v6145_v12 = vld [vmem:[%s7817_s1 + $0x218] sm:$0xff]   ;;  %v6158_v43 = vld [vmem:[%s7817_s1 + $0x270] sm:$0xff]   ;;  %v6159_v59 = vld [vmem:[%s7817_s1 + $0x280] sm:$0xff]  }
  0xb6   :  { %v585_v2 = vpop.permute.xlu0 %584 }
  0xb7   :  { %1888 = vmatmul.mubr.bf16.gmra.mrb[4].mxu1 %v5173_v9  ;;  %v587_v57 = vpop.permute.xlu1 %586  ;;  %v781_v7 = vsel %vm712_vm8, %v555_v8, %v585_v2  ;;  %1929 = vmatmul.mubr.bf16.vlgmr.msra.gmra.mrb[8].mxu0 %v5164_v35  ;;  %v6140_v35 = vld [vmem:[%s7817_s1 + $0x250] sm:$0xff]   ;;  %v6306_v8 = vld [vmem:[#allocation2 + $0x18] sm:$0xf]  ;;  %v6151_v2 = vld [vmem:[%s7817_s1 + $0x220] sm:$0xff]  }
  0xb8   :  { %5470 = vmatpush3.bf16.msra.mxu1 %v6131_v16  ;;  %v784_v15 = vsel %vm712_vm8, %v563_v13, %v587_v57  ;;  %5494 = vmatpush3.bf16.msra.mxu0 %v6133_v50  ;;  %v6146_v16 = vld [vmem:[%s7817_s1 + $0x1f0] sm:$0xff]  }
  0xb9   :  { %v5176_v52 = vcombine.low %v781_v7, %v784_v15  ;;  %5471 = vmatprep.subr.bf16.mxu1 %v6134_v37  ;;  %5495 = vmatprep.subr.bf16.mxu0 %v6136_v4  ;;  %v7867_v4 = vcombine.low %v6657_v28, %v6701_v22  ;;  %v6152_v28 = vld [vmem:[%s7817_s1 + $0x1f8] sm:$0xff]   ;;  %v6155_v22 = vld [vmem:[%s7817_s1 + $0x268] sm:$0xff]   ;;  %v7869_v57 = vld [vmem:[#allocation9_spill] sm:$0xff] }
  0xba   :  { %v517_v27 = vpop.permute.xlu0 %516  ;;  %v620_v34 = vshll.u32 %v7869_v57, 16  ;;  %v7870_v7 = vld [vmem:[#allocation10_spill] sm:$0xff] }
  0xbb   :  { %1936 = vmatprep.mubr.bf16.mxu0 %v5176_v52  ;;  %v519_v53 = vpop.permute.xlu1 %518  ;;  %v769_v10 = vsel %vm712_vm8, %v488_v3, %v517_v27  ;;  %v881_v39 = vrot.slane %v7867_v4, 1  ;;  %v617_v3 = vshrl.u32 %v7869_v57, 16  ;;  %v625_v15 = vshrl.u32 %v7870_v7, 16  ;;  %v6157_v27 = vld [vmem:[%s7817_s1 + $0x228] sm:$0xff]  }
  0xbc   :  { %5472 = vmatpush3.bf16.msra.mxu1 %v6135_v32  ;;  %v772_v5 = vsel %vm712_vm8, %v495_v58, %v519_v53  ;;  %5496 = vmatpush3.bf16.msra.mxu0 %v6137_v48  ;;  %v628_v32 = vshll.u32 %v7870_v7, 16  ;;  %v6154_v48 = vld [vmem:[%s7817_s1 + $0x1b8] sm:$0xff]   ;;  %v224_v53 = vld [vmem:[#allocation2 + $0x10] sm:$0x8] }
  0xbd   :  { %v5175_v31 = vcombine.low %v769_v10, %v772_v5  ;;  %5473 = vmatprep.subr.bf16.mxu1 %v6138_v47  ;;  %5497 = vmatprep.subr.bf16.mxu0 %v6140_v35  ;;  %v225_v10 = vld [vmem:[#allocation2 + $0x18] sm:$0x8]  ;;  %v619_v11 = vrot.slane %v617_v3, 2 }
  0xbe   :  { %v705_v23 = vpop.permute.xlu0 %704  ;;  %v6163_v3 = vld [vmem:[%s7817_s1 + $0x238] sm:$0xff]  }
  0xbf   :  { %v707_v38 = vpop.permute.xlu1 %706  ;;  %v799_v55 = vsel %vm712_vm8, %v6305_v6, %v705_v23  ;;  %1937 = vmatmul.mubr.bf16.gmra.mrb[12].mxu0 %v5175_v31  ;;  %v622_v31 = vrot.slane %v620_v34, 3 }
  0xc0   :  { %5474 = vmatpush3.bf16.msra.mxu1 %v6139_v18  ;;  %v802_v13 = vsel %vm712_vm8, %v6306_v8, %v707_v38  ;;  %5498 = vmatpush3.bf16.msra.mxu0 %v6141_v25  ;;  %v7871_v25 = vld [vmem:[#allocation13_spill] sm:$0xff]  ;;  %v7874_v38 = vld [vmem:[#allocation14_spill] sm:$0xff]  ;;  %v627_v8 = vrot.slane %v625_v15, 2 }
  0xc1   :  { %v5167_v44 = vcombine.low %v799_v55, %v802_v13  ;;  %5475 = vmatprep.subr.bf16.mxu1 %v6142_v30  ;;  %5499 = vmatprep.subr.bf16.mxu0 %v6144_v26  ;;  %v7872_v30 = vld [vmem:[#allocation7_spill] sm:$0xff]  ;;  %v630_v13 = vrot.slane %v628_v32, 3 }
  0xc2   :  { %v649_v21 = vpop.permute.xlu0 %648  ;;  %v7873_v26 = vcombine.low %v7871_v25, %v7872_v30 }
  0xc3   :  { %1977 = vmatprep.mubr.bf16.mxu1 %v5167_v44  ;;  %v651_v9 = vpop.permute.xlu1 %650  ;;  %v787_v50 = vsel %vm712_vm8, %v607_v62, %v649_v21  ;;  %v7875_v62 = vld [vmem:[#allocation8_spill] sm:$0xff]  ;;  %v6160_v44 = vld [vmem:[%s7817_s1 + $0x230] sm:$0xff]   ;;  %v6308_v21 = vld [vmem:[#allocation2 + $0x1c] sm:$0x7] }
  0xc4   :  { %5476 = vmatpush3.bf16.msra.mxu1 %v6143_v51  ;;  %v790_v37 = vsel %vm712_vm8, %v615_v29, %v651_v9  ;;  %5500 = vmatpush3.bf16.msra.mxu0 %v6145_v12  ;;  %v7876_v6 = vcombine.low %v7874_v38, %v7875_v62  ;;  %v6162_v12 = vld [vmem:[%s7817_s1 + $0x288] sm:$0xff]   ;;  %v5152_v9 = vcombine.low %v225_v10, %v6308_v21  ;;  %v5159_v62 = vld [vmem:[%s7818_s5] ss:$0 sm:$0xff] }
  0xc5   :  { %v5166_v60 = vcombine.low %v787_v50, %v790_v37  ;;  %5477 = vmatprep.subr.bf16.mxu1 %v6146_v16  ;;  %5501 = vmatprep.subr.bf16.mxu0 %v6149_v63  ;;  %v6307_v16 = vld [vmem:[#allocation2 + $0x14] sm:$0x7]  ;;  %v6161_v50 = vld [vmem:[%s7817_s1 + $0x278] sm:$0xff]  }
  0xc6   :  { %v930_v56 = vpop.permute.xlu0 %929  ;;  %v5151_v63 = vcombine.low %v224_v53, %v6307_v16 }
  0xc7   :  { %v932_v33 = vpop.permute.xlu1 %931  ;;  %v967_v58 = vsel %vm712_vm8, %v881_v39, %v930_v56  ;;  %v5156_v56 = vrot.slane %v5152_v9, 3 }
  0xc8   :  { %5478 = vmatpush3.bf16.msra.mxu1 %v6148_v54  ;;  %v970_v52 = vsel %vm712_vm8, %v882_v61, %v932_v33  ;;  %v986_v47 = vrot.slane %v967_v58, 1  ;;  %5502 = vmatpush3.bf16.msra.mxu0 %v6151_v2  ;;  %v6309_v54 = vld [vmem:[#allocation2 + $0x30] sm:$0xf]  ;;  %v6310_v61 = vld [vmem:[#allocation2 + $0x38] sm:$0xf]  ;;  %v5155_v34 = vrot.slane %v5151_v63, 3 }
  0xc9   :  { %v989_v35 = vrot.slane %v970_v52, 1  ;;  %5479 = vmatprep.subr.bf16.mxu1 %v6152_v28  ;;  %5503 = vmatprep.subr.bf16.mxu0 %v6155_v22  ;;  %v623_v28 = vor.u32 %v622_v31, %v619_v11  ;;  %v631_v22 = vor.u32 %v630_v13, %v627_v8  ;;  %v883_v58 = vrot.slane %v5145_v19, 1  ;;  %v7878_v11 = vld [vmem:[#allocation12_spill] sm:$0xff] }
  0xca   :  { %v862_v5 = vpop.permute.xlu0 %861  ;;  %v884_v52 = vrot.slane %v5146_v40, 1 }
  0xcb   :  { %v864_v18 = vpop.permute.xlu1 %863  ;;  %v5169_v36 = vcombine.low %v986_v47, %v989_v35  ;;  %v955_v23 = vsel %vm712_vm8, %v7873_v26, %v862_v5  ;;  %v6168_v47 = vld [vmem:[%s7817_s1 + $0x298] sm:$0xff]   ;;  %v5170_v35 = vcombine.low %v5155_v34, %v5156_v56 }
  0xcc   :  { %5480 = vmatpush3.bf16.msra.mxu1 %v6154_v48  ;;  %v958_v55 = vsel %vm712_vm8, %v7876_v6, %v864_v18  ;;  %v985_v51 = vrot.slane %v955_v23, 1  ;;  %5504 = vmatpush3.bf16.msra.mxu0 %v6157_v27 }
  0xcd   :  { %v988_v29 = vrot.slane %v958_v55, 1  ;;  %2026 = vmatprep.mubr.bf16.mxu0 %v5169_v36  ;;  %5505 = vmatprep.subr.bf16.mxu0 %v6158_v43  ;;  %v7877_v36 = vld [vmem:[#allocation11_spill] sm:$0xff] }
  0xce   :  { %5621 = vmatprep.subr.bf16.mxu1 %v6159_v59  ;;  %v709_v4 = vpop.permute.xlu0 %708  ;;  %v7879_v31 = vcombine.low %v7877_v36, %v7878_v11 }
  0xcf   :  { %v5168_v37 = vcombine.low %v985_v51, %v988_v29  ;;  %1978 = vmatmul.mubr.bf16.vlgmr.msra.gmra.mrb[8].mxu1 %v5166_v60  ;;  %v711_v39 = vpop.permute.xlu1 %710  ;;  %v805_v17 = vsel %vm712_vm8, %v6309_v54, %v709_v4  ;;  %v6165_v60 = vld [vmem:[%s7817_s1 + $0x290] sm:$0xff]  }
  0xd0   :  { %v808_v2 = vsel %vm712_vm8, %v6310_v61, %v711_v39  ;;  %5622 = vmatpush3.bf16.msra.mxu1 %v6159_v59  ;;  %5506 = vmatpush3.bf16.msra.mxu0 %v6160_v44 }
  0xd1   :  { %v5178_v57 = vcombine.low %v805_v17, %v808_v2  ;;  %5623 = vmatprep.subr.bf16.mxu1 %v6162_v12  ;;  %5507 = vmatprep.subr.bf16.mxu0 %v6161_v50 }
  0xd2   :  { %v653_v33 = vpop.permute.xlu0 %652 }
  0xd3   :  { %1985 = vmatprep.mubr.bf16.mxu1 %v5178_v57  ;;  %v655_v7 = vpop.permute.xlu1 %654  ;;  %v793_v15 = vsel %vm712_vm8, %v623_v28, %v653_v33 }
  0xd4   :  { %v796_v32 = vsel %vm712_vm8, %v631_v22, %v655_v7  ;;  %5624 = vmatpush3.bf16.msra.mxu1 %v6162_v12  ;;  %5508 = vmatpush3.bf16.msra.mxu0 %v6163_v3 }
  0xd5   :  { %v5177_v48 = vcombine.low %v793_v15, %v796_v32  ;;  %5625 = vmatprep.subr.bf16.mxu1 %v6165_v60 }
  0xd6   :  { %v934_v27 = vpop.permute.xlu0 %933 }
  0xd7   :  { %1986 = vmatmul.mubr.bf16.gmra.mrb[12].mxu1 %v5177_v48  ;;  %v936_v53 = vpop.permute.xlu1 %935  ;;  %v973_v43 = vsel %vm712_vm8, %v883_v58, %v934_v27  ;;  %2027 = vmatmul.mubr.bf16.vlgmr.msra.gmra.mrb[16].mxu0 %v5168_v37 }
  0xd8   :  { %v976_v0 = vsel %vm712_vm8, %v884_v52, %v936_v53  ;;  %5626 = vmatpush3.bf16.msra.mxu1 %v6165_v60  ;;  %v992_v45 = vrot.slane %v973_v43, 1  ;;  %5629 = vmatprep.mubr.msk.bf16.mxu1 %vm712_vm8, %v5170_v35 }
  0xd9   :  { %v995_v41 = vrot.slane %v976_v0, 1  ;;  %5627 = vmatprep.subr.bf16.mxu1 %v6168_v47 }
  0xda   :  { %v866_v49 = vpop.permute.xlu0 %865 }
  0xdb   :  { %v868_v19 = vpop.permute.xlu1 %867  ;;  %v5180_v40 = vcombine.low %v992_v45, %v995_v41  ;;  %v961_v59 = vsel %vm712_vm8, %v5137_v1, %v866_v49 }
  0xdc   :  { %v964_v10 = vsel %vm712_vm8, %v5138_v42, %v868_v19  ;;  %5628 = vmatpush3.bf16.msra.mxu1 %v6168_v47  ;;  %v991_v5 = vrot.slane %v961_v59, 1 }
  0xdd   :  { %v994_v18 = vrot.slane %v964_v10, 1  ;;  %2034 = vmatprep.mubr.bf16.mxu0 %v5180_v40 }
  0xdf   :  { %5630 = vmatmul.mubr.msk.bf16.vlgmr.msra.gmra.mrb[16].mxu1 %vm712_vm8, %v7879_v31  ;;  %v5179_v25 = vcombine.low %v991_v5, %v994_v18 }
  0xe1   :  { %2035 = vmatmul.mubr.bf16.gmra.mrb[20].mxu0 %v5179_v25 }
 0x16a   :  { %v5397_v30 = vpop.f32.mrb[0].mxu0 }
 0x16b   :  { %v5398_v20 = vpop.f32.mrb[1].mxu0 }
 0x16c   :  { %v5399_v24 = vadd.f32 %v5398_v20, %v5397_v30  ;;  %v5400_v1 = vpop.f32.mrb[2].mxu0 }
 0x16d   :  { %v5401_v26 = vpop.f32.mrb[3].mxu0 }
 0x16e   :  { %v5402_v23 = vadd.f32 %v5401_v26, %v5400_v1  ;;  %v1833_v51 = vadd.f32 %v5399_v24, %v5159_v62 }
 0x170   :  { %v1836_v16 = vadd.f32 %v5402_v23, %v5159_v62 }
 0x17e   :  { %v5403_v14 = vpop.f32.mrb[4].mxu0 }
 0x17f   :  { %v5404_v46 = vpop.f32.mrb[5].mxu0 }
 0x180   :  { %v5405_v42 = vadd.f32 %v5404_v46, %v5403_v14  ;;  %v5406_v38 = vpop.f32.mrb[6].mxu0 }
 0x181   :  { %v5407_v6 = vpop.f32.mrb[7].mxu0 }
 0x182   :  { %v5408_v55 = vadd.f32 %v5407_v6, %v5406_v38  ;;  %v5425_v8 = vpop.f32.mrb[0].mxu1  ;;  %v1841_v39 = vadd.f32 %v5405_v42, %v5159_v62 }
 0x183   :  { %v5426_v13 = vpop.f32.mrb[1].mxu1 }
 0x184   :  { %v5427_v29 = vadd.f32 %v5426_v13, %v5425_v8  ;;  %v5428_v44 = vpop.f32.mrb[2].mxu1  ;;  %v1844_v57 = vadd.f32 %v5408_v55, %v5159_v62 }
 0x185   :  { %v5429_v12 = vpop.f32.mrb[3].mxu1 }
 0x186   :  { %v1882_v63 = vadd.f32 %v5427_v29, %v1833_v51  ;;  %v5430_v21 = vadd.f32 %v5429_v12, %v5428_v44 }
 0x188   :  { %v1885_v9 = vadd.f32 %v5430_v21, %v1836_v16 }
 0x18a   :  { %v5431_v50 = vpop.f32.mrb[4].mxu1  ;;  %v5453_v37 = vpop.f32.mrb[8].mxu0 }
 0x18b   :  { %v5432_v4 = vpop.f32.mrb[5].mxu1  ;;  %v5454_v17 = vpop.f32.mrb[9].mxu0 }
 0x18c   :  { %v5433_v54 = vadd.f32 %v5432_v4, %v5431_v50  ;;  %v5434_v61 = vpop.f32.mrb[6].mxu1  ;;  %v5455_v2 = vadd.f32 %v5454_v17, %v5453_v37  ;;  %v5456_v28 = vpop.f32.mrb[10].mxu0 }
 0x18d   :  { %v5435_v22 = vpop.f32.mrb[7].mxu1  ;;  %v5457_v34 = vpop.f32.mrb[11].mxu0 }
 0x18e   :  { %v1890_v3 = vadd.f32 %v5433_v54, %v1841_v39  ;;  %v5436_v60 = vadd.f32 %v5435_v22, %v5434_v61  ;;  %v1931_v56 = vadd.f32 %v5455_v2, %v1882_v63  ;;  %v5458_v33 = vadd.f32 %v5457_v34, %v5456_v28 }
 0x190   :  { %v1893_v7 = vadd.f32 %v5436_v60, %v1844_v57  ;;  %v1934_v15 = vadd.f32 %v5458_v33, %v1885_v9 }
 0x192   :  { %v5459_v32 = vpop.f32.mrb[12].mxu0 }
 0x193   :  { %v5460_v58 = vpop.f32.mrb[13].mxu0 }
 0x194   :  { %v5461_v52 = vadd.f32 %v5460_v58, %v5459_v32  ;;  %v5462_v48 = vpop.f32.mrb[14].mxu0 }
 0x195   :  { %v5463_v47 = vpop.f32.mrb[15].mxu0 }
 0x196   :  { %v1939_v35 = vadd.f32 %v5461_v52, %v1890_v3  ;;  %v5464_v27 = vadd.f32 %v5463_v47, %v5462_v48 }
 0x198   :  { %v1942_v53 = vadd.f32 %v5464_v27, %v1893_v7 }
 0x1a2   :  { %v5481_v43 = vpop.f32.mrb[8].mxu1 }
 0x1a3   :  { %v5482_v0 = vpop.f32.mrb[9].mxu1 }
 0x1a4   :  { %v5483_v45 = vadd.f32 %v5482_v0, %v5481_v43  ;;  %v5484_v41 = vpop.f32.mrb[10].mxu1  ;;  %v6172_v43 = vld [vmem:[%s7819_s2] sm:$0xff]   ;;  %v6173_v0 = vld [vmem:[%s7819_s2 + $0x8] sm:$0xff]  }
 0x1a5   :  { %v5485_v49 = vpop.f32.mrb[11].mxu1  ;;  %5633 = vmatprep.subr.bf16.mxu1 %v6172_v43 }
 0x1a6   :  { %v1980_v19 = vadd.f32 %v5483_v45, %v1931_v56  ;;  %v5486_v40 = vadd.f32 %v5485_v49, %v5484_v41  ;;  %5634 = vmatpush3.bf16.msra.mxu1 %v6172_v43  ;;  %v6174_v45 = vld [vmem:[%s7819_s2 + $0x10] sm:$0xff]   ;;  %v6175_v41 = vld [vmem:[%s7819_s2 + $0x18] sm:$0xff]   ;;  %v6176_v49 = vld [vmem:[%s7819_s2 + $0x20] sm:$0xff]  }
 0x1a7   :  { %5635 = vmatprep.subr.bf16.mxu1 %v6173_v0  ;;  %5645 = vmatprep.subr.bf16.mxu0 %v6176_v49 }
 0x1a8   :  { %v1983_v59 = vadd.f32 %v5486_v40, %v1934_v15  ;;  %5646 = vmatpush3.bf16.msra.mxu0 %v6176_v49  ;;  %v6312_v49 = vld [vmem:[%s7816_s0 + $0x8] sm:$0xff] }
 0x1aa   :  { %v5487_v10 = vpop.f32.mrb[12].mxu1  ;;  %v5509_v5 = vpop.f32.mrb[16].mxu0  ;;  %5636 = vmatpush3.bf16.msra.mxu1 %v6173_v0  ;;  %v6311_v0 = vld [vmem:[%s7816_s0] sm:$0xff] }
 0x1ab   :  { %v5488_v18 = vpop.f32.mrb[13].mxu1  ;;  %v5510_v11 = vpop.f32.mrb[17].mxu0  ;;  %5637 = vmatprep.subr.bf16.mxu1 %v6174_v45 }
 0x1ac   :  { %v5489_v36 = vadd.f32 %v5488_v18, %v5487_v10  ;;  %v5490_v31 = vpop.f32.mrb[14].mxu1  ;;  %v5511_v25 = vadd.f32 %v5510_v11, %v5509_v5  ;;  %v5512_v30 = vpop.f32.mrb[18].mxu0 }
 0x1ad   :  { %v5491_v20 = vpop.f32.mrb[15].mxu1  ;;  %v5513_v26 = vpop.f32.mrb[19].mxu0 }
 0x1ae   :  { %v1988_v24 = vadd.f32 %v5489_v36, %v1939_v35  ;;  %v5492_v1 = vadd.f32 %v5491_v20, %v5490_v31  ;;  %v5514_v23 = vadd.f32 %v5513_v26, %v5512_v30  ;;  %v2029_v14 = vadd.f32 %v5511_v25, %v1980_v19  ;;  %5638 = vmatpush3.bf16.msra.mxu1 %v6174_v45  ;;  %v6177_v19 = vld [vmem:[%s7819_s2 + $0x28] sm:$0xff]   ;;  %v5268_v26 = vld [vmem:[%s7818_s5 + $0x1] ss:$0 sm:$0xff] }
 0x1af   :  { %5639 = vmatprep.subr.bf16.mxu1 %v6175_v41  ;;  %5647 = vmatprep.subr.bf16.mxu0 %v6177_v19 }
 0x1b0   :  { %v1991_v46 = vadd.f32 %v5492_v1, %v1942_v53  ;;  %v2032_v42 = vadd.f32 %v5514_v23, %v1983_v59  ;;  %5648 = vmatpush3.bf16.msra.mxu0 %v6177_v19 }
 0x1b2   :  { %v5631_v38 = vpop.f32.mrb[16].mxu1  ;;  %5640 = vmatpush3.bf16.msra.mxu1 %v6175_v41 }
 0x1b3   :  { %v2077_v62 = vpop.f32.mrb[17].mxu1 }
 0x1b4   :  { %v2078_v6 = vadd.f32 %v2077_v62, %v2029_v14  ;;  %v5515_v55 = vpop.f32.mrb[20].mxu0  ;;  %v5632_v8 = vpop.f32.mrb[18].mxu1 }
 0x1b5   :  { %v5516_v13 = vpop.f32.mrb[21].mxu0  ;;  %v2080_v51 = vpop.f32.mrb[19].mxu1 }
 0x1b6   :  { %v5517_v29 = vadd.f32 %v5516_v13, %v5515_v55  ;;  %v2081_v44 = vadd.f32 %v2080_v51, %v2032_v42  ;;  %v5518_v12 = vpop.f32.mrb[22].mxu0  ;;  %v2094_v16 = vsel %vm712_vm8, %v2078_v6, 0.0 }
 0x1b7   :  { %2095 = vadd.xlane.f32.xlu0 %v2094_v16  ;;  %v5519_v63 = vpop.f32.mrb[23].mxu0 }
 0x1b8   :  { %v2037_v21 = vadd.f32 %v5517_v29, %v1988_v24  ;;  %v5520_v9 = vadd.f32 %v5519_v63, %v5518_v12  ;;  %v2097_v50 = vsel %vm712_vm8, %v2081_v44, 0.0 }
 0x1b9   :  { %2098 = vadd.xlane.f32.xlu1 %v2097_v50  ;;  %v7880_v50 = vmov 0  }
 0x1ba   :  { %v2040_v37 = vadd.f32 %v5520_v9, %v1991_v46  ;;  %v2086_v4 = vadd.f32 %v5631_v38, %v2037_v21  ;;  %v5269_v38 = vld [vmem:[%s7818_s5 + $0x2] ss:$0 sm:$0xff] }
 0x1bc   :  { %v2100_v39 = vsel %vm712_vm8, %v2086_v4, 0.0  ;;  %v2089_v54 = vadd.f32 %v5632_v8, %v2040_v37  ;;  %v6178_v37 = vld [vmem:[%s7819_s2 + $0x30] sm:$0xff]  }
 0x1bd   :  { %2101 = vadd.xlane.f32.xlu0 %v2100_v39  ;;  %5649 = vmatprep.subr.bf16.mxu0 %v6178_v37  ;;  %v5270_v39 = vld [vmem:[%s7818_s5 + $0x3] ss:$0 sm:$0xff] }
 0x1be   :  { %v2103_v17 = vsel %vm712_vm8, %v2089_v54, 0.0  ;;  %5650 = vmatpush3.bf16.msra.mxu0 %v6178_v37  ;;  %v6186_v37 = vld [vmem:[%s7820_s3 + $0x20] ss:$8 sps:$4 sm:$0xff]  }
 0x1c1   :  { %2104 = vadd.xlane.f32.xlu0 %v2103_v17 }
 0x244   :  { %v2096_v61 = vpop.xlane.xlu0 %2095 }
 0x245   :  { %v2107_v2 = vmul.f32 0.015625, %v2096_v61 }
 0x246   :  { %v2099_v28 = vpop.xlane.xlu1 %2098 }
 0x247   :  { %v2111_v22 = vsub.f32 %v2078_v6, %v2107_v2  ;;  %v2108_v57 = vmul.f32 0.015625, %v2099_v28 }
 0x249   :  { %v2112_v3 = vsub.f32 %v2081_v44, %v2108_v57  ;;  %v2115_v60 = vmul.f32 %v2111_v22, %v2111_v22 }
 0x24a   :  { %v2102_v34 = vpop.xlane.xlu0 %2101 }
 0x24b   :  { %v2109_v56 = vmul.f32 0.015625, %v2102_v34  ;;  %v2119_v33 = vsel %vm712_vm8, %v2115_v60, 0.0  ;;  %v2116_v7 = vmul.f32 %v2112_v3, %v2112_v3 }
 0x24c   :  { %2120 = vadd.xlane.f32.xlu1 %v2119_v33 }
 0x24d   :  { %v2113_v15 = vsub.f32 %v2086_v4, %v2109_v56  ;;  %v2122_v32 = vsel %vm712_vm8, %v2116_v7, 0.0  ;;  %v6179_v4 = vld [vmem:[%s7819_s2 + $0x38] sm:$0xff]  }
 0x24e   :  { %v2105_v58 = vpop.xlane.xlu0 %2104  ;;  %2123 = vadd.xlane.f32.xlu0 %v2122_v32  ;;  %5651 = vmatprep.subr.bf16.mxu0 %v6179_v4  ;;  %v5285_v32 = vld [vmem:[%s7818_s5 + $0x4] ss:$0 sm:$0xff] }
 0x24f   :  { %v2110_v52 = vmul.f32 0.015625, %v2105_v58  ;;  %v2117_v48 = vmul.f32 %v2113_v15, %v2113_v15  ;;  %5652 = vmatpush3.bf16.msra.mxu0 %v6179_v4  ;;  %v6191_v4 = vld [vmem:[%s7820_s3 + $0x34] ss:$8 sps:$4 sm:$0xff]  }
 0x251   :  { %v2114_v47 = vsub.f32 %v2089_v54, %v2110_v52  ;;  %v2125_v35 = vsel %vm712_vm8, %v2117_v48, 0.0 }
 0x252   :  { %2126 = vadd.xlane.f32.xlu1 %v2125_v35 }
 0x253   :  { %v2118_v27 = vmul.f32 %v2114_v47, %v2114_v47 }
 0x255   :  { %v2128_v53 = vsel %vm712_vm8, %v2118_v27, 0.0 }
 0x256   :  { %2129 = vadd.xlane.f32.xlu0 %v2128_v53 }
 0x2d9   :  { %v2121_v40 = vpop.xlane.xlu1 %2120 }
 0x2da   :  { %v2131_v59 = vmul.f32 0.015625, %v2121_v40  ;;  %v6313_v40 = vld [vmem:[%s7816_s0 + $0x10] sm:$0xff] }
 0x2db   :  { %v2124_v10 = vpop.xlane.xlu0 %2123 }
 0x2dc   :  { %v2135_v5 = vadd.f32 1e-05, %v2131_v59  ;;  %v2132_v18 = vmul.f32 0.015625, %v2124_v10 }
 0x2de   :  { %6204 = vrsqrt.f32 %v2135_v5  ;;  %v2136_v36 = vadd.f32 1e-05, %v2132_v18  ;;  %v6314_v5 = vld [vmem:[%s7816_s0 + $0x18] sm:$0xff] }
 0x2df   :  { %v2127_v11 = vpop.xlane.xlu1 %2126 }
 0x2e0   :  { %6206 = vrsqrt.f32 %v2136_v36  ;;  %v2133_v31 = vmul.f32 0.015625, %v2127_v11 }
 0x2e2   :  { %v2137_v25 = vadd.f32 1e-05, %v2133_v31 }
 0x2e3   :  { %v2130_v30 = vpop.xlane.xlu0 %2129 }
 0x2e4   :  { %6208 = vrsqrt.f32 %v2137_v25  ;;  %v2134_v20 = vmul.f32 0.015625, %v2130_v30 }
 0x2e6   :  { %v2138_v24 = vadd.f32 1e-05, %v2134_v20 }
 0x2e8   :  { %v6205_v1 = vpop.eup %6204  ;;  %6210 = vrsqrt.f32 %v2138_v24 }
 0x2e9   :  { %v2143_v23 = vmul.f32 %v6205_v1, %v2111_v22 }
 0x2ea   :  { %v6207_v14 = vpop.eup %6206 }
 0x2eb   :  { %v2144_v46 = vmul.f32 %v6207_v14, %v2112_v3  ;;  %v2151_v42 = vmul.f32 %v5268_v26, %v2143_v23 }
 0x2ed   :  { %v2152_v62 = vmul.f32 %v5268_v26, %v2144_v46  ;;  %v2159_v8 = vadd.f32 %v5269_v38, %v2151_v42 }
 0x2ee   :  { %v6209_v6 = vpop.eup %6208 }
 0x2ef   :  { %v2145_v55 = vmul.f32 %v6209_v6, %v2113_v15  ;;  %v2160_v13 = vadd.f32 %v5269_v38, %v2152_v62 }
 0x2f1   :  { %v2163_v51 = vpack.c.bf16 %v2160_v13, %v2159_v8  ;;  %v2153_v12 = vmul.f32 %v5268_v26, %v2145_v55 }
 0x2f2   :  { %v6211_v29 = vpop.eup %6210 }
 0x2f3   :  { %v2146_v44 = vmul.f32 %v6211_v29, %v2114_v47  ;;  %5641 = vmatprep.mubr.msk.bf16.mxu1 %vm712_vm8, %v2163_v51  ;;  %v2161_v63 = vadd.f32 %v5269_v38, %v2153_v12  ;;  %v6182_v12 = vld [vmem:[%s7820_s3 + $0x4] ss:$8 sps:$4 sm:$0xff]  }
 0x2f4   :  { %2507 = vmatprep.subr.bf16.mxu1 %v6182_v12 }
 0x2f5   :  { %v2154_v16 = vmul.f32 %v5268_v26, %v2146_v44 }
 0x2f7   :  { %v2162_v21 = vadd.f32 %v5269_v38, %v2154_v16  ;;  %v6180_v16 = vld [vmem:[%s7820_s3] ss:$8 sps:$4 sm:$0xff]  }
 0x2f9   :  { %v2164_v9 = vpack.c.bf16 %v2162_v21, %v2161_v63  ;;  %v6185_v63 = vld [vmem:[%s7820_s3 + $0x14] ss:$8 sps:$4 sm:$0xff]   ;;  %v6183_v21 = vld [vmem:[%s7820_s3 + $0x10] ss:$8 sps:$4 sm:$0xff]  }
 0x2fb   :  { %5642 = vmatmul.mubr.msk.bf16.vlgmr.msra.gmra.mrb[20].mxu1 %vm712_vm8, %v2164_v9  ;;  %v6188_v9 = vld [vmem:[%s7820_s3 + $0x24] ss:$8 sps:$4 sm:$0xff]  }
 0x2fc   :  { %2539 = vmatprep.mubr.bf16.mxu1 %v7880_v50  ;;  %2508 = vmatpush1.bf16.msra.mxu1 %v6180_v16 }
 0x2fd   :  { %2509 = vmatprep.subr.bf16.mxu1 %v6185_v63 }
 0x300   :  { %2510 = vmatpush1.bf16.msra.mxu1 %v6183_v21 }
 0x301   :  { %2511 = vmatprep.subr.bf16.mxu1 %v6188_v9 }
 0x304   :  { %2512 = vmatpush1.bf16.msra.mxu1 %v6186_v37 }
 0x305   :  { %2513 = vmatprep.subr.bf16.mxu1 %v6191_v4 }
 0x3ce   :  { %v5643_v54 = vpop.f32.mrb[20].mxu1 }
 0x3cf   :  { %v2251_v17 = vadd.f32 %v5643_v54, %v5270_v39  ;;  %v2242_v61 = vpop.f32.mrb[21].mxu1 }
 0x3d0   :  { %v2243_v2 = vadd.f32 %v5270_v39, %v2242_v61  ;;  %v5644_v28 = vpop.f32.mrb[22].mxu1 }
 0x3d1   :  { %v2254_v22 = vadd.f32 %v5644_v28, %v5270_v39  ;;  %v2245_v57 = vpop.f32.mrb[23].mxu1  ;;  %v2259_v60 = vmax.f32 %v2251_v17, 0.0 }
 0x3d2   :  { %v2246_v3 = vadd.f32 %v5270_v39, %v2245_v57  ;;  %v2257_v56 = vmax.f32 %v2243_v2, 0.0  ;;  %v6189_v39 = vld [vmem:[%s7820_s3 + $0x30] ss:$8 sps:$4 sm:$0xff]  }
 0x3d3   :  { %v2260_v34 = vmax.f32 %v2254_v22, 0.0  ;;  %2514 = vmatpush1.bf16.msra.mxu1 %v6189_v39 }
 0x3d4   :  { %v2258_v33 = vmax.f32 %v2246_v3, 0.0 }
 0x3d5   :  { %v2262_v7 = vpack.c.bf16 %v2260_v34, %v2259_v60 }
 0x3d6   :  { %v2261_v15 = vpack.c.bf16 %v2258_v33, %v2257_v56 }
 0x3d8   :  { %5653 = vmatprep.mubr.msk.bf16.mxu0 %vm712_vm8, %v2261_v15  ;;  %v5292_v15 = vld [vmem:[%s7818_s5 + $0x5] ss:$0 sm:$0xff] }
 0x3d9   :  { %5654 = vmatmul.mubr.msk.bf16.vlgmr.msra.gmra.mrb[24].mxu0 %vm712_vm8, %v2262_v7 }
 0x4ac   :  { %v5655_v58 = vpop.f32.mrb[24].mxu0 }
 0x4ad   :  { %v2341_v52 = vpop.f32.mrb[25].mxu0  ;;  %v2350_v48 = vadd.f32 %v5655_v58, %v5285_v32 }
 0x4ae   :  { %v2342_v47 = vadd.f32 %v5285_v32, %v2341_v52  ;;  %v5656_v35 = vpop.f32.mrb[26].mxu0 }
 0x4af   :  { %v2344_v27 = vpop.f32.mrb[27].mxu0  ;;  %v2353_v53 = vadd.f32 %v5656_v35, %v5285_v32  ;;  %v2358_v59 = vadd.f32 %v6313_v40, %v2350_v48  ;;  %v5293_v35 = vld [vmem:[%s7818_s5 + $0x6] ss:$0 sm:$0xff] }
 0x4b0   :  { %v2345_v43 = vadd.f32 %v5285_v32, %v2344_v27  ;;  %v2356_v45 = vadd.f32 %v6311_v0, %v2342_v47 }
 0x4b1   :  { %v2359_v18 = vadd.f32 %v6314_v5, %v2353_v53  ;;  %v2368_v36 = vsel %vm712_vm8, %v2358_v59, 0.0 }
 0x4b2   :  { %v2362_v41 = vsel %vm712_vm8, %v2356_v45, 0.0  ;;  %v2357_v19 = vadd.f32 %v6312_v49, %v2345_v43 }
 0x4b3   :  { %2363 = vadd.xlane.f32.xlu1 %v2362_v41  ;;  %v2371_v11 = vsel %vm712_vm8, %v2359_v18, 0.0 }
 0x4b4   :  { %v2365_v10 = vsel %vm712_vm8, %v2357_v19, 0.0 }
 0x4b5   :  { %2366 = vadd.xlane.f32.xlu0 %v2365_v10 }
 0x4b7   :  { %2369 = vadd.xlane.f32.xlu1 %v2368_v36 }
 0x4b9   :  { %2372 = vadd.xlane.f32.xlu0 %v2371_v11 }
 0x540   :  { %v2364_v31 = vpop.xlane.xlu1 %2363 }
 0x541   :  { %v2374_v25 = vmul.f32 0.015625, %v2364_v31  ;;  %v2438_v31 = vld [vmem:[%s7821_s7] sm:$0x3]  ;;  %s6317_s7 = smov 112  }
 0x542   :  { %v2367_v30 = vpop.xlane.xlu0 %2366 }
 0x543   :  { %v2378_v20 = vsub.f32 %v2356_v45, %v2374_v25  ;;  %v2375_v24 = vmul.f32 0.015625, %v2367_v30 }
 0x544   :  { %v2370_v1 = vpop.xlane.xlu1 %2369 }
 0x545   :  { %v2379_v26 = vsub.f32 %v2357_v19, %v2375_v24  ;;  %v2376_v23 = vmul.f32 0.015625, %v2370_v1  ;;  %v2382_v14 = vmul.f32 %v2378_v20, %v2378_v20 }
 0x546   :  { %v2373_v46 = vpop.xlane.xlu0 %2372 }
 0x547   :  { %v2380_v42 = vsub.f32 %v2358_v59, %v2376_v23  ;;  %v2377_v38 = vmul.f32 0.015625, %v2373_v46  ;;  %v2386_v62 = vsel %vm712_vm8, %v2382_v14, 0.0  ;;  %v2383_v6 = vmul.f32 %v2379_v26, %v2379_v26 }
 0x548   :  { %2387 = vadd.xlane.f32.xlu1 %v2386_v62 }
 0x549   :  { %v2381_v55 = vsub.f32 %v2359_v18, %v2377_v38  ;;  %v2389_v8 = vsel %vm712_vm8, %v2383_v6, 0.0  ;;  %v2384_v13 = vmul.f32 %v2380_v42, %v2380_v42  ;;  %v2451_v18 = vlaneseq }
 0x54a   :  { %2390 = vadd.xlane.f32.xlu0 %v2389_v8 }
 0x54b   :  { %v2392_v51 = vsel %vm712_vm8, %v2384_v13, 0.0  ;;  %v2385_v29 = vmul.f32 %v2381_v55, %v2381_v55  ;;  %v7241_v36 = vshrl.u32 %v2451_v18, 7 }
 0x54c   :  { %2393 = vadd.xlane.f32.xlu1 %v2392_v51 }
 0x54d   :  { %v2395_v44 = vsel %vm712_vm8, %v2385_v29, 0.0  ;;  %v2453_v11 = vsub.s32 0, %v7241_v36 }
 0x54e   :  { %2396 = vadd.xlane.f32.xlu0 %v2395_v44 }
 0x54f   :  { %v2454_v25 = vrot.slane %v2438_v31, %v2453_v11 }
 0x5d5   :  { %v2388_v54 = vpop.xlane.xlu1 %2387 }
 0x5d6   :  { %v2398_v17 = vmul.f32 0.015625, %v2388_v54 }
 0x5d7   :  { %v2391_v61 = vpop.xlane.xlu0 %2390 }
 0x5d8   :  { %v2402_v2 = vadd.f32 1e-05, %v2398_v17  ;;  %v2399_v28 = vmul.f32 0.015625, %v2391_v61 }
 0x5d9   :  { %v2394_v22 = vpop.xlane.xlu1 %2393 }
 0x5da   :  { %6212 = vrsqrt.f32 %v2402_v2  ;;  %v2403_v57 = vadd.f32 1e-05, %v2399_v28  ;;  %v2400_v3 = vmul.f32 0.015625, %v2394_v22 }
 0x5db   :  { %v2397_v60 = vpop.xlane.xlu0 %2396 }
 0x5dc   :  { %6214 = vrsqrt.f32 %v2403_v57  ;;  %v2404_v34 = vadd.f32 1e-05, %v2400_v3  ;;  %v2401_v56 = vmul.f32 0.015625, %v2397_v60 }
 0x5de   :  { %6216 = vrsqrt.f32 %v2404_v34  ;;  %v2405_v33 = vadd.f32 1e-05, %v2401_v56 }
 0x5e0   :  { %6218 = vrsqrt.f32 %v2405_v33 }
 0x5e4   :  { %v6213_v7 = vpop.eup %6212 }
 0x5e5   :  { %v2410_v32 = vmul.f32 %v6213_v7, %v2378_v20 }
 0x5e6   :  { %v6215_v58 = vpop.eup %6214 }
 0x5e7   :  { %v2418_v52 = vmul.f32 %v5292_v15, %v2410_v32  ;;  %v2411_v48 = vmul.f32 %v6215_v58, %v2379_v26 }
 0x5e8   :  { %v6217_v47 = vpop.eup %6216 }
 0x5e9   :  { %v2419_v27 = vmul.f32 %v5292_v15, %v2411_v48  ;;  %v7226_v0 = vadd.f32 %v5293_v35, %v2418_v52  ;;  %v2412_v41 = vmul.f32 %v6217_v47, %v2380_v42 }
 0x5ea   :  { %v6219_v53 = vpop.eup %6218 }
 0x5eb   :  { %v2413_v43 = vmul.f32 %v6219_v53, %v2381_v55  ;;  %v7228_v45 = vadd.f32 %v5293_v35, %v2419_v27  ;;  %v2420_v40 = vmul.f32 %v5292_v15, %v2412_v41  ;;  %v6318_v55 = vmov 0.0  }
 0x5ec   :  { %5657 = vmatprep.subr.bf16.mxu0 %v6318_v55  ;;  %5669 = vmatprep.subr.bf16.mxu1 %v6318_v55 }
 0x5ed   :  { %v2448_v49 = vpack.c.bf16 %v7228_v45, %v7226_v0  ;;  %v2421_v19 = vmul.f32 %v5292_v15, %v2413_v43  ;;  %v7236_v10 = vadd.f32 %v5293_v35, %v2420_v40  ;;  %5659 = vmatprep.mubr.msk.bf16.mxu0 %vm6320_vm9, %v6318_v55 }
 0x5ef   :  { %5302 = vmatmul.mubr.msk.bf16.vlgmr.msra.gmra.mrb[24].mxu1 %vm712_vm8, %v2448_v49  ;;  %v7234_v59 = vadd.f32 %v5293_v35, %v2421_v19 }
 0x5f0   :  { %2549 = vmatprep.mubr.bf16.mxu1 %v7880_v50  ;;  %v2457_v50 = vsub.s32 1, %v7241_v36 }
 0x5f1   :  { %v2449_v5 = vpack.c.bf16 %v7234_v59, %v7236_v10 }
 0x5f2   :  { %v2458_v20 = vrot.slane %v2438_v31, %v2457_v50 }
 0x5f7   :  { %5303 = vmatmul.mubr.msk.bf16.gmra.mrb[28].mxu1 %vm712_vm8, %v2449_v5 }
 0x5f8   :  { %5671 = vmatprep.mubr.msk.bf16.mxu1 %vm6320_vm9, %v6318_v55 }
 0x6c2   :  { %v2541_v30 = vpop.f32.mrb[24].mxu1 }
 0x6c3   :  { %v2543_v24 = vpop.f32.mrb[25].mxu1  ;;  %v2542_v1 = vadd.f32 %v2541_v30, %v2454_v25 }
 0x6c4   :  { %v2545_v26 = vpop.f32.mrb[26].mxu1  ;;  %v7250_v42 = vadd.f32 %v2543_v24, %v2458_v20 }
 0x6c5   :  { %v2546_v23 = vadd.f32 %v2545_v26, %v2454_v25  ;;  %v2547_v14 = vpop.f32.mrb[27].mxu1  ;;  %v7252_v62 = vmul.f32 0.25, %v2542_v1  ;;  %v2660_v61 = vpack.c.bf16 %v2542_v1, %v2542_v1 }
 0x6c6   :  { %v7248_v46 = vadd.f32 %v2547_v14, %v2458_v20 }
 0x6c7   :  { %v5896_v38 = vpack.i.bf16 %v2546_v23, %v2542_v1  ;;  %v7254_v6 = vmul.f32 0.25, %v2546_v23  ;;  %v2661_v2 = vpack.c.bf16 %v2546_v23, %v2546_v23  ;;  %v2604_v18 = vpack.c.bf16 %v7252_v62, %v7252_v62 }
 0x6c8   :  { %v7260_v8 = vpack.i.bf16 %v7248_v46, %v7250_v42 }
 0x6c9   :  { %5897 = vrot.lane.b32.xlu1 %v5896_v38, %s6317_s7  ;;  %v7264_v51 = vpack.i.bf16 %v7254_v6, %v7252_v62  ;;  %v2605_v23 = vpack.c.bf16 %v7254_v6, %v7254_v6 }
 0x6ca   :  { %v2551_v13 = vpop.f32.mrb[28].mxu1 }
 0x6cb   :  { %v2553_v29 = vpop.f32.mrb[29].mxu1  ;;  %v2552_v44 = vadd.f32 %v2551_v13, %v2454_v25 }
 0x6cc   :  { %v7267_v12 = vadd.f32 %v2553_v29, %v2458_v20  ;;  %v2555_v16 = vpop.f32.mrb[30].mxu1 }
 0x6cd   :  { %v2556_v63 = vadd.f32 %v2555_v16, %v2454_v25  ;;  %5907 = vrot.lane.b32.xlu1 %v5896_v38, %s6319_s20  ;;  %v2557_v21 = vpop.f32.mrb[31].mxu1  ;;  %v7274_v4 = vmul.f32 0.25, %v2552_v44  ;;  %v2662_v22 = vpack.c.bf16 %v2552_v44, %v2552_v44 }
 0x6ce   :  { %v7270_v9 = vadd.f32 %v2557_v21, %v2458_v20 }
 0x6cf   :  { %v5911_v37 = vpack.i.bf16 %v2556_v63, %v2552_v44  ;;  %v7276_v39 = vmul.f32 0.25, %v2556_v63  ;;  %v2663_v28 = vpack.c.bf16 %v2556_v63, %v2556_v63 }
 0x6d0   :  { %v7282_v54 = vpack.i.bf16 %v7270_v9, %v7267_v12 }
 0x6d1   :  { %5912 = vrot.lane.b32.xlu1 %v5911_v37, %s6319_s20  ;;  %5902 = vrot.lane.b32.xlu0 %v5911_v37, %s6317_s7  ;;  %v7288_v17 = vpack.i.bf16 %v7276_v39, %v7274_v4  ;;  %v2607_v63 = vpack.c.bf16 %v7276_v39, %v7276_v39 }
 0x6d5   :  { %2733 = vrot.lane.b32.xlu1 %v2660_v61, %s6316_s19  ;;  %5917 = vrot.lane.b32.xlu0 %v5896_v38, %s6321_s21  ;;  %v2606_v38 = vpack.c.bf16 %v7274_v4, %v7274_v4 }
 0x6d9   :  { %2783 = vrot.lane.b32.xlu1 %v2661_v2, %s6316_s19  ;;  %5922 = vrot.lane.b32.xlu0 %v5911_v37, %s6321_s21 }
 0x6dd   :  { %2881 = vrot.lane.b32.xlu1 %v2663_v28, %s6316_s19  ;;  %2832 = vrot.lane.b32.xlu0 %v2662_v22, %s6316_s19 }
 0x73b   :  { %v5898_v57 = vpop.permute.xlu1 %5897 }
 0x73c   :  { %v5900_v3 = vunpack.i.h.bf16 %v5898_v57  ;;  %v5899_v60 = vunpack.i.l.bf16 %v5898_v57 }
 0x73e   :  { %v2665_v34 = vpack.c.bf16 %v5900_v3, %v5900_v3  ;;  %v2664_v56 = vpack.c.bf16 %v5899_v60, %v5899_v60 }
 0x73f   :  { %v5908_v33 = vpop.permute.xlu1 %5907 }
 0x740   :  { %2979 = vrot.lane.b32.xlu1 %v2665_v34, %s6316_s19  ;;  %2930 = vrot.lane.b32.xlu0 %v2664_v56, %s6316_s19  ;;  %v5909_v52 = vunpack.i.l.bf16 %v5908_v33  ;;  %v5910_v43 = vunpack.i.h.bf16 %v5908_v33 }
 0x742   :  { %v2668_v41 = vpack.c.bf16 %v5909_v52, %v5909_v52  ;;  %v2669_v40 = vpack.c.bf16 %v5910_v43, %v5910_v43 }
 0x743   :  { %v5903_v7 = vpop.permute.xlu0 %5902  ;;  %v5913_v15 = vpop.permute.xlu1 %5912 }
 0x744   :  { %v5905_v32 = vunpack.i.h.bf16 %v5903_v7  ;;  %v5904_v58 = vunpack.i.l.bf16 %v5903_v7  ;;  %5927 = vrot.lane.b32.xlu0 %v7264_v51, %s6317_s7  ;;  %v5914_v5 = vunpack.i.l.bf16 %v5913_v15  ;;  %v5915_v11 = vunpack.i.h.bf16 %v5913_v15 }
 0x746   :  { %v2667_v48 = vpack.c.bf16 %v5905_v32, %v5905_v32  ;;  %v2666_v47 = vpack.c.bf16 %v5904_v58, %v5904_v58  ;;  %v2670_v30 = vpack.c.bf16 %v5914_v5, %v5914_v5  ;;  %v2671_v20 = vpack.c.bf16 %v5915_v11, %v5915_v11 }
 0x747   :  { %v5918_v35 = vpop.permute.xlu0 %5917  ;;  %v2734_v27 = vpop.permute.xlu1 %2733 }
 0x748   :  { %v2740_v53 = vsel %vm2735_vm10, %v2734_v27, 0  ;;  %3028 = vrot.lane.b32.xlu1 %v2666_v47, %s6316_s19  ;;  %3077 = vrot.lane.b32.xlu0 %v2667_v48, %s6316_s19  ;;  %v5919_v24 = vunpack.i.l.bf16 %v5918_v35  ;;  %v5920_v1 = vunpack.i.h.bf16 %v5918_v35 }
 0x749   :  { %5658 = vmatpush3.bf16.xpose.msra.mxu0 %v2740_v53 }
 0x74a   :  { %5663 = vmatprep.subr.bf16.mxu0 %v6318_v55  ;;  %v2672_v14 = vpack.c.bf16 %v5919_v24, %v5919_v24  ;;  %v2673_v13 = vpack.c.bf16 %v5920_v1, %v5920_v1 }
 0x74b   :  { %v5923_v49 = vpop.permute.xlu0 %5922  ;;  %v2784_v19 = vpop.permute.xlu1 %2783 }
 0x74c   :  { %5932 = vrot.lane.b32.xlu1 %v7288_v17, %s6317_s7  ;;  %3126 = vrot.lane.b32.xlu0 %v2668_v41, %s6316_s19  ;;  %v2789_v50 = vsel %vm2735_vm10, %v2784_v19, 0  ;;  %v5924_v29 = vunpack.i.l.bf16 %v5923_v49  ;;  %v5925_v6 = vunpack.i.h.bf16 %v5923_v49 }
 0x74e   :  { %v2674_v44 = vpack.c.bf16 %v5924_v29, %v5924_v29  ;;  %v2675_v16 = vpack.c.bf16 %v5925_v6, %v5925_v6 }
 0x74f   :  { %v2833_v31 = vpop.permute.xlu0 %2832  ;;  %v2882_v26 = vpop.permute.xlu1 %2881 }
 0x750   :  { %v2838_v25 = vsel %vm2735_vm10, %v2833_v31, 0  ;;  %5660 = vmatmul.mubr.msk.bf16.vlgmr.msra.gmra.mrb[28].mxu0 %vm2735_vm10, %v2604_v18  ;;  %3175 = vrot.lane.b32.xlu1 %v2669_v40, %s6316_s19  ;;  %v2887_v62 = vsel %vm2735_vm10, %v2882_v26, 0 }
 0x751   :  { %5937 = vrot.lane.b32.xlu0 %v7264_v51, %s6319_s20  ;;  %5664 = vmatpush3.bf16.xpose.msra.mxu0 %v2789_v50 }
 0x752   :  { %5670 = vmatpush3.bf16.xpose.msra.mxu1 %v2838_v25  ;;  %5665 = vmatprep.mubr.msk.bf16.mxu0 %vm6320_vm9, %v6318_v55 }
 0x753   :  { %5675 = vmatprep.subr.bf16.mxu0 %v6318_v55  ;;  %5681 = vmatprep.subr.bf16.mxu1 %v6318_v55 }
 0x754   :  { %3224 = vrot.lane.b32.xlu1 %v2670_v30, %s6316_s19 }
 0x755   :  { %3273 = vrot.lane.b32.xlu0 %v2671_v20, %s6316_s19 }
 0x758   :  { %5666 = vmatmul.mubr.msk.bf16.vlgmr.msra.gmra.mrb[32].mxu0 %vm2735_vm10, %v2605_v23  ;;  %5942 = vrot.lane.b32.xlu1 %v7288_v17, %s6319_s20 }
 0x759   :  { %5672 = vmatmul.mubr.msk.bf16.vlgmr.msra.gmra.mrb[32].mxu1 %vm2735_vm10, %v2606_v38  ;;  %3322 = vrot.lane.b32.xlu0 %v2672_v14, %s6316_s19 }
 0x75a   :  { %5676 = vmatpush3.bf16.xpose.msra.mxu0 %v2887_v62  ;;  %5677 = vmatprep.mubr.msk.bf16.mxu0 %vm6320_vm9, %v6318_v55 }
 0x75b   :  { %5687 = vmatprep.subr.bf16.mxu0 %v6318_v55  ;;  %5683 = vmatprep.mubr.msk.bf16.mxu1 %vm6320_vm9, %v6318_v55 }
 0x75c   :  { %3371 = vrot.lane.b32.xlu1 %v2673_v13, %s6316_s19 }
 0x75d   :  { %5947 = vrot.lane.b32.xlu0 %v7264_v51, %s6321_s21 }
 0x760   :  { %3420 = vrot.lane.b32.xlu1 %v2674_v44, %s6316_s19 }
 0x761   :  { %5678 = vmatmul.mubr.msk.bf16.vlgmr.msra.gmra.mrb[36].mxu0 %vm2735_vm10, %v2607_v63  ;;  %3469 = vrot.lane.b32.xlu0 %v2675_v16, %s6316_s19 }
 0x762   :  { %5689 = vmatprep.mubr.msk.bf16.mxu0 %vm6320_vm9, %v6318_v55 }
 0x764   :  { %5952 = vrot.lane.b32.xlu1 %v7288_v17, %s6321_s21 }
 0x7b2   :  { %v2980_v21 = vpop.permute.xlu1 %2979  ;;  %v2931_v37 = vpop.permute.xlu0 %2930 }
 0x7b3   :  { %v2985_v51 = vsel %vm2735_vm10, %v2980_v21, 0  ;;  %v2936_v4 = vsel %vm2735_vm10, %v2931_v37, 0  ;;  %v2716_v21 = vpack.c.bf16 %v7250_v42, %v7250_v42  ;;  %v2717_v37 = vpack.c.bf16 %v7248_v46, %v7248_v46 }
 0x7b4   :  { %5682 = vmatpush3.bf16.xpose.msra.mxu1 %v2936_v4  ;;  %5688 = vmatpush3.bf16.xpose.msra.mxu0 %v2985_v51 }
 0x7b5   :  { %5693 = vmatprep.subr.bf16.mxu1 %v6318_v55  ;;  %5699 = vmatprep.subr.bf16.mxu0 %v6318_v55 }
 0x7b6   :  { %v5928_v39 = vpop.permute.xlu0 %5927 }
 0x7b7   :  { %v5930_v61 = vunpack.i.h.bf16 %v5928_v39  ;;  %v5929_v2 = vunpack.i.l.bf16 %v5928_v39  ;;  %v3715_v39 = vsel %vm3713_vm11, %v2716_v21, 0 }
 0x7b9   :  { %v2609_v28 = vpack.c.bf16 %v5930_v61, %v5930_v61  ;;  %v2608_v22 = vpack.c.bf16 %v5929_v2, %v5929_v2  ;;  %v3761_v61 = vsel %vm3713_vm11, %v2717_v37, 0 }
 0x7ba   :  { %v3029_v57 = vpop.permute.xlu1 %3028  ;;  %v3078_v3 = vpop.permute.xlu0 %3077 }
 0x7bb   :  { %v3034_v17 = vsel %vm2735_vm10, %v3029_v57, 0  ;;  %v3083_v60 = vsel %vm2735_vm10, %v3078_v3, 0  ;;  %5684 = vmatmul.mubr.msk.bf16.vlgmr.msra.gmra.mrb[36].mxu1 %vm2735_vm10, %v2608_v22  ;;  %5690 = vmatmul.mubr.msk.bf16.vlgmr.msra.gmra.mrb[40].mxu0 %vm2735_vm10, %v2609_v28 }
 0x7bc   :  { %5694 = vmatpush3.bf16.xpose.msra.mxu1 %v3034_v17  ;;  %5700 = vmatpush3.bf16.xpose.msra.mxu0 %v3083_v60 }
 0x7bd   :  { %5695 = vmatprep.mubr.msk.bf16.mxu1 %vm6320_vm9, %v6318_v55  ;;  %5701 = vmatprep.mubr.msk.bf16.mxu0 %vm6320_vm9, %v6318_v55 }
 0x7be   :  { %v5933_v34 = vpop.permute.xlu1 %5932  ;;  %v3127_v56 = vpop.permute.xlu0 %3126  ;;  %5705 = vmatprep.subr.bf16.mxu1 %v6318_v55  ;;  %5711 = vmatprep.subr.bf16.mxu0 %v6318_v55 }
 0x7bf   :  { %v5935_v33 = vunpack.i.h.bf16 %v5933_v34  ;;  %v5934_v7 = vunpack.i.l.bf16 %v5933_v34  ;;  %v3132_v52 = vsel %vm2735_vm10, %v3127_v56, 0 }
 0x7c1   :  { %v2611_v15 = vpack.c.bf16 %v5935_v33, %v5935_v33  ;;  %v2610_v32 = vpack.c.bf16 %v5934_v7, %v5934_v7 }
 0x7c2   :  { %v3176_v58 = vpop.permute.xlu1 %3175 }
 0x7c3   :  { %v3181_v48 = vsel %vm2735_vm10, %v3176_v58, 0  ;;  %v5938_v47 = vpop.permute.xlu0 %5937  ;;  %5696 = vmatmul.mubr.msk.bf16.vlgmr.msra.gmra.mrb[40].mxu1 %vm2735_vm10, %v2610_v32  ;;  %5702 = vmatmul.mubr.msk.bf16.vlgmr.msra.gmra.mrb[44].mxu0 %vm2735_vm10, %v2611_v15 }
 0x7c4   :  { %5706 = vmatpush3.bf16.xpose.msra.mxu1 %v3132_v52  ;;  %5712 = vmatpush3.bf16.xpose.msra.mxu0 %v3181_v48  ;;  %v5940_v35 = vunpack.i.h.bf16 %v5938_v47  ;;  %v5939_v27 = vunpack.i.l.bf16 %v5938_v47 }
 0x7c5   :  { %5707 = vmatprep.mubr.msk.bf16.mxu1 %vm6320_vm9, %v6318_v55  ;;  %5713 = vmatprep.mubr.msk.bf16.mxu0 %vm6320_vm9, %v6318_v55 }
 0x7c6   :  { %v3225_v53 = vpop.permute.xlu1 %3224  ;;  %5717 = vmatprep.subr.bf16.mxu1 %v6318_v55  ;;  %5723 = vmatprep.subr.bf16.mxu0 %v6318_v55  ;;  %v2613_v41 = vpack.c.bf16 %v5940_v35, %v5940_v35  ;;  %v2612_v49 = vpack.c.bf16 %v5939_v27, %v5939_v27 }
 0x7c7   :  { %v3274_v43 = vpop.permute.xlu0 %3273  ;;  %v3230_v40 = vsel %vm2735_vm10, %v3225_v53, 0 }
 0x7c8   :  { %v3279_v5 = vsel %vm2735_vm10, %v3274_v43, 0 }
 0x7ca   :  { %v5943_v19 = vpop.permute.xlu1 %5942 }
 0x7cb   :  { %5708 = vmatmul.mubr.msk.bf16.vlgmr.msra.gmra.mrb[44].mxu1 %vm2735_vm10, %v2612_v49  ;;  %5714 = vmatmul.mubr.msk.bf16.vlgmr.msra.gmra.mrb[48].mxu0 %vm2735_vm10, %v2613_v41  ;;  %v3323_v18 = vpop.permute.xlu0 %3322  ;;  %v5945_v11 = vunpack.i.h.bf16 %v5943_v19  ;;  %v5944_v31 = vunpack.i.l.bf16 %v5943_v19 }
 0x7cc   :  { %5718 = vmatpush3.bf16.xpose.msra.mxu1 %v3230_v40  ;;  %5724 = vmatpush3.bf16.xpose.msra.mxu0 %v3279_v5  ;;  %v3328_v24 = vsel %vm2735_vm10, %v3323_v18, 0 }
 0x7cd   :  { %5719 = vmatprep.mubr.msk.bf16.mxu1 %vm6320_vm9, %v6318_v55  ;;  %5725 = vmatprep.mubr.msk.bf16.mxu0 %vm6320_vm9, %v6318_v55  ;;  %v2615_v25 = vpack.c.bf16 %v5945_v11, %v5945_v11  ;;  %v2614_v30 = vpack.c.bf16 %v5944_v31, %v5944_v31 }
 0x7ce   :  { %v3372_v50 = vpop.permute.xlu1 %3371  ;;  %5729 = vmatprep.subr.bf16.mxu1 %v6318_v55  ;;  %5735 = vmatprep.subr.bf16.mxu0 %v6318_v55 }
 0x7cf   :  { %v5948_v20 = vpop.permute.xlu0 %5947  ;;  %v3377_v1 = vsel %vm2735_vm10, %v3372_v50, 0 }
 0x7d0   :  { %v5950_v23 = vunpack.i.h.bf16 %v5948_v20  ;;  %v5949_v14 = vunpack.i.l.bf16 %v5948_v20 }
 0x7d2   :  { %v3421_v26 = vpop.permute.xlu1 %3420  ;;  %v2617_v62 = vpack.c.bf16 %v5950_v23, %v5950_v23  ;;  %v2616_v13 = vpack.c.bf16 %v5949_v14, %v5949_v14 }
 0x7d3   :  { %5720 = vmatmul.mubr.msk.bf16.vlgmr.msra.gmra.mrb[48].mxu1 %vm2735_vm10, %v2614_v30  ;;  %5726 = vmatmul.mubr.msk.bf16.vlgmr.msra.gmra.mrb[52].mxu0 %vm2735_vm10, %v2615_v25  ;;  %v3470_v38 = vpop.permute.xlu0 %3469  ;;  %v3426_v6 = vsel %vm2735_vm10, %v3421_v26, 0 }
 0x7d4   :  { %5730 = vmatpush3.bf16.xpose.msra.mxu1 %v3328_v24  ;;  %5736 = vmatpush3.bf16.xpose.msra.mxu0 %v3377_v1  ;;  %v3475_v44 = vsel %vm2735_vm10, %v3470_v38, 0 }
 0x7d5   :  { %5731 = vmatprep.mubr.msk.bf16.mxu1 %vm6320_vm9, %v6318_v55  ;;  %5737 = vmatprep.mubr.msk.bf16.mxu0 %vm6320_vm9, %v6318_v55 }
 0x7d6   :  { %5741 = vmatprep.subr.bf16.mxu1 %v6318_v55  ;;  %5747 = vmatprep.subr.bf16.mxu0 %v6318_v55  ;;  %v5953_v29 = vpop.permute.xlu1 %5952 }
 0x7d7   :  { %v5955_v16 = vunpack.i.h.bf16 %v5953_v29  ;;  %v5954_v63 = vunpack.i.l.bf16 %v5953_v29 }
 0x7d9   :  { %v2619_v51 = vpack.c.bf16 %v5955_v16, %v5955_v16  ;;  %v2618_v4 = vpack.c.bf16 %v5954_v63, %v5954_v63 }
 0x7db   :  { %5732 = vmatmul.mubr.msk.bf16.vlgmr.msra.gmra.mrb[52].mxu1 %vm2735_vm10, %v2616_v13  ;;  %5738 = vmatmul.mubr.msk.bf16.vlgmr.msra.gmra.mrb[56].mxu0 %vm2735_vm10, %v2617_v62 }
 0x7dc   :  { %5742 = vmatpush3.bf16.xpose.msra.mxu1 %v3426_v6  ;;  %5748 = vmatpush3.bf16.xpose.msra.mxu0 %v3475_v44 }
 0x7dd   :  { %5743 = vmatprep.mubr.msk.bf16.mxu1 %vm6320_vm9, %v6318_v55  ;;  %5749 = vmatprep.mubr.msk.bf16.mxu0 %vm6320_vm9, %v6318_v55 }
 0x7de   :  { %5753 = vmatprep.subr.bf16.mxu1 %v6318_v55  ;;  %5759 = vmatprep.subr.bf16.mxu0 %v6318_v55 }
 0x7e3   :  { %5744 = vmatmul.mubr.msk.bf16.vlgmr.msra.gmra.mrb[56].mxu1 %vm2735_vm10, %v2618_v4  ;;  %5750 = vmatmul.mubr.msk.bf16.vlgmr.msra.gmra.mrb[60].mxu0 %vm2735_vm10, %v2619_v51 }
 0x7e4   :  { %5754 = vmatpush3.bf16.msra.mxu1 %v3715_v39  ;;  %5760 = vmatpush3.bf16.msra.mxu0 %v3761_v61 }
 0x7e5   :  { %5761 = vmatprep.mubr.msk.bf16.mxu0 %vm6320_vm9, %v6318_v55  ;;  %5771 = vmatprep.subr.bf16.mxu0 %v6318_v55 }
 0x7e6   :  { %5755 = vmatprep.mubr.msk.bf16.mxu1 %vm6320_vm9, %v6318_v55  ;;  %5765 = vmatprep.subr.bf16.mxu1 %v6318_v55 }
 0x823   :  { %v7416_v46 = vpop.f32.mrb[28].mxu0 }
 0x824   :  { %v5661_v42 = vpop.f32.mrb[29].mxu0  ;;  %v3518_v2 = vsel %vm3517_vm12, %v7416_v46, -inf }
 0x825   :  { %v2779_v28 = vpop.f32.mrb[30].mxu0  ;;  %3519 = vmax.xlane.f32.xlu0 %v3518_v2 }
 0x826   :  { %v5662_v22 = vpop.f32.mrb[31].mxu0 }
 0x82b   :  { %v7420_v57 = vpop.f32.mrb[32].mxu0 }
 0x82c   :  { %v7422_v3 = vpop.f32.mrb[32].mxu1  ;;  %v5667_v17 = vpop.f32.mrb[33].mxu0  ;;  %v3521_v60 = vsel %vm3517_vm12, %v7420_v57, -inf }
 0x82d   :  { %v5673_v34 = vpop.f32.mrb[33].mxu1  ;;  %v2828_v56 = vpop.f32.mrb[34].mxu0  ;;  %3522 = vmax.xlane.f32.xlu1 %v3521_v60  ;;  %v3524_v33 = vsel %vm3517_vm12, %v7422_v3, -inf }
 0x82e   :  { %v2877_v7 = vpop.f32.mrb[34].mxu1  ;;  %3525 = vmax.xlane.f32.xlu0 %v3524_v33  ;;  %v5668_v15 = vpop.f32.mrb[35].mxu0 }
 0x82f   :  { %v5674_v32 = vpop.f32.mrb[35].mxu1 }
 0x834   :  { %v7428_v58 = vpop.f32.mrb[36].mxu0 }
 0x835   :  { %v5679_v52 = vpop.f32.mrb[37].mxu0  ;;  %v3527_v48 = vsel %vm3517_vm12, %v7428_v58, -inf }
 0x836   :  { %v2926_v47 = vpop.f32.mrb[38].mxu0  ;;  %3528 = vmax.xlane.f32.xlu0 %v3527_v48 }
 0x837   :  { %v5680_v35 = vpop.f32.mrb[39].mxu0 }
 0x88e   :  { %v7432_v27 = vpop.f32.mrb[36].mxu1  ;;  %v7434_v53 = vpop.f32.mrb[40].mxu0 }
 0x88f   :  { %v5685_v43 = vpop.f32.mrb[37].mxu1  ;;  %v5691_v41 = vpop.f32.mrb[41].mxu0  ;;  %v3533_v49 = vsel %vm3517_vm12, %v7434_v53, -inf  ;;  %v3530_v19 = vsel %vm3517_vm12, %v7432_v27, -inf }
 0x890   :  { %3534 = vmax.xlane.f32.xlu0 %v3533_v49  ;;  %v3024_v40 = vpop.f32.mrb[42].mxu0  ;;  %3531 = vmax.xlane.f32.xlu1 %v3530_v19  ;;  %v2975_v5 = vpop.f32.mrb[38].mxu1 }
 0x891   :  { %v5686_v18 = vpop.f32.mrb[39].mxu1  ;;  %v5692_v11 = vpop.f32.mrb[43].mxu0 }
 0x896   :  { %v7440_v31 = vpop.f32.mrb[40].mxu1  ;;  %v7442_v50 = vpop.f32.mrb[44].mxu0 }
 0x897   :  { %v5697_v25 = vpop.f32.mrb[41].mxu1  ;;  %v5703_v30 = vpop.f32.mrb[45].mxu0  ;;  %v3539_v20 = vsel %vm3517_vm12, %v7442_v50, -inf }
 0x898   :  { %3540 = vmax.xlane.f32.xlu0 %v3539_v20  ;;  %v3073_v24 = vpop.f32.mrb[42].mxu1  ;;  %v3122_v1 = vpop.f32.mrb[46].mxu0  ;;  %v3536_v20 = vsel %vm3517_vm12, %v7440_v31, -inf }
 0x899   :  { %v5698_v26 = vpop.f32.mrb[43].mxu1  ;;  %v5704_v23 = vpop.f32.mrb[47].mxu0 }
 0x89e   :  { %v7446_v14 = vpop.f32.mrb[44].mxu1  ;;  %v7448_v38 = vpop.f32.mrb[48].mxu0 }
 0x89f   :  { %v5709_v62 = vpop.f32.mrb[45].mxu1  ;;  %v5715_v13 = vpop.f32.mrb[49].mxu0  ;;  %v3545_v29 = vsel %vm3517_vm12, %v7448_v38, -inf  ;;  %v3542_v1 = vsel %vm3517_vm12, %v7446_v14, -inf }
 0x8a0   :  { %3546 = vmax.xlane.f32.xlu0 %v3545_v29  ;;  %v3171_v6 = vpop.f32.mrb[46].mxu1  ;;  %v3220_v44 = vpop.f32.mrb[50].mxu0 }
 0x8a1   :  { %v5716_v16 = vpop.f32.mrb[51].mxu0  ;;  %5957 = vrot.lane.b32.xlu1 %v7260_v8, %s6317_s7  ;;  %v5710_v63 = vpop.f32.mrb[47].mxu1 }
 0x8a6   :  { %v7454_v21 = vpop.f32.mrb[48].mxu1  ;;  %v7456_v37 = vpop.f32.mrb[52].mxu0 }
 0x8a7   :  { %v5721_v51 = vpop.f32.mrb[49].mxu1  ;;  %v5727_v4 = vpop.f32.mrb[53].mxu0  ;;  %v3551_v39 = vsel %vm3517_vm12, %v7456_v37, -inf }
 0x8a8   :  { %3552 = vmax.xlane.f32.xlu0 %v3551_v39  ;;  %v3269_v61 = vpop.f32.mrb[50].mxu1  ;;  %v3318_v42 = vpop.f32.mrb[54].mxu0 }
 0x8a9   :  { %v5722_v2 = vpop.f32.mrb[51].mxu1  ;;  %v5728_v28 = vpop.f32.mrb[55].mxu0 }
 0x8ae   :  { %v7460_v22 = vpop.f32.mrb[52].mxu1  ;;  %v7462_v17 = vpop.f32.mrb[56].mxu0 }
 0x8af   :  { %v5733_v60 = vpop.f32.mrb[53].mxu1  ;;  %v5739_v34 = vpop.f32.mrb[57].mxu0  ;;  %v3557_v56 = vsel %vm3517_vm12, %v7462_v17, -inf }
 0x8b0   :  { %3558 = vmax.xlane.f32.xlu0 %v3557_v56  ;;  %v3367_v33 = vpop.f32.mrb[54].mxu1  ;;  %v3416_v7 = vpop.f32.mrb[58].mxu0 }
 0x8b1   :  { %v5734_v15 = vpop.f32.mrb[55].mxu1  ;;  %v5740_v32 = vpop.f32.mrb[59].mxu0 }
 0x8b2   :  { %v3520_v25 = vpop.xlane.xlu0 %3519 }
 0x8b3   :  { %v3566_v30 = vsub.f32 %v7416_v46, %v3520_v25  ;;  %v3554_v46 = vsel %vm3517_vm12, %v7460_v22, -inf }
 0x8b5   :  { %v3582_v24 = vmul.f32 1.442695, %v3566_v30 }
 0x8b6   :  { %v7466_v52 = vpop.f32.mrb[56].mxu1  ;;  %v7468_v48 = vpop.f32.mrb[60].mxu0 }
 0x8b7   :  { %v5745_v47 = vpop.f32.mrb[57].mxu1  ;;  %v5751_v35 = vpop.f32.mrb[61].mxu0  ;;  %v3563_v43 = vsel %vm3517_vm12, %v7468_v48, -inf  ;;  %v3560_v62 = vsel %vm3517_vm12, %v7466_v52, -inf }
 0x8b8   :  { %3564 = vmax.xlane.f32.xlu0 %v3563_v43  ;;  %v3465_v41 = vpop.f32.mrb[58].mxu1  ;;  %v3514_v49 = vpop.f32.mrb[62].mxu0 }
 0x8b9   :  { %v5746_v19 = vpop.f32.mrb[59].mxu1  ;;  %v5752_v40 = vpop.f32.mrb[63].mxu0 }
 0x8ba   :  { %v3523_v5 = vpop.xlane.xlu1 %3522 }
 0x8bb   :  { %v3567_v18 = vsub.f32 %v7420_v57, %v3523_v5  ;;  %v3548_v57 = vsel %vm3517_vm12, %v7454_v21, -inf  ;;  %v3526_v6 = vpop.xlane.xlu0 %3525 }
 0x8bc   :  { %v3568_v51 = vsub.f32 %v7422_v3, %v3526_v6 }
 0x8bd   :  { %v3584_v11 = vmul.f32 1.442695, %v3567_v18 }
 0x8be   :  { %v3586_v39 = vmul.f32 1.442695, %v3568_v51 }
 0x8bf   :  { %6220 = vpow2.f32 %v3584_v11 }
 0x8c0   :  { %6222 = vpow2.f32 %v3582_v24 }
 0x8c3   :  { %v3529_v44 = vpop.xlane.xlu0 %3528 }
 0x8c4   :  { %v3569_v16 = vsub.f32 %v7428_v58, %v3529_v44 }
 0x8c5   :  { %3537 = vmax.xlane.f32.xlu1 %v3536_v20 }
 0x8c6   :  { %v3588_v63 = vmul.f32 1.442695, %v3569_v16 }
 0x8c8   :  { %6224 = vpow2.f32 %v3588_v63 }
 0x8c9   :  { %v7478_v26 = vpop.eup %6220  ;;  %3543 = vmax.xlane.f32.xlu1 %v3542_v1  ;;  %6226 = vpow2.f32 %v3586_v39 }
 0x8ca   :  { %v3617_v23 = vsel %vm3517_vm12, %v7478_v26, 0.0  ;;  %v7488_v13 = vpop.eup %6222 }
 0x8cb   :  { %3618 = vadd.xlane.f32.xlu0 %v3617_v23  ;;  %v3614_v29 = vsel %vm3517_vm12, %v7488_v13, 0.0 }
 0x8cd   :  { %3549 = vmax.xlane.f32.xlu1 %v3548_v57 }
 0x8d1   :  { %3555 = vmax.xlane.f32.xlu1 %v3554_v46 }
 0x8d2   :  { %v7498_v4 = vpop.eup %6224 }
 0x8d3   :  { %v3623_v61 = vsel %vm3517_vm12, %v7498_v4, 0.0  ;;  %v7502_v42 = vpop.eup %6226 }
 0x8d4   :  { %v3620_v58 = vsel %vm3517_vm12, %v7502_v42, 0.0 }
 0x8d5   :  { %3561 = vmax.xlane.f32.xlu1 %v3560_v62 }
 0x8d9   :  { %3615 = vadd.xlane.f32.xlu1 %v3614_v29 }
 0x8e1   :  { %5962 = vrot.lane.b32.xlu0 %v7282_v54, %s6317_s7 }
 0x8ea   :  { %5967 = vrot.lane.b32.xlu1 %v7260_v8, %s6319_s20 }
 0x900   :  { %3624 = vadd.xlane.f32.xlu0 %v3623_v61 }
 0x90e   :  { %3621 = vadd.xlane.f32.xlu1 %v3620_v58 }
 0x91d   :  { %v3535_v2 = vpop.xlane.xlu0 %3534  ;;  %v3532_v28 = vpop.xlane.xlu1 %3531 }
 0x91e   :  { %v3571_v60 = vsub.f32 %v7434_v53, %v3535_v2  ;;  %v3570_v3 = vsub.f32 %v7432_v27, %v3532_v28 }
 0x920   :  { %v3592_v34 = vmul.f32 1.442695, %v3571_v60  ;;  %v3590_v56 = vmul.f32 1.442695, %v3570_v3 }
 0x921   :  { %v7526_v5 = vpop.permute.xlu1 %5957 }
 0x922   :  { %6228 = vpow2.f32 %v3592_v34 }
 0x923   :  { %6230 = vpow2.f32 %v3590_v56 }
 0x925   :  { %v3541_v33 = vpop.xlane.xlu0 %3540 }
 0x926   :  { %v3573_v7 = vsub.f32 %v7442_v50, %v3541_v33 }
 0x928   :  { %v3596_v15 = vmul.f32 1.442695, %v3573_v7 }
 0x92a   :  { %6232 = vpow2.f32 %v3596_v15 }
 0x92c   :  { %v7509_v32 = vpop.eup %6228 }
 0x92d   :  { %v7511_v47 = vpop.eup %6230  ;;  %v3547_v35 = vpop.xlane.xlu0 %3546  ;;  %v3629_v43 = vsel %vm3517_vm12, %v7509_v32, 0.0 }
 0x92e   :  { %v3575_v53 = vsub.f32 %v7448_v38, %v3547_v35  ;;  %3630 = vadd.xlane.f32.xlu0 %v3629_v43  ;;  %v3626_v27 = vsel %vm3517_vm12, %v7511_v47, 0.0 }
 0x92f   :  { %3627 = vadd.xlane.f32.xlu1 %v3626_v27  ;;  %v2718_v27 = vpack.c.bf16 %v7267_v12, %v7267_v12 }
 0x930   :  { %v3600_v41 = vmul.f32 1.442695, %v3575_v53 }
 0x932   :  { %6234 = vpow2.f32 %v3600_v41 }
 0x934   :  { %v7518_v50 = vpop.eup %6232 }
 0x935   :  { %v3635_v49 = vsel %vm3517_vm12, %v7518_v50, 0.0  ;;  %v3553_v38 = vpop.xlane.xlu0 %3552 }
 0x936   :  { %3636 = vadd.xlane.f32.xlu0 %v3635_v49  ;;  %v3577_v57 = vsub.f32 %v7456_v37, %v3553_v38  ;;  %v3807_v38 = vsel %vm3713_vm11, %v2718_v27, 0 }
 0x938   :  { %v3604_v6 = vmul.f32 1.442695, %v3577_v57 }
 0x93c   :  { %v7522_v19 = vpop.eup %6234 }
 0x93d   :  { %v3641_v40 = vsel %vm3517_vm12, %v7522_v19, 0.0  ;;  %v3559_v18 = vpop.xlane.xlu0 %3558 }
 0x93e   :  { %3642 = vadd.xlane.f32.xlu0 %v3641_v40  ;;  %v3579_v44 = vsub.f32 %v7462_v17, %v3559_v18  ;;  %v2719_v17 = vpack.c.bf16 %v7270_v9, %v7270_v9 }
 0x940   :  { %v3608_v51 = vmul.f32 1.442695, %v3579_v44 }
 0x945   :  { %v3565_v30 = vpop.xlane.xlu0 %3564 }
 0x946   :  { %v3581_v2 = vsub.f32 %v7468_v48, %v3565_v30  ;;  %v5960_v30 = vunpack.i.h.bf16 %v7526_v5 }
 0x948   :  { %v3612_v9 = vmul.f32 1.442695, %v3581_v2 }
 0x952   :  { %v3538_v11 = vpop.xlane.xlu1 %3537 }
 0x953   :  { %v3572_v25 = vsub.f32 %v7440_v31, %v3538_v11 }
 0x955   :  { %v3594_v20 = vmul.f32 1.442695, %v3572_v25 }
 0x956   :  { %v3544_v24 = vpop.xlane.xlu1 %3543 }
 0x957   :  { %6236 = vpow2.f32 %v3594_v20  ;;  %v3574_v1 = vsub.f32 %v7446_v14, %v3544_v24 }
 0x958   :  { %v3619_v23 = vpop.xlane.xlu0 %3618 }
 0x959   :  { %v3598_v46 = vmul.f32 1.442695, %v3574_v1  ;;  %6238 = vrcp.f32 %v3619_v23  ;;  %v2721_v23 = vpack.c.bf16 %v5960_v30, %v5960_v30 }
 0x95a   :  { %v3550_v62 = vpop.xlane.xlu1 %3549 }
 0x95b   :  { %6240 = vpow2.f32 %v3598_v46  ;;  %v3576_v29 = vsub.f32 %v7454_v21, %v3550_v62 }
 0x95c   :  { %v5963_v18 = vpop.permute.xlu0 %5962 }
 0x95d   :  { %v3602_v16 = vmul.f32 1.442695, %v3576_v29  ;;  %v5959_v29 = vunpack.i.l.bf16 %v7526_v5 }
 0x95e   :  { %v3556_v31 = vpop.xlane.xlu1 %3555 }
 0x95f   :  { %6242 = vpow2.f32 %v3602_v16 }
 0x960   :  { %6244 = vpow2.f32 %v3604_v6  ;;  %v2720_v6 = vpack.c.bf16 %v5959_v29, %v5959_v29 }
 0x961   :  { %v7533_v63 = vpop.eup %6236  ;;  %6246 = vpow2.f32 %v3608_v51 }
 0x962   :  { %v3562_v14 = vpop.xlane.xlu1 %3561  ;;  %v3632_v37 = vsel %vm3517_vm12, %v7533_v63, 0.0 }
 0x963   :  { %v6239_v39 = vpop.eup %6238  ;;  %v3580_v61 = vsub.f32 %v7466_v52, %v3562_v14  ;;  %3633 = vadd.xlane.f32.xlu1 %v3632_v37  ;;  %v3853_v52 = vsel %vm3713_vm11, %v2719_v17, 0  ;;  %v5965_v14 = vunpack.i.h.bf16 %v5963_v18  ;;  %v5964_v37 = vunpack.i.l.bf16 %v5963_v18 }
 0x964   :  { %v3665_v21 = vmul.f32 %v6239_v39, %v7478_v26 }
 0x965   :  { %v7541_v58 = vpop.eup %6240  ;;  %v3610_v28 = vmul.f32 1.442695, %v3580_v61  ;;  %v2722_v2 = vpack.c.bf16 %v5964_v37, %v5964_v37 }
 0x966   :  { %v3616_v60 = vpop.xlane.xlu1 %3615  ;;  %v3638_v3 = vsel %vm3517_vm12, %v7541_v58, 0.0  ;;  %v3695_v34 = vpack.c.bf16 %v3665_v21, %v3665_v21  ;;  %v2723_v21 = vpack.c.bf16 %v5965_v14, %v5965_v14 }
 0x967   :  { %3639 = vadd.xlane.f32.xlu1 %v3638_v3  ;;  %6248 = vrcp.f32 %v3616_v60 }
 0x968   :  { %5762 = vmatmul.mubr.msk.bf16.vlgmr.msra.gmra.mrb[64].mxu0 %vm3517_vm12, %v3695_v34  ;;  %6250 = vpow2.f32 %v3610_v28 }
 0x969   :  { %v7548_v26 = vpop.eup %6242  ;;  %5772 = vmatpush3.bf16.msra.mxu0 %v3853_v52  ;;  %5773 = vmatprep.mubr.msk.bf16.mxu0 %vm6320_vm9, %v6318_v55  ;;  %6252 = vpow2.f32 %v3612_v9  ;;  %v4037_v52 = vsel %vm3713_vm11, %v2723_v21, 0  ;;  %v3991_v9 = vsel %vm3713_vm11, %v2722_v2, 0 }
 0x96a   :  { %v3644_v48 = vsel %vm3517_vm12, %v7548_v26, 0.0  ;;  %5783 = vmatprep.subr.bf16.mxu0 %v6318_v55  ;;  %v7555_v56 = vpop.eup %6244  ;;  %v7587_v24 = vpop.permute.xlu1 %5967 }
 0x96b   :  { %3645 = vadd.xlane.f32.xlu0 %v3644_v48  ;;  %v3647_v33 = vsel %vm3517_vm12, %v7555_v56, 0.0  ;;  %v7559_v7 = vpop.eup %6246  ;;  %v5970_v3 = vunpack.i.h.bf16 %v7587_v24 }
 0x96c   :  { %v3653_v35 = vsel %vm3517_vm12, %v7559_v7, 0.0 }
 0x96f   :  { %3648 = vadd.xlane.f32.xlu0 %v3647_v33 }
 0x971   :  { %v6249_v15 = vpop.eup %6248 }
 0x972   :  { %v7563_v43 = vpop.eup %6250  ;;  %v3663_v53 = vmul.f32 %v6249_v15, %v7488_v13  ;;  %v3578_v13 = vsub.f32 %v7460_v22, %v3556_v31  ;;  %v3899_v31 = vsel %vm3713_vm11, %v2720_v6, 0 }
 0x973   :  { %3654 = vadd.xlane.f32.xlu0 %v3653_v35  ;;  %v3656_v49 = vsel %vm3517_vm12, %v7563_v43, 0.0  ;;  %v7570_v40 = vpop.eup %6252 }
 0x974   :  { %v3694_v41 = vpack.c.bf16 %v3663_v53, %v3663_v53  ;;  %v3659_v12 = vsel %vm3517_vm12, %v7570_v40, 0.0  ;;  %v3606_v11 = vmul.f32 1.442695, %v3578_v13 }
 0x976   :  { %5756 = vmatmul.mubr.msk.bf16.vlgmr.msra.gmra.mrb[60].mxu1 %vm3517_vm12, %v3694_v41  ;;  %6254 = vpow2.f32 %v3606_v11 }
 0x977   :  { %3657 = vadd.xlane.f32.xlu0 %v3656_v49  ;;  %5766 = vmatpush3.bf16.msra.mxu1 %v3807_v38  ;;  %v5969_v49 = vunpack.i.l.bf16 %v7587_v24 }
 0x978   :  { %5972 = vrot.lane.b32.xlu1 %v7282_v54, %s6319_s20  ;;  %5767 = vmatprep.mubr.msk.bf16.mxu1 %vm6320_vm9, %v6318_v55 }
 0x979   :  { %5777 = vmatprep.subr.bf16.mxu1 %v6318_v55 }
 0x97b   :  { %3660 = vadd.xlane.f32.xlu0 %v3659_v12 }
 0x980   :  { %v7585_v20 = vpop.eup %6254 }
 0x981   :  { %v3650_v22 = vsel %vm3517_vm12, %v7585_v20, 0.0 }
 0x98d   :  { %v3625_v25 = vpop.xlane.xlu0 %3624 }
 0x98e   :  { %6256 = vrcp.f32 %v3625_v25  ;;  %v2724_v25 = vpack.c.bf16 %v5969_v49, %v5969_v49 }
 0x991   :  { %5977 = vrot.lane.b32.xlu0 %v7260_v8, %s6321_s21  ;;  %v3945_v8 = vsel %vm3713_vm11, %v2721_v23, 0 }
 0x998   :  { %v6257_v1 = vpop.eup %6256 }
 0x999   :  { %v3669_v57 = vmul.f32 %v6257_v1, %v7498_v4 }
 0x99b   :  { %v3622_v46 = vpop.xlane.xlu1 %3621  ;;  %v3697_v62 = vpack.c.bf16 %v3669_v57, %v3669_v57 }
 0x99c   :  { %6258 = vrcp.f32 %v3622_v46  ;;  %3651 = vadd.xlane.f32.xlu1 %v3650_v22  ;;  %v4083_v22 = vsel %vm3713_vm11, %v2724_v25, 0 }
 0x99d   :  { %5774 = vmatmul.mubr.msk.bf16.vlgmr.msra.gmra.mrb[68].mxu0 %vm3517_vm12, %v3697_v62 }
 0x99e   :  { %5784 = vmatpush3.bf16.msra.mxu0 %v3945_v8  ;;  %5785 = vmatprep.mubr.msk.bf16.mxu0 %vm6320_vm9, %v6318_v55 }
 0x99f   :  { %5795 = vmatprep.subr.bf16.mxu0 %v6318_v55 }
 0x9a6   :  { %v6259_v4 = vpop.eup %6258 }
 0x9a7   :  { %v3667_v44 = vmul.f32 %v6259_v4, %v7502_v42 }
 0x9a9   :  { %v3696_v16 = vpack.c.bf16 %v3667_v44, %v3667_v44 }
 0x9ab   :  { %5768 = vmatmul.mubr.msk.bf16.vlgmr.msra.gmra.mrb[64].mxu1 %vm3517_vm12, %v3696_v16 }
 0x9ac   :  { %5778 = vmatpush3.bf16.msra.mxu1 %v3899_v31  ;;  %5779 = vmatprep.mubr.msk.bf16.mxu1 %vm6320_vm9, %v6318_v55 }
 0x9ad   :  { %5982 = vrot.lane.b32.xlu1 %v7282_v54, %s6321_s21  ;;  %5789 = vmatprep.subr.bf16.mxu1 %v6318_v55 }
 0x9bb   :  { %v3631_v51 = vpop.xlane.xlu0 %3630 }
 0x9bc   :  { %6260 = vrcp.f32 %v3631_v51  ;;  %v3628_v5 = vpop.xlane.xlu1 %3627 }
 0x9bd   :  { %6262 = vrcp.f32 %v3628_v5 }
 0x9c3   :  { %v3637_v42 = vpop.xlane.xlu0 %3636 }
 0x9c4   :  { %6264 = vrcp.f32 %v3637_v42 }
 0x9c6   :  { %v6261_v39 = vpop.eup %6260 }
 0x9c7   :  { %v6263_v61 = vpop.eup %6262  ;;  %v3673_v17 = vmul.f32 %v6261_v39, %v7509_v32 }
 0x9c8   :  { %v3671_v28 = vmul.f32 %v6263_v61, %v7511_v47  ;;  %v2725_v47 = vpack.c.bf16 %v5970_v3, %v5970_v3 }
 0x9c9   :  { %v3699_v60 = vpack.c.bf16 %v3673_v17, %v3673_v17 }
 0x9ca   :  { %v3698_v54 = vpack.c.bf16 %v3671_v28, %v3671_v28  ;;  %v4129_v15 = vsel %vm3713_vm11, %v2725_v47, 0 }
 0x9cb   :  { %v3643_v34 = vpop.xlane.xlu0 %3642  ;;  %5786 = vmatmul.mubr.msk.bf16.vlgmr.msra.gmra.mrb[72].mxu0 %vm3517_vm12, %v3699_v60 }
 0x9cc   :  { %6266 = vrcp.f32 %v3643_v34  ;;  %5780 = vmatmul.mubr.msk.bf16.vlgmr.msra.gmra.mrb[68].mxu1 %vm3517_vm12, %v3698_v54  ;;  %5796 = vmatpush3.bf16.msra.mxu0 %v4037_v52 }
 0x9cd   :  { %5790 = vmatpush3.bf16.msra.mxu1 %v3991_v9  ;;  %5797 = vmatprep.mubr.msk.bf16.mxu0 %vm6320_vm9, %v6318_v55 }
 0x9ce   :  { %v6265_v32 = vpop.eup %6264  ;;  %5807 = vmatprep.subr.bf16.mxu0 %v6318_v55  ;;  %5791 = vmatprep.mubr.msk.bf16.mxu1 %vm6320_vm9, %v6318_v55 }
 0x9cf   :  { %v3677_v48 = vmul.f32 %v6265_v32, %v7518_v50  ;;  %5801 = vmatprep.subr.bf16.mxu1 %v6318_v55 }
 0x9d1   :  { %v3701_v33 = vpack.c.bf16 %v3677_v48, %v3677_v48 }
 0x9d3   :  { %5798 = vmatmul.mubr.msk.bf16.vlgmr.msra.gmra.mrb[76].mxu0 %vm3517_vm12, %v3701_v33 }
 0x9d4   :  { %5808 = vmatpush3.bf16.msra.mxu0 %v4129_v15  ;;  %5809 = vmatprep.mubr.msk.bf16.mxu0 %vm6320_vm9, %v6318_v55 }
 0x9d5   :  { %5819 = vmatprep.subr.bf16.mxu0 %v6318_v55 }
 0x9d6   :  { %v6267_v35 = vpop.eup %6266 }
 0x9d7   :  { %v3681_v53 = vmul.f32 %v6267_v35, %v7522_v19 }
 0x9d9   :  { %v3703_v27 = vpack.c.bf16 %v3681_v53, %v3681_v53 }
 0x9db   :  { %5810 = vmatmul.mubr.msk.bf16.vlgmr.msra.gmra.mrb[80].mxu0 %vm3517_vm12, %v3703_v27 }
 0x9dc   :  { %5821 = vmatprep.mubr.msk.bf16.mxu0 %vm6320_vm9, %v6318_v55 }
 0x9f0   :  { %v3634_v50 = vpop.xlane.xlu1 %3633 }
 0x9f1   :  { %6268 = vrcp.f32 %v3634_v50 }
 0x9f4   :  { %v3640_v41 = vpop.xlane.xlu1 %3639 }
 0x9f5   :  { %6270 = vrcp.f32 %v3640_v41 }
 0x9f8   :  { %v3646_v38 = vpop.xlane.xlu0 %3645  ;;  %v5973_v12 = vpop.permute.xlu1 %5972 }
 0x9f9   :  { %v5975_v13 = vunpack.i.h.bf16 %v5973_v12  ;;  %6272 = vrcp.f32 %v3646_v38  ;;  %v5974_v46 = vunpack.i.l.bf16 %v5973_v12 }
 0x9fb   :  { %v6269_v18 = vpop.eup %6268  ;;  %v2727_v11 = vpack.c.bf16 %v5975_v13, %v5975_v13  ;;  %v2726_v62 = vpack.c.bf16 %v5974_v46, %v5974_v46 }
 0x9fc   :  { %v3675_v19 = vmul.f32 %v6269_v18, %v7533_v63  ;;  %v3649_v30 = vpop.xlane.xlu0 %3648 }
 0x9fd   :  { %6274 = vrcp.f32 %v3649_v30  ;;  %v4221_v1 = vsel %vm3713_vm11, %v2727_v11, 0  ;;  %v4175_v31 = vsel %vm3713_vm11, %v2726_v62, 0 }
 0x9fe   :  { %5820 = vmatpush3.bf16.msra.mxu0 %v4221_v1  ;;  %v3700_v23 = vpack.c.bf16 %v3675_v19, %v3675_v19 }
 0x9ff   :  { %v6271_v57 = vpop.eup %6270  ;;  %5831 = vmatprep.subr.bf16.mxu0 %v6318_v55 }
 0xa00   :  { %v3655_v24 = vpop.xlane.xlu0 %3654  ;;  %5792 = vmatmul.mubr.msk.bf16.vlgmr.msra.gmra.mrb[72].mxu1 %vm3517_vm12, %v3700_v23  ;;  %v3679_v63 = vmul.f32 %v6271_v57, %v7541_v58 }
 0xa01   :  { %5802 = vmatpush3.bf16.msra.mxu1 %v4083_v22  ;;  %5803 = vmatprep.mubr.msk.bf16.mxu1 %vm6320_vm9, %v6318_v55  ;;  %6276 = vrcp.f32 %v3655_v24 }
 0xa02   :  { %5813 = vmatprep.subr.bf16.mxu1 %v6318_v55  ;;  %v3702_v4 = vpack.c.bf16 %v3679_v63, %v3679_v63 }
 0xa03   :  { %v6273_v29 = vpop.eup %6272 }
 0xa04   :  { %v3658_v8 = vpop.xlane.xlu0 %3657  ;;  %v3683_v58 = vmul.f32 %v6273_v29, %v7548_v26 }
 0xa06   :  { %v3704_v37 = vpack.c.bf16 %v3683_v58, %v3683_v58 }
 0xa07   :  { %v6275_v6 = vpop.eup %6274 }
 0xa08   :  { %v3685_v44 = vmul.f32 %v6275_v6, %v7555_v56  ;;  %v3661_v16 = vpop.xlane.xlu0 %3660  ;;  %5804 = vmatmul.mubr.msk.bf16.vlgmr.msra.gmra.mrb[76].mxu1 %vm3517_vm12, %v3702_v4 }
 0xa09   :  { %5814 = vmatpush3.bf16.msra.mxu1 %v4175_v31  ;;  %5815 = vmatprep.mubr.msk.bf16.mxu1 %vm6320_vm9, %v6318_v55  ;;  %6278 = vrcp.f32 %v3661_v16 }
 0xa0a   :  { %v3705_v51 = vpack.c.bf16 %v3685_v44, %v3685_v44  ;;  %5825 = vmatprep.subr.bf16.mxu1 %v6318_v55 }
 0xa0b   :  { %v6277_v5 = vpop.eup %6276 }
 0xa0c   :  { %v5978_v14 = vpop.permute.xlu0 %5977  ;;  %5822 = vmatmul.mubr.msk.bf16.vlgmr.msra.gmra.mrb[84].mxu0 %vm3517_vm12, %v3705_v51  ;;  %v3689_v39 = vmul.f32 %v6277_v5, %v7559_v7 }
 0xa0d   :  { %v5980_v42 = vunpack.i.h.bf16 %v5978_v14  ;;  %v5979_v56 = vunpack.i.l.bf16 %v5978_v14  ;;  %5833 = vmatprep.mubr.msk.bf16.mxu0 %vm6320_vm9, %v6318_v55 }
 0xa0e   :  { %v3707_v2 = vpack.c.bf16 %v3689_v39, %v3689_v39 }
 0xa0f   :  { %v2729_v61 = vpack.c.bf16 %v5980_v42, %v5980_v42  ;;  %v2728_v21 = vpack.c.bf16 %v5979_v56, %v5979_v56 }
 0xa10   :  { %5816 = vmatmul.mubr.msk.bf16.vlgmr.msra.gmra.mrb[80].mxu1 %vm3517_vm12, %v3704_v37 }
 0xa11   :  { %v4267_v26 = vsel %vm3713_vm11, %v2728_v21, 0  ;;  %v4313_v17 = vsel %vm3713_vm11, %v2729_v61, 0  ;;  %5827 = vmatprep.mubr.msk.bf16.mxu1 %vm6320_vm9, %v6318_v55 }
 0xa12   :  { %5826 = vmatpush3.bf16.msra.mxu1 %v4267_v26  ;;  %5832 = vmatpush3.bf16.msra.mxu0 %v4313_v17 }
 0xa13   :  { %5843 = vmatprep.subr.bf16.mxu0 %v6318_v55  ;;  %5837 = vmatprep.subr.bf16.mxu1 %v6318_v55  ;;  %v6279_v28 = vpop.eup %6278 }
 0xa14   :  { %v3693_v3 = vmul.f32 %v6279_v28, %v7570_v40 }
 0xa15   :  { %5834 = vmatmul.mubr.msk.bf16.vlgmr.msra.gmra.mrb[88].mxu0 %vm3517_vm12, %v3707_v2  ;;  %v6192_v2 = vld [vmem:[%s7822_s4] sm:$0xff]  }
 0xa16   :  { %5845 = vmatprep.mubr.msk.bf16.mxu0 %vm6320_vm9, %v6318_v55  ;;  %v3709_v47 = vpack.c.bf16 %v3693_v3, %v3693_v3 }
 0xa29   :  { %v3652_v7 = vpop.xlane.xlu1 %3651 }
 0xa2a   :  { %6280 = vrcp.f32 %v3652_v7 }
 0xa2b   :  { %6282 = vrcp.f32 %v3658_v8 }
 0xa2d   :  { %v5983_v60 = vpop.permute.xlu1 %5982 }
 0xa2e   :  { %v5985_v54 = vunpack.i.h.bf16 %v5983_v60  ;;  %v5984_v52 = vunpack.i.l.bf16 %v5983_v60 }
 0xa30   :  { %v2731_v34 = vpack.c.bf16 %v5985_v54, %v5985_v54  ;;  %v2730_v33 = vpack.c.bf16 %v5984_v52, %v5984_v52 }
 0xa32   :  { %v4405_v9 = vsel %vm3713_vm11, %v2731_v34, 0  ;;  %v4359_v53 = vsel %vm3713_vm11, %v2730_v33, 0 }
 0xa33   :  { %5844 = vmatpush3.bf16.msra.mxu0 %v4405_v9 }
 0xa34   :  { %v6281_v32 = vpop.eup %6280 }
 0xa35   :  { %v3687_v48 = vmul.f32 %v6281_v32, %v7585_v20  ;;  %v6283_v35 = vpop.eup %6282 }
 0xa36   :  { %5846 = vmatmul.mubr.msk.bf16.vlgmr.msra.gmra.mrb[92].mxu0 %vm3517_vm12, %v3709_v47  ;;  %v3691_v40 = vmul.f32 %v6283_v35, %v7563_v43 }
 0xa37   :  { %v3706_v15 = vpack.c.bf16 %v3687_v48, %v3687_v48 }
 0xa38   :  { %v3708_v49 = vpack.c.bf16 %v3691_v40, %v3691_v40  ;;  %v6193_v40 = vld [vmem:[%s7822_s4 + $0x8] sm:$0xff]  }
 0xa39   :  { %5828 = vmatmul.mubr.msk.bf16.vlgmr.msra.gmra.mrb[84].mxu1 %vm3517_vm12, %v3706_v15 }
 0xa3a   :  { %5838 = vmatpush3.bf16.msra.mxu1 %v4359_v53  ;;  %5839 = vmatprep.mubr.msk.bf16.mxu1 %vm6320_vm9, %v6318_v55 }
 0xa3b   :  { %v7669_v27 = vpop.f32.mrb[64].mxu0  ;;  %5849 = vmatprep.subr.bf16.mxu1 %v6192_v2 }
 0xa3c   :  { %v5763_v50 = vpop.f32.mrb[65].mxu0 }
 0xa3d   :  { %v3800_v41 = vpop.f32.mrb[66].mxu0  ;;  %v6194_v50 = vld [vmem:[%s7822_s4 + $0x10] sm:$0xff]  }
 0xa3e   :  { %v5764_v20 = vpop.f32.mrb[67].mxu0 }
 0xa41   :  { %5840 = vmatmul.mubr.msk.bf16.vlgmr.msra.gmra.mrb[88].mxu1 %vm3517_vm12, %v3708_v49 }
 0xa42   :  { %5850 = vmatpush3.bf16.msra.mxu1 %v6192_v2 }
 0xa43   :  { %5851 = vmatprep.subr.bf16.mxu1 %v6193_v40 }
 0xa46   :  { %5852 = vmatpush3.bf16.msra.mxu1 %v6193_v40 }
 0xa47   :  { %5853 = vmatprep.subr.bf16.mxu1 %v6194_v50 }
 0xa49   :  { %v7672_v38 = vpop.f32.mrb[60].mxu1 }
 0xa4a   :  { %v5757_v12 = vpop.f32.mrb[61].mxu1  ;;  %5854 = vmatpush3.bf16.msra.mxu1 %v6194_v50 }
 0xa4b   :  { %v3754_v13 = vpop.f32.mrb[62].mxu1 }
 0xa4c   :  { %v5758_v18 = vpop.f32.mrb[63].mxu1 }
 0xa4d   :  { %v6195_v18 = vld [vmem:[%s7822_s4 + $0x18] sm:$0xff]  }
 0xa4e   :  { %5855 = vmatprep.subr.bf16.mxu1 %v6195_v18 }
 0xa4f   :  { %5856 = vmatpush3.bf16.msra.mxu1 %v6195_v18 }
 0xa70   :  { %v7674_v11 = vpop.f32.mrb[68].mxu0 }
 0xa71   :  { %v5775_v25 = vpop.f32.mrb[69].mxu0 }
 0xa72   :  { %v3892_v19 = vpop.f32.mrb[70].mxu0 }
 0xa73   :  { %v5776_v55 = vpop.f32.mrb[71].mxu0 }
 0xa7e   :  { %v7676_v30 = vpop.f32.mrb[64].mxu1 }
 0xa7f   :  { %v5769_v43 = vpop.f32.mrb[65].mxu1 }
 0xa80   :  { %v3846_v1 = vpop.f32.mrb[66].mxu1 }
 0xa81   :  { %v5770_v23 = vpop.f32.mrb[67].mxu1 }
 0xa9e   :  { %v3981_v57 = vpop.f32.mrb[72].mxu0 }
 0xa9f   :  { %v3935_v46 = vpop.f32.mrb[68].mxu1  ;;  %v5787_v24 = vpop.f32.mrb[73].mxu0 }
 0xaa0   :  { %v5986_v22 = vpack.i.bf16 %v3981_v57, %v3935_v46  ;;  %v5781_v63 = vpop.f32.mrb[69].mxu1  ;;  %v3984_v62 = vpop.f32.mrb[74].mxu0 }
 0xaa1   :  { %v3938_v8 = vpop.f32.mrb[70].mxu1  ;;  %v5788_v29 = vpop.f32.mrb[75].mxu0 }
 0xaa2   :  { %5987 = vrot.lane.b32.xlu1 %v5986_v22, %s6322_s22  ;;  %v5782_v4 = vpop.f32.mrb[71].mxu1 }
 0xaa6   :  { %v4073_v6 = vpop.f32.mrb[76].mxu0 }
 0xaa7   :  { %v5799_v44 = vpop.f32.mrb[77].mxu0 }
 0xaa8   :  { %v4076_v16 = vpop.f32.mrb[78].mxu0 }
 0xaa9   :  { %v5800_v31 = vpop.f32.mrb[79].mxu0 }
 0xaae   :  { %v4165_v58 = vpop.f32.mrb[80].mxu0 }
 0xaaf   :  { %v5811_v51 = vpop.f32.mrb[81].mxu0 }
 0xab0   :  { %v4168_v5 = vpop.f32.mrb[82].mxu0 }
 0xab1   :  { %v5812_v14 = vpop.f32.mrb[83].mxu0 }
 0xad3   :  { %v4027_v42 = vpop.f32.mrb[72].mxu1 }
 0xad4   :  { %v5991_v56 = vpack.i.bf16 %v4073_v6, %v4027_v42  ;;  %v5793_v37 = vpop.f32.mrb[73].mxu1 }
 0xad5   :  { %v4030_v39 = vpop.f32.mrb[74].mxu1 }
 0xad6   :  { %5992 = vrot.lane.b32.xlu1 %v5991_v56, %s6322_s22  ;;  %v5794_v61 = vpop.f32.mrb[75].mxu1 }
 0xadb   :  { %v4119_v21 = vpop.f32.mrb[76].mxu1 }
 0xadc   :  { %v5996_v26 = vpack.i.bf16 %v4165_v58, %v4119_v21  ;;  %v5805_v17 = vpop.f32.mrb[77].mxu1 }
 0xadd   :  { %v4122_v7 = vpop.f32.mrb[78].mxu1 }
 0xade   :  { %5997 = vrot.lane.b32.xlu1 %v5996_v26, %s6323_s24  ;;  %v5806_v28 = vpop.f32.mrb[79].mxu1 }
 0xadf   :  { %v4257_v60 = vpop.f32.mrb[84].mxu0 }
 0xae0   :  { %v5823_v54 = vpop.f32.mrb[85].mxu0 }
 0xae1   :  { %v4260_v3 = vpop.f32.mrb[86].mxu0 }
 0xae2   :  { %v5824_v34 = vpop.f32.mrb[87].mxu0 }
 0xae3   :  { %v4211_v52 = vpop.f32.mrb[80].mxu1 }
 0xae4   :  { %v6001_v9 = vpack.i.bf16 %v4257_v60, %v4211_v52  ;;  %v5817_v32 = vpop.f32.mrb[81].mxu1 }
 0xae5   :  { %v4214_v47 = vpop.f32.mrb[82].mxu1 }
 0xae6   :  { %6002 = vrot.lane.b32.xlu1 %v6001_v9, %s6323_s24  ;;  %v5818_v48 = vpop.f32.mrb[83].mxu1 }
 0xae8   :  { %v4349_v33 = vpop.f32.mrb[88].mxu0 }
 0xae9   :  { %v5835_v15 = vpop.f32.mrb[89].mxu0 }
 0xaea   :  { %v4352_v35 = vpop.f32.mrb[90].mxu0 }
 0xaeb   :  { %v5836_v53 = vpop.f32.mrb[91].mxu0 }
 0xb09   :  { %v4441_v41 = vpop.f32.mrb[92].mxu0 }
 0xb0a   :  { %v5847_v20 = vpop.f32.mrb[93].mxu0 }
 0xb0b   :  { %v4444_v49 = vpop.f32.mrb[94].mxu0 }
 0xb0c   :  { %v4303_v12 = vpop.f32.mrb[84].mxu1  ;;  %v5848_v13 = vpop.f32.mrb[95].mxu0 }
 0xb0d   :  { %v6006_v25 = vpack.i.bf16 %v4349_v33, %v4303_v12  ;;  %v5829_v19 = vpop.f32.mrb[85].mxu1 }
 0xb0e   :  { %v4306_v55 = vpop.f32.mrb[86].mxu1 }
 0xb0f   :  { %6007 = vrot.lane.b32.xlu0 %v6006_v25, %s6324_s9  ;;  %v5830_v43 = vpop.f32.mrb[87].mxu1 }
 0xb14   :  { %v4395_v1 = vpop.f32.mrb[88].mxu1  ;;  %v5988_v22 = vpop.permute.xlu1 %5987 }
 0xb15   :  { %v6011_v23 = vpack.i.bf16 %v4441_v41, %v4395_v1  ;;  %v5841_v57 = vpop.f32.mrb[89].mxu1  ;;  %v5990_v8 = vunpack.i.h.bf16 %v5988_v22  ;;  %v5989_v29 = vunpack.i.l.bf16 %v5988_v22 }
 0xb16   :  { %v4398_v46 = vpop.f32.mrb[90].mxu1 }
 0xb17   :  { %6012 = vrot.lane.b32.xlu1 %v6011_v23, %s6324_s9  ;;  %v5842_v24 = vpop.f32.mrb[91].mxu1  ;;  %v4496_v16 = vsel %vm2735_vm10, %v7669_v27, %v5990_v8  ;;  %v4495_v31 = vsel %vm2735_vm10, %v7672_v38, %v5989_v29 }
 0xb48   :  { %v5993_v63 = vpop.permute.xlu1 %5992 }
 0xb49   :  { %v5995_v61 = vunpack.i.h.bf16 %v5993_v63  ;;  %v5994_v21 = vunpack.i.l.bf16 %v5993_v63 }
 0xb4b   :  { %v4498_v38 = vsel %vm2735_vm10, %v7674_v11, %v5995_v61  ;;  %v4497_v2 = vsel %vm2735_vm10, %v7676_v30, %v5994_v21  ;;  %v5336_v11 = vld [vmem:[%s7823_s6] ss:$0 sm:$0xff] }
 0xb50   :  { %v5998_v62 = vpop.permute.xlu1 %5997 }
 0xb51   :  { %v6000_v4 = vunpack.i.h.bf16 %v5998_v62  ;;  %v5999_v6 = vunpack.i.l.bf16 %v5998_v62 }
 0xb53   :  { %v4501_v5 = vsel %vm4499_vm13, %v4496_v16, %v6000_v4  ;;  %v4500_v14 = vsel %vm4499_vm13, %v4495_v31, %v5999_v6  ;;  %v6196_v6 = vld [vmem:[%s7822_s4 + $0x20] sm:$0xff]   ;;  %v6198_v16 = vld [vmem:[%s7822_s4 + $0x30] sm:$0xff]   ;;  %v6199_v31 = vld [vmem:[%s7822_s4 + $0x38] sm:$0xff]  }
 0xb54   :  { %5861 = vmatprep.subr.bf16.mxu0 %v6196_v6 }
 0xb55   :  { %5862 = vmatpush3.bf16.msra.mxu0 %v6196_v6 }
 0xb58   :  { %v6003_v42 = vpop.permute.xlu1 %6002 }
 0xb59   :  { %v6005_v26 = vunpack.i.h.bf16 %v6003_v42  ;;  %v6004_v17 = vunpack.i.l.bf16 %v6003_v42 }
 0xb5b   :  { %v4503_v60 = vsel %vm4499_vm13, %v4498_v38, %v6005_v26  ;;  %v4502_v54 = vsel %vm4499_vm13, %v4497_v2, %v6004_v17 }
 0xb81   :  { %v6008_v44 = vpop.permute.xlu0 %6007 }
 0xb82   :  { %v6010_v58 = vunpack.i.h.bf16 %v6008_v44  ;;  %v6009_v51 = vunpack.i.l.bf16 %v6008_v44  ;;  %v6197_v44 = vld [vmem:[%s7822_s4 + $0x28] sm:$0xff]  }
 0xb83   :  { %5863 = vmatprep.subr.bf16.mxu0 %v6197_v44 }
 0xb84   :  { %v4506_v56 = vsel %vm4504_vm14, %v4501_v5, %v6010_v58  ;;  %v4505_v37 = vsel %vm4504_vm14, %v4500_v14, %v6009_v51  ;;  %5864 = vmatpush3.bf16.msra.mxu0 %v6197_v44  ;;  %v6200_v58 = vld [vmem:[%s7822_s4 + $0x40] sm:$0xff]   ;;  %v6201_v51 = vld [vmem:[%s7822_s4 + $0x48] sm:$0xff]  }
 0xb85   :  { %v4509_v39 = vpack.c.bf16 %v4506_v56, %v4505_v37  ;;  %5865 = vmatprep.subr.bf16.mxu0 %v6198_v16  ;;  %5873 = vmatprep.subr.bf16.mxu1 %v6200_v58 }
 0xb87   :  { %5857 = vmatprep.mubr.msk.bf16.mxu1 %vm712_vm8, %v4509_v39 }
 0xb88   :  { %5866 = vmatpush3.bf16.msra.mxu0 %v6198_v16 }
 0xb89   :  { %v6013_v27 = vpop.permute.xlu1 %6012  ;;  %5867 = vmatprep.subr.bf16.mxu0 %v6199_v31 }
 0xb8a   :  { %v6015_v7 = vunpack.i.h.bf16 %v6013_v27  ;;  %v6014_v28 = vunpack.i.l.bf16 %v6013_v27 }
 0xb8c   :  { %v4508_v3 = vsel %vm4504_vm14, %v4503_v60, %v6015_v7  ;;  %v4507_v34 = vsel %vm4504_vm14, %v4502_v54, %v6014_v28  ;;  %5868 = vmatpush3.bf16.msra.mxu0 %v6199_v31  ;;  %v5343_v7 = vld [vmem:[%s7823_s6 + $0x1] ss:$0 sm:$0xff] }
 0xb8d   :  { %v4510_v52 = vpack.c.bf16 %v4508_v3, %v4507_v34 }
 0xb8f   :  { %5858 = vmatmul.mubr.msk.bf16.vlgmr.msra.gmra.mrb[92].mxu1 %vm712_vm8, %v4510_v52  ;;  %v5344_v52 = vld [vmem:[%s7823_s6 + $0x2] ss:$0 sm:$0xff] }
 0xb90   :  { %5874 = vmatpush3.bf16.msra.mxu1 %v6200_v58 }
 0xb91   :  { %5875 = vmatprep.subr.bf16.mxu1 %v6201_v51 }
 0xb94   :  { %5876 = vmatpush3.bf16.msra.mxu1 %v6201_v51 }
 0xc62   :  { %v5859_v9 = vpop.f32.mrb[92].mxu1 }
 0xc63   :  { %v4579_v32 = vpop.f32.mrb[93].mxu1  ;;  %v4588_v30 = vadd.f32 %v5859_v9, %v5336_v11 }
 0xc64   :  { %v4580_v47 = vadd.f32 %v5336_v11, %v4579_v32  ;;  %v5860_v48 = vpop.f32.mrb[94].mxu1 }
 0xc65   :  { %v4582_v33 = vpop.f32.mrb[95].mxu1  ;;  %v4596_v53 = vadd.f32 %v4588_v30, %v7236_v10  ;;  %v4591_v40 = vadd.f32 %v5860_v48, %v5336_v11 }
 0xc66   :  { %v4594_v15 = vadd.f32 %v4580_v47, %v7226_v0  ;;  %v4583_v35 = vadd.f32 %v5336_v11, %v4582_v33 }
 0xc67   :  { %v4597_v49 = vadd.f32 %v4591_v40, %v7234_v59  ;;  %v4606_v12 = vsel %vm712_vm8, %v4596_v53, 0.0 }
 0xc68   :  { %v4595_v50 = vadd.f32 %v4583_v35, %v7228_v45  ;;  %v4600_v41 = vsel %vm712_vm8, %v4594_v15, 0.0 }
 0xc69   :  { %4601 = vadd.xlane.f32.xlu0 %v4600_v41  ;;  %v4609_v13 = vsel %vm712_vm8, %v4597_v49, 0.0  ;;  %v6202_v41 = vld [vmem:[%s7822_s4 + $0x50] sm:$0xff]  }
 0xc6a   :  { %v4603_v20 = vsel %vm712_vm8, %v4595_v50, 0.0  ;;  %5877 = vmatprep.subr.bf16.mxu1 %v6202_v41 }
 0xc6b   :  { %4604 = vadd.xlane.f32.xlu1 %v4603_v20  ;;  %5878 = vmatpush3.bf16.msra.mxu1 %v6202_v41  ;;  %v6203_v20 = vld [vmem:[%s7822_s4 + $0x58] sm:$0xff]  }
 0xc6c   :  { %5879 = vmatprep.subr.bf16.mxu1 %v6203_v20 }
 0xc6d   :  { %4607 = vadd.xlane.f32.xlu0 %v4606_v12 }
 0xc6f   :  { %5880 = vmatpush3.bf16.msra.mxu1 %v6203_v20 }
 0xc71   :  { %4610 = vadd.xlane.f32.xlu0 %v4609_v13 }
 0xcf6   :  { %v4602_v0 = vpop.xlane.xlu0 %4601 }
 0xcf7   :  { %v4612_v18 = vmul.f32 0.015625, %v4602_v0 }
 0xcf8   :  { %v4605_v10 = vpop.xlane.xlu1 %4604 }
 0xcf9   :  { %v4616_v25 = vsub.f32 %v4594_v15, %v4612_v18  ;;  %v4613_v19 = vmul.f32 0.015625, %v4605_v10 }
 0xcfa   :  { %v4608_v45 = vpop.xlane.xlu0 %4607 }
 0xcfb   :  { %v4617_v55 = vsub.f32 %v4595_v50, %v4613_v19  ;;  %v4614_v43 = vmul.f32 0.015625, %v4608_v45  ;;  %v4620_v1 = vmul.f32 %v4616_v25, %v4616_v25 }
 0xcfd   :  { %v4618_v23 = vsub.f32 %v4596_v53, %v4614_v43  ;;  %v4624_v57 = vsel %vm712_vm8, %v4620_v1, 0.0  ;;  %v4621_v46 = vmul.f32 %v4617_v55, %v4617_v55 }
 0xcfe   :  { %4625 = vadd.xlane.f32.xlu1 %v4624_v57  ;;  %v4611_v59 = vpop.xlane.xlu0 %4610 }
 0xcff   :  { %v4615_v24 = vmul.f32 0.015625, %v4611_v59  ;;  %v4627_v22 = vsel %vm712_vm8, %v4621_v46, 0.0  ;;  %v4622_v63 = vmul.f32 %v4618_v23, %v4618_v23  ;;  %v5368_v59 = vld [vmem:[%s7823_s6 + $0x4] ss:$0 sm:$0xff] }
 0xd00   :  { %4628 = vadd.xlane.f32.xlu0 %v4627_v22 }
 0xd01   :  { %v4619_v62 = vsub.f32 %v4597_v49, %v4615_v24  ;;  %v4630_v8 = vsel %vm712_vm8, %v4622_v63, 0.0  ;;  %v5353_v49 = vld [vmem:[%s7823_s6 + $0x3] ss:$0 sm:$0xff] }
 0xd02   :  { %4631 = vadd.xlane.f32.xlu1 %v4630_v8 }
 0xd03   :  { %v4623_v29 = vmul.f32 %v4619_v62, %v4619_v62 }
 0xd05   :  { %v4633_v4 = vsel %vm712_vm8, %v4623_v29, 0.0 }
 0xd06   :  { %4634 = vadd.xlane.f32.xlu0 %v4633_v4 }
 0xd8b   :  { %v4626_v5 = vpop.xlane.xlu1 %4625 }
 0xd8c   :  { %v4636_v14 = vmul.f32 0.015625, %v4626_v5 }
 0xd8d   :  { %v4629_v42 = vpop.xlane.xlu0 %4628 }
 0xd8e   :  { %v4640_v56 = vadd.f32 1e-05, %v4636_v14  ;;  %v4637_v37 = vmul.f32 0.015625, %v4629_v42 }
 0xd8f   :  { %v4632_v39 = vpop.xlane.xlu1 %4631 }
 0xd90   :  { %6284 = vrsqrt.f32 %v4640_v56  ;;  %v4641_v61 = vadd.f32 1e-05, %v4637_v37  ;;  %v4638_v21 = vmul.f32 0.015625, %v4632_v39 }
 0xd92   :  { %6286 = vrsqrt.f32 %v4641_v61  ;;  %v4642_v26 = vadd.f32 1e-05, %v4638_v21 }
 0xd93   :  { %v4635_v17 = vpop.xlane.xlu0 %4634 }
 0xd94   :  { %6288 = vrsqrt.f32 %v4642_v26  ;;  %v4639_v27 = vmul.f32 0.015625, %v4635_v17 }
 0xd96   :  { %v4643_v38 = vadd.f32 1e-05, %v4639_v27 }
 0xd98   :  { %6290 = vrsqrt.f32 %v4643_v38 }
 0xd9a   :  { %v6285_v2 = vpop.eup %6284 }
 0xd9b   :  { %v4648_v28 = vmul.f32 %v6285_v2, %v4616_v25 }
 0xd9c   :  { %v6287_v60 = vpop.eup %6286 }
 0xd9d   :  { %v4649_v54 = vmul.f32 %v6287_v60, %v4617_v55  ;;  %v4656_v3 = vmul.f32 %v5343_v7, %v4648_v28 }
 0xd9e   :  { %v6289_v34 = vpop.eup %6288 }
 0xd9f   :  { %v4650_v11 = vmul.f32 %v6289_v34, %v4618_v23  ;;  %v4657_v9 = vmul.f32 %v5343_v7, %v4649_v54  ;;  %v4664_v32 = vadd.f32 %v5344_v52, %v4656_v3 }
 0xda1   :  { %v4665_v30 = vadd.f32 %v5344_v52, %v4657_v9  ;;  %v4658_v48 = vmul.f32 %v5343_v7, %v4650_v11 }
 0xda2   :  { %v6291_v47 = vpop.eup %6290 }
 0xda3   :  { %v4651_v33 = vmul.f32 %v6291_v47, %v4619_v62  ;;  %v4668_v15 = vpack.c.bf16 %v4665_v30, %v4664_v32  ;;  %v4666_v53 = vadd.f32 %v5344_v52, %v4658_v48 }
 0xda5   :  { %v4659_v35 = vmul.f32 %v5343_v7, %v4651_v33  ;;  %5869 = vmatprep.mubr.msk.bf16.mxu0 %vm712_vm8, %v4668_v15 }
 0xda7   :  { %v4667_v40 = vadd.f32 %v5344_v52, %v4659_v35 }
 0xda9   :  { %v4669_v50 = vpack.c.bf16 %v4667_v40, %v4666_v53 }
 0xdab   :  { %5870 = vmatmul.mubr.msk.bf16.vlgmr.msra.gmra.mrb[96].mxu0 %vm712_vm8, %v4669_v50 }
 0xe7e   :  { %v5871_v12 = vpop.f32.mrb[96].mxu0 }
 0xe7f   :  { %v4757_v13 = vadd.f32 %v5871_v12, %v5353_v49  ;;  %v4748_v0 = vpop.f32.mrb[97].mxu0 }
 0xe80   :  { %v4749_v18 = vadd.f32 %v5353_v49, %v4748_v0  ;;  %v5872_v10 = vpop.f32.mrb[98].mxu0 }
 0xe81   :  { %v4760_v25 = vadd.f32 %v5872_v10, %v5353_v49  ;;  %v4751_v19 = vpop.f32.mrb[99].mxu0  ;;  %v4765_v55 = vmax.f32 %v4757_v13, 0.0  ;;  %v5375_v13 = vld [vmem:[%s7823_s6 + $0x5] ss:$0 sm:$0xff]  ;;  %v5376_v10 = vld [vmem:[%s7823_s6 + $0x6] ss:$0 sm:$0xff] }
 0xe82   :  { %v4752_v45 = vadd.f32 %v5353_v49, %v4751_v19  ;;  %v4763_v1 = vmax.f32 %v4749_v18, 0.0 }
 0xe83   :  { %v4766_v43 = vmax.f32 %v4760_v25, 0.0 }
 0xe84   :  { %v4764_v23 = vmax.f32 %v4752_v45, 0.0 }
 0xe85   :  { %v4768_v57 = vpack.c.bf16 %v4766_v43, %v4765_v55 }
 0xe86   :  { %v4767_v46 = vpack.c.bf16 %v4764_v23, %v4763_v1 }
 0xe88   :  { %5881 = vmatprep.mubr.msk.bf16.mxu1 %vm712_vm8, %v4767_v46 }
 0xe89   :  { %5882 = vmatmul.mubr.msk.bf16.vlgmr.msra.gmra.mrb[96].mxu1 %vm712_vm8, %v4768_v57 }
 0xf5c   :  { %v5883_v24 = vpop.f32.mrb[96].mxu1 }
 0xf5d   :  { %v4847_v22 = vpop.f32.mrb[97].mxu1  ;;  %v4856_v63 = vadd.f32 %v5883_v24, %v5368_v59 }
 0xf5e   :  { %v4848_v62 = vadd.f32 %v5368_v59, %v4847_v22  ;;  %v5884_v8 = vpop.f32.mrb[98].mxu1 }
 0xf5f   :  { %v4850_v29 = vpop.f32.mrb[99].mxu1  ;;  %v4859_v6 = vadd.f32 %v5884_v8, %v5368_v59  ;;  %v4864_v16 = vadd.f32 %v4856_v63, %v4666_v53 }
 0xf60   :  { %v4862_v4 = vadd.f32 %v4848_v62, %v4664_v32  ;;  %v4851_v44 = vadd.f32 %v5368_v59, %v4850_v29 }
 0xf61   :  { %v4865_v51 = vadd.f32 %v4859_v6, %v4667_v40  ;;  %v4874_v14 = vsel %vm712_vm8, %v4864_v16, 0.0 }
 0xf62   :  { %v4863_v31 = vadd.f32 %v4851_v44, %v4665_v30  ;;  %v4868_v58 = vsel %vm712_vm8, %v4862_v4, 0.0 }
 0xf63   :  { %4869 = vadd.xlane.f32.xlu1 %v4868_v58  ;;  %v4877_v42 = vsel %vm712_vm8, %v4865_v51, 0.0 }
 0xf64   :  { %v4871_v5 = vsel %vm712_vm8, %v4863_v31, 0.0 }
 0xf65   :  { %4872 = vadd.xlane.f32.xlu0 %v4871_v5 }
 0xf67   :  { %4875 = vadd.xlane.f32.xlu1 %v4874_v14 }
 0xf69   :  { %4878 = vadd.xlane.f32.xlu0 %v4877_v42 }
 0xff0   :  { %v4870_v56 = vpop.xlane.xlu1 %4869 }
 0xff1   :  { %v4880_v37 = vmul.f32 0.015625, %v4870_v56 }
 0xff2   :  { %v4873_v39 = vpop.xlane.xlu0 %4872 }
 0xff3   :  { %v4884_v61 = vsub.f32 %v4862_v4, %v4880_v37  ;;  %v4881_v21 = vmul.f32 0.015625, %v4873_v39 }
 0xff4   :  { %v4876_v26 = vpop.xlane.xlu1 %4875 }
 0xff5   :  { %v4885_v17 = vsub.f32 %v4863_v31, %v4881_v21  ;;  %v4882_v27 = vmul.f32 0.015625, %v4876_v26  ;;  %v4888_v38 = vmul.f32 %v4884_v61, %v4884_v61 }
 0xff6   :  { %v4879_v2 = vpop.xlane.xlu0 %4878 }
 0xff7   :  { %v4886_v7 = vsub.f32 %v4864_v16, %v4882_v27  ;;  %v4883_v28 = vmul.f32 0.015625, %v4879_v2  ;;  %v4892_v60 = vsel %vm712_vm8, %v4888_v38, 0.0  ;;  %v4889_v54 = vmul.f32 %v4885_v17, %v4885_v17 }
 0xff8   :  { %4893 = vadd.xlane.f32.xlu1 %v4892_v60 }
 0xff9   :  { %v4887_v3 = vsub.f32 %v4865_v51, %v4883_v28  ;;  %v4895_v34 = vsel %vm712_vm8, %v4889_v54, 0.0  ;;  %v4890_v52 = vmul.f32 %v4886_v7, %v4886_v7 }
 0xffa   :  { %4896 = vadd.xlane.f32.xlu0 %v4895_v34 }
 0xffb   :  { %v4898_v11 = vsel %vm712_vm8, %v4890_v52, 0.0  ;;  %v4891_v9 = vmul.f32 %v4887_v3, %v4887_v3 }
 0xffc   :  { %4899 = vadd.xlane.f32.xlu1 %v4898_v11 }
 0xffd   :  { %v4901_v32 = vsel %vm712_vm8, %v4891_v9, 0.0 }
 0xffe   :  { %4902 = vadd.xlane.f32.xlu0 %v4901_v32 }
0x1085   :  { %v4894_v30 = vpop.xlane.xlu1 %4893 }
0x1086   :  { %v4904_v47 = vmul.f32 0.015625, %v4894_v30 }
0x1087   :  { %v4897_v48 = vpop.xlane.xlu0 %4896 }
0x1088   :  { %v4908_v33 = vadd.f32 1e-05, %v4904_v47  ;;  %v4905_v15 = vmul.f32 0.015625, %v4897_v48 }
0x1089   :  { %v4900_v35 = vpop.xlane.xlu1 %4899 }
0x108a   :  { %6292 = vrsqrt.f32 %v4908_v33  ;;  %v4909_v53 = vadd.f32 1e-05, %v4905_v15  ;;  %v4906_v40 = vmul.f32 0.015625, %v4900_v35 }
0x108b   :  { %v4903_v50 = vpop.xlane.xlu0 %4902 }
0x108c   :  { %6294 = vrsqrt.f32 %v4909_v53  ;;  %v4910_v41 = vadd.f32 1e-05, %v4906_v40  ;;  %v4907_v20 = vmul.f32 0.015625, %v4903_v50 }
0x108e   :  { %6296 = vrsqrt.f32 %v4910_v41  ;;  %v4911_v49 = vadd.f32 1e-05, %v4907_v20 }
0x1090   :  { %6298 = vrsqrt.f32 %v4911_v49 }
0x1094   :  { %v6293_v12 = vpop.eup %6292 }
0x1095   :  { %v4916_v0 = vmul.f32 %v6293_v12, %v4884_v61  ;;  %v6325_v12 = vmov 1983009808  }
0x1096   :  { %v6295_v18 = vpop.eup %6294 }
0x1097   :  { %v4924_v25 = vmul.f32 %v5375_v13, %v4916_v0  ;;  %v4917_v19 = vmul.f32 %v6295_v18, %v4885_v17 }
0x1098   :  { %v6297_v45 = vpop.eup %6296 }
0x1099   :  { %v4932_v55 = vadd.f32 %v5376_v10, %v4924_v25  ;;  %v4918_v43 = vmul.f32 %v6297_v45, %v4886_v7  ;;  %v4925_v23 = vmul.f32 %v5375_v13, %v4917_v19 }
0x109a   :  { %v6299_v1 = vpop.eup %6298 }
0x109b   :  { %v4926_v57 = vmul.f32 %v5375_v13, %v4918_v43  ;;  %v4919_v46 = vmul.f32 %v6299_v1, %v4887_v3  ;;  %v4942_v22 = vrot.slane %v4932_v55, 1  ;;  %v4933_v63 = vadd.f32 %v5376_v10, %v4925_v23 }
0x109c   :  { %v4951_v62 = vrot.slane %v4932_v55, 3  ;;  %v4961_v44 = vrot.slane %v4932_v55, 5  ;;  %v4971_v5 = vrot.slane %v4932_v55, 7  ;;  %v4947_v14 = vrot.slane %v4932_v55, 2 }
0x109d   :  { %v4934_v59 = vadd.f32 %v5376_v10, %v4926_v57  ;;  %v4927_v24 = vmul.f32 %v5375_v13, %v4919_v46  ;;  %v4957_v42 = vrot.slane %v4932_v55, 4  ;;  %v4982_v56 = vrot.slane %v4933_v63, 1 }
0x109e   :  { %v4967_v61 = vrot.slane %v4932_v55, 6  ;;  %v4997_v28 = vrot.slane %v4933_v63, 4  ;;  %v4987_v3 = vrot.slane %v4933_v63, 2  ;;  %v5001_v52 = vrot.slane %v4933_v63, 5 }
0x109f   :  { %v4935_v8 = vadd.f32 %v5376_v10, %v4927_v24  ;;  %v4943_v29 = vsel %vm4939_vm15, %v4934_v59, %v4942_v22  ;;  %v4952_v4 = vrot.slane %v4934_v59, 2  ;;  %v4962_v6 = vrot.slane %v4934_v59, 4 }
0x10a0   :  { %4944 = vrot.lane.b32.xlu1 %v4943_v29, %s6316_s19  ;;  %v4938_v16 = vrot.slane %v4934_v59, 7  ;;  %v4948_v31 = vrot.slane %v4934_v59, 1  ;;  %v4958_v58 = vrot.slane %v4934_v59, 3  ;;  %v4972_v37 = vrot.slane %v4934_v59, 6 }
0x10a1   :  { %v4953_v51 = vsel %vm4939_vm15, %v4952_v4, %v4951_v62  ;;  %v4963_v21 = vsel %vm4939_vm15, %v4962_v6, %v4961_v44  ;;  %v4979_v27 = vrot.slane %v4935_v8, 7  ;;  %v4983_v38 = vsel %vm4939_vm15, %v4935_v8, %v4982_v56 }
0x10a2   :  { %4954 = vrot.lane.b32.xlu0 %v4953_v51, %s6316_s19  ;;  %v4940_v39 = vsel %vm4939_vm15, %v4938_v16, %v4932_v55  ;;  %v4949_v26 = vsel %vm4939_vm15, %v4948_v31, %v4947_v14  ;;  %v4959_v17 = vsel %vm4939_vm15, %v4958_v58, %v4957_v42  ;;  %v5002_v2 = vrot.slane %v4935_v8, 4 }
0x10a3   :  { %v4968_v7 = vrot.slane %v4934_v59, 5  ;;  %v4980_v60 = vsel %vm4939_vm15, %v4979_v27, %v4933_v63  ;;  %v4998_v54 = vrot.slane %v4935_v8, 3  ;;  %v4988_v34 = vrot.slane %v4935_v8, 1 }
0x10a4   :  { %4964 = vrot.lane.b32.xlu1 %v4963_v21, %s6316_s19  ;;  %v5007_v9 = vrot.slane %v4933_v63, 6  ;;  %v5008_v32 = vrot.slane %v4935_v8, 5  ;;  %v4973_v30 = vsel %vm4939_vm15, %v4972_v37, %v4971_v5  ;;  %v4992_v47 = vrot.slane %v4935_v8, 2 }
0x10a5   :  { %v4969_v11 = vsel %vm4939_vm15, %v4968_v7, %v4967_v61  ;;  %v4999_v48 = vsel %vm4939_vm15, %v4998_v54, %v4997_v28  ;;  %v4989_v33 = vsel %vm4939_vm15, %v4988_v34, %v4987_v3  ;;  %v5003_v35 = vsel %vm4939_vm15, %v5002_v2, %v5001_v52 }
0x10a6   :  { %4984 = vrot.lane.b32.xlu0 %v4983_v38, %s6316_s19  ;;  %v5009_v15 = vsel %vm4939_vm15, %v5008_v32, %v5007_v9  ;;  %v4991_v53 = vrot.slane %v4933_v63, 3  ;;  %v5012_v50 = vrot.slane %v4935_v8, 6  ;;  %v5011_v41 = vrot.slane %v4933_v63, 7 }
0x10a7   :  { %v5036_v13 = vunpack.c.l.s4 %v6325_v12 }
0x10a8   :  { %4974 = vrot.lane.b32.xlu1 %v4973_v30, %s6316_s19  ;;  %v4993_v40 = vsel %vm4939_vm15, %v4992_v47, %v4991_v53  ;;  %v5013_v20 = vsel %vm4939_vm15, %v5012_v50, %v5011_v41 }
0x10a9   :  { %v5037_v25 = vunpack.c.0.s8 %v5036_v13 }
0x10aa   :  { %5004 = vrot.lane.b32.xlu0 %v5003_v35, %s6316_s19 }
0x10ab   :  { %v5040_v55 = vsub.s32 %v5037_v25, %v7241_v36 }
0x10ac   :  { %4994 = vrot.lane.b32.xlu1 %v4993_v40, %s6316_s19 }
0x10b0   :  { %5014 = vrot.lane.b32.xlu1 %v5013_v20, %s6316_s19 }
0x1112   :  { %v4945_v49 = vpop.permute.xlu1 %4944 }
0x1113   :  { %v5017_v18 = vsel %vm712_vm8, %v4940_v39, %v4945_v49 }
0x1114   :  { %v4955_v0 = vpop.permute.xlu0 %4954 }
0x1115   :  { %v5018_v10 = vsel %vm712_vm8, %v4949_v26, %v4955_v0 }
0x1116   :  { %v5033_v19 = vcombine.low %v5017_v18, %v5018_v10  ;;  %v4965_v45 = vpop.permute.xlu1 %4964 }
0x1117   :  { %v5019_v23 = vsel %vm712_vm8, %v4959_v17, %v4965_v45 }
0x1118   :  { %v4985_v43 = vpop.permute.xlu0 %4984  ;;  %v5041_v59 = vrot.slane %v5033_v19, %v5040_v55 }
0x1119   :  { %v5021_v63 = vsel %vm712_vm8, %v4980_v60, %v4985_v43 }
0x111a   :  { %v4975_v1 = vpop.permute.xlu1 %4974 }
0x111b   :  { %v5020_v57 = vsel %vm712_vm8, %v4969_v11, %v4975_v1 }
0x111c   :  { %v5034_v46 = vcombine.low %v5019_v23, %v5020_v57  ;;  %v5005_v29 = vpop.permute.xlu0 %5004 }
0x111d   :  { %v5023_v6 = vsel %vm712_vm8, %v4999_v48, %v5005_v29 }
0x111e   :  { %v5048_v24 = vrot.slane %v5034_v46, %v5040_v55  ;;  %v4995_v22 = vpop.permute.xlu1 %4994 }
0x111f   :  { %v5022_v62 = vsel %vm712_vm8, %v4989_v33, %v4995_v22 }
0x1120   :  { %v5049_v8 = vcombine.low %v5041_v59, %v5048_v24  ;;  %v5050_v4 = vcombine.low %v5021_v63, %v5022_v62 }
0x1122   :  { %5069 = vst [vmem:[%s7824_s8] sm:$0xff] %v5049_v8  ;;  %v5015_v36 = vpop.permute.xlu1 %5014  ;;  %v5058_v31 = vrot.slane %v5050_v4, %v5040_v55 }
0x1123   :  { %v5024_v44 = vsel %vm712_vm8, %v5009_v15, %v5015_v36 }
0x1124   :  { %v5051_v16 = vcombine.low %v5023_v6, %v5024_v44 }
0x1126   :  { %v5065_v58 = vrot.slane %v5051_v16, %v5040_v55 }
0x1128   :  { %v5066_v51 = vcombine.low %v5058_v31, %v5065_v58 }
0x112a   :  { %5070 = vst [vmem:[%s7824_s8 + $0x8] sm:$0xff] %v5066_v51 }

</bundles_post_ra>
